<compile_context>
chip_gen: v5e
topology: v5e:2x2
jax: 0.10.0
libtpu: 0.0.40
codegen_flags: <defaults>
</compile_context>

<pallas_src>
import functools

import jax
import jax.numpy as jnp
from jax.experimental import pallas as pl
from jax.experimental.pallas import tpu as pltpu

IN_FEATURES = 160 * 100 + 1   # 16001
HIDDEN = 200
OUT = 1
TK = 8192                     # K tile (contraction) size


def qn_kernel(x_ref, w1_ref, b1_ref, w2t_ref, b2_ref, o_ref, acc_ref, *, tk):
    """Grid step k (K-tile of the lin1 contraction).

    Accumulates x[:, k-tile] @ W1[k-tile, :] into a f32 VMEM scratch on the
    MXU; on the last K tile the whole rest of the network (b1, sigmoid, lin2
    as a VPU broadcast-multiply + lane reduction, b2, final sigmoid) runs as a
    fused epilogue and writes the (Bp, 1) output directly.
    """
    k = pl.program_id(0)

    @pl.when(k == 0)
    def _():
        acc_ref[...] = jnp.zeros_like(acc_ref)

    start = pl.multiple_of(k * tk, tk)
    x_blk = x_ref[:, pl.ds(start, tk)]                     # (Bp, tk) bf16, resident
    acc_ref[...] += jnp.dot(x_blk, w1_ref[...],            # bf16 x bf16 -> f32 MXU
                            preferred_element_type=jnp.float32)

    @pl.when(k == pl.num_programs(0) - 1)
    def _():
        h = jax.nn.sigmoid(acc_ref[...] + b1_ref[...])     # (Bp, 200) f32
        # lin2 has N=1: broadcast-multiply + lane reduction instead of an MXU
        # matmul padded to 128 output lanes.
        z = jnp.sum(h * w2t_ref[...], axis=-1, keepdims=True) + b2_ref[...]  # (Bp, 1)
        o_ref[...] = jax.nn.sigmoid(z)


def prepare_params(w1, b1, w2, b2, *, tk=TK):
    """One-time layout / dtype prep (hoisted out of the per-call path).

    w1: (IN_FEATURES, HIDDEN) f32 (already transposed vs. PyTorch [out, in]),
    b1: (HIDDEN,), w2: (HIDDEN, OUT), b2: (OUT,).
    Returns:
      w1p  (Kp, HIDDEN)  bf16  -- K zero-padded to a tk multiple; each (tk, H)
                                  streamed block is a contiguous HBM slab.
      b1p  (1, HIDDEN)   f32
      w2tp (1, HIDDEN)   f32   -- lin2 weight row
      b2p  (1, 1)        f32
    Zero K-row padding contributes 0 to the contraction, so the math is exact.
    """
    F, H = w1.shape
    assert H == HIDDEN, (H, HIDDEN)
    Kp = pl.cdiv(F, tk) * tk
    w1p = jnp.pad(w1.astype(jnp.bfloat16), ((0, Kp - F), (0, 0)))
    b1p = b1.reshape(1, H).astype(jnp.float32)
    w2tp = w2.reshape(H, OUT).T.astype(jnp.float32)
    b2p = b2.reshape(1, 1).astype(jnp.float32)
    return w1p, b1p, w2tp, b2p


@functools.partial(jax.jit, static_argnames=("tk",))
def qn_forward(x, w1p, b1p, w2tp, b2p, *, tk=TK):
    """x: (B, IN_FEATURES) f32; prepared params from prepare_params(tk=same tk).
    Returns (B, OUT) f32."""
    B, F = x.shape
    Kp, H = w1p.shape
    assert Kp % tk == 0, (Kp, tk)        # prepare_params / qn_forward must agree on tk
    nk = Kp // tk
    Bp = max(16, ((B + 15) // 16) * 16)  # multiple of 16: native bf16 sublane tile

    # Single fused pad+cast of x (small: Bp x Kp bf16 ~ 0.5 MB); weights are
    # pre-padded so nothing touches the ~6.5 MB W1 on the per-call path.
    xp = jnp.pad(x.astype(jnp.bfloat16), ((0, Bp - B), (0, Kp - F)))

    out = pl.pallas_call(
        functools.partial(qn_kernel, tk=tk),
        out_shape=jax.ShapeDtypeStruct((Bp, OUT), jnp.float32),
        grid_spec=pltpu.PrefetchScalarGridSpec(
            num_scalar_prefetch=0,
            grid=(nk,),                                            # reduction axis
            in_specs=[
                pl.BlockSpec((Bp, Kp), lambda k: (0, 0)),          # x: fully resident
                pl.BlockSpec((tk, H), lambda k: (k, 0)),           # W1 tile (contiguous)
                pl.BlockSpec((1, H), lambda k: (0, 0)),            # b1 (resident)
                pl.BlockSpec((1, H), lambda k: (0, 0)),            # W2^T (resident)
                pl.BlockSpec((1, 1), lambda k: (0, 0)),            # b2 (resident)
            ],
            out_specs=pl.BlockSpec((Bp, OUT), lambda k: (0, 0)),
            scratch_shapes=[pltpu.VMEM((Bp, H), jnp.float32)],     # lin1 accumulator
        ),
        compiler_params=pltpu.CompilerParams(
            dimension_semantics=("arbitrary",)),
    )(xp, w1p, b1p, w2tp, b2p)

    return out[:B]


def init_params(key):
    """Deterministic init mimicking PyTorch Linear default U(-1/sqrt(in), 1/sqrt(in))."""
    k1, k2, k3, k4 = jax.random.split(key, 4)
    bound1 = 1.0 / jnp.sqrt(jnp.float32(IN_FEATURES))
    bound2 = 1.0 / jnp.sqrt(jnp.float32(HIDDEN))
    w1 = jax.random.uniform(k1, (IN_FEATURES, HIDDEN), jnp.float32, -bound1, bound1)
    b1 = jax.random.uniform(k2, (HIDDEN,), jnp.float32, -bound1, bound1)
    w2 = jax.random.uniform(k3, (HIDDEN, OUT), jnp.float32, -bound2, bound2)
    b2 = jax.random.uniform(k4, (OUT,), jnp.float32, -bound2, bound2)
    return w1, b1, w2, b2


if __name__ == "__main__":
    key = jax.random.PRNGKey(0)
    kx, kp = jax.random.split(key)

    B = 2
    x = jax.random.normal(kx, (B, IN_FEATURES), jnp.float32)
    w1, b1, w2, b2 = init_params(kp)

    params = prepare_params(w1, b1, w2, b2)      # one-time pad / bf16 cast (hoisted)
    y = qn_forward(x, *params)
    y = jax.block_until_ready(y)

    # Pure-JAX reference with the same bf16 rounding of x / W1 (f32 math).
    x32 = x.astype(jnp.bfloat16).astype(jnp.float32)
    w1_32 = w1.astype(jnp.bfloat16).astype(jnp.float32)
    ref = jax.nn.sigmoid(jax.nn.sigmoid(x32 @ w1_32 + b1) @ w2 + b2)

    assert y.shape == (B, OUT), y.shape
    assert jnp.allclose(y, ref, rtol=2e-3, atol=2e-3), (y, ref)

    print("KERNEL_OK")
</pallas_src>

<mosaic_0001>
module attributes {stable_mosaic.version = 11 : i64} {
  func.func @qn_kernel(%arg0: i32, %arg1: memref<16x16384xbf16, #tpu.memory_space<vmem>>, %arg2: memref<8192x200xbf16, #tpu.memory_space<vmem>>, %arg3: memref<1x200xf32, #tpu.memory_space<vmem>>, %arg4: memref<1x200xf32, #tpu.memory_space<vmem>>, %arg5: memref<1x1xf32, #tpu.memory_space<vmem>>, %arg6: memref<16x1xf32, #tpu.memory_space<vmem>>, %arg7: memref<16x200xf32, #tpu.memory_space<vmem>>) attributes {dimension_semantics = [#tpu.dimension_semantics<arbitrary>], iteration_bounds = array<i64: 2>, scalar_prefetch = 0 : i64, scratch_operands = 1 : i64, tpu.core_type = #tpu.core_type<tc>, window_params = [{pipeline_mode = #tpu.pipeline_mode<synchronous>, transform_indices = @transform_0, window_bounds = array<i64: 16, 16384>}, {transform_indices = @transform_1, window_bounds = array<i64: 8192, 200>}, {pipeline_mode = #tpu.pipeline_mode<synchronous>, transform_indices = @transform_2, window_bounds = array<i64: 1, 200>}, {pipeline_mode = #tpu.pipeline_mode<synchronous>, transform_indices = @transform_3, window_bounds = array<i64: 1, 200>}, {pipeline_mode = #tpu.pipeline_mode<synchronous>, transform_indices = @transform_4, window_bounds = array<i64: 1, 1>}, {pipeline_mode = #tpu.pipeline_mode<synchronous>, transform_indices = @transform_5, window_bounds = array<i64: 16, 1>}]} {
    %c0_i32 = arith.constant 0 : i32
    %0 = arith.cmpi eq, %arg0, %c0_i32 : i32
    %1 = arith.extui %0 : i1 to i32
    %c0_i32_0 = arith.constant 0 : i32
    %2 = arith.cmpi ne, %1, %c0_i32_0 : i32
    scf.if %2 {
      %cst_8 = arith.constant 0.000000e+00 : f32
      %15 = vector.broadcast %cst_8 : f32 to vector<16x200xf32>
      %c0_9 = arith.constant 0 : index
      %c0_10 = arith.constant 0 : index
      %16 = vector.load %arg7[%c0_9, %c0_10] : memref<16x200xf32, #tpu.memory_space<vmem>>, vector<16x200xf32>
      tpu.vector_store %arg7[%c0_9, %c0_10], %15 {strides = array<i32>} : memref<16x200xf32, #tpu.memory_space<vmem>>, vector<16x200xf32>,
    } else {
    }
    %c8192_i32 = arith.constant 8192 : i32
    %3 = arith.muli %arg0, %c8192_i32 : i32
    %4 = tpu.assume_multiple %3, 8192 : i32
    %c0 = arith.constant 0 : index
    %5 = arith.index_cast %4 : i32 to index
    %6 = vector.load %arg1[%c0, %5] : memref<16x16384xbf16, #tpu.memory_space<vmem>>, vector<16x8192xbf16>
    %c0_1 = arith.constant 0 : index
    %c0_2 = arith.constant 0 : index
    %7 = vector.load %arg7[%c0_1, %c0_2] : memref<16x200xf32, #tpu.memory_space<vmem>>, vector<16x200xf32>
    %c0_3 = arith.constant 0 : index
    %c0_4 = arith.constant 0 : index
    %8 = vector.load %arg2[%c0_3, %c0_4] : memref<8192x200xbf16, #tpu.memory_space<vmem>>, vector<8192x200xbf16>
    %cst = arith.constant dense<0.000000e+00> : vector<16x200xf32>
    %9 = tpu.matmul %6, %8, %cst {dimension_numbers = #tpu.dot_dimension_numbers<[1], [0], [0], [1], [0, 0, 1, 1], [], []>} : vector<16x8192xbf16>, vector<8192x200xbf16>, vector<16x200xf32> -> vector<16x200xf32>
    %10 = arith.addf %7, %9 : vector<16x200xf32>
    %c0_5 = arith.constant 0 : index
    %c0_6 = arith.constant 0 : index
    %11 = vector.load %arg7[%c0_5, %c0_6] : memref<16x200xf32, #tpu.memory_space<vmem>>, vector<16x200xf32>
    tpu.vector_store %arg7[%c0_5, %c0_6], %10 {strides = array<i32>} : memref<16x200xf32, #tpu.memory_space<vmem>>, vector<16x200xf32>,
    %c1_i32 = arith.constant 1 : i32
    %12 = arith.cmpi eq, %arg0, %c1_i32 : i32
    %13 = arith.extui %12 : i1 to i32
    %c0_i32_7 = arith.constant 0 : i32
    %14 = arith.cmpi ne, %13, %c0_i32_7 : i32
    scf.if %14 {
      %c0_8 = arith.constant 0 : index
      %c0_9 = arith.constant 0 : index
      %15 = vector.load %arg7[%c0_8, %c0_9] : memref<16x200xf32, #tpu.memory_space<vmem>>, vector<16x200xf32>
      %c0_10 = arith.constant 0 : index
      %c0_11 = arith.constant 0 : index
      %16 = vector.load %arg3[%c0_10, %c0_11] : memref<1x200xf32, #tpu.memory_space<vmem>>, vector<1x200xf32>
      %17 = vector.broadcast %16 : vector<1x200xf32> to vector<16x200xf32>
      %18 = arith.addf %15, %17 : vector<16x200xf32>
      %19 = arith.negf %18 : vector<16x200xf32>
      %20 = math.exp %19 : vector<16x200xf32>
      %cst_12 = arith.constant 1.000000e+00 : f32
      %21 = vector.broadcast %cst_12 : f32 to vector<16x200xf32>
      %22 = arith.addf %21, %20 : vector<16x200xf32>
      %23 = arith.divf %21, %22 : vector<16x200xf32>
      %c0_13 = arith.constant 0 : index
      %c0_14 = arith.constant 0 : index
      %24 = vector.load %arg4[%c0_13, %c0_14] : memref<1x200xf32, #tpu.memory_space<vmem>>, vector<1x200xf32>
      %25 = vector.broadcast %24 : vector<1x200xf32> to vector<16x200xf32>
      %26 = arith.mulf %23, %25 : vector<16x200xf32>
      %cst_15 = arith.constant dense<0.000000e+00> : vector<16xf32>
      %27 = vector.multi_reduction <add>, %26, %cst_15 [1] : vector<16x200xf32> to vector<16xf32>
      %28 = vector.shape_cast %27 : vector<16xf32> to vector<16x1xf32>
      %c0_16 = arith.constant 0 : index
      %c0_17 = arith.constant 0 : index
      %29 = vector.load %arg5[%c0_16, %c0_17] : memref<1x1xf32, #tpu.memory_space<vmem>>, vector<1x1xf32>
      %30 = vector.broadcast %29 : vector<1x1xf32> to vector<16x1xf32>
      %31 = arith.addf %28, %30 : vector<16x1xf32>
      %32 = arith.negf %31 : vector<16x1xf32>
      %33 = math.exp %32 : vector<16x1xf32>
      %cst_18 = arith.constant 1.000000e+00 : f32
      %34 = vector.broadcast %cst_18 : f32 to vector<16x1xf32>
      %35 = arith.addf %34, %33 : vector<16x1xf32>
      %36 = arith.divf %34, %35 : vector<16x1xf32>
      %c0_19 = arith.constant 0 : index
      %c0_20 = arith.constant 0 : index
      %37 = vector.load %arg6[%c0_19, %c0_20] : memref<16x1xf32, #tpu.memory_space<vmem>>, vector<16x1xf32>
      tpu.vector_store %arg6[%c0_19, %c0_20], %36 {strides = array<i32>} : memref<16x1xf32, #tpu.memory_space<vmem>>, vector<16x1xf32>,
    } else {
    }
    return
  }
  func.func @transform_0(%arg0: i32) -> (i32, i32) {
    %c0_i32 = arith.constant 0 : i32
    %c0_i32_0 = arith.constant 0 : i32
    %c0_i32_1 = arith.constant 0 : i32
    return %c0_i32, %c0_i32_0 : i32, i32
  }
  func.func @transform_1(%arg0: i32) -> (i32, i32) {
    %c0_i32 = arith.constant 0 : i32
    %c0_i32_0 = arith.constant 0 : i32
    return %arg0, %c0_i32 : i32, i32
  }
  func.func @transform_2(%arg0: i32) -> (i32, i32) {
    %c0_i32 = arith.constant 0 : i32
    %c0_i32_0 = arith.constant 0 : i32
    %c0_i32_1 = arith.constant 0 : i32
    return %c0_i32, %c0_i32_0 : i32, i32
  }
  func.func @transform_3(%arg0: i32) -> (i32, i32) {
    %c0_i32 = arith.constant 0 : i32
    %c0_i32_0 = arith.constant 0 : i32
    %c0_i32_1 = arith.constant 0 : i32
    return %c0_i32, %c0_i32_0 : i32, i32
  }
  func.func @transform_4(%arg0: i32) -> (i32, i32) {
    %c0_i32 = arith.constant 0 : i32
    %c0_i32_0 = arith.constant 0 : i32
    %c0_i32_1 = arith.constant 0 : i32
    return %c0_i32, %c0_i32_0 : i32, i32
  }
  func.func @transform_5(%arg0: i32) -> (i32, i32) {
    %c0_i32 = arith.constant 0 : i32
    %c0_i32_0 = arith.constant 0 : i32
    %c0_i32_1 = arith.constant 0 : i32
    return %c0_i32, %c0_i32_0 : i32, i32
  }
}

</mosaic_0001>

<bundles_post_ra>
// kernel: qn_forward.1
= control target key start
LH: loop header
LB: loop body
LE: loop exit
PB: predicated region body
PF: predicated region fallthrough
CT: control target
= control target key end

     0   :  { %s14289_s20 = smov 0   ;;  %s17140_s0 = inlined_call_operand.vmem [shape: bf16[16,16384], index: 0, kind: input, shape index: {}]   ;;  %s17141_s1 = inlined_call_operand.vmem [shape: bf16[16384,200], index: 1, kind: input, shape index: {}]   ;;  %s17142_s2 = inlined_call_operand.vmem [shape: f32[1,200], index: 2, kind: input, shape index: {}]   ;;  %s17143_s3 = inlined_call_operand.vmem [shape: f32[1,200], index: 3, kind: input, shape index: {}]   ;;  %s17144_s4 = inlined_call_operand.<no memory space> [shape: f32[1,1], index: 4, kind: input, shape index: {}]   ;;  %s17145_s5 = inlined_call_operand.vmem [shape: f32[16,1], index: 5, kind: output, shape index: {}]  }
   0x1   :  { %v10_v0 = vstv %s17144_s4 }
   0x2   :  { %11 = vst [vmem:[#allocation3] sm:$0x1] %v10_v0 }
   0x3 LB: > { %s14295_s21 = sadd.s32 4294967295, %s14253_s20   ;;  %p8756_p0 = scmp.ge.s32.totalorder %s14253_s20, 1  ;;  %s14253_s20 = sphi %s14289_s20, %s17_s20  }
   0x4   : > { %p186_p1 = scmp.lt.s32.totalorder %s14253_s20, 3 }
   0x6   : > { %p187_p2 = pnand %p8756_p0, %p186_p1 }
   0x8   : > { %190 = sbr.rel (%p187_p2) target bundleno = 1395 (0x573), region = 40 }
   0xd   : > { %s8757_s22 = sshll.u32 %s14295_s21, 10  ;;  %p8760_p4 = scmp.ne.s32.totalorder %s14295_s21, 0 }
   0xe   : > { %p211_p3 = scmp.lt.s32.totalorder %s8757_s22, 2047 }
   0xf   : > { %220 = sbr.rel (%p8760_p4) target bundleno = 25 (0x19), region = 44 }
  0x10   : > { %s17305_s22 = smov (!%p211_p3, %s8757_s22), 2047 }
  0x11   : > { %s13124_s4 = sshll.u32 %s17305_s22, 3 }
  0x12   : > { %s14303_s25 = scalar_lea.vmem %s17141_s1, %s13124_s4 }
  0x14   : > { %vm222_vm0 = vcmask 588800   ;;  %v14255_v1 = vmov 0.0  }
  0x15   : > { %221 = vst [vmem:[#allocation2] sm:$0xff] %v14255_v1 }
  0x16   : > { %224 = vst [vmem:[#allocation2 + $0x10] sm:$0xff] %v14255_v1 }
  0x17   : > { %223 = vst.msk [vmem:[#allocation2 + $0x8] sm:$0xff] %vm222_vm0, %v14255_v1 }
  0x18   : > { %225 = vst.msk [vmem:[#allocation2 + $0x18] sm:$0xff] %vm222_vm0, %v14255_v1 }
  0x19 PF: > { %v9077_v2 = vld [vmem:[%s14303_s25 + $0x70] sm:$0xf]  ;;  %v13204_v3 = vld [vmem:[%s14303_s25 + $0x74] sm:$0xf0]  ;;  %v9069_v13 = vld [vmem:[%s14303_s25 + $0x60] sm:$0xf] }
  0x1a   : > { %v9141_v4 = vld [vmem:[%s14303_s25 + $0xf0] sm:$0xf]  ;;  %v9078_v5 = vor.u32 %v13204_v3, %v9077_v2  ;;  %v13220_v6 = vld [vmem:[%s14303_s25 + $0xf4] sm:$0xf0]  ;;  %v13202_v15 = vld [vmem:[%s14303_s25 + $0x64] sm:$0xf0] }
  0x1b   : > { %v9205_v7 = vld [vmem:[%s14303_s25 + $0x170] sm:$0xf]  ;;  %v13236_v8 = vld [vmem:[%s14303_s25 + $0x174] sm:$0xf0]  ;;  %v9142_v9 = vor.u32 %v13220_v6, %v9141_v4  ;;  %v9133_v16 = vld [vmem:[%s14303_s25 + $0xe0] sm:$0xf]  ;;  %v9070_v18 = vor.u32 %v13202_v15, %v9069_v13 }
  0x1c   : > { %v9206_v10 = vor.u32 %v13236_v8, %v9205_v7  ;;  %v9269_v11 = vld [vmem:[%s14303_s25 + $0x1f0] sm:$0xf]  ;;  %v13252_v12 = vld [vmem:[%s14303_s25 + $0x1f4] sm:$0xf0]  ;;  %6763 = vmatpush.bf16.msra.mxu0 %v9078_v5  ;;  %v13218_v17 = vld [vmem:[%s14303_s25 + $0xe4] sm:$0xf0] }
  0x1d   : > { %v9270_v14 = vor.u32 %v13252_v12, %v9269_v11  ;;  %6777 = vmatpush.bf16.msra.mxu1 %v9142_v9  ;;  %v9134_v19 = vor.u32 %v13218_v17, %v9133_v16  ;;  %v9197_v20 = vld [vmem:[%s14303_s25 + $0x160] sm:$0xf]  ;;  %v13234_v21 = vld [vmem:[%s14303_s25 + $0x164] sm:$0xf0]  ;;  %v9061_v25 = vld [vmem:[%s14303_s25 + $0x50] sm:$0xf] }
  0x1e   : > { %6791 = vmatpush.bf16.msra.mxu2 %v9206_v10  ;;  %v9261_v22 = vld [vmem:[%s14303_s25 + $0x1e0] sm:$0xf]  ;;  %v9198_v23 = vor.u32 %v13234_v21, %v9197_v20  ;;  %v13250_v24 = vld [vmem:[%s14303_s25 + $0x1e4] sm:$0xf0]  ;;  %v13200_v26 = vld [vmem:[%s14303_s25 + $0x54] sm:$0xf0] }
  0x1f   : > { %6805 = vmatpush.bf16.msra.mxu3 %v9270_v14  ;;  %v9262_v27 = vor.u32 %v13250_v24, %v9261_v22  ;;  %v9125_v28 = vld [vmem:[%s14303_s25 + $0xd0] sm:$0xf]  ;;  %v13216_v29 = vld [vmem:[%s14303_s25 + $0xd4] sm:$0xf0]  ;;  %v9062_v31 = vor.u32 %v13200_v26, %v9061_v25  ;;  %v9053_v37 = vld [vmem:[%s14303_s25 + $0x40] sm:$0xf] }
  0x20   : > { %v9189_v30 = vld [vmem:[%s14303_s25 + $0x150] sm:$0xf]  ;;  %6764 = vmatpush.bf16.msra.mxu0 %v9070_v18  ;;  %v13232_v32 = vld [vmem:[%s14303_s25 + $0x154] sm:$0xf0]  ;;  %v9126_v35 = vor.u32 %v13216_v29, %v9125_v28  ;;  %v13198_v38 = vld [vmem:[%s14303_s25 + $0x44] sm:$0xf0] }
  0x21   : > { %v9253_v33 = vld [vmem:[%s14303_s25 + $0x1d0] sm:$0xf]  ;;  %v13248_v34 = vld [vmem:[%s14303_s25 + $0x1d4] sm:$0xf0]  ;;  %6778 = vmatpush.bf16.msra.mxu1 %v9134_v19  ;;  %v9190_v36 = vor.u32 %v13232_v32, %v9189_v30  ;;  %v9117_v39 = vld [vmem:[%s14303_s25 + $0xc0] sm:$0xf]  ;;  %v9054_v46 = vor.u32 %v13198_v38, %v9053_v37 }
  0x22   : > { %6792 = vmatpush.bf16.msra.mxu2 %v9198_v23  ;;  %v9254_v40 = vor.u32 %v13248_v34, %v9253_v33  ;;  %v13214_v41 = vld [vmem:[%s14303_s25 + $0xc4] sm:$0xf0]  ;;  %v9181_v42 = vld [vmem:[%s14303_s25 + $0x140] sm:$0xf]  ;;  %v9045_v49 = vld [vmem:[%s14303_s25 + $0x30] sm:$0xf] }
  0x23   : > { %6806 = vmatpush.bf16.msra.mxu3 %v9262_v27  ;;  %v13230_v43 = vld [vmem:[%s14303_s25 + $0x144] sm:$0xf0]  ;;  %v9245_v44 = vld [vmem:[%s14303_s25 + $0x1c0] sm:$0xf]  ;;  %v9118_v47 = vor.u32 %v13214_v41, %v9117_v39  ;;  %v13196_v50 = vld [vmem:[%s14303_s25 + $0x34] sm:$0xf0] }
  0x24   : > { %v13246_v45 = vld [vmem:[%s14303_s25 + $0x1c4] sm:$0xf0]  ;;  %6765 = vmatpush.bf16.msra.mxu0 %v9062_v31  ;;  %v9182_v48 = vor.u32 %v13230_v43, %v9181_v42  ;;  %v9109_v51 = vld [vmem:[%s14303_s25 + $0xb0] sm:$0xf]  ;;  %v13212_v53 = vld [vmem:[%s14303_s25 + $0xb4] sm:$0xf0]  ;;  %v9046_v58 = vor.u32 %v13196_v50, %v9045_v49 }
  0x25   : > { %6779 = vmatpush.bf16.msra.mxu1 %v9126_v35  ;;  %v9246_v52 = vor.u32 %v13246_v45, %v9245_v44  ;;  %v9173_v54 = vld [vmem:[%s14303_s25 + $0x130] sm:$0xf]  ;;  %v13228_v55 = vld [vmem:[%s14303_s25 + $0x134] sm:$0xf0]  ;;  %v9110_v59 = vor.u32 %v13212_v53, %v9109_v51  ;;  %v9037_v61 = vld [vmem:[%s14303_s25 + $0x20] sm:$0xf] }
  0x26   : > { %6793 = vmatpush.bf16.msra.mxu2 %v9190_v36  ;;  %v9237_v56 = vld [vmem:[%s14303_s25 + $0x1b0] sm:$0xf]  ;;  %v13244_v57 = vld [vmem:[%s14303_s25 + $0x1b4] sm:$0xf0]  ;;  %v9174_v60 = vor.u32 %v13228_v55, %v9173_v54  ;;  %v13194_v62 = vld [vmem:[%s14303_s25 + $0x24] sm:$0xf0] }
  0x27   : > { %6807 = vmatpush.bf16.msra.mxu3 %v9254_v40  ;;  %v9101_v63 = vld [vmem:[%s14303_s25 + $0xa0] sm:$0xf]  ;;  %v9238_v0 = vor.u32 %v13244_v57, %v9237_v56  ;;  %v13210_v1 = vld [vmem:[%s14303_s25 + $0xa4] sm:$0xf0]  ;;  %v9038_v6 = vor.u32 %v13194_v62, %v9037_v61  ;;  %v9029_v9 = vld [vmem:[%s14303_s25 + $0x10] sm:$0xf] }
  0x28   : > { %6766 = vmatpush.bf16.msra.mxu0 %v9054_v46  ;;  %v9165_v2 = vld [vmem:[%s14303_s25 + $0x120] sm:$0xf]  ;;  %v13226_v3 = vld [vmem:[%s14303_s25 + $0x124] sm:$0xf0]  ;;  %v9102_v7 = vor.u32 %v13210_v1, %v9101_v63  ;;  %v13192_v10 = vld [vmem:[%s14303_s25 + $0x14] sm:$0xf0] }
  0x29   : > { %6780 = vmatpush.bf16.msra.mxu1 %v9118_v47  ;;  %v9229_v4 = vld [vmem:[%s14303_s25 + $0x1a0] sm:$0xf]  ;;  %v13242_v5 = vld [vmem:[%s14303_s25 + $0x1a4] sm:$0xf0]  ;;  %v9166_v8 = vor.u32 %v13226_v3, %v9165_v2  ;;  %v9093_v11 = vld [vmem:[%s14303_s25 + $0x90] sm:$0xf]  ;;  %v9030_v18 = vor.u32 %v13192_v10, %v9029_v9 }
  0x2a   : > { %6794 = vmatpush.bf16.msra.mxu2 %v9182_v48  ;;  %v9230_v12 = vor.u32 %v13242_v5, %v9229_v4  ;;  %v13208_v13 = vld [vmem:[%s14303_s25 + $0x94] sm:$0xf0]  ;;  %v9157_v14 = vld [vmem:[%s14303_s25 + $0x110] sm:$0xf]  ;;  %v9021_v19 = vld [vmem:[%s14303_s25] sm:$0xf] }
  0x2b   : > { %6808 = vmatpush.bf16.msra.mxu3 %v9246_v52  ;;  %v13224_v15 = vld [vmem:[%s14303_s25 + $0x114] sm:$0xf0]  ;;  %v9221_v16 = vld [vmem:[%s14303_s25 + $0x190] sm:$0xf]  ;;  %v13190_v20 = vld [vmem:[%s14303_s25 + $0x4] sm:$0xf0]  ;;  %v9094_v21 = vor.u32 %v13208_v13, %v9093_v11 }
  0x2c   : > { %6767 = vmatpush.bf16.msra.mxu0 %v9046_v58  ;;  %v13240_v17 = vld [vmem:[%s14303_s25 + $0x194] sm:$0xf0]  ;;  %v9158_v22 = vor.u32 %v13224_v15, %v9157_v14  ;;  %v9085_v23 = vld [vmem:[%s14303_s25 + $0x80] sm:$0xf]  ;;  %v13206_v24 = vld [vmem:[%s14303_s25 + $0x84] sm:$0xf0]  ;;  %v9022_v33 = vor.u32 %v13190_v20, %v9021_v19 }
  0x2d   : > { %6781 = vmatpush.bf16.msra.mxu1 %v9110_v59  ;;  %v9149_v25 = vld [vmem:[%s14303_s25 + $0x100] sm:$0xf]  ;;  %v9222_v26 = vor.u32 %v13240_v17, %v9221_v16  ;;  %v13222_v27 = vld [vmem:[%s14303_s25 + $0x104] sm:$0xf0]  ;;  %v9333_v30 = vld [vmem:[%s14303_s25 + $0x270] sm:$0xf]  ;;  %v9086_v37 = vor.u32 %v13206_v24, %v9085_v23 }
  0x2e   : > { %6795 = vmatpush.bf16.msra.mxu2 %v9174_v60  ;;  %v9213_v28 = vld [vmem:[%s14303_s25 + $0x180] sm:$0xf]  ;;  %v13238_v29 = vld [vmem:[%s14303_s25 + $0x184] sm:$0xf0]  ;;  %v13268_v31 = vld [vmem:[%s14303_s25 + $0x274] sm:$0xf0]  ;;  %v9150_v38 = vor.u32 %v13222_v27, %v9149_v25 }
  0x2f   : > { %6809 = vmatpush.bf16.msra.mxu3 %v9238_v0  ;;  %v9397_v32 = vld [vmem:[%s14303_s25 + $0x2f0] sm:$0xf]  ;;  %v13284_v34 = vld [vmem:[%s14303_s25 + $0x2f4] sm:$0xf0]  ;;  %v9214_v41 = vor.u32 %v13238_v29, %v9213_v28  ;;  %v9334_v42 = vor.u32 %v13268_v31, %v9333_v30  ;;  %v9325_v43 = vld [vmem:[%s14303_s25 + $0x260] sm:$0xf] }
  0x30   : > { %6768 = vmatpush.bf16.msra.mxu0 %v9038_v6  ;;  %v9461_v35 = vld [vmem:[%s14303_s25 + $0x370] sm:$0xf]  ;;  %v13300_v36 = vld [vmem:[%s14303_s25 + $0x374] sm:$0xf0]  ;;  %v9398_v44 = vor.u32 %v13284_v34, %v9397_v32  ;;  %v13266_v46 = vld [vmem:[%s14303_s25 + $0x264] sm:$0xf0] }
  0x31   : > { %6782 = vmatpush.bf16.msra.mxu1 %v9102_v7  ;;  %v9525_v39 = vld [vmem:[%s14303_s25 + $0x3f0] sm:$0xf]  ;;  %v13316_v40 = vld [vmem:[%s14303_s25 + $0x3f4] sm:$0xf0]  ;;  %v9462_v45 = vor.u32 %v13300_v36, %v9461_v35  ;;  %v9389_v47 = vld [vmem:[%s14303_s25 + $0x2e0] sm:$0xf]  ;;  %v9326_v55 = vor.u32 %v13266_v46, %v9325_v43 }
  0x32   : > { %6796 = vmatpush.bf16.msra.mxu2 %v9166_v8  ;;  %v13282_v48 = vld [vmem:[%s14303_s25 + $0x2e4] sm:$0xf0]  ;;  %v9526_v49 = vor.u32 %v13316_v40, %v9525_v39  ;;  %v9453_v50 = vld [vmem:[%s14303_s25 + $0x360] sm:$0xf]  ;;  %v9317_v54 = vld [vmem:[%s14303_s25 + $0x250] sm:$0xf] }
  0x33   : > { %6810 = vmatpush.bf16.msra.mxu3 %v9230_v12  ;;  %v13298_v51 = vld [vmem:[%s14303_s25 + $0x364] sm:$0xf0]  ;;  %v9517_v52 = vld [vmem:[%s14303_s25 + $0x3e0] sm:$0xf]  ;;  %s8761_s26 = sshll.u32 %s14295_s21, 13  ;;  %v9390_v58 = vor.u32 %v13282_v48, %v9389_v47  ;;  %vm8560_vm1 = vcmask 588800  }
  0x34   : > { %6769 = vmatpush.bf16.msra.mxu0 %v9030_v18  ;;  %v13314_v53 = vld [vmem:[%s14303_s25 + $0x3e4] sm:$0xf0]  ;;  %v13264_v56 = vld [vmem:[%s14303_s25 + $0x254] sm:$0xf0]  ;;  %v9381_v57 = vld [vmem:[%s14303_s25 + $0x2d0] sm:$0xf]  ;;  %v9454_v59 = vor.u32 %v13298_v51, %v9453_v50 }
  0x35   : > { %6783 = vmatpush.bf16.msra.mxu1 %v9094_v21  ;;  %s227_s27 = sshra.s32 %s8761_s26, 7  ;;  %v13280_v60 = vld [vmem:[%s14303_s25 + $0x2d4] sm:$0xf0]  ;;  %v9445_v61 = vld [vmem:[%s14303_s25 + $0x350] sm:$0xf]  ;;  %v9518_v62 = vor.u32 %v13314_v53, %v9517_v52  ;;  %v9318_v7 = vor.u32 %v13264_v56, %v9317_v54  ;;  %p13115_p5 = scmp.ne.s32.totalorder %s14295_s21, 1 }
  0x36   : > { %6797 = vmatpush.bf16.msra.mxu2 %v9158_v22  ;;  %s8762_s28 = sshll.u32 %s227_s27, 2  ;;  %v13296_v63 = vld [vmem:[%s14303_s25 + $0x354] sm:$0xf0]  ;;  %v9509_v0 = vld [vmem:[%s14303_s25 + $0x3d0] sm:$0xf]  ;;  %v9382_v8 = vor.u32 %v13280_v60, %v9381_v57 }
  0x37   : > { %6811 = vmatpush.bf16.msra.mxu3 %v9222_v26  ;;  %v13312_v1 = vld [vmem:[%s14303_s25 + $0x3d4] sm:$0xf0]  ;;  %s14398_s6 = scalar_lea.vmem %s17140_s0, %s8762_s28  ;;  %v9309_v2 = vld [vmem:[%s14303_s25 + $0x240] sm:$0xf]  ;;  %v13262_v3 = vld [vmem:[%s14303_s25 + $0x244] sm:$0xf0]  ;;  %v9446_v13 = vor.u32 %v13296_v63, %v9445_v61 }
  0x38   : > { %6770 = vmatpush.bf16.msra.mxu0 %v9022_v33  ;;  %v8765_v4 = vld [vmem:[%s14398_s6] sm:$0xf]  ;;  %v8773_v6 = vld [vmem:[%s14398_s6 + $0x8] sm:$0xf]  ;;  %v13125_v11 = vld [vmem:[%s14398_s6 + $0x4] sm:$0xf]  ;;  %v9510_v19 = vor.u32 %v13312_v1, %v9509_v0  ;;  %v9310_v26 = vor.u32 %v13262_v3, %v9309_v2 }
  0x39   : > { %6784 = vmatpush.bf16.msra.mxu1 %v9086_v37  ;;  %v13157_v5 = vld [vmem:[%s14398_s6 + $0x1fc] sm:$0xf0]  ;;  %v13158_v10 = vld [vmem:[%s14398_s6 + $0x204] sm:$0xf0]  ;;  %v8767_v12 = vld [vmem:[%s14398_s6 + $0x200] sm:$0xf0] }
  0x3a   : > { %6798 = vmatpush.bf16.msra.mxu2 %v9150_v38  ;;  %v14405_v9 = vor.u32 %v13157_v5, %v8765_v4  ;;  %v9373_v14 = vld [vmem:[%s14303_s25 + $0x2c0] sm:$0xf]  ;;  %v14411_v15 = vor.u32 %v13158_v10, %v8773_v6  ;;  %v14413_v16 = vor.u32 %v13125_v11, %v8767_v12  ;;  %v13126_v17 = vld [vmem:[%s14398_s6 + $0xc] sm:$0xf]  ;;  %v13278_v20 = vld [vmem:[%s14303_s25 + $0x2c4] sm:$0xf0] }
  0x3b   : > { %6812 = vmatpush.bf16.msra.mxu3 %v9214_v41  ;;  %v8775_v18 = vld [vmem:[%s14398_s6 + $0x208] sm:$0xf0]  ;;  %v9437_v21 = vld [vmem:[%s14303_s25 + $0x340] sm:$0xf]  ;;  %v13294_v22 = vld [vmem:[%s14303_s25 + $0x344] sm:$0xf0]  ;;  %v9374_v27 = vor.u32 %v13278_v20, %v9373_v14 }
  0x3c   : > { %6819 = vmatpush.bf16.msrb.mxu0 %v9334_v42  ;;  %v14421_v23 = vor.u32 %v13126_v17, %v8775_v18  ;;  %v9501_v24 = vld [vmem:[%s14303_s25 + $0x3c0] sm:$0xf]  ;;  %v13310_v25 = vld [vmem:[%s14303_s25 + $0x3c4] sm:$0xf0]  ;;  %6785 = vmatmul.bf16.vlgmr.msra.gmra.mxu1 %v14413_v16  ;;  %v9438_v28 = vor.u32 %v13294_v22, %v9437_v21  ;;  %v9301_v29 = vld [vmem:[%s14303_s25 + $0x230] sm:$0xf] }
  0x3d   : > { %6833 = vmatpush.bf16.msrb.mxu1 %v9398_v44  ;;  %6771 = vmatmul.bf16.vlgmr.msra.gmra.mxu0 %v14405_v9  ;;  %v13260_v30 = vld [vmem:[%s14303_s25 + $0x234] sm:$0xf0]  ;;  %v9365_v31 = vld [vmem:[%s14303_s25 + $0x2b0] sm:$0xf]  ;;  %v9502_v32 = vor.u32 %v13310_v25, %v9501_v24  ;;  %v9293_v41 = vld [vmem:[%s14303_s25 + $0x220] sm:$0xf] }
  0x3e   : > { %6847 = vmatpush.bf16.msrb.mxu2 %v9462_v45  ;;  %6813 = vmatmul.bf16.vlgmr.msra.gmra.mxu3 %v14421_v23  ;;  %v13276_v33 = vld [vmem:[%s14303_s25 + $0x2b4] sm:$0xf0]  ;;  %v9429_v34 = vld [vmem:[%s14303_s25 + $0x330] sm:$0xf]  ;;  %v9302_v38 = vor.u32 %v13260_v30, %v9301_v29  ;;  %v13258_v42 = vld [vmem:[%s14303_s25 + $0x224] sm:$0xf0] }
  0x3f   : > { %6861 = vmatpush.bf16.msrb.mxu3 %v9526_v49  ;;  %6799 = vmatmul.bf16.vlgmr.msra.gmra.mxu2 %v14411_v15  ;;  %v13292_v35 = vld [vmem:[%s14303_s25 + $0x334] sm:$0xf0]  ;;  %v9493_v36 = vld [vmem:[%s14303_s25 + $0x3b0] sm:$0xf]  ;;  %v9366_v39 = vor.u32 %v13276_v33, %v9365_v31  ;;  %v9357_v43 = vld [vmem:[%s14303_s25 + $0x2a0] sm:$0xf]  ;;  %v9294_v50 = vor.u32 %v13258_v42, %v9293_v41 }
  0x40   : > { %6820 = vmatpush.bf16.msrb.mxu0 %v9326_v55  ;;  %v13308_v37 = vld [vmem:[%s14303_s25 + $0x3b4] sm:$0xf0]  ;;  %v9430_v40 = vor.u32 %v13292_v35, %v9429_v34  ;;  %v13274_v45 = vld [vmem:[%s14303_s25 + $0x2a4] sm:$0xf0]  ;;  %v9421_v46 = vld [vmem:[%s14303_s25 + $0x320] sm:$0xf] }
  0x41   : > { %6834 = vmatpush.bf16.msrb.mxu1 %v9390_v58  ;;  %v9494_v44 = vor.u32 %v13308_v37, %v9493_v36  ;;  %v13290_v47 = vld [vmem:[%s14303_s25 + $0x324] sm:$0xf0]  ;;  %v9485_v48 = vld [vmem:[%s14303_s25 + $0x3a0] sm:$0xf]  ;;  %v9285_v51 = vld [vmem:[%s14303_s25 + $0x210] sm:$0xf]  ;;  %v9358_v52 = vor.u32 %v13274_v45, %v9357_v43 }
  0x42   : > { %6848 = vmatpush.bf16.msrb.mxu2 %v9454_v59  ;;  %v13306_v49 = vld [vmem:[%s14303_s25 + $0x3a4] sm:$0xf0]  ;;  %v9422_v53 = vor.u32 %v13290_v47, %v9421_v46  ;;  %v13256_v54 = vld [vmem:[%s14303_s25 + $0x214] sm:$0xf0]  ;;  %v9349_v55 = vld [vmem:[%s14303_s25 + $0x290] sm:$0xf] }
  0x43   : > { %6862 = vmatpush.bf16.msrb.mxu3 %v9518_v62  ;;  %v13272_v56 = vld [vmem:[%s14303_s25 + $0x294] sm:$0xf0]  ;;  %v9486_v57 = vor.u32 %v13306_v49, %v9485_v48  ;;  %v9413_v58 = vld [vmem:[%s14303_s25 + $0x310] sm:$0xf]  ;;  %v9277_v62 = vld [vmem:[%s14303_s25 + $0x200] sm:$0xf]  ;;  %v9286_v0 = vor.u32 %v13256_v54, %v9285_v51 }
  0x44   : > { %6821 = vmatpush.bf16.msrb.mxu0 %v9318_v7  ;;  %v13288_v59 = vld [vmem:[%s14303_s25 + $0x314] sm:$0xf0]  ;;  %v9477_v60 = vld [vmem:[%s14303_s25 + $0x390] sm:$0xf]  ;;  %v13254_v63 = vld [vmem:[%s14303_s25 + $0x204] sm:$0xf0]  ;;  %v9350_v5 = vor.u32 %v13272_v56, %v9349_v55 }
  0x45   : > { %6835 = vmatpush.bf16.msrb.mxu1 %v9382_v8  ;;  %v13304_v61 = vld [vmem:[%s14303_s25 + $0x394] sm:$0xf0]  ;;  %v9341_v1 = vld [vmem:[%s14303_s25 + $0x280] sm:$0xf]  ;;  %v13270_v2 = vld [vmem:[%s14303_s25 + $0x284] sm:$0xf0]  ;;  %v9414_v6 = vor.u32 %v13288_v59, %v9413_v58  ;;  %v9278_v20 = vor.u32 %v13254_v63, %v9277_v62 }
  0x46   : > { %6849 = vmatpush.bf16.msrb.mxu2 %v9446_v13  ;;  %v9405_v3 = vld [vmem:[%s14303_s25 + $0x300] sm:$0xf]  ;;  %v13286_v4 = vld [vmem:[%s14303_s25 + $0x304] sm:$0xf0]  ;;  %v9589_v10 = vld [vmem:[%s14303_s25 + $0x470] sm:$0xf]  ;;  %v9478_v11 = vor.u32 %v13304_v61, %v9477_v60  ;;  %v9342_v25 = vor.u32 %v13270_v2, %v9341_v1 }
  0x47   : > { %6863 = vmatpush.bf16.msrb.mxu3 %v9510_v19  ;;  %v9469_v7 = vld [vmem:[%s14303_s25 + $0x380] sm:$0xf]  ;;  %v13302_v8 = vld [vmem:[%s14303_s25 + $0x384] sm:$0xf0]  ;;  %v13332_v12 = vld [vmem:[%s14303_s25 + $0x474] sm:$0xf0] }
  0x48   : > { %6822 = vmatpush.bf16.msrb.mxu0 %v9310_v26  ;;  %v9653_v13 = vld [vmem:[%s14303_s25 + $0x4f0] sm:$0xf]  ;;  %v13348_v14 = vld [vmem:[%s14303_s25 + $0x4f4] sm:$0xf0]  ;;  %v9406_v26 = vor.u32 %v13286_v4, %v9405_v3  ;;  %v13127_v29 = vld [vmem:[%s14398_s6 + $0x14] sm:$0xf]  ;;  %v9470_v30 = vor.u32 %v13302_v8, %v9469_v7  ;;  %v9590_v31 = vor.u32 %v13332_v12, %v9589_v10 }
  0x49   : > { %6836 = vmatpush.bf16.msrb.mxu1 %v9374_v27  ;;  %v9717_v17 = vld [vmem:[%s14303_s25 + $0x570] sm:$0xf]  ;;  %v13364_v18 = vld [vmem:[%s14303_s25 + $0x574] sm:$0xf0]  ;;  %v13128_v33 = vld [vmem:[%s14398_s6 + $0x1c] sm:$0xf]  ;;  %v9654_v35 = vor.u32 %v13348_v14, %v9653_v13 }
  0x4a   : > { %6850 = vmatpush.bf16.msrb.mxu2 %v9438_v28  ;;  %v9781_v19 = vld [vmem:[%s14303_s25 + $0x5f0] sm:$0xf]  ;;  %v13380_v21 = vld [vmem:[%s14303_s25 + $0x5f4] sm:$0xf0]  ;;  %v8791_v34 = vld [vmem:[%s14398_s6 + $0x218] sm:$0xf0]  ;;  %v9718_v36 = vor.u32 %v13364_v18, %v9717_v17 }
  0x4b   : > { %6864 = vmatpush.bf16.msrb.mxu3 %v9502_v32  ;;  %v8781_v22 = vld [vmem:[%s14398_s6 + $0x10] sm:$0xf]  ;;  %v8789_v27 = vld [vmem:[%s14398_s6 + $0x18] sm:$0xf]  ;;  %v8783_v32 = vld [vmem:[%s14398_s6 + $0x210] sm:$0xf0]  ;;  %v14490_v49 = vor.u32 %v13128_v33, %v8791_v34 }
  0x4c   : > { %6823 = vmatpush.bf16.msrb.mxu0 %v9302_v38  ;;  %v13159_v24 = vld [vmem:[%s14398_s6 + $0x20c] sm:$0xf0]  ;;  %v13160_v28 = vld [vmem:[%s14398_s6 + $0x214] sm:$0xf0]  ;;  %v9581_v37 = vld [vmem:[%s14303_s25 + $0x460] sm:$0xf]  ;;  %v14486_v46 = vor.u32 %v13127_v29, %v8783_v32 }
  0x4d   : > { %6837 = vmatpush.bf16.msrb.mxu1 %v9366_v39  ;;  %v13330_v38 = vld [vmem:[%s14303_s25 + $0x464] sm:$0xf0]  ;;  %v9645_v39 = vld [vmem:[%s14303_s25 + $0x4e0] sm:$0xf]  ;;  %v14479_v41 = vor.u32 %v13159_v24, %v8781_v22  ;;  %v14484_v45 = vor.u32 %v13160_v28, %v8789_v27  ;;  %17197 = vst [vmem:[#allocation7_spill] sm:$0xff] %v14490_v49 }
  0x4e   : > { %6851 = vmatpush.bf16.msrb.mxu2 %v9430_v40  ;;  %v9782_v40 = vor.u32 %v13380_v21, %v9781_v19  ;;  %v13346_v42 = vld [vmem:[%s14303_s25 + $0x4e4] sm:$0xf0]  ;;  %v9709_v43 = vld [vmem:[%s14303_s25 + $0x560] sm:$0xf]  ;;  %17196 = vst [vmem:[#allocation6_spill] sm:$0xff] %v14486_v46 }
  0x4f   : > { %6865 = vmatpush.bf16.msrb.mxu3 %v9494_v44  ;;  %17194 = vst [vmem:[#allocation4_spill] sm:$0xff] %v14479_v41  ;;  %v13362_v44 = vld [vmem:[%s14303_s25 + $0x564] sm:$0xf0]  ;;  %v9773_v47 = vld [vmem:[%s14303_s25 + $0x5e0] sm:$0xf]  ;;  %v9646_v51 = vor.u32 %v13346_v42, %v9645_v39 }
  0x50   : > { %6824 = vmatpush.bf16.msrb.mxu0 %v9294_v50  ;;  %17195 = vst [vmem:[#allocation5_spill] sm:$0xff] %v14484_v45  ;;  %v13378_v48 = vld [vmem:[%s14303_s25 + $0x5e4] sm:$0xf0]  ;;  %v9582_v50 = vor.u32 %v13330_v38, %v9581_v37  ;;  %v13328_v54 = vld [vmem:[%s14303_s25 + $0x454] sm:$0xf0] }
  0x51   : > { %6838 = vmatpush.bf16.msrb.mxu1 %v9358_v52  ;;  %v9710_v52 = vor.u32 %v13362_v44, %v9709_v43  ;;  %v9637_v55 = vld [vmem:[%s14303_s25 + $0x4d0] sm:$0xf]  ;;  %v9774_v56 = vor.u32 %v13378_v48, %v9773_v47  ;;  %v13360_v59 = vld [vmem:[%s14303_s25 + $0x554] sm:$0xf0]  ;;  %v9565_v1 = vld [vmem:[%s14303_s25 + $0x440] sm:$0xf] }
  0x52   : > { %6852 = vmatpush.bf16.msrb.mxu2 %v9422_v53  ;;  %v9573_v53 = vld [vmem:[%s14303_s25 + $0x450] sm:$0xf]  ;;  %v13376_v61 = vld [vmem:[%s14303_s25 + $0x5d4] sm:$0xf0]  ;;  %v13326_v2 = vld [vmem:[%s14303_s25 + $0x444] sm:$0xf0] }
  0x53   : > { %6866 = vmatpush.bf16.msrb.mxu3 %v9486_v57  ;;  %v13344_v57 = vld [vmem:[%s14303_s25 + $0x4d4] sm:$0xf0]  ;;  %v9701_v58 = vld [vmem:[%s14303_s25 + $0x550] sm:$0xf]  ;;  %v9574_v62 = vor.u32 %v13328_v54, %v9573_v53  ;;  %v9629_v3 = vld [vmem:[%s14303_s25 + $0x4c0] sm:$0xf] }
  0x54   : > { %6825 = vmatpush.bf16.msrb.mxu0 %v9286_v0  ;;  %v9765_v60 = vld [vmem:[%s14303_s25 + $0x5d0] sm:$0xf]  ;;  %v9638_v63 = vor.u32 %v13344_v57, %v9637_v55  ;;  %v9702_v0 = vor.u32 %v13360_v59, %v9701_v58  ;;  %v13358_v7 = vld [vmem:[%s14303_s25 + $0x544] sm:$0xf0]  ;;  %v9757_v8 = vld [vmem:[%s14303_s25 + $0x5c0] sm:$0xf] }
  0x55   : > { %6839 = vmatpush.bf16.msrb.mxu1 %v9350_v5  ;;  %v9766_v4 = vor.u32 %v13376_v61, %v9765_v60  ;;  %v13342_v5 = vld [vmem:[%s14303_s25 + $0x4c4] sm:$0xf0]  ;;  %v9557_v14 = vld [vmem:[%s14303_s25 + $0x430] sm:$0xf]  ;;  %v13324_v17 = vld [vmem:[%s14303_s25 + $0x434] sm:$0xf0] }
  0x56   : > { %6853 = vmatpush.bf16.msrb.mxu2 %v9414_v6  ;;  %v9693_v6 = vld [vmem:[%s14303_s25 + $0x540] sm:$0xf]  ;;  %v13374_v10 = vld [vmem:[%s14303_s25 + $0x5c4] sm:$0xf0]  ;;  %v9630_v12 = vor.u32 %v13342_v5, %v9629_v3  ;;  %v9621_v18 = vld [vmem:[%s14303_s25 + $0x4b0] sm:$0xf] }
  0x57   : > { %6867 = vmatpush.bf16.msrb.mxu3 %v9478_v11  ;;  %v9566_v11 = vor.u32 %v13326_v2, %v9565_v1  ;;  %v9694_v13 = vor.u32 %v13358_v7, %v9693_v6  ;;  %v9758_v19 = vor.u32 %v13374_v10, %v9757_v8  ;;  %v9685_v21 = vld [vmem:[%s14303_s25 + $0x530] sm:$0xf]  ;;  %v13356_v22 = vld [vmem:[%s14303_s25 + $0x534] sm:$0xf0]  ;;  %v9549_v29 = vld [vmem:[%s14303_s25 + $0x420] sm:$0xf] }
  0x58   : > { %6826 = vmatpush.bf16.msrb.mxu0 %v9278_v20  ;;  %v13340_v20 = vld [vmem:[%s14303_s25 + $0x4b4] sm:$0xf0]  ;;  %v9749_v24 = vld [vmem:[%s14303_s25 + $0x5b0] sm:$0xf]  ;;  %v9686_v28 = vor.u32 %v13356_v22, %v9685_v21  ;;  %v13338_v33 = vld [vmem:[%s14303_s25 + $0x4a4] sm:$0xf0] }
  0x59   : > { %6840 = vmatpush.bf16.msrb.mxu1 %v9342_v25  ;;  %v13372_v25 = vld [vmem:[%s14303_s25 + $0x5b4] sm:$0xf0]  ;;  %v9622_v27 = vor.u32 %v13340_v20, %v9621_v18  ;;  %v9677_v34 = vld [vmem:[%s14303_s25 + $0x520] sm:$0xf]  ;;  %v13370_v37 = vld [vmem:[%s14303_s25 + $0x5a4] sm:$0xf0] }
  0x5a   : > { %6854 = vmatpush.bf16.msrb.mxu2 %v9406_v26  ;;  %v9558_v26 = vor.u32 %v13324_v17, %v9557_v14  ;;  %v9750_v32 = vor.u32 %v13372_v25, %v9749_v24  ;;  %v9541_v39 = vld [vmem:[%s14303_s25 + $0x410] sm:$0xf]  ;;  %v13320_v43 = vld [vmem:[%s14303_s25 + $0x414] sm:$0xf0]  ;;  %v9533_v54 = vld [vmem:[%s14303_s25 + $0x400] sm:$0xf] }
  0x5b   : > { %6868 = vmatpush.bf16.msrb.mxu3 %v9470_v30  ;;  %6827 = vmatmul.bf16.vlgmr.msrb.gmra.mxu0 %v14479_v41  ;;  %v13322_v30 = vld [vmem:[%s14303_s25 + $0x424] sm:$0xf0]  ;;  %v9605_v44 = vld [vmem:[%s14303_s25 + $0x490] sm:$0xf]  ;;  %v13336_v47 = vld [vmem:[%s14303_s25 + $0x494] sm:$0xf0] }
  0x5c   : > { %6875 = vmatpush.bf16.msra.mxu0 %v9590_v31  ;;  %6841 = vmatmul.bf16.vlgmr.msrb.gmra.mxu1 %v14486_v46  ;;  %v9613_v31 = vld [vmem:[%s14303_s25 + $0x4a0] sm:$0xf]  ;;  %v9550_v38 = vor.u32 %v13322_v30, %v9549_v29  ;;  %v13368_v53 = vld [vmem:[%s14303_s25 + $0x594] sm:$0xf0]  ;;  %v13318_v55 = vld [vmem:[%s14303_s25 + $0x404] sm:$0xf0]  ;;  %v9606_v61 = vor.u32 %v13336_v47, %v9605_v44 }
  0x5d   : > { %6889 = vmatpush.bf16.msra.mxu1 %v9654_v35  ;;  %6855 = vmatmul.bf16.vlgmr.msrb.gmra.mxu2 %v14484_v45  ;;  %v13354_v35 = vld [vmem:[%s14303_s25 + $0x524] sm:$0xf0]  ;;  %v9597_v57 = vld [vmem:[%s14303_s25 + $0x480] sm:$0xf]  ;;  %v9845_v1 = vld [vmem:[%s14303_s25 + $0x670] sm:$0xf]  ;;  %v9534_v10 = vor.u32 %v13318_v55, %v9533_v54 }
  0x5e   : > { %6903 = vmatpush.bf16.msra.mxu2 %v9718_v36  ;;  %6869 = vmatmul.bf16.vlgmr.msrb.gmra.mxu3 %v14490_v49  ;;  %v9741_v36 = vld [vmem:[%s14303_s25 + $0x5a0] sm:$0xf]  ;;  %v9678_v42 = vor.u32 %v13354_v35, %v9677_v34  ;;  %v13334_v58 = vld [vmem:[%s14303_s25 + $0x484] sm:$0xf0]  ;;  %v13396_v3 = vld [vmem:[%s14303_s25 + $0x674] sm:$0xf0] }
  0x5f   : > { %6917 = vmatpush.bf16.msra.mxu3 %v9782_v40  ;;  %v9614_v40 = vor.u32 %v13338_v33, %v9613_v31  ;;  %v9742_v48 = vor.u32 %v13370_v37, %v9741_v36  ;;  %v9661_v59 = vld [vmem:[%s14303_s25 + $0x500] sm:$0xf]  ;;  %v13350_v60 = vld [vmem:[%s14303_s25 + $0x504] sm:$0xf0]  ;;  %v13412_v5 = vld [vmem:[%s14303_s25 + $0x6f4] sm:$0xf0]  ;;  %v9598_v14 = vor.u32 %v13334_v58, %v9597_v57  ;;  %v9846_v22 = vor.u32 %v13396_v3, %v9845_v1 }
  0x60   : > { %6876 = vmatpush.bf16.msra.mxu0 %v9582_v50  ;;  %v9669_v50 = vld [vmem:[%s14303_s25 + $0x510] sm:$0xf]  ;;  %v13428_v7 = vld [vmem:[%s14303_s25 + $0x774] sm:$0xf0]  ;;  %v9662_v17 = vor.u32 %v13350_v60, %v9661_v59  ;;  %v8805_v18 = vld [vmem:[%s14398_s6 + $0x28] sm:$0xf] }
  0x61   : > { %6890 = vmatpush.bf16.msra.mxu1 %v9646_v51  ;;  %v13352_v51 = vld [vmem:[%s14303_s25 + $0x514] sm:$0xf0]  ;;  %v9973_v6 = vld [vmem:[%s14303_s25 + $0x770] sm:$0xf]  ;;  %v13129_v20 = vld [vmem:[%s14398_s6 + $0x24] sm:$0xf] }
  0x62   : > { %6904 = vmatpush.bf16.msra.mxu2 %v9710_v52  ;;  %v9733_v52 = vld [vmem:[%s14303_s25 + $0x590] sm:$0xf]  ;;  %v8799_v24 = vld [vmem:[%s14398_s6 + $0x220] sm:$0xf0]  ;;  %v13130_v25 = vld [vmem:[%s14398_s6 + $0x2c] sm:$0xf] }
  0x63   : > { %6918 = vmatpush.bf16.msra.mxu3 %v9774_v56  ;;  %v9542_v56 = vor.u32 %v13320_v43, %v9541_v39  ;;  %v9734_v2 = vor.u32 %v13368_v53, %v9733_v52  ;;  %v10037_v8 = vld [vmem:[%s14303_s25 + $0x7f0] sm:$0xf]  ;;  %v9837_v29 = vld [vmem:[%s14303_s25 + $0x660] sm:$0xf]  ;;  %v13394_v30 = vld [vmem:[%s14303_s25 + $0x664] sm:$0xf0] }
  0x64   : > { %6877 = vmatpush.bf16.msra.mxu0 %v9574_v62  ;;  %v9670_v62 = vor.u32 %v13352_v51, %v9669_v50  ;;  %v9901_v31 = vld [vmem:[%s14303_s25 + $0x6e0] sm:$0xf]  ;;  %v13410_v34 = vld [vmem:[%s14303_s25 + $0x6e4] sm:$0xf0]  ;;  %v9838_v43 = vor.u32 %v13394_v30, %v9837_v29  ;;  %v13392_v50 = vld [vmem:[%s14303_s25 + $0x654] sm:$0xf0] }
  0x65   : > { %6891 = vmatpush.bf16.msra.mxu1 %v9638_v63  ;;  %v9725_v63 = vld [vmem:[%s14303_s25 + $0x580] sm:$0xf]  ;;  %v13426_v36 = vld [vmem:[%s14303_s25 + $0x764] sm:$0xf0]  ;;  %v9902_v44 = vor.u32 %v13410_v34, %v9901_v31  ;;  %v9893_v51 = vld [vmem:[%s14303_s25 + $0x6d0] sm:$0xf] }
  0x66   : > { %6905 = vmatpush.bf16.msra.mxu2 %v9702_v0  ;;  %v13366_v0 = vld [vmem:[%s14303_s25 + $0x584] sm:$0xf0]  ;;  %v9965_v35 = vld [vmem:[%s14303_s25 + $0x760] sm:$0xf]  ;;  %v13408_v53 = vld [vmem:[%s14303_s25 + $0x6d4] sm:$0xf0] }
  0x67   : > { %6919 = vmatpush.bf16.msra.mxu3 %v9766_v4  ;;  %v9909_v4 = vld [vmem:[%s14303_s25 + $0x6f0] sm:$0xf]  ;;  %v9726_v21 = vor.u32 %v13366_v0, %v9725_v63  ;;  %v10029_v39 = vld [vmem:[%s14303_s25 + $0x7e0] sm:$0xf]  ;;  %v9966_v47 = vor.u32 %v13426_v36, %v9965_v35  ;;  %v13424_v55 = vld [vmem:[%s14303_s25 + $0x754] sm:$0xf0]  ;;  %v9894_v59 = vor.u32 %v13408_v53, %v9893_v51 }
  0x68   : > { %6878 = vmatpush.bf16.msra.mxu0 %v9566_v11  ;;  %v13444_v11 = vld [vmem:[%s14303_s25 + $0x7f4] sm:$0xf0]  ;;  %v9957_v54 = vld [vmem:[%s14303_s25 + $0x750] sm:$0xf]  ;;  %v9885_v63 = vld [vmem:[%s14303_s25 + $0x6c0] sm:$0xf] }
  0x69   : > { %6892 = vmatpush.bf16.msra.mxu1 %v9630_v12  ;;  %v8797_v12 = vld [vmem:[%s14398_s6 + $0x20] sm:$0xf]  ;;  %v13440_v57 = vld [vmem:[%s14303_s25 + $0x7d4] sm:$0xf0]  ;;  %v9958_v60 = vor.u32 %v13424_v55, %v9957_v54  ;;  %v13406_v1 = vld [vmem:[%s14303_s25 + $0x6c4] sm:$0xf0] }
  0x6a   : > { %6906 = vmatpush.bf16.msra.mxu2 %v9694_v13  ;;  %v13161_v13 = vld [vmem:[%s14398_s6 + $0x21c] sm:$0xf0]  ;;  %v13422_v3 = vld [vmem:[%s14303_s25 + $0x744] sm:$0xf0]  ;;  %v9797_v36 = vld [vmem:[%s14303_s25 + $0x610] sm:$0xf] }
  0x6b   : > { %6920 = vmatpush.bf16.msra.mxu3 %v9758_v19  ;;  %v13162_v19 = vld [vmem:[%s14398_s6 + $0x224] sm:$0xf0]  ;;  %v14563_v33 = vor.u32 %v13161_v13, %v8797_v12  ;;  %v9877_v12 = vld [vmem:[%s14303_s25 + $0x6b0] sm:$0xf]  ;;  %v9933_v30 = vld [vmem:[%s14303_s25 + $0x720] sm:$0xf] }
  0x6c   : > { %6879 = vmatpush.bf16.msra.mxu0 %v9558_v26  ;;  %v8807_v26 = vld [vmem:[%s14398_s6 + $0x228] sm:$0xf0]  ;;  %v14568_v37 = vor.u32 %v13162_v19, %v8805_v18  ;;  %v13420_v18 = vld [vmem:[%s14303_s25 + $0x734] sm:$0xf0]  ;;  %v10005_v19 = vld [vmem:[%s14303_s25 + $0x7b0] sm:$0xf] }
  0x6d   : > { %6893 = vmatpush.bf16.msra.mxu1 %v9622_v27  ;;  %v9910_v27 = vor.u32 %v13412_v5, %v9909_v4  ;;  %17198 = vst [vmem:[#allocation8_spill] sm:$0xff] %v14563_v33  ;;  %v10013_v4 = vld [vmem:[%s14303_s25 + $0x7c0] sm:$0xf]  ;;  %v13438_v5 = vld [vmem:[%s14303_s25 + $0x7c4] sm:$0xf0] }
  0x6e   : > { %6907 = vmatpush.bf16.msra.mxu2 %v9686_v28  ;;  %v9974_v28 = vor.u32 %v13428_v7, %v9973_v6  ;;  %17199 = vst [vmem:[#allocation9_spill] sm:$0xff] %v14568_v37  ;;  %v9886_v7 = vor.u32 %v13406_v1, %v9885_v63  ;;  %v10014_v13 = vor.u32 %v13438_v5, %v10013_v4  ;;  %v13402_v29 = vld [vmem:[%s14303_s25 + $0x6a4] sm:$0xf0]  ;;  %v13416_v51 = vld [vmem:[%s14303_s25 + $0x714] sm:$0xf0] }
  0x6f   : > { %6921 = vmatpush.bf16.msra.mxu3 %v9750_v32  ;;  %v10038_v32 = vor.u32 %v13444_v11, %v10037_v8  ;;  %v13388_v11 = vld [vmem:[%s14303_s25 + $0x634] sm:$0xf0]  ;;  %v13418_v31 = vld [vmem:[%s14303_s25 + $0x724] sm:$0xf0]  ;;  %v9789_v54 = vld [vmem:[%s14303_s25 + $0x600] sm:$0xf] }
  0x70   : > { %6880 = vmatpush.bf16.msra.mxu0 %v9550_v38  ;;  %v14570_v38 = vor.u32 %v13129_v20, %v8799_v24  ;;  %v13436_v20 = vld [vmem:[%s14303_s25 + $0x7b4] sm:$0xf0]  ;;  %v13434_v34 = vld [vmem:[%s14303_s25 + $0x7a4] sm:$0xf0]  ;;  %v9981_v63 = vld [vmem:[%s14303_s25 + $0x780] sm:$0xf] }
  0x71   : > { %6894 = vmatpush.bf16.msra.mxu1 %v9614_v40  ;;  %v13442_v40 = vld [vmem:[%s14303_s25 + $0x7e4] sm:$0xf0]  ;;  %v13432_v53 = vld [vmem:[%s14303_s25 + $0x794] sm:$0xf0]  ;;  %v10101_v1 = vld [vmem:[%s14303_s25 + $0x870] sm:$0xf] }
  0x72   : > { %6908 = vmatpush.bf16.msra.mxu2 %v9678_v42  ;;  %17200 = vst [vmem:[#allocation10_spill] sm:$0xff] %v14570_v38  ;;  %v14574_v42 = vor.u32 %v13130_v25, %v8807_v26  ;;  %v10030_v52 = vor.u32 %v13442_v40, %v10029_v39  ;;  %v9805_v25 = vld [vmem:[%s14303_s25 + $0x620] sm:$0xf]  ;;  %v13386_v26 = vld [vmem:[%s14303_s25 + $0x624] sm:$0xf0]  ;;  %v9934_v40 = vor.u32 %v13418_v31, %v9933_v30 }
  0x73   : > { %6922 = vmatpush.bf16.msra.mxu3 %v9742_v48  ;;  %v9829_v48 = vld [vmem:[%s14303_s25 + $0x650] sm:$0xf]  ;;  %v9806_v35 = vor.u32 %v13386_v26, %v9805_v25  ;;  %v13382_v55 = vld [vmem:[%s14303_s25 + $0x604] sm:$0xf0]  ;;  %v13476_v5 = vld [vmem:[%s14303_s25 + $0x8f4] sm:$0xf0] }
  0x74   : > { %6881 = vmatpush.bf16.msra.mxu0 %v9542_v56  ;;  %17201 = vst [vmem:[#allocation11_spill] sm:$0xff] %v14574_v42  ;;  %v10021_v56 = vld [vmem:[%s14303_s25 + $0x7d0] sm:$0xf]  ;;  %v9830_v58 = vor.u32 %v13392_v50, %v9829_v48  ;;  %v13132_v25 = vld [vmem:[%s14398_s6 + $0x3c] sm:$0xf] }
  0x75   : > { %6895 = vmatpush.bf16.msra.mxu1 %v9606_v61  ;;  %v9821_v61 = vld [vmem:[%s14303_s25 + $0x640] sm:$0xf]  ;;  %v10022_v0 = vor.u32 %v13440_v57, %v10021_v56  ;;  %v9925_v50 = vld [vmem:[%s14303_s25 + $0x710] sm:$0xf]  ;;  %v8823_v26 = vld [vmem:[%s14398_s6 + $0x238] sm:$0xf0] }
  0x76   : > { %6909 = vmatpush.bf16.msra.mxu2 %v9670_v62  ;;  %v13390_v62 = vld [vmem:[%s14303_s25 + $0x644] sm:$0xf0]  ;;  %v9853_v57 = vld [vmem:[%s14303_s25 + $0x680] sm:$0xf]  ;;  %v10165_v4 = vld [vmem:[%s14303_s25 + $0x8f0] sm:$0xf] }
  0x77   : > { %6923 = vmatpush.bf16.msra.mxu3 %v9734_v2  ;;  %v9949_v2 = vld [vmem:[%s14303_s25 + $0x740] sm:$0xf]  ;;  %v9822_v6 = vor.u32 %v13390_v62, %v9821_v61  ;;  %v9926_v62 = vor.u32 %v13416_v51, %v9925_v50  ;;  %v13458_v30 = vld [vmem:[%s14303_s25 + $0x864] sm:$0xf0] }
  0x78   : > { %6882 = vmatpush.bf16.msra.mxu0 %v9534_v10  ;;  %v9950_v8 = vor.u32 %v13422_v3, %v9949_v2  ;;  %v9813_v10 = vld [vmem:[%s14303_s25 + $0x630] sm:$0xf]  ;;  %v13460_v3 = vld [vmem:[%s14303_s25 + $0x874] sm:$0xf0]  ;;  %v10157_v31 = vld [vmem:[%s14303_s25 + $0x8e0] sm:$0xf] }
  0x79   : > { %6896 = vmatpush.bf16.msra.mxu1 %v9598_v14  ;;  %v13404_v14 = vld [vmem:[%s14303_s25 + $0x6b4] sm:$0xf0]  ;;  %v13970_v49 = vld [vmem:[%s14303_s25 + $0x1864] sm:$0xf0]  ;;  %v12269_v46 = vld [vmem:[%s14303_s25 + $0x1960] sm:$0xf] }
  0x7a   : > { %6910 = vmatpush.bf16.msra.mxu2 %v9662_v17  ;;  %v9941_v17 = vld [vmem:[%s14303_s25 + $0x730] sm:$0xf] }
  0x7b   : > { %6924 = vmatpush.bf16.msra.mxu3 %v9726_v21  ;;  %6883 = vmatmul.bf16.vlgmr.msra.gmra.mxu0 %v14563_v33  ;;  %v9814_v21 = vor.u32 %v13388_v11, %v9813_v10  ;;  %v9942_v24 = vor.u32 %v13420_v18, %v9941_v17  ;;  %v9790_v10 = vor.u32 %v13382_v55, %v9789_v54  ;;  %v13508_v11 = vld [vmem:[%s14303_s25 + $0x9f4] sm:$0xf0]  ;;  %v10149_v55 = vld [vmem:[%s14303_s25 + $0x8d0] sm:$0xf] }
  0x7c   : > { %6931 = vmatpush.bf16.msrb.mxu0 %v9846_v22  ;;  %6897 = vmatmul.bf16.vlgmr.msra.gmra.mxu1 %v14570_v38  ;;  %v9878_v22 = vor.u32 %v13404_v14, %v9877_v12  ;;  %v8813_v12 = vld [vmem:[%s14398_s6 + $0x30] sm:$0xf]  ;;  %v8821_v18 = vld [vmem:[%s14398_s6 + $0x38] sm:$0xf]  ;;  %v12013_v38 = vld [vmem:[%s14303_s25 + $0x1760] sm:$0xf] }
  0x7d   : > { %6945 = vmatpush.bf16.msrb.mxu1 %v9910_v27  ;;  %6911 = vmatmul.bf16.vlgmr.msra.gmra.mxu2 %v14568_v37  ;;  %v9869_v27 = vld [vmem:[%s14303_s25 + $0x6a0] sm:$0xf]  ;;  %v13456_v54 = vld [vmem:[%s14303_s25 + $0x854] sm:$0xf0] }
  0x7e   : > { %6959 = vmatpush.bf16.msrb.mxu2 %v9974_v28  ;;  %6925 = vmatmul.bf16.vlgmr.msra.gmra.mxu3 %v14574_v42  ;;  %v10006_v28 = vor.u32 %v13436_v20, %v10005_v19  ;;  %v9870_v39 = vor.u32 %v13402_v29, %v9869_v27  ;;  %v13164_v19 = vld [vmem:[%s14398_s6 + $0x234] sm:$0xf0]  ;;  %v13131_v20 = vld [vmem:[%s14398_s6 + $0x34] sm:$0xf]  ;;  %v10166_v27 = vor.u32 %v13476_v5, %v10165_v4  ;;  %v10093_v29 = vld [vmem:[%s14303_s25 + $0x860] sm:$0xf] }
  0x7f   : > { %6973 = vmatpush.bf16.msrb.mxu3 %v10038_v32  ;;  %v9997_v32 = vld [vmem:[%s14303_s25 + $0x7a0] sm:$0xf]  ;;  %v10094_v50 = vor.u32 %v13458_v30, %v10093_v29  ;;  %v13470_v5 = vld [vmem:[%s14303_s25 + $0x8c4] sm:$0xf0] }
  0x80   : > { %6932 = vmatpush.bf16.msrb.mxu0 %v9838_v43  ;;  %v13384_v43 = vld [vmem:[%s14303_s25 + $0x614] sm:$0xf0]  ;;  %v9998_v48 = vor.u32 %v13434_v34, %v9997_v32  ;;  %v10061_v29 = vld [vmem:[%s14303_s25 + $0x820] sm:$0xf]  ;;  %v13450_v30 = vld [vmem:[%s14303_s25 + $0x824] sm:$0xf0] }
  0x81   : > { %6946 = vmatpush.bf16.msrb.mxu1 %v9902_v44  ;;  %v9861_v44 = vld [vmem:[%s14303_s25 + $0x690] sm:$0xf]  ;;  %v9798_v56 = vor.u32 %v13384_v43, %v9797_v36  ;;  %v10221_v36 = vld [vmem:[%s14303_s25 + $0x960] sm:$0xf]  ;;  %v13906_v42 = vld [vmem:[%s14303_s25 + $0x1664] sm:$0xf0] }
  0x82   : > { %6960 = vmatpush.bf16.msrb.mxu2 %v9966_v47  ;;  %v13400_v47 = vld [vmem:[%s14303_s25 + $0x694] sm:$0xf0] }
  0x83   : > { %6974 = vmatpush.bf16.msrb.mxu3 %v10030_v52  ;;  %v9989_v52 = vld [vmem:[%s14303_s25 + $0x790] sm:$0xf]  ;;  %v9862_v61 = vor.u32 %v13400_v47, %v9861_v44  ;;  %v10285_v44 = vld [vmem:[%s14303_s25 + $0x9e0] sm:$0xf]  ;;  %v13506_v47 = vld [vmem:[%s14303_s25 + $0x9e4] sm:$0xf0] }
  0x84   : > { %6933 = vmatpush.bf16.msrb.mxu0 %v9830_v58  ;;  %v13398_v58 = vld [vmem:[%s14303_s25 + $0x684] sm:$0xf0]  ;;  %v9990_v2 = vor.u32 %v13432_v53, %v9989_v52  ;;  %v10085_v53 = vld [vmem:[%s14303_s25 + $0x850] sm:$0xf] }
  0x85   : > { %6947 = vmatpush.bf16.msrb.mxu1 %v9894_v59  ;;  %v9917_v59 = vld [vmem:[%s14303_s25 + $0x700] sm:$0xf]  ;;  %v9854_v14 = vor.u32 %v13398_v58, %v9853_v57  ;;  %v13472_v57 = vld [vmem:[%s14303_s25 + $0x8d4] sm:$0xf0]  ;;  %v10213_v58 = vld [vmem:[%s14303_s25 + $0x950] sm:$0xf] }
  0x86   : > { %6961 = vmatpush.bf16.msrb.mxu2 %v9958_v60  ;;  %v13414_v60 = vld [vmem:[%s14303_s25 + $0x704] sm:$0xf0] }
  0x87   : > { %6975 = vmatpush.bf16.msrb.mxu3 %v10022_v0  ;;  %v13430_v0 = vld [vmem:[%s14303_s25 + $0x784] sm:$0xf0]  ;;  %v9918_v17 = vor.u32 %v13414_v60, %v9917_v59  ;;  %v13488_v59 = vld [vmem:[%s14303_s25 + $0x954] sm:$0xf0]  ;;  %v10277_v60 = vld [vmem:[%s14303_s25 + $0x9d0] sm:$0xf] }
  0x88   : > { %6934 = vmatpush.bf16.msrb.mxu0 %v9822_v6  ;;  %v10229_v6 = vld [vmem:[%s14303_s25 + $0x970] sm:$0xf] }
  0x89   : > { %6948 = vmatpush.bf16.msrb.mxu1 %v9886_v7  ;;  %v13492_v7 = vld [vmem:[%s14303_s25 + $0x974] sm:$0xf0] }
  0x8a   : > { %6962 = vmatpush.bf16.msrb.mxu2 %v9950_v8  ;;  %v10293_v8 = vld [vmem:[%s14303_s25 + $0x9f0] sm:$0xf] }
  0x8b   : > { %6976 = vmatpush.bf16.msrb.mxu3 %v10014_v13  ;;  %v13163_v13 = vld [vmem:[%s14398_s6 + $0x22c] sm:$0xf0]  ;;  %v10294_v32 = vor.u32 %v13508_v11, %v10293_v8  ;;  %v10269_v8 = vld [vmem:[%s14303_s25 + $0x9c0] sm:$0xf] }
  0x8c   : > { %6935 = vmatpush.bf16.msrb.mxu0 %v9814_v21  ;;  %v9982_v21 = vor.u32 %v13430_v0, %v9981_v63  ;;  %v14647_v34 = vor.u32 %v13163_v13, %v8813_v12  ;;  %v10150_v63 = vor.u32 %v13472_v57, %v10149_v55  ;;  %v10214_v0 = vor.u32 %v13488_v59, %v10213_v58  ;;  %v10117_v55 = vld [vmem:[%s14303_s25 + $0x890] sm:$0xf]  ;;  %v13480_v59 = vld [vmem:[%s14303_s25 + $0x914] sm:$0xf0] }
  0x8d   : > { %6949 = vmatpush.bf16.msrb.mxu1 %v9878_v22  ;;  %v10102_v22 = vor.u32 %v13460_v3, %v10101_v1  ;;  %v10077_v1 = vld [vmem:[%s14303_s25 + $0x840] sm:$0xf]  ;;  %v10181_v58 = vld [vmem:[%s14303_s25 + $0x910] sm:$0xf] }
  0x8e   : > { %6963 = vmatpush.bf16.msrb.mxu2 %v9942_v24  ;;  %v8815_v24 = vld [vmem:[%s14398_s6 + $0x230] sm:$0xf0]  ;;  %17202 = vst [vmem:[#allocation12_spill] sm:$0xff] %v14647_v34  ;;  %v10141_v3 = vld [vmem:[%s14303_s25 + $0x8c0] sm:$0xf] }
  0x8f   : > { %6977 = vmatpush.bf16.msrb.mxu3 %v10006_v28  ;;  %v10230_v28 = vor.u32 %v13492_v7, %v10229_v6  ;;  %v14654_v43 = vor.u32 %v13131_v20, %v8815_v24  ;;  %v10205_v6 = vld [vmem:[%s14303_s25 + $0x940] sm:$0xf]  ;;  %v13486_v7 = vld [vmem:[%s14303_s25 + $0x944] sm:$0xf0]  ;;  %v10142_v12 = vor.u32 %v13470_v5, %v10141_v3  ;;  %v13468_v20 = vld [vmem:[%s14303_s25 + $0x8b4] sm:$0xf0] }
  0x90   : > { %6936 = vmatpush.bf16.msrb.mxu0 %v9806_v35  ;;  %v13474_v35 = vld [vmem:[%s14303_s25 + $0x8e4] sm:$0xf0]  ;;  %v10206_v13 = vor.u32 %v13486_v7, %v10205_v6  ;;  %v10261_v24 = vld [vmem:[%s14303_s25 + $0x9b0] sm:$0xf]  ;;  %v10173_v3 = vld [vmem:[%s14303_s25 + $0x900] sm:$0xf]  ;;  %v10182_v6 = vor.u32 %v13480_v59, %v10181_v58 }
  0x91   : > { %6950 = vmatpush.bf16.msrb.mxu1 %v9870_v39  ;;  %v13490_v39 = vld [vmem:[%s14303_s25 + $0x964] sm:$0xf0]  ;;  %17204 = vst [vmem:[#allocation14_spill] sm:$0xff] %v14654_v43  ;;  %v10158_v51 = vor.u32 %v13474_v35, %v10157_v31  ;;  %v10125_v31 = vld [vmem:[%s14303_s25 + $0x8a0] sm:$0xf] }
  0x92   : > { %6964 = vmatpush.bf16.msrb.mxu2 %v9934_v40  ;;  %v14652_v40 = vor.u32 %v13164_v19, %v8821_v18  ;;  %v10222_v52 = vor.u32 %v13490_v39, %v10221_v36  ;;  %v10133_v18 = vld [vmem:[%s14303_s25 + $0x8b0] sm:$0xf]  ;;  %v13466_v35 = vld [vmem:[%s14303_s25 + $0x8a4] sm:$0xf0]  ;;  %v10189_v36 = vld [vmem:[%s14303_s25 + $0x920] sm:$0xf] }
  0x93   : > { %6978 = vmatpush.bf16.msrb.mxu3 %v9998_v48  ;;  %v14658_v48 = vor.u32 %v13132_v25, %v8823_v26  ;;  %v13500_v25 = vld [vmem:[%s14303_s25 + $0x9b4] sm:$0xf0]  ;;  %v13482_v39 = vld [vmem:[%s14303_s25 + $0x924] sm:$0xf0]  ;;  %v10237_v7 = vld [vmem:[%s14303_s25 + $0x980] sm:$0xf] }
  0x94   : > { %6937 = vmatpush.bf16.msrb.mxu0 %v9798_v56  ;;  %17203 = vst [vmem:[#allocation13_spill] sm:$0xff] %v14652_v40  ;;  %v10286_v56 = vor.u32 %v13506_v47, %v10285_v44  ;;  %v10253_v44 = vld [vmem:[%s14303_s25 + $0x9a0] sm:$0xf]  ;;  %v13498_v47 = vld [vmem:[%s14303_s25 + $0x9a4] sm:$0xf0] }
  0x95   : > { %6951 = vmatpush.bf16.msrb.mxu1 %v9862_v61  ;;  %17205 = vst [vmem:[#allocation15_spill] sm:$0xff] %v14658_v48  ;;  %v13504_v61 = vld [vmem:[%s14303_s25 + $0x9d4] sm:$0xf0]  ;;  %v10254_v57 = vor.u32 %v13498_v47, %v10253_v44  ;;  %v10349_v47 = vld [vmem:[%s14303_s25 + $0xa60] sm:$0xf] }
  0x96   : > { %6965 = vmatpush.bf16.msrb.mxu2 %v9926_v62  ;;  %v10086_v62 = vor.u32 %v13456_v54, %v10085_v53  ;;  %v10278_v4 = vor.u32 %v13504_v61, %v10277_v60  ;;  %v10190_v53 = vor.u32 %v13482_v39, %v10189_v36  ;;  %v13448_v54 = vld [vmem:[%s14303_s25 + $0x814] sm:$0xf0]  ;;  %v10245_v60 = vld [vmem:[%s14303_s25 + $0x990] sm:$0xf]  ;;  %v8839_v36 = vld [vmem:[%s14398_s6 + $0x248] sm:$0xf0] }
  0x97   : > { %6979 = vmatpush.bf16.msrb.mxu3 %v9990_v2  ;;  %v13454_v2 = vld [vmem:[%s14303_s25 + $0x844] sm:$0xf0]  ;;  %v13496_v61 = vld [vmem:[%s14303_s25 + $0x994] sm:$0xf0]  ;;  %v10541_v59 = vld [vmem:[%s14303_s25 + $0xbe0] sm:$0xf] }
  0x98   : > { %6938 = vmatpush.bf16.msrb.mxu0 %v9790_v10  ;;  %v13502_v10 = vld [vmem:[%s14303_s25 + $0x9c4] sm:$0xf0]  ;;  %v10078_v11 = vor.u32 %v13454_v2, %v10077_v1  ;;  %v10109_v1 = vld [vmem:[%s14303_s25 + $0x880] sm:$0xf] }
  0x99   : > { %6952 = vmatpush.bf16.msrb.mxu1 %v9854_v14  ;;  %v10069_v14 = vld [vmem:[%s14303_s25 + $0x830] sm:$0xf]  ;;  %v10270_v19 = vor.u32 %v13502_v10, %v10269_v8  ;;  %v13462_v2 = vld [vmem:[%s14303_s25 + $0x884] sm:$0xf0] }
  0x9a   : > { %6966 = vmatpush.bf16.msrb.mxu2 %v9918_v17  ;;  %v13452_v17 = vld [vmem:[%s14303_s25 + $0x834] sm:$0xf0]  ;;  %v13494_v8 = vld [vmem:[%s14303_s25 + $0x984] sm:$0xf0]  ;;  %v10357_v10 = vld [vmem:[%s14303_s25 + $0xa70] sm:$0xf] }
  0x9b   : > { %6980 = vmatpush.bf16.msrb.mxu3 %v9982_v21  ;;  %6939 = vmatmul.bf16.vlgmr.msrb.gmra.mxu0 %v14647_v34  ;;  %v10197_v21 = vld [vmem:[%s14303_s25 + $0x930] sm:$0xf]  ;;  %v10070_v26 = vor.u32 %v13452_v17, %v10069_v14  ;;  %v13540_v14 = vld [vmem:[%s14303_s25 + $0xaf4] sm:$0xf0] }
  0x9c   : > { %6987 = vmatpush.bf16.msra.mxu0 %v10102_v22  ;;  %6953 = vmatmul.bf16.vlgmr.msrb.gmra.mxu1 %v14654_v43  ;;  %v13484_v22 = vld [vmem:[%s14303_s25 + $0x934] sm:$0xf0]  ;;  %v10485_v17 = vld [vmem:[%s14303_s25 + $0xb70] sm:$0xf]  ;;  %v11757_v43 = vld [vmem:[%s14303_s25 + $0x1560] sm:$0xf] }
  0x9d   : > { %7001 = vmatpush.bf16.msra.mxu1 %v10166_v27  ;;  %6967 = vmatmul.bf16.vlgmr.msrb.gmra.mxu2 %v14652_v40  ;;  %v10134_v27 = vor.u32 %v13468_v20, %v10133_v18  ;;  %v13556_v18 = vld [vmem:[%s14303_s25 + $0xb74] sm:$0xf0] }
  0x9e   : > { %7015 = vmatpush.bf16.msra.mxu2 %v10230_v28  ;;  %6981 = vmatmul.bf16.vlgmr.msrb.gmra.mxu3 %v14658_v48  ;;  %v10198_v28 = vor.u32 %v13484_v22, %v10197_v21  ;;  %v13572_v21 = vld [vmem:[%s14303_s25 + $0xbf4] sm:$0xf0]  ;;  %v8829_v22 = vld [vmem:[%s14398_s6 + $0x40] sm:$0xf]  ;;  %v10486_v44 = vor.u32 %v13556_v18, %v10485_v17  ;;  %v13518_v17 = vld [vmem:[%s14303_s25 + $0xa44] sm:$0xf0] }
  0x9f   : > { %7029 = vmatpush.bf16.msra.mxu3 %v10294_v32  ;;  %v10262_v32 = vor.u32 %v13500_v25, %v10261_v24  ;;  %v13165_v24 = vld [vmem:[%s14398_s6 + $0x23c] sm:$0xf0]  ;;  %v10110_v25 = vor.u32 %v13462_v2, %v10109_v1  ;;  %v10341_v1 = vld [vmem:[%s14303_s25 + $0xa50] sm:$0xf]  ;;  %v13520_v2 = vld [vmem:[%s14303_s25 + $0xa54] sm:$0xf0] }
  0xa0   : > { %6988 = vmatpush.bf16.msra.mxu0 %v10094_v50  ;;  %v10062_v50 = vor.u32 %v13450_v30, %v10061_v29  ;;  %v13133_v29 = vld [vmem:[%s14398_s6 + $0x44] sm:$0xf]  ;;  %v10238_v30 = vor.u32 %v13494_v8, %v10237_v7  ;;  %v13552_v7 = vld [vmem:[%s14303_s25 + $0xb54] sm:$0xf0]  ;;  %v10533_v8 = vld [vmem:[%s14303_s25 + $0xbd0] sm:$0xf] }
  0xa1   : > { %7002 = vmatpush.bf16.msra.mxu1 %v10158_v51  ;;  %v10053_v51 = vld [vmem:[%s14303_s25 + $0x810] sm:$0xf]  ;;  %v10397_v18 = vld [vmem:[%s14303_s25 + $0xac0] sm:$0xf]  ;;  %v13842_v48 = vld [vmem:[%s14303_s25 + $0x1464] sm:$0xf0] }
  0xa2   : > { %7016 = vmatpush.bf16.msra.mxu2 %v10222_v52  ;;  %v10126_v52 = vor.u32 %v13466_v35, %v10125_v31  ;;  %v13134_v35 = vld [vmem:[%s14398_s6 + $0x4c] sm:$0xf] }
  0xa3   : > { %7030 = vmatpush.bf16.msra.mxu3 %v10286_v56  ;;  %v13464_v56 = vld [vmem:[%s14303_s25 + $0x894] sm:$0xf0] }
  0xa4   : > { %6989 = vmatpush.bf16.msra.mxu0 %v10086_v62  ;;  %v10045_v62 = vld [vmem:[%s14303_s25 + $0x800] sm:$0xf]  ;;  %v10118_v5 = vor.u32 %v13464_v56, %v10117_v55  ;;  %v13554_v56 = vld [vmem:[%s14303_s25 + $0xb64] sm:$0xf0] }
  0xa5   : > { %7003 = vmatpush.bf16.msra.mxu1 %v10150_v63  ;;  %v13446_v63 = vld [vmem:[%s14303_s25 + $0x804] sm:$0xf0]  ;;  %v10477_v55 = vld [vmem:[%s14303_s25 + $0xb60] sm:$0xf] }
  0xa6   : > { %7017 = vmatpush.bf16.msra.mxu2 %v10214_v0  ;;  %v10054_v0 = vor.u32 %v13448_v54, %v10053_v51  ;;  %v10046_v20 = vor.u32 %v13446_v63, %v10045_v62  ;;  %v10413_v51 = vld [vmem:[%s14303_s25 + $0xae0] sm:$0xf]  ;;  %v13538_v54 = vld [vmem:[%s14303_s25 + $0xae4] sm:$0xf0] }
  0xa7   : > { %7031 = vmatpush.bf16.msra.mxu3 %v10278_v4  ;;  %v13478_v4 = vld [vmem:[%s14303_s25 + $0x904] sm:$0xf0]  ;;  %v10414_v63 = vor.u32 %v13538_v54, %v10413_v51 }
  0xa8   : > { %6990 = vmatpush.bf16.msra.mxu0 %v10078_v11  ;;  %v10246_v11 = vor.u32 %v13496_v61, %v10245_v60  ;;  %v13570_v60 = vld [vmem:[%s14303_s25 + $0xbe4] sm:$0xf0]  ;;  %v14742_v61 = vor.u32 %v13134_v35, %v8839_v36  ;;  %v13532_v35 = vld [vmem:[%s14303_s25 + $0xab4] sm:$0xf0]  ;;  %v10453_v36 = vld [vmem:[%s14303_s25 + $0xb30] sm:$0xf] }
  0xa9   : > { %7004 = vmatpush.bf16.msra.mxu1 %v10142_v12  ;;  %v13524_v12 = vld [vmem:[%s14303_s25 + $0xa74] sm:$0xf0] }
  0xaa   : > { %7018 = vmatpush.bf16.msra.mxu2 %v10206_v13  ;;  %v10421_v13 = vld [vmem:[%s14303_s25 + $0xaf0] sm:$0xf]  ;;  %v10358_v31 = vor.u32 %v13524_v12, %v10357_v10  ;;  %17209 = vst [vmem:[#allocation19_spill] sm:$0xff] %v14742_v61  ;;  %v13568_v10 = vld [vmem:[%s14303_s25 + $0xbd4] sm:$0xf0] }
  0xab   : > { %7032 = vmatpush.bf16.msra.mxu3 %v10270_v19  ;;  %v10549_v19 = vld [vmem:[%s14303_s25 + $0xbf0] sm:$0xf]  ;;  %v10422_v39 = vor.u32 %v13540_v14, %v10421_v13  ;;  %v10333_v14 = vld [vmem:[%s14303_s25 + $0xa40] sm:$0xf] }
  0xac   : > { %6991 = vmatpush.bf16.msra.mxu0 %v10070_v26  ;;  %v10174_v26 = vor.u32 %v13478_v4, %v10173_v3  ;;  %v10405_v3 = vld [vmem:[%s14303_s25 + $0xad0] sm:$0xf]  ;;  %v10542_v4 = vor.u32 %v13570_v60, %v10541_v59  ;;  %v13514_v59 = vld [vmem:[%s14303_s25 + $0xa24] sm:$0xf0]  ;;  %v10381_v60 = vld [vmem:[%s14303_s25 + $0xaa0] sm:$0xf] }
  0xad   : > { %7005 = vmatpush.bf16.msra.mxu1 %v10134_v27  ;;  %v8837_v27 = vld [vmem:[%s14398_s6 + $0x48] sm:$0xf] }
  0xae   : > { %7019 = vmatpush.bf16.msra.mxu2 %v10198_v28  ;;  %v13166_v28 = vld [vmem:[%s14398_s6 + $0x244] sm:$0xf0] }
  0xaf   : > { %7033 = vmatpush.bf16.msra.mxu3 %v10262_v32  ;;  %v8831_v32 = vld [vmem:[%s14398_s6 + $0x240] sm:$0xf0] }
  0xb0   : > { %6992 = vmatpush.bf16.msra.mxu0 %v10062_v50  ;;  %v13522_v50 = vld [vmem:[%s14303_s25 + $0xa64] sm:$0xf0]  ;;  %v14738_v58 = vor.u32 %v13133_v29, %v8831_v32  ;;  %v10325_v29 = vld [vmem:[%s14303_s25 + $0xa30] sm:$0xf] }
  0xb1   : > { %7006 = vmatpush.bf16.msra.mxu1 %v10126_v52  ;;  %v10550_v52 = vor.u32 %v13572_v21, %v10549_v19  ;;  %v10350_v62 = vor.u32 %v13522_v50, %v10349_v47  ;;  %v10534_v19 = vor.u32 %v13568_v10, %v10533_v8  ;;  %v10461_v21 = vld [vmem:[%s14303_s25 + $0xb40] sm:$0xf]  ;;  %v13564_v47 = vld [vmem:[%s14303_s25 + $0xbb4] sm:$0xf0] }
  0xb2   : > { %7020 = vmatpush.bf16.msra.mxu2 %v10190_v53  ;;  %v14731_v53 = vor.u32 %v13165_v24, %v8829_v22  ;;  %17208 = vst [vmem:[#allocation18_spill] sm:$0xff] %v14738_v58  ;;  %v13550_v22 = vld [vmem:[%s14303_s25 + $0xb44] sm:$0xf0]  ;;  %v10525_v24 = vld [vmem:[%s14303_s25 + $0xbc0] sm:$0xf] }
  0xb3   : > { %7034 = vmatpush.bf16.msra.mxu3 %v10254_v57  ;;  %v14736_v57 = vor.u32 %v13166_v28, %v8837_v27  ;;  %v10462_v28 = vor.u32 %v13550_v22, %v10461_v21  ;;  %v13512_v10 = vld [vmem:[%s14303_s25 + $0xa14] sm:$0xf0]  ;;  %v10301_v21 = vld [vmem:[%s14303_s25 + $0xa00] sm:$0xf]  ;;  %v13510_v22 = vld [vmem:[%s14303_s25 + $0xa04] sm:$0xf0] }
  0xb4   : > { %6993 = vmatpush.bf16.msra.mxu0 %v10054_v0  ;;  %17206 = vst [vmem:[#allocation16_spill] sm:$0xff] %v14731_v53  ;;  %v10478_v0 = vor.u32 %v13554_v56, %v10477_v55  ;;  %v10317_v56 = vld [vmem:[%s14303_s25 + $0xa20] sm:$0xf] }
  0xb5   : > { %7007 = vmatpush.bf16.msra.mxu1 %v10118_v5  ;;  %17207 = vst [vmem:[#allocation17_spill] sm:$0xff] %v14736_v57  ;;  %v13536_v5 = vld [vmem:[%s14303_s25 + $0xad4] sm:$0xf0] }
  0xb6   : > { %7021 = vmatpush.bf16.msra.mxu2 %v10182_v6  ;;  %v10469_v6 = vld [vmem:[%s14303_s25 + $0xb50] sm:$0xf]  ;;  %v10406_v12 = vor.u32 %v13536_v5, %v10405_v3  ;;  %v10509_v3 = vld [vmem:[%s14303_s25 + $0xba0] sm:$0xf]  ;;  %v10318_v5 = vor.u32 %v13514_v59, %v10317_v56  ;;  %v10302_v59 = vor.u32 %v13510_v22, %v10301_v21  ;;  %v13602_v21 = vld [vmem:[%s14303_s25 + $0xce4] sm:$0xf0] }
  0xb7   : > { %7035 = vmatpush.bf16.msra.mxu3 %v10246_v11  ;;  %v10342_v11 = vor.u32 %v13520_v2, %v10341_v1  ;;  %v10470_v13 = vor.u32 %v13552_v7, %v10469_v6  ;;  %v10445_v1 = vld [vmem:[%s14303_s25 + $0xb20] sm:$0xf]  ;;  %v13546_v2 = vld [vmem:[%s14303_s25 + $0xb24] sm:$0xf0]  ;;  %v10309_v6 = vld [vmem:[%s14303_s25 + $0xa10] sm:$0xf] }
  0xb8   : > { %6994 = vmatpush.bf16.msra.mxu0 %v10046_v20  ;;  %v13534_v20 = vld [vmem:[%s14303_s25 + $0xac4] sm:$0xf0]  ;;  %v10446_v8 = vor.u32 %v13546_v2, %v10445_v1  ;;  %v10805_v56 = vld [vmem:[%s14303_s25 + $0xdf0] sm:$0xf]  ;;  %v8853_v2 = vld [vmem:[%s14398_s6 + $0x58] sm:$0xf] }
  0xb9   : > { %7008 = vmatpush.bf16.msra.mxu1 %v10110_v25  ;;  %v13566_v25 = vld [vmem:[%s14303_s25 + $0xbc4] sm:$0xf0]  ;;  %v10398_v27 = vor.u32 %v13534_v20, %v10397_v18  ;;  %v10501_v18 = vld [vmem:[%s14303_s25 + $0xb90] sm:$0xf]  ;;  %v13560_v20 = vld [vmem:[%s14303_s25 + $0xb94] sm:$0xf0] }
  0xba   : > { %7022 = vmatpush.bf16.msra.mxu2 %v10174_v26  ;;  %v10334_v26 = vor.u32 %v13518_v17, %v10333_v14  ;;  %v10526_v32 = vor.u32 %v13566_v25, %v10525_v24  ;;  %v6772_v51 = vpop.f32.mrf.mxu0  ;;  %v10437_v14 = vld [vmem:[%s14303_s25 + $0xb10] sm:$0xf]  ;;  %v13544_v17 = vld [vmem:[%s14303_s25 + $0xb14] sm:$0xf0]  ;;  %v10310_v25 = vor.u32 %v13512_v10, %v10309_v6  ;;  %v8855_v10 = vld [vmem:[%s14398_s6 + $0x258] sm:$0xf0] }
  0xbb   : > { %7036 = vmatpush.bf16.msra.mxu3 %v10238_v30  ;;  %6995 = vmatmul.bf16.vlgmr.msra.gmra.mxu0 %v14731_v53  ;;  %v13516_v30 = vld [vmem:[%s14303_s25 + $0xa34] sm:$0xf0]  ;;  %v10733_v22 = vld [vmem:[%s14303_s25 + $0xd60] sm:$0xf] }
  0xbc   : > { %7043 = vmatpush.bf16.msrb.mxu0 %v10358_v31  ;;  %7009 = vmatmul.bf16.vlgmr.msra.gmra.mxu1 %v14738_v58  ;;  %v10389_v31 = vld [vmem:[%s14303_s25 + $0xab0] sm:$0xf]  ;;  %v10326_v50 = vor.u32 %v13516_v30, %v10325_v29  ;;  %v13542_v29 = vld [vmem:[%s14303_s25 + $0xb04] sm:$0xf0]  ;;  %v11501_v58 = vld [vmem:[%s14303_s25 + $0x1360] sm:$0xf] }
  0xbd   : > { %7057 = vmatpush.bf16.msrb.mxu1 %v10422_v39  ;;  %7023 = vmatmul.bf16.vlgmr.msra.gmra.mxu2 %v14736_v57  ;;  %v13548_v39 = vld [vmem:[%s14303_s25 + $0xb34] sm:$0xf0]  ;;  %v10390_v54 = vor.u32 %v13532_v35, %v10389_v31  ;;  %v10493_v35 = vld [vmem:[%s14303_s25 + $0xb80] sm:$0xf] }
  0xbe   : > { %7071 = vmatpush.bf16.msrb.mxu2 %v10486_v44  ;;  %7037 = vmatmul.bf16.vlgmr.msra.gmra.mxu3 %v14742_v61  ;;  %v10517_v44 = vld [vmem:[%s14303_s25 + $0xbb0] sm:$0xf]  ;;  %v10454_v55 = vor.u32 %v13548_v39, %v10453_v36  ;;  %v13558_v36 = vld [vmem:[%s14303_s25 + $0xb84] sm:$0xf0] }
  0xbf   : > { %7085 = vmatpush.bf16.msrb.mxu3 %v10550_v52  ;;  %v6786_v52 = vpop.f32.mrf.mxu1  ;;  %v10613_v39 = vld [vmem:[%s14303_s25 + $0xc70] sm:$0xf]  ;;  %v13778_v61 = vld [vmem:[%s14303_s25 + $0x1264] sm:$0xf0] }
  0xc0   : > { %7044 = vmatpush.bf16.msrb.mxu0 %v10350_v62  ;;  %v6787_v62 = vadd.f32 %v6786_v52, %v6772_v51  ;;  %v10677_v51 = vld [vmem:[%s14303_s25 + $0xcf0] sm:$0xf]  ;;  %v13604_v52 = vld [vmem:[%s14303_s25 + $0xcf4] sm:$0xf0] }
  0xc1   : > { %7058 = vmatpush.bf16.msrb.mxu1 %v10414_v63  ;;  %v10518_v63 = vor.u32 %v13564_v47, %v10517_v44  ;;  %v6814_v30 = vpop.f32.mrf.mxu3  ;;  %v10502_v47 = vor.u32 %v13560_v20, %v10501_v18  ;;  %v10669_v18 = vld [vmem:[%s14303_s25 + $0xce0] sm:$0xf] }
  0xc2   : > { %7072 = vmatpush.bf16.msrb.mxu2 %v10478_v0  ;;  %v13530_v0 = vld [vmem:[%s14303_s25 + $0xaa4] sm:$0xf0] }
  0xc3   : > { %7086 = vmatpush.bf16.msrb.mxu3 %v10542_v4  ;;  %v13562_v4 = vld [vmem:[%s14303_s25 + $0xba4] sm:$0xf0]  ;;  %v10382_v7 = vor.u32 %v13530_v0, %v10381_v60  ;;  %v13636_v60 = vld [vmem:[%s14303_s25 + $0xdf4] sm:$0xf0] }
  0xc4   : > { %7045 = vmatpush.bf16.msrb.mxu0 %v10342_v11  ;;  %v10373_v11 = vld [vmem:[%s14303_s25 + $0xa90] sm:$0xf] }
  0xc5   : > { %7059 = vmatpush.bf16.msrb.mxu1 %v10406_v12  ;;  %v13528_v12 = vld [vmem:[%s14303_s25 + $0xa94] sm:$0xf0] }
  0xc6   : > { %7073 = vmatpush.bf16.msrb.mxu2 %v10470_v13  ;;  %v10510_v13 = vor.u32 %v13562_v4, %v10509_v3  ;;  %v10374_v31 = vor.u32 %v13528_v12, %v10373_v11  ;;  %v13168_v3 = vld [vmem:[%s14398_s6 + $0x254] sm:$0xf0]  ;;  %v13135_v4 = vld [vmem:[%s14398_s6 + $0x54] sm:$0xf]  ;;  %v10678_v11 = vor.u32 %v13604_v52, %v10677_v51  ;;  %v10725_v52 = vld [vmem:[%s14303_s25 + $0xd50] sm:$0xf] }
  0xc7   : > { %7087 = vmatpush.bf16.msrb.mxu3 %v10534_v19  ;;  %v6800_v19 = vpop.f32.mrf.mxu2  ;;  %v13600_v51 = vld [vmem:[%s14303_s25 + $0xcd4] sm:$0xf0] }
  0xc8   : > { %7046 = vmatpush.bf16.msrb.mxu0 %v10334_v26  ;;  %v6801_v24 = vadd.f32 %v6800_v19, %v6787_v62  ;;  %v10365_v26 = vld [vmem:[%s14303_s25 + $0xa80] sm:$0xf]  ;;  %v8845_v62 = vld [vmem:[%s14398_s6 + $0x50] sm:$0xf]  ;;  %v10806_v19 = vor.u32 %v13636_v60, %v10805_v56  ;;  %v13632_v56 = vld [vmem:[%s14303_s25 + $0xdd4] sm:$0xf0] }
  0xc9   : > { %7060 = vmatpush.bf16.msrb.mxu1 %v10398_v27  ;;  %v13526_v27 = vld [vmem:[%s14303_s25 + $0xa84] sm:$0xf0] }
  0xca   : > { %7074 = vmatpush.bf16.msrb.mxu2 %v10462_v28  ;;  %v10429_v28 = vld [vmem:[%s14303_s25 + $0xb00] sm:$0xf]  ;;  %v14797_v44 = vadd.f32 %v6814_v30, %v6801_v24  ;;  %v10366_v0 = vor.u32 %v13526_v27, %v10365_v26  ;;  %v13618_v24 = vld [vmem:[%s14303_s25 + $0xd64] sm:$0xf0] }
  0xcb   : > { %7088 = vmatpush.bf16.msrb.mxu3 %v10526_v32  ;;  %v10438_v32 = vor.u32 %v13544_v17, %v10437_v14  ;;  %v10430_v1 = vor.u32 %v13542_v29, %v10429_v28  ;;  %v10605_v14 = vld [vmem:[%s14303_s25 + $0xc60] sm:$0xf]  ;;  %v13586_v17 = vld [vmem:[%s14303_s25 + $0xc64] sm:$0xf0]  ;;  %v14830_v29 = vpop.f32.mrf.mxu1 }
  0xcc   : > { %7047 = vmatpush.bf16.msrb.mxu0 %v10326_v50  ;;  %v13588_v50 = vld [vmem:[%s14303_s25 + $0xc74] sm:$0xf0]  ;;  %v10797_v27 = vld [vmem:[%s14303_s25 + $0xde0] sm:$0xf]  ;;  %v13634_v28 = vld [vmem:[%s14303_s25 + $0xde4] sm:$0xf0] }
  0xcd   : > { %7061 = vmatpush.bf16.msrb.mxu1 %v10390_v54  ;;  %v10741_v54 = vld [vmem:[%s14303_s25 + $0xd70] sm:$0xf]  ;;  %v10614_v6 = vor.u32 %v13588_v50, %v10613_v39  ;;  %v13584_v39 = vld [vmem:[%s14303_s25 + $0xc54] sm:$0xf0]  ;;  %v10798_v50 = vor.u32 %v13634_v28, %v10797_v27 }
  0xce   : > { %7075 = vmatpush.bf16.msrb.mxu2 %v10454_v55  ;;  %v13620_v55 = vld [vmem:[%s14303_s25 + $0xd74] sm:$0xf0] }
  0xcf   : > { %7089 = vmatpush.bf16.msrb.mxu3 %v10518_v63  ;;  %v13167_v63 = vld [vmem:[%s14398_s6 + $0x24c] sm:$0xf0]  ;;  %v10742_v12 = vor.u32 %v13620_v55, %v10741_v54  ;;  %v13616_v54 = vld [vmem:[%s14303_s25 + $0xd54] sm:$0xf0]  ;;  %v14846_v60 = vpop.f32.mrf.mxu2 }
  0xd0   : > { %7048 = vmatpush.bf16.msrb.mxu0 %v10318_v5  ;;  %v10494_v5 = vor.u32 %v13558_v36, %v10493_v35  ;;  %v14819_v20 = vor.u32 %v13167_v63, %v8845_v62  ;;  %v10734_v35 = vor.u32 %v13618_v24, %v10733_v22  ;;  %v10597_v36 = vld [vmem:[%s14303_s25 + $0xc50] sm:$0xf]  ;;  %v10726_v63 = vor.u32 %v13616_v54, %v10725_v52  ;;  %v13580_v22 = vld [vmem:[%s14303_s25 + $0xc34] sm:$0xf0]  ;;  %v13578_v52 = vld [vmem:[%s14303_s25 + $0xc24] sm:$0xf0] }
  0xd1   : > { %7062 = vmatpush.bf16.msrb.mxu1 %v10382_v7  ;;  %v8847_v7 = vld [vmem:[%s14398_s6 + $0x250] sm:$0xf0]  ;;  %v10789_v55 = vld [vmem:[%s14303_s25 + $0xdd0] sm:$0xf]  ;;  %v10637_v54 = vld [vmem:[%s14303_s25 + $0xca0] sm:$0xf] }
  0xd2   : > { %7076 = vmatpush.bf16.msrb.mxu2 %v10446_v8  ;;  %v13136_v8 = vld [vmem:[%s14398_s6 + $0x5c] sm:$0xf]  ;;  %17210 = vst [vmem:[#allocation20_spill] sm:$0xff] %v14819_v20  ;;  %v14826_v26 = vor.u32 %v13135_v4, %v8847_v7  ;;  %v14851_v4 = vpop.f32.mrf.mxu3  ;;  %v13614_v7 = vld [vmem:[%s14303_s25 + $0xd44] sm:$0xf0] }
  0xd3   : > { %7090 = vmatpush.bf16.msrb.mxu3 %v10510_v13  ;;  %v14814_v13 = vpop.f32.mrf.mxu0  ;;  %v14832_v30 = vor.u32 %v13136_v8, %v8855_v10  ;;  %v10781_v10 = vld [vmem:[%s14303_s25 + $0xdc0] sm:$0xf]  ;;  %v10645_v24 = vld [vmem:[%s14303_s25 + $0xcb0] sm:$0xf] }
  0xd4   : > { %7049 = vmatpush.bf16.msrb.mxu0 %v10310_v25  ;;  %v14824_v25 = vor.u32 %v13168_v3, %v8853_v2  ;;  %17212 = vst [vmem:[#allocation22_spill] sm:$0xff] %v14826_v26  ;;  %v10653_v2 = vld [vmem:[%s14303_s25 + $0xcc0] sm:$0xf]  ;;  %v10790_v3 = vor.u32 %v13632_v56, %v10789_v55 }
  0xd5   : > { %7063 = vmatpush.bf16.msrb.mxu1 %v10374_v31  ;;  %17213 = vst [vmem:[#allocation23_spill] sm:$0xff] %v14832_v30  ;;  %v10606_v31 = vor.u32 %v13586_v17, %v10605_v14 }
  0xd6   : > { %7077 = vmatpush.bf16.msrb.mxu2 %v10438_v32  ;;  %17211 = vst [vmem:[#allocation21_spill] sm:$0xff] %v14824_v25  ;;  %v10670_v32 = vor.u32 %v13602_v21, %v10669_v18  ;;  %v10581_v21 = vld [vmem:[%s14303_s25 + $0xc30] sm:$0xf] }
  0xd7   : > { %7091 = vmatpush.bf16.msrb.mxu3 %v10502_v47  ;;  %v10661_v47 = vld [vmem:[%s14303_s25 + $0xcd0] sm:$0xf] }
  0xd8   : > { %7050 = vmatpush.bf16.msrb.mxu0 %v10302_v59  ;;  %v10598_v59 = vor.u32 %v13584_v39, %v10597_v36  ;;  %v10662_v62 = vor.u32 %v13600_v51, %v10661_v47  ;;  %v13628_v36 = vld [vmem:[%s14303_s25 + $0xdb4] sm:$0xf0]  ;;  %v10582_v39 = vor.u32 %v13580_v22, %v10581_v21  ;;  %v10573_v51 = vld [vmem:[%s14303_s25 + $0xc20] sm:$0xf]  ;;  %v10757_v21 = vld [vmem:[%s14303_s25 + $0xd90] sm:$0xf] }
  0xd9   : > { %7064 = vmatpush.bf16.msrb.mxu1 %v10366_v0  ;;  %v10589_v0 = vld [vmem:[%s14303_s25 + $0xc40] sm:$0xf]  ;;  %v13624_v22 = vld [vmem:[%s14303_s25 + $0xd94] sm:$0xf0] }
  0xda   : > { %7078 = vmatpush.bf16.msrb.mxu2 %v10430_v1  ;;  %v13582_v1 = vld [vmem:[%s14303_s25 + $0xc44] sm:$0xf0] }
  0xdb   : > { %7092 = vmatpush.bf16.msrb.mxu3 %v10494_v5  ;;  %7051 = vmatmul.bf16.vlgmr.msrb.gmra.mxu0 %v14819_v20  ;;  %v13598_v5 = vld [vmem:[%s14303_s25 + $0xcc4] sm:$0xf0]  ;;  %v6828_v8 = vpop.f32.mrf.mxu0  ;;  %v10590_v14 = vor.u32 %v13582_v1, %v10589_v0  ;;  %v10765_v1 = vld [vmem:[%s14303_s25 + $0xda0] sm:$0xf] }
  0xdc   : > { %7099 = vmatpush.bf16.msra.mxu0 %v10614_v6  ;;  %7065 = vmatmul.bf16.vlgmr.msrb.gmra.mxu1 %v14826_v26  ;;  %v10717_v6 = vld [vmem:[%s14303_s25 + $0xd40] sm:$0xf]  ;;  %v10654_v17 = vor.u32 %v13598_v5, %v10653_v2  ;;  %v13626_v2 = vld [vmem:[%s14303_s25 + $0xda4] sm:$0xf0]  ;;  %v10574_v5 = vor.u32 %v13578_v52, %v10573_v51  ;;  %v10869_v51 = vld [vmem:[%s14303_s25 + $0xe70] sm:$0xf]  ;;  %v10758_v52 = vor.u32 %v13624_v22, %v10757_v21 }
  0xdd   : > { %7113 = vmatpush.bf16.msra.mxu1 %v10678_v11  ;;  %7079 = vmatmul.bf16.vlgmr.msrb.gmra.mxu2 %v14824_v25  ;;  %v13630_v11 = vld [vmem:[%s14303_s25 + $0xdc4] sm:$0xf0]  ;;  %v10718_v18 = vor.u32 %v13614_v7, %v10717_v6  ;;  %v10565_v6 = vld [vmem:[%s14303_s25 + $0xc10] sm:$0xf]  ;;  %v11245_v26 = vld [vmem:[%s14303_s25 + $0x1160] sm:$0xf] }
  0xde   : > { %7127 = vmatpush.bf16.msra.mxu2 %v10742_v12  ;;  %7093 = vmatmul.bf16.vlgmr.msrb.gmra.mxu3 %v14832_v30  ;;  %v6829_v12 = vadd.f32 %v6828_v8, %v14797_v44  ;;  %v10782_v27 = vor.u32 %v13630_v11, %v10781_v10  ;;  %v13612_v44 = vld [vmem:[%s14303_s25 + $0xd34] sm:$0xf0]  ;;  %v13714_v30 = vld [vmem:[%s14303_s25 + $0x1064] sm:$0xf0] }
  0xdf   : > { %7141 = vmatpush.bf16.msra.mxu3 %v10806_v19  ;;  %v6842_v19 = vpop.f32.mrf.mxu1  ;;  %v13576_v11 = vld [vmem:[%s14303_s25 + $0xc14] sm:$0xf0] }
  0xe0   : > { %7100 = vmatpush.bf16.msra.mxu0 %v10606_v31  ;;  %v6843_v28 = vadd.f32 %v6842_v19, %v6829_v12  ;;  %v13596_v31 = vld [vmem:[%s14303_s25 + $0xcb4] sm:$0xf0]  ;;  %v6856_v56 = vpop.f32.mrf.mxu2  ;;  %v10629_v12 = vld [vmem:[%s14303_s25 + $0xc90] sm:$0xf] }
  0xe1   : > { %7114 = vmatpush.bf16.msra.mxu1 %v10670_v32  ;;  %v10709_v32 = vld [vmem:[%s14303_s25 + $0xd30] sm:$0xf]  ;;  %v10646_v47 = vor.u32 %v13596_v31, %v10645_v24  ;;  %v13608_v19 = vld [vmem:[%s14303_s25 + $0xd14] sm:$0xf0]  ;;  %v10557_v24 = vld [vmem:[%s14303_s25 + $0xc00] sm:$0xf] }
  0xe2   : > { %7128 = vmatpush.bf16.msra.mxu2 %v10734_v35  ;;  %v10773_v35 = vld [vmem:[%s14303_s25 + $0xdb0] sm:$0xf]  ;;  %v6857_v0 = vadd.f32 %v6856_v56, %v6843_v28  ;;  %v10566_v28 = vor.u32 %v13576_v11, %v10565_v6  ;;  %v10621_v31 = vld [vmem:[%s14303_s25 + $0xc80] sm:$0xf]  ;;  %v13668_v56 = vld [vmem:[%s14303_s25 + $0xef4] sm:$0xf0] }
  0xe3   : > { %7142 = vmatpush.bf16.msra.mxu3 %v10798_v50  ;;  %v10710_v50 = vor.u32 %v13612_v44, %v10709_v32  ;;  %v10774_v55 = vor.u32 %v13628_v36, %v10773_v35  ;;  %v13590_v32 = vld [vmem:[%s14303_s25 + $0xc84] sm:$0xf0]  ;;  %v10685_v44 = vld [vmem:[%s14303_s25 + $0xd00] sm:$0xf]  ;;  %v13137_v11 = vld [vmem:[%s14398_s6 + $0x64] sm:$0xf] }
  0xe4   : > { %7101 = vmatpush.bf16.msra.mxu0 %v10598_v59  ;;  %v13594_v59 = vld [vmem:[%s14303_s25 + $0xca4] sm:$0xf0] }
  0xe5   : > { %7115 = vmatpush.bf16.msra.mxu1 %v10662_v62  ;;  %v10701_v62 = vld [vmem:[%s14303_s25 + $0xd20] sm:$0xf]  ;;  %v10638_v8 = vor.u32 %v13594_v59, %v10637_v54  ;;  %v13606_v35 = vld [vmem:[%s14303_s25 + $0xd04] sm:$0xf0]  ;;  %v13652_v54 = vld [vmem:[%s14303_s25 + $0xe74] sm:$0xf0] }
  0xe6   : > { %7129 = vmatpush.bf16.msra.mxu2 %v10726_v63  ;;  %v13610_v63 = vld [vmem:[%s14303_s25 + $0xd24] sm:$0xf0]  ;;  %v10997_v59 = vld [vmem:[%s14303_s25 + $0xf70] sm:$0xf]  ;;  %v10686_v6 = vor.u32 %v13606_v35, %v10685_v44  ;;  %v10989_v35 = vld [vmem:[%s14303_s25 + $0xf60] sm:$0xf] }
  0xe7   : > { %7143 = vmatpush.bf16.msra.mxu3 %v10790_v3  ;;  %v6870_v3 = vpop.f32.mrf.mxu3  ;;  %v10702_v10 = vor.u32 %v13610_v63, %v10701_v62  ;;  %v13684_v62 = vld [vmem:[%s14303_s25 + $0xf74] sm:$0xf0]  ;;  %v11061_v63 = vld [vmem:[%s14303_s25 + $0xff0] sm:$0xf]  ;;  %v13666_v44 = vld [vmem:[%s14303_s25 + $0xee4] sm:$0xf0] }
  0xe8   : > { %7102 = vmatpush.bf16.msra.mxu0 %v10590_v14  ;;  %v14876_v7 = vadd.f32 %v6870_v3, %v6857_v0  ;;  %v13592_v14 = vld [vmem:[%s14303_s25 + $0xc94] sm:$0xf0]  ;;  %v13169_v3 = vld [vmem:[%s14398_s6 + $0x25c] sm:$0xf0]  ;;  %v10998_v22 = vor.u32 %v13684_v62, %v10997_v59 }
  0xe9   : > { %7116 = vmatpush.bf16.msra.mxu1 %v10654_v17  ;;  %v10766_v17 = vor.u32 %v13626_v2, %v10765_v1  ;;  %v10630_v36 = vor.u32 %v13592_v14, %v10629_v12  ;;  %v13700_v1 = vld [vmem:[%s14303_s25 + $0xff4] sm:$0xf0]  ;;  %v8861_v2 = vld [vmem:[%s14398_s6 + $0x60] sm:$0xf]  ;;  %v10870_v14 = vor.u32 %v13652_v54, %v10869_v51  ;;  %v14925_v54 = vpop.f32.mrf.mxu1 }
  0xea   : > { %7130 = vmatpush.bf16.msra.mxu2 %v10718_v18  ;;  %v10693_v18 = vld [vmem:[%s14303_s25 + $0xd10] sm:$0xf]  ;;  %v11053_v51 = vld [vmem:[%s14303_s25 + $0xfe0] sm:$0xf] }
  0xeb   : > { %7144 = vmatpush.bf16.msra.mxu3 %v10782_v27  ;;  %v13574_v27 = vld [vmem:[%s14303_s25 + $0xc04] sm:$0xf0] }
  0xec   : > { %7103 = vmatpush.bf16.msra.mxu0 %v10582_v39  ;;  %v10694_v39 = vor.u32 %v13608_v19, %v10693_v18  ;;  %v10558_v0 = vor.u32 %v13574_v27, %v10557_v24  ;;  %v13138_v18 = vld [vmem:[%s14398_s6 + $0x6c] sm:$0xf]  ;;  %v10861_v24 = vld [vmem:[%s14303_s25 + $0xe60] sm:$0xf]  ;;  %v13650_v27 = vld [vmem:[%s14303_s25 + $0xe64] sm:$0xf0] }
  0xed   : > { %7117 = vmatpush.bf16.msra.mxu1 %v10646_v47  ;;  %v10749_v47 = vld [vmem:[%s14303_s25 + $0xd80] sm:$0xf]  ;;  %v8871_v19 = vld [vmem:[%s14398_s6 + $0x268] sm:$0xf0] }
  0xee   : > { %7131 = vmatpush.bf16.msra.mxu2 %v10710_v50  ;;  %v13622_v50 = vld [vmem:[%s14303_s25 + $0xd84] sm:$0xf0] }
  0xef   : > { %7145 = vmatpush.bf16.msra.mxu3 %v10774_v55  ;;  %v10933_v55 = vld [vmem:[%s14303_s25 + $0xef0] sm:$0xf]  ;;  %v10750_v12 = vor.u32 %v13622_v50, %v10749_v47 }
  0xf0   : > { %7104 = vmatpush.bf16.msra.mxu0 %v10574_v5  ;;  %v10622_v5 = vor.u32 %v13590_v32, %v10621_v31  ;;  %v10934_v21 = vor.u32 %v13668_v56, %v10933_v55  ;;  %v11062_v31 = vor.u32 %v13700_v1, %v11061_v63  ;;  %v14912_v32 = vor.u32 %v13169_v3, %v8861_v2  ;;  %v10853_v63 = vld [vmem:[%s14303_s25 + $0xe50] sm:$0xf]  ;;  %v13664_v3 = vld [vmem:[%s14303_s25 + $0xed4] sm:$0xf0] }
  0xf1   : > { %7118 = vmatpush.bf16.msra.mxu1 %v10638_v8  ;;  %v8869_v8 = vld [vmem:[%s14398_s6 + $0x68] sm:$0xf]  ;;  %v14927_v55 = vor.u32 %v13138_v18, %v8871_v19  ;;  %v10862_v56 = vor.u32 %v13650_v27, %v10861_v24  ;;  %v10917_v1 = vld [vmem:[%s14303_s25 + $0xed0] sm:$0xf]  ;;  %v10909_v19 = vld [vmem:[%s14303_s25 + $0xec0] sm:$0xf] }
  0xf2   : > { %7132 = vmatpush.bf16.msra.mxu2 %v10702_v10  ;;  %v13170_v10 = vld [vmem:[%s14398_s6 + $0x264] sm:$0xf0]  ;;  %17214 = vst [vmem:[#allocation24_spill] sm:$0xff] %v14912_v32  ;;  %v10973_v27 = vld [vmem:[%s14303_s25 + $0xf40] sm:$0xf] }
  0xf3   : > { %7146 = vmatpush.bf16.msra.mxu3 %v10766_v17  ;;  %v8863_v17 = vld [vmem:[%s14398_s6 + $0x260] sm:$0xf0]  ;;  %v14919_v47 = vor.u32 %v13170_v10, %v8869_v8  ;;  %17217 = vst [vmem:[#allocation27_spill] sm:$0xff] %v14927_v55  ;;  %v11045_v8 = vld [vmem:[%s14303_s25 + $0xfd0] sm:$0xf] }
  0xf4   : > { %7105 = vmatpush.bf16.msra.mxu0 %v10566_v28  ;;  %v10925_v28 = vld [vmem:[%s14303_s25 + $0xee0] sm:$0xf]  ;;  %v14921_v50 = vor.u32 %v13137_v11, %v8863_v17  ;;  %v13696_v10 = vld [vmem:[%s14303_s25 + $0xfd4] sm:$0xf0]  ;;  %v13646_v18 = vld [vmem:[%s14303_s25 + $0xe44] sm:$0xf0] }
  0xf5   : > { %7119 = vmatpush.bf16.msra.mxu1 %v10630_v36  ;;  %v13682_v36 = vld [vmem:[%s14303_s25 + $0xf64] sm:$0xf0]  ;;  %17215 = vst [vmem:[#allocation25_spill] sm:$0xff] %v14919_v47  ;;  %v10926_v59 = vor.u32 %v13666_v44, %v10925_v28  ;;  %v10845_v17 = vld [vmem:[%s14303_s25 + $0xe40] sm:$0xf] }
  0xf6   : > { %7133 = vmatpush.bf16.msra.mxu2 %v10694_v39  ;;  %v14917_v39 = vpop.f32.mrf.mxu0  ;;  %17216 = vst [vmem:[#allocation26_spill] sm:$0xff] %v14921_v50  ;;  %v10990_v62 = vor.u32 %v13682_v36, %v10989_v35  ;;  %v13662_v24 = vld [vmem:[%s14303_s25 + $0xec4] sm:$0xf0]  ;;  %v11037_v35 = vld [vmem:[%s14303_s25 + $0xfc0] sm:$0xf] }
  0xf7   : > { %7147 = vmatpush.bf16.msra.mxu3 %v10758_v52  ;;  %v13698_v52 = vld [vmem:[%s14303_s25 + $0xfe4] sm:$0xf0] }
  0xf8   : > { %7106 = vmatpush.bf16.msra.mxu0 %v10558_v0  ;;  %v13648_v0 = vld [vmem:[%s14303_s25 + $0xe54] sm:$0xf0]  ;;  %v11054_v2 = vor.u32 %v13698_v52, %v11053_v51  ;;  %v13678_v28 = vld [vmem:[%s14303_s25 + $0xf44] sm:$0xf0]  ;;  %v10846_v52 = vor.u32 %v13646_v18, %v10845_v17  ;;  %v10829_v17 = vld [vmem:[%s14303_s25 + $0xe20] sm:$0xf] }
  0xf9   : > { %7120 = vmatpush.bf16.msra.mxu1 %v10622_v5  ;;  %v10981_v5 = vld [vmem:[%s14303_s25 + $0xf50] sm:$0xf]  ;;  %v10854_v11 = vor.u32 %v13648_v0, %v10853_v63  ;;  %v13694_v36 = vld [vmem:[%s14303_s25 + $0xfc4] sm:$0xf0]  ;;  %v13644_v0 = vld [vmem:[%s14303_s25 + $0xe34] sm:$0xf0] }
  0xfa   : > { %7134 = vmatpush.bf16.msra.mxu2 %v10686_v6  ;;  %v13680_v6 = vld [vmem:[%s14303_s25 + $0xf54] sm:$0xf0]  ;;  %v10837_v63 = vld [vmem:[%s14303_s25 + $0xe30] sm:$0xf]  ;;  %v13642_v18 = vld [vmem:[%s14303_s25 + $0xe24] sm:$0xf0] }
  0xfb   : > { %7148 = vmatpush.bf16.msra.mxu3 %v10750_v12  ;;  %7107 = vmatmul.bf16.vlgmr.msra.gmra.mxu0 %v14912_v32  ;;  %v10918_v12 = vor.u32 %v13664_v3, %v10917_v1  ;;  %v10901_v1 = vld [vmem:[%s14303_s25 + $0xeb0] sm:$0xf] }
  0xfc   : > { %7155 = vmatpush.bf16.msrb.mxu0 %v10870_v14  ;;  %7121 = vmatmul.bf16.vlgmr.msra.gmra.mxu1 %v14921_v50  ;;  %v10982_v14 = vor.u32 %v13680_v6, %v10981_v5  ;;  %v13660_v5 = vld [vmem:[%s14303_s25 + $0xeb4] sm:$0xf0]  ;;  %v10965_v6 = vld [vmem:[%s14303_s25 + $0xf30] sm:$0xf]  ;;  %v13140_v50 = vld [vmem:[%s14398_s6 + $0x7c] sm:$0xf] }
  0xfd   : > { %7169 = vmatpush.bf16.msrb.mxu1 %v10934_v21  ;;  %7135 = vmatmul.bf16.vlgmr.msra.gmra.mxu2 %v14919_v47  ;;  %v14944_v21 = vpop.f32.mrf.mxu2  ;;  %v8887_v47 = vld [vmem:[%s14398_s6 + $0x278] sm:$0xf0] }
  0xfe   : > { %7183 = vmatpush.bf16.msrb.mxu2 %v10998_v22  ;;  %7149 = vmatmul.bf16.vlgmr.msra.gmra.mxu3 %v14927_v55  ;;  %v11046_v22 = vor.u32 %v13696_v10, %v11045_v8  ;;  %v6884_v44 = vpop.f32.mrf.mxu0  ;;  %v11029_v8 = vld [vmem:[%s14303_s25 + $0xfb0] sm:$0xf]  ;;  %v13692_v10 = vld [vmem:[%s14303_s25 + $0xfb4] sm:$0xf0]  ;;  %v13139_v55 = vld [vmem:[%s14398_s6 + $0x74] sm:$0xf] }
  0xff   : > { %7197 = vmatpush.bf16.msrb.mxu3 %v11062_v31  ;;  %v14949_v31 = vpop.f32.mrf.mxu3  ;;  %v6885_v51 = vadd.f32 %v6884_v44, %v14876_v7  ;;  %v13676_v7 = vld [vmem:[%s14303_s25 + $0xf34] sm:$0xf0]  ;;  %v13674_v44 = vld [vmem:[%s14303_s25 + $0xf24] sm:$0xf0] }
 0x100   : > { %7156 = vmatpush.bf16.msrb.mxu0 %v10862_v56  ;;  %v6898_v56 = vpop.f32.mrf.mxu1 }
 0x101   : > { %7170 = vmatpush.bf16.msrb.mxu1 %v10926_v59  ;;  %v10910_v59 = vor.u32 %v13662_v24, %v10909_v19  ;;  %v6899_v3 = vadd.f32 %v6898_v56, %v6885_v51  ;;  %v10893_v19 = vld [vmem:[%s14303_s25 + $0xea0] sm:$0xf]  ;;  %v10830_v56 = vor.u32 %v13642_v18, %v10829_v17  ;;  %v13654_v18 = vld [vmem:[%s14303_s25 + $0xe84] sm:$0xf0] }
 0x102   : > { %7184 = vmatpush.bf16.msrb.mxu2 %v10990_v62  ;;  %v10974_v62 = vor.u32 %v13678_v28, %v10973_v27  ;;  %v13658_v27 = vld [vmem:[%s14303_s25 + $0xea4] sm:$0xf0]  ;;  %v10957_v28 = vld [vmem:[%s14303_s25 + $0xf20] sm:$0xf] }
 0x103   : > { %7198 = vmatpush.bf16.msrb.mxu3 %v11054_v2  ;;  %v11038_v2 = vor.u32 %v13694_v36, %v11037_v35  ;;  %v11021_v51 = vld [vmem:[%s14303_s25 + $0xfa0] sm:$0xf] }
 0x104   : > { %7157 = vmatpush.bf16.msrb.mxu0 %v10854_v11  ;;  %v10838_v11 = vor.u32 %v13644_v0, %v10837_v63  ;;  %v10894_v63 = vor.u32 %v13658_v27, %v10893_v19  ;;  %v10958_v0 = vor.u32 %v13674_v44, %v10957_v28  ;;  %v10877_v17 = vld [vmem:[%s14303_s25 + $0xe80] sm:$0xf]  ;;  %v13686_v44 = vld [vmem:[%s14303_s25 + $0xf84] sm:$0xf0] }
 0x105   : > { %7171 = vmatpush.bf16.msrb.mxu1 %v10918_v12  ;;  %v10902_v12 = vor.u32 %v13660_v5, %v10901_v1  ;;  %v6912_v24 = vpop.f32.mrf.mxu2  ;;  %v13640_v1 = vld [vmem:[%s14303_s25 + $0xe14] sm:$0xf0]  ;;  %v10941_v19 = vld [vmem:[%s14303_s25 + $0xf00] sm:$0xf] }
 0x106   : > { %7185 = vmatpush.bf16.msrb.mxu2 %v10982_v14  ;;  %v10966_v14 = vor.u32 %v13676_v7, %v10965_v6  ;;  %v6913_v35 = vadd.f32 %v6912_v24, %v6899_v3  ;;  %v13656_v3 = vld [vmem:[%s14303_s25 + $0xe94] sm:$0xf0]  ;;  %v10949_v6 = vld [vmem:[%s14303_s25 + $0xf10] sm:$0xf]  ;;  %v11005_v28 = vld [vmem:[%s14303_s25 + $0xf80] sm:$0xf]  ;;  %v15012_v25 = vpop.f32.mrf.mxu0 }
 0x107   : > { %7199 = vmatpush.bf16.msrb.mxu3 %v11046_v22  ;;  %v11030_v22 = vor.u32 %v13692_v10, %v11029_v8  ;;  %v6926_v36 = vpop.f32.mrf.mxu3  ;;  %v13672_v7 = vld [vmem:[%s14303_s25 + $0xf14] sm:$0xf0]  ;;  %v11013_v8 = vld [vmem:[%s14303_s25 + $0xf90] sm:$0xf] }
 0x108   : > { %7158 = vmatpush.bf16.msrb.mxu0 %v10846_v52  ;;  %v13690_v52 = vld [vmem:[%s14303_s25 + $0xfa4] sm:$0xf0]  ;;  %v13688_v10 = vld [vmem:[%s14303_s25 + $0xf94] sm:$0xf0]  ;;  %v10950_v27 = vor.u32 %v13672_v7, %v10949_v6  ;;  %v13171_v6 = vld [vmem:[%s14398_s6 + $0x26c] sm:$0xf0] }
 0x109   : > { %7172 = vmatpush.bf16.msrb.mxu1 %v10910_v59  ;;  %v10821_v59 = vld [vmem:[%s14303_s25 + $0xe10] sm:$0xf]  ;;  %v11022_v5 = vor.u32 %v13690_v52, %v11021_v51  ;;  %v13716_v51 = vld [vmem:[%s14303_s25 + $0x1074] sm:$0xf0] }
 0x10a   : > { %7186 = vmatpush.bf16.msrb.mxu2 %v10974_v62  ;;  %v14971_v62 = vadd.f32 %v6926_v36, %v6913_v35  ;;  %v11125_v35 = vld [vmem:[%s14303_s25 + $0x1070] sm:$0xf]  ;;  %v11014_v36 = vor.u32 %v13688_v10, %v11013_v8  ;;  %v8885_v8 = vld [vmem:[%s14398_s6 + $0x78] sm:$0xf] }
 0x10b   : > { %7200 = vmatpush.bf16.msrb.mxu3 %v11038_v2  ;;  %v10885_v2 = vld [vmem:[%s14303_s25 + $0xe90] sm:$0xf]  ;;  %v13172_v10 = vld [vmem:[%s14398_s6 + $0x274] sm:$0xf0] }
 0x10c   : > { %7159 = vmatpush.bf16.msrb.mxu0 %v10838_v11  ;;  %v10813_v11 = vld [vmem:[%s14303_s25 + $0xe00] sm:$0xf]  ;;  %v10886_v24 = vor.u32 %v13656_v3, %v10885_v2  ;;  %v11189_v52 = vld [vmem:[%s14303_s25 + $0x10f0] sm:$0xf]  ;;  %v13764_v2 = vld [vmem:[%s14303_s25 + $0x11f4] sm:$0xf0] }
 0x10d   : > { %7173 = vmatpush.bf16.msrb.mxu1 %v10902_v12  ;;  %v13638_v12 = vld [vmem:[%s14303_s25 + $0xe04] sm:$0xf0]  ;;  %v8877_v3 = vld [vmem:[%s14398_s6 + $0x70] sm:$0xf] }
 0x10e   : > { %7187 = vmatpush.bf16.msrb.mxu2 %v10966_v14  ;;  %v10822_v14 = vor.u32 %v13640_v1, %v10821_v59  ;;  %v11253_v59 = vld [vmem:[%s14303_s25 + $0x1170] sm:$0xf]  ;;  %v13748_v1 = vld [vmem:[%s14303_s25 + $0x1174] sm:$0xf0] }
 0x10f   : > { %7201 = vmatpush.bf16.msrb.mxu3 %v11030_v22  ;;  %v13670_v22 = vld [vmem:[%s14303_s25 + $0xf04] sm:$0xf0] }
 0x110   : > { %7160 = vmatpush.bf16.msrb.mxu0 %v10830_v56  ;;  %v13732_v56 = vld [vmem:[%s14303_s25 + $0x10f4] sm:$0xf0]  ;;  %v10942_v7 = vor.u32 %v13670_v22, %v10941_v19  ;;  %v15007_v19 = vor.u32 %v13171_v6, %v8877_v3  ;;  %v13730_v22 = vld [vmem:[%s14303_s25 + $0x10e4] sm:$0xf0] }
 0x111   : > { %7174 = vmatpush.bf16.msrb.mxu1 %v10894_v63  ;;  %v11317_v63 = vld [vmem:[%s14303_s25 + $0x11f0] sm:$0xf]  ;;  %v11190_v32 = vor.u32 %v13732_v56, %v11189_v52  ;;  %v15020_v52 = vpop.f32.mrf.mxu1  ;;  %v15022_v56 = vor.u32 %v13140_v50, %v8887_v47  ;;  %v13728_v6 = vld [vmem:[%s14303_s25 + $0x10d4] sm:$0xf0] }
 0x112   : > { %7188 = vmatpush.bf16.msrb.mxu2 %v10958_v0  ;;  %v10814_v0 = vor.u32 %v13638_v12, %v10813_v11  ;;  %v11126_v11 = vor.u32 %v13716_v51, %v11125_v35  ;;  %v8879_v12 = vld [vmem:[%s14398_s6 + $0x270] sm:$0xf0]  ;;  %17218 = vst [vmem:[#allocation28_spill] sm:$0xff] %v15007_v19  ;;  %v11309_v35 = vld [vmem:[%s14303_s25 + $0x11e0] sm:$0xf] }
 0x113   : > { %7202 = vmatpush.bf16.msrb.mxu3 %v11022_v5  ;;  %v10878_v5 = vor.u32 %v13654_v18, %v10877_v17  ;;  %v11181_v17 = vld [vmem:[%s14303_s25 + $0x10e0] sm:$0xf]  ;;  %v11318_v18 = vor.u32 %v13764_v2, %v11317_v63  ;;  %v13762_v51 = vld [vmem:[%s14303_s25 + $0x11e4] sm:$0xf0]  ;;  %17221 = vst [vmem:[#allocation31_spill] sm:$0xff] %v15022_v56 }
 0x114   : > { %7161 = vmatpush.bf16.msrb.mxu0 %v10822_v14  ;;  %v11006_v14 = vor.u32 %v13686_v44, %v11005_v28  ;;  %v15014_v28 = vor.u32 %v13172_v10, %v8885_v8  ;;  %v15016_v44 = vor.u32 %v13139_v55, %v8879_v12  ;;  %v11109_v55 = vld [vmem:[%s14303_s25 + $0x1050] sm:$0xf]  ;;  %v11310_v3 = vor.u32 %v13762_v51, %v11309_v35  ;;  %v13744_v50 = vld [vmem:[%s14303_s25 + $0x1154] sm:$0xf0]  ;;  %v11101_v8 = vld [vmem:[%s14303_s25 + $0x1040] sm:$0xf] }
 0x115   : > { %7175 = vmatpush.bf16.msrb.mxu1 %v10886_v24  ;;  %v11254_v24 = vor.u32 %v13748_v1, %v11253_v59  ;;  %v11182_v1 = vor.u32 %v13730_v22, %v11181_v17  ;;  %v11173_v2 = vld [vmem:[%s14303_s25 + $0x10d0] sm:$0xf]  ;;  %v13710_v10 = vld [vmem:[%s14303_s25 + $0x1044] sm:$0xf0] }
 0x116   : > { %7189 = vmatpush.bf16.msrb.mxu2 %v10950_v27  ;;  %v11117_v27 = vld [vmem:[%s14303_s25 + $0x1060] sm:$0xf]  ;;  %17219 = vst [vmem:[#allocation29_spill] sm:$0xff] %v15014_v28  ;;  %v11237_v47 = vld [vmem:[%s14303_s25 + $0x1150] sm:$0xf] }
 0x117   : > { %7203 = vmatpush.bf16.msrb.mxu3 %v11014_v36  ;;  %v13746_v36 = vld [vmem:[%s14303_s25 + $0x1164] sm:$0xf0]  ;;  %17220 = vst [vmem:[#allocation30_spill] sm:$0xff] %v15016_v44  ;;  %v11118_v59 = vor.u32 %v13714_v30, %v11117_v27  ;;  %v11301_v30 = vld [vmem:[%s14303_s25 + $0x11d0] sm:$0xf] }
 0x118   : > { %7162 = vmatpush.bf16.msrb.mxu0 %v10814_v0  ;;  %v11246_v63 = vor.u32 %v13746_v36, %v11245_v26  ;;  %v13712_v0 = vld [vmem:[%s14303_s25 + $0x1054] sm:$0xf0]  ;;  %v11229_v27 = vld [vmem:[%s14303_s25 + $0x1140] sm:$0xf]  ;;  %v13742_v17 = vld [vmem:[%s14303_s25 + $0x1144] sm:$0xf0]  ;;  %v6940_v22 = vpop.f32.mrf.mxu0 }
 0x119   : > { %7176 = vmatpush.bf16.msrb.mxu1 %v10878_v5  ;;  %v13760_v26 = vld [vmem:[%s14303_s25 + $0x11d4] sm:$0xf0]  ;;  %v11174_v5 = vor.u32 %v13728_v6, %v11173_v2  ;;  %v11293_v36 = vld [vmem:[%s14303_s25 + $0x11c0] sm:$0xf]  ;;  %v13758_v35 = vld [vmem:[%s14303_s25 + $0x11c4] sm:$0xf0]  ;;  %v6941_v51 = vadd.f32 %v6940_v22, %v14971_v62 }
 0x11a   : > { %7190 = vmatpush.bf16.msrb.mxu2 %v10942_v7  ;;  %v11238_v7 = vor.u32 %v13744_v50, %v11237_v47  ;;  %v11302_v12 = vor.u32 %v13760_v26, %v11301_v30  ;;  %v13708_v2 = vld [vmem:[%s14303_s25 + $0x1034] sm:$0xf0]  ;;  %v11294_v6 = vor.u32 %v13758_v35, %v11293_v36  ;;  %v11221_v30 = vld [vmem:[%s14303_s25 + $0x1130] sm:$0xf]  ;;  %v11213_v22 = vld [vmem:[%s14303_s25 + $0x1120] sm:$0xf] }
 0x11b   : > { %7204 = vmatpush.bf16.msrb.mxu3 %v11006_v14  ;;  %7163 = vmatmul.bf16.vlgmr.msrb.gmra.mxu0 %v15007_v19  ;;  %v11165_v14 = vld [vmem:[%s14303_s25 + $0x10c0] sm:$0xf]  ;;  %v13724_v50 = vld [vmem:[%s14303_s25 + $0x10b4] sm:$0xf0]  ;;  %v11285_v26 = vld [vmem:[%s14303_s25 + $0x11b0] sm:$0xf] }
 0x11c   : > { %7211 = vmatpush.bf16.msra.mxu0 %v11126_v11  ;;  %7177 = vmatmul.bf16.vlgmr.msrb.gmra.mxu1 %v15016_v44  ;;  %v15039_v11 = vpop.f32.mrf.mxu2  ;;  %v13740_v62 = vld [vmem:[%s14303_s25 + $0x1134] sm:$0xf0]  ;;  %v13738_v36 = vld [vmem:[%s14303_s25 + $0x1124] sm:$0xf0]  ;;  %v13141_v44 = vld [vmem:[%s14398_s6 + $0x84] sm:$0xf] }
 0x11d   : > { %7225 = vmatpush.bf16.msra.mxu1 %v11190_v32  ;;  %7191 = vmatmul.bf16.vlgmr.msrb.gmra.mxu2 %v15014_v28  ;;  %v11110_v32 = vor.u32 %v13712_v0, %v11109_v55  ;;  %v11230_v55 = vor.u32 %v13742_v17, %v11229_v27  ;;  %v11093_v0 = vld [vmem:[%s14303_s25 + $0x1030] sm:$0xf]  ;;  %v13722_v17 = vld [vmem:[%s14303_s25 + $0x10a4] sm:$0xf0]  ;;  %v13142_v28 = vld [vmem:[%s14398_s6 + $0x8c] sm:$0xf] }
 0x11e   : > { %7239 = vmatpush.bf16.msra.mxu2 %v11254_v24  ;;  %7205 = vmatmul.bf16.vlgmr.msrb.gmra.mxu3 %v15022_v56  ;;  %v13726_v24 = vld [vmem:[%s14303_s25 + $0x10c4] sm:$0xf0]  ;;  %v13812_v56 = vld [vmem:[%s14303_s25 + $0x1374] sm:$0xf0]  ;;  %v8903_v19 = vld [vmem:[%s14398_s6 + $0x288] sm:$0xf0] }
 0x11f   : > { %7253 = vmatpush.bf16.msra.mxu3 %v11318_v18  ;;  %v15044_v18 = vpop.f32.mrf.mxu3 }
 0x120   : > { %7212 = vmatpush.bf16.msra.mxu0 %v11118_v59  ;;  %v11102_v59 = vor.u32 %v13710_v10, %v11101_v8  ;;  %v11222_v8 = vor.u32 %v13740_v62, %v11221_v30  ;;  %v11085_v10 = vld [vmem:[%s14303_s25 + $0x1020] sm:$0xf]  ;;  %v11205_v62 = vld [vmem:[%s14303_s25 + $0x1110] sm:$0xf]  ;;  %v15107_v57 = vpop.f32.mrf.mxu0 }
 0x121   : > { %7226 = vmatpush.bf16.msra.mxu1 %v11182_v1  ;;  %v6954_v1 = vpop.f32.mrf.mxu1 }
 0x122   : > { %7240 = vmatpush.bf16.msra.mxu2 %v11246_v63  ;;  %v11166_v63 = vor.u32 %v13726_v24, %v11165_v14  ;;  %v6955_v47 = vadd.f32 %v6954_v1, %v6941_v51  ;;  %v13706_v14 = vld [vmem:[%s14303_s25 + $0x1024] sm:$0xf0] }
 0x123   : > { %7254 = vmatpush.bf16.msra.mxu3 %v11310_v3  ;;  %v11157_v3 = vld [vmem:[%s14303_s25 + $0x10b0] sm:$0xf]  ;;  %v13754_v1 = vld [vmem:[%s14303_s25 + $0x11a4] sm:$0xf0] }
 0x124   : > { %7213 = vmatpush.bf16.msra.mxu0 %v11110_v32  ;;  %v13756_v32 = vld [vmem:[%s14303_s25 + $0x11b4] sm:$0xf0]  ;;  %v6968_v27 = vpop.f32.mrf.mxu2 }
 0x125   : > { %7227 = vmatpush.bf16.msra.mxu1 %v11174_v5  ;;  %v11094_v5 = vor.u32 %v13708_v2, %v11093_v0  ;;  %v11286_v24 = vor.u32 %v13756_v32, %v11285_v26  ;;  %v6969_v35 = vadd.f32 %v6968_v27, %v6955_v47  ;;  %v11141_v47 = vld [vmem:[%s14303_s25 + $0x1090] sm:$0xf]  ;;  %v13736_v26 = vld [vmem:[%s14303_s25 + $0x1114] sm:$0xf0]  ;;  %v13734_v27 = vld [vmem:[%s14303_s25 + $0x1104] sm:$0xf0] }
 0x126   : > { %7241 = vmatpush.bf16.msra.mxu2 %v11238_v7  ;;  %v11158_v7 = vor.u32 %v13724_v50, %v11157_v3  ;;  %v11214_v3 = vor.u32 %v13738_v36, %v11213_v22  ;;  %v13720_v50 = vld [vmem:[%s14303_s25 + $0x1094] sm:$0xf0]  ;;  %v11269_v32 = vld [vmem:[%s14303_s25 + $0x1190] sm:$0xf]  ;;  %v11206_v22 = vor.u32 %v13736_v26, %v11205_v62  ;;  %v11261_v36 = vld [vmem:[%s14303_s25 + $0x1180] sm:$0xf] }
 0x127   : > { %7255 = vmatpush.bf16.msra.mxu3 %v11302_v12  ;;  %v11149_v12 = vld [vmem:[%s14303_s25 + $0x10a0] sm:$0xf]  ;;  %v6982_v51 = vpop.f32.mrf.mxu3 }
 0x128   : > { %7214 = vmatpush.bf16.msra.mxu0 %v11102_v59  ;;  %v11277_v59 = vld [vmem:[%s14303_s25 + $0x11a0] sm:$0xf]  ;;  %v15066_v0 = vadd.f32 %v6982_v51, %v6969_v35  ;;  %v11150_v2 = vor.u32 %v13722_v17, %v11149_v12  ;;  %v13718_v12 = vld [vmem:[%s14303_s25 + $0x1084] sm:$0xf0]  ;;  %v11142_v17 = vor.u32 %v13720_v50, %v11141_v47  ;;  %v11381_v51 = vld [vmem:[%s14303_s25 + $0x1270] sm:$0xf] }
 0x129   : > { %7228 = vmatpush.bf16.msra.mxu1 %v11166_v63  ;;  %v11086_v63 = vor.u32 %v13706_v14, %v11085_v10  ;;  %v11278_v30 = vor.u32 %v13754_v1, %v11277_v59  ;;  %v11133_v14 = vld [vmem:[%s14303_s25 + $0x1080] sm:$0xf]  ;;  %v13750_v35 = vld [vmem:[%s14303_s25 + $0x1184] sm:$0xf0]  ;;  %v13780_v1 = vld [vmem:[%s14303_s25 + $0x1274] sm:$0xf0] }
 0x12a   : > { %7242 = vmatpush.bf16.msra.mxu2 %v11230_v55  ;;  %v11077_v55 = vld [vmem:[%s14303_s25 + $0x1010] sm:$0xf]  ;;  %v13828_v47 = vld [vmem:[%s14303_s25 + $0x13f4] sm:$0xf0]  ;;  %v8893_v50 = vld [vmem:[%s14398_s6 + $0x80] sm:$0xf] }
 0x12b   : > { %7256 = vmatpush.bf16.msra.mxu3 %v11294_v6  ;;  %v13704_v6 = vld [vmem:[%s14303_s25 + $0x1014] sm:$0xf0]  ;;  %v13173_v62 = vld [vmem:[%s14398_s6 + $0x27c] sm:$0xf0] }
 0x12c   : > { %7215 = vmatpush.bf16.msra.mxu0 %v11094_v5  ;;  %v13752_v5 = vld [vmem:[%s14303_s25 + $0x1194] sm:$0xf0]  ;;  %v11078_v10 = vor.u32 %v13704_v6, %v11077_v55  ;;  %v11509_v6 = vld [vmem:[%s14303_s25 + $0x1370] sm:$0xf] }
 0x12d   : > { %7229 = vmatpush.bf16.msra.mxu1 %v11158_v7  ;;  %v11069_v7 = vld [vmem:[%s14303_s25 + $0x1000] sm:$0xf]  ;;  %v11270_v59 = vor.u32 %v13752_v5, %v11269_v32  ;;  %v13796_v55 = vld [vmem:[%s14303_s25 + $0x12f4] sm:$0xf0]  ;;  %v8901_v32 = vld [vmem:[%s14398_s6 + $0x88] sm:$0xf] }
 0x12e   : > { %7243 = vmatpush.bf16.msra.mxu2 %v11222_v8  ;;  %v13702_v8 = vld [vmem:[%s14303_s25 + $0x1004] sm:$0xf0] }
 0x12f   : > { %7257 = vmatpush.bf16.msra.mxu3 %v11286_v24  ;;  %v11197_v24 = vld [vmem:[%s14303_s25 + $0x1100] sm:$0xf]  ;;  %v13174_v5 = vld [vmem:[%s14398_s6 + $0x284] sm:$0xf0] }
 0x130   : > { %7216 = vmatpush.bf16.msra.mxu0 %v11086_v63  ;;  %v11445_v63 = vld [vmem:[%s14303_s25 + $0x12f0] sm:$0xf]  ;;  %v11198_v26 = vor.u32 %v13734_v27, %v11197_v24  ;;  %v15102_v24 = vor.u32 %v13173_v62, %v8893_v50  ;;  %v13794_v27 = vld [vmem:[%s14303_s25 + $0x12e4] sm:$0xf0]  ;;  %v13792_v62 = vld [vmem:[%s14303_s25 + $0x12d4] sm:$0xf0] }
 0x131   : > { %7230 = vmatpush.bf16.msra.mxu1 %v11150_v2  ;;  %v11573_v2 = vld [vmem:[%s14303_s25 + $0x13f0] sm:$0xf]  ;;  %v11446_v20 = vor.u32 %v13796_v55, %v11445_v63  ;;  %v15117_v63 = vor.u32 %v13142_v28, %v8903_v19  ;;  %v13808_v28 = vld [vmem:[%s14303_s25 + $0x1354] sm:$0xf0] }
 0x132   : > { %7244 = vmatpush.bf16.msra.mxu2 %v11214_v3  ;;  %v11070_v3 = vor.u32 %v13702_v8, %v11069_v7  ;;  %v11382_v7 = vor.u32 %v13780_v1, %v11381_v51  ;;  %v8895_v8 = vld [vmem:[%s14398_s6 + $0x280] sm:$0xf0]  ;;  %17222 = vst [vmem:[#allocation32_spill] sm:$0xff] %v15102_v24  ;;  %v13826_v51 = vld [vmem:[%s14303_s25 + $0x13e4] sm:$0xf0]  ;;  %v15115_v1 = vpop.f32.mrf.mxu1 }
 0x133   : > { %7258 = vmatpush.bf16.msra.mxu3 %v11278_v30  ;;  %v11134_v30 = vor.u32 %v13718_v12, %v11133_v14  ;;  %v11437_v14 = vld [vmem:[%s14303_s25 + $0x12e0] sm:$0xf]  ;;  %v11574_v12 = vor.u32 %v13828_v47, %v11573_v2  ;;  %17225 = vst [vmem:[#allocation35_spill] sm:$0xff] %v15117_v63  ;;  %v11429_v47 = vld [vmem:[%s14303_s25 + $0x12d0] sm:$0xf] }
 0x134   : > { %7217 = vmatpush.bf16.msra.mxu0 %v11078_v10  ;;  %v11262_v10 = vor.u32 %v13750_v35, %v11261_v36  ;;  %v15109_v36 = vor.u32 %v13174_v5, %v8901_v32  ;;  %v11565_v35 = vld [vmem:[%s14303_s25 + $0x13e0] sm:$0xf]  ;;  %v11493_v19 = vld [vmem:[%s14303_s25 + $0x1350] sm:$0xf]  ;;  %v13774_v5 = vld [vmem:[%s14303_s25 + $0x1244] sm:$0xf0] }
 0x135   : > { %7231 = vmatpush.bf16.msra.mxu1 %v11142_v17  ;;  %v11510_v17 = vor.u32 %v13812_v56, %v11509_v6  ;;  %v15111_v56 = vor.u32 %v13141_v44, %v8895_v8  ;;  %v11438_v6 = vor.u32 %v13794_v27, %v11437_v14  ;;  %v11365_v44 = vld [vmem:[%s14303_s25 + $0x1250] sm:$0xf]  ;;  %v11566_v50 = vor.u32 %v13826_v51, %v11565_v35  ;;  %v11357_v32 = vld [vmem:[%s14303_s25 + $0x1240] sm:$0xf]  ;;  %v13806_v14 = vld [vmem:[%s14303_s25 + $0x1344] sm:$0xf0] }
 0x136   : > { %7245 = vmatpush.bf16.msra.mxu2 %v11206_v22  ;;  %v11373_v22 = vld [vmem:[%s14303_s25 + $0x1260] sm:$0xf]  ;;  %17223 = vst [vmem:[#allocation33_spill] sm:$0xff] %v15109_v36  ;;  %v13822_v35 = vld [vmem:[%s14303_s25 + $0x13c4] sm:$0xf0] }
 0x137   : > { %7259 = vmatpush.bf16.msra.mxu3 %v11270_v59  ;;  %v13810_v59 = vld [vmem:[%s14303_s25 + $0x1364] sm:$0xf0]  ;;  %17224 = vst [vmem:[#allocation34_spill] sm:$0xff] %v15111_v56  ;;  %v11374_v55 = vor.u32 %v13778_v61, %v11373_v22  ;;  %v11557_v61 = vld [vmem:[%s14303_s25 + $0x13d0] sm:$0xf] }
 0x138   : > { %7218 = vmatpush.bf16.msra.mxu0 %v11070_v3  ;;  %v11502_v2 = vor.u32 %v13810_v59, %v11501_v58  ;;  %v13776_v3 = vld [vmem:[%s14303_s25 + $0x1254] sm:$0xf0]  ;;  %v11485_v22 = vld [vmem:[%s14303_s25 + $0x1340] sm:$0xf]  ;;  %v6996_v27 = vpop.f32.mrf.mxu0 }
 0x139   : > { %7232 = vmatpush.bf16.msra.mxu1 %v11134_v30  ;;  %v13824_v58 = vld [vmem:[%s14303_s25 + $0x13d4] sm:$0xf0]  ;;  %v11430_v30 = vor.u32 %v13792_v62, %v11429_v47  ;;  %v11549_v59 = vld [vmem:[%s14303_s25 + $0x13c0] sm:$0xf]  ;;  %v6997_v51 = vadd.f32 %v6996_v27, %v15066_v0 }
 0x13a   : > { %7246 = vmatpush.bf16.msra.mxu2 %v11198_v26  ;;  %v11494_v26 = vor.u32 %v13808_v28, %v11493_v19  ;;  %v11558_v8 = vor.u32 %v13824_v58, %v11557_v61  ;;  %v13772_v47 = vld [vmem:[%s14303_s25 + $0x1234] sm:$0xf0]  ;;  %v11550_v62 = vor.u32 %v13822_v35, %v11549_v59  ;;  %v11477_v61 = vld [vmem:[%s14303_s25 + $0x1330] sm:$0xf]  ;;  %v11469_v27 = vld [vmem:[%s14303_s25 + $0x1320] sm:$0xf] }
 0x13b   : > { %7260 = vmatpush.bf16.msra.mxu3 %v11262_v10  ;;  %7219 = vmatmul.bf16.vlgmr.msra.gmra.mxu0 %v15102_v24  ;;  %v11421_v10 = vld [vmem:[%s14303_s25 + $0x12c0] sm:$0xf]  ;;  %v13788_v28 = vld [vmem:[%s14303_s25 + $0x12b4] sm:$0xf0]  ;;  %v11541_v58 = vld [vmem:[%s14303_s25 + $0x13b0] sm:$0xf] }
 0x13c   : > { %7267 = vmatpush.bf16.msrb.mxu0 %v11382_v7  ;;  %7233 = vmatmul.bf16.vlgmr.msra.gmra.mxu1 %v15111_v56  ;;  %v15134_v7 = vpop.f32.mrf.mxu2  ;;  %v13804_v0 = vld [vmem:[%s14303_s25 + $0x1334] sm:$0xf0]  ;;  %v13802_v59 = vld [vmem:[%s14303_s25 + $0x1324] sm:$0xf0]  ;;  %v13143_v56 = vld [vmem:[%s14398_s6 + $0x94] sm:$0xf] }
 0x13d   : > { %7281 = vmatpush.bf16.msrb.mxu1 %v11446_v20  ;;  %7247 = vmatmul.bf16.vlgmr.msra.gmra.mxu2 %v15109_v36  ;;  %v11366_v20 = vor.u32 %v13776_v3, %v11365_v44  ;;  %v11486_v44 = vor.u32 %v13806_v14, %v11485_v22  ;;  %v11349_v3 = vld [vmem:[%s14303_s25 + $0x1230] sm:$0xf]  ;;  %v13786_v14 = vld [vmem:[%s14303_s25 + $0x12a4] sm:$0xf0]  ;;  %v13144_v36 = vld [vmem:[%s14398_s6 + $0x9c] sm:$0xf] }
 0x13e   : > { %7295 = vmatpush.bf16.msrb.mxu2 %v11510_v17  ;;  %7261 = vmatmul.bf16.vlgmr.msra.gmra.mxu3 %v15117_v63  ;;  %v13790_v17 = vld [vmem:[%s14303_s25 + $0x12c4] sm:$0xf0]  ;;  %v13876_v63 = vld [vmem:[%s14303_s25 + $0x1574] sm:$0xf0]  ;;  %v8919_v24 = vld [vmem:[%s14398_s6 + $0x298] sm:$0xf0] }
 0x13f   : > { %7309 = vmatpush.bf16.msrb.mxu3 %v11574_v12  ;;  %v15139_v12 = vpop.f32.mrf.mxu3 }
 0x140   : > { %7268 = vmatpush.bf16.msrb.mxu0 %v11374_v55  ;;  %v11358_v55 = vor.u32 %v13774_v5, %v11357_v32  ;;  %v11478_v32 = vor.u32 %v13804_v0, %v11477_v61  ;;  %v11341_v5 = vld [vmem:[%s14303_s25 + $0x1220] sm:$0xf]  ;;  %v11461_v0 = vld [vmem:[%s14303_s25 + $0x1310] sm:$0xf]  ;;  %v15202_v40 = vpop.f32.mrf.mxu0 }
 0x141   : > { %7282 = vmatpush.bf16.msrb.mxu1 %v11438_v6  ;;  %v7010_v6 = vpop.f32.mrf.mxu1 }
 0x142   : > { %7296 = vmatpush.bf16.msrb.mxu2 %v11502_v2  ;;  %v11422_v2 = vor.u32 %v13790_v17, %v11421_v10  ;;  %v7011_v19 = vadd.f32 %v7010_v6, %v6997_v51  ;;  %v13770_v10 = vld [vmem:[%s14303_s25 + $0x1224] sm:$0xf0] }
 0x143   : > { %7310 = vmatpush.bf16.msrb.mxu3 %v11566_v50  ;;  %v11413_v50 = vld [vmem:[%s14303_s25 + $0x12b0] sm:$0xf]  ;;  %v13818_v6 = vld [vmem:[%s14303_s25 + $0x13a4] sm:$0xf0] }
 0x144   : > { %7269 = vmatpush.bf16.msrb.mxu0 %v11366_v20  ;;  %v13820_v20 = vld [vmem:[%s14303_s25 + $0x13b4] sm:$0xf0]  ;;  %v7024_v22 = vpop.f32.mrf.mxu2 }
 0x145   : > { %7283 = vmatpush.bf16.msrb.mxu1 %v11430_v30  ;;  %v11350_v30 = vor.u32 %v13772_v47, %v11349_v3  ;;  %v11542_v17 = vor.u32 %v13820_v20, %v11541_v58  ;;  %v7025_v35 = vadd.f32 %v7024_v22, %v7011_v19  ;;  %v11397_v19 = vld [vmem:[%s14303_s25 + $0x1290] sm:$0xf]  ;;  %v13800_v58 = vld [vmem:[%s14303_s25 + $0x1314] sm:$0xf0]  ;;  %v13798_v22 = vld [vmem:[%s14303_s25 + $0x1304] sm:$0xf0] }
 0x146   : > { %7297 = vmatpush.bf16.msrb.mxu2 %v11494_v26  ;;  %v11414_v26 = vor.u32 %v13788_v28, %v11413_v50  ;;  %v11470_v50 = vor.u32 %v13802_v59, %v11469_v27  ;;  %v13784_v28 = vld [vmem:[%s14303_s25 + $0x1294] sm:$0xf0]  ;;  %v11525_v20 = vld [vmem:[%s14303_s25 + $0x1390] sm:$0xf]  ;;  %v11462_v27 = vor.u32 %v13800_v58, %v11461_v0  ;;  %v11517_v59 = vld [vmem:[%s14303_s25 + $0x1380] sm:$0xf] }
 0x147   : > { %7311 = vmatpush.bf16.msrb.mxu3 %v11558_v8  ;;  %v11405_v8 = vld [vmem:[%s14303_s25 + $0x12a0] sm:$0xf]  ;;  %v7038_v51 = vpop.f32.mrf.mxu3  ;;  %v13175_v0 = vld [vmem:[%s14398_s6 + $0x28c] sm:$0xf0] }
 0x148   : > { %7270 = vmatpush.bf16.msrb.mxu0 %v11358_v55  ;;  %v11533_v55 = vld [vmem:[%s14303_s25 + $0x13a0] sm:$0xf]  ;;  %v15161_v3 = vadd.f32 %v7038_v51, %v7025_v35  ;;  %v11406_v47 = vor.u32 %v13786_v14, %v11405_v8  ;;  %v13782_v8 = vld [vmem:[%s14303_s25 + $0x1284] sm:$0xf0]  ;;  %v11398_v14 = vor.u32 %v13784_v28, %v11397_v19  ;;  %v11637_v51 = vld [vmem:[%s14303_s25 + $0x1470] sm:$0xf] }
 0x149   : > { %7284 = vmatpush.bf16.msrb.mxu1 %v11422_v2  ;;  %v11342_v2 = vor.u32 %v13770_v10, %v11341_v5  ;;  %v11534_v61 = vor.u32 %v13818_v6, %v11533_v55  ;;  %v11389_v10 = vld [vmem:[%s14303_s25 + $0x1280] sm:$0xf]  ;;  %v13814_v35 = vld [vmem:[%s14303_s25 + $0x1384] sm:$0xf0]  ;;  %v13844_v6 = vld [vmem:[%s14303_s25 + $0x1474] sm:$0xf0] }
 0x14a   : > { %7298 = vmatpush.bf16.msrb.mxu2 %v11486_v44  ;;  %v11333_v44 = vld [vmem:[%s14303_s25 + $0x1210] sm:$0xf]  ;;  %v13892_v19 = vld [vmem:[%s14303_s25 + $0x15f4] sm:$0xf0] }
 0x14b   : > { %7312 = vmatpush.bf16.msrb.mxu3 %v11550_v62  ;;  %v13768_v62 = vld [vmem:[%s14303_s25 + $0x1214] sm:$0xf0]  ;;  %v8909_v28 = vld [vmem:[%s14398_s6 + $0x90] sm:$0xf] }
 0x14c   : > { %7271 = vmatpush.bf16.msrb.mxu0 %v11350_v30  ;;  %v13816_v30 = vld [vmem:[%s14303_s25 + $0x1394] sm:$0xf0]  ;;  %v11334_v5 = vor.u32 %v13768_v62, %v11333_v44  ;;  %v11765_v62 = vld [vmem:[%s14303_s25 + $0x1570] sm:$0xf] }
 0x14d   : > { %7285 = vmatpush.bf16.msrb.mxu1 %v11414_v26  ;;  %v11325_v26 = vld [vmem:[%s14303_s25 + $0x1200] sm:$0xf]  ;;  %v11526_v55 = vor.u32 %v13816_v30, %v11525_v20  ;;  %v13860_v44 = vld [vmem:[%s14303_s25 + $0x14f4] sm:$0xf0] }
 0x14e   : > { %7299 = vmatpush.bf16.msrb.mxu2 %v11478_v32  ;;  %v13766_v32 = vld [vmem:[%s14303_s25 + $0x1204] sm:$0xf0]  ;;  %v8917_v20 = vld [vmem:[%s14398_s6 + $0x98] sm:$0xf] }
 0x14f   : > { %7313 = vmatpush.bf16.msrb.mxu3 %v11542_v17  ;;  %v11453_v17 = vld [vmem:[%s14303_s25 + $0x1300] sm:$0xf]  ;;  %v13176_v30 = vld [vmem:[%s14398_s6 + $0x294] sm:$0xf0] }
 0x150   : > { %7272 = vmatpush.bf16.msrb.mxu0 %v11342_v2  ;;  %v11701_v2 = vld [vmem:[%s14303_s25 + $0x14f0] sm:$0xf]  ;;  %v11454_v58 = vor.u32 %v13798_v22, %v11453_v17  ;;  %v15197_v17 = vor.u32 %v13175_v0, %v8909_v28  ;;  %v13858_v22 = vld [vmem:[%s14303_s25 + $0x14e4] sm:$0xf0]  ;;  %v13856_v0 = vld [vmem:[%s14303_s25 + $0x14d4] sm:$0xf0] }
 0x151   : > { %7286 = vmatpush.bf16.msrb.mxu1 %v11406_v47  ;;  %v11829_v47 = vld [vmem:[%s14303_s25 + $0x15f0] sm:$0xf]  ;;  %v11702_v53 = vor.u32 %v13860_v44, %v11701_v2  ;;  %v15212_v2 = vor.u32 %v13144_v36, %v8919_v24  ;;  %v13872_v36 = vld [vmem:[%s14303_s25 + $0x1554] sm:$0xf0] }
 0x152   : > { %7300 = vmatpush.bf16.msrb.mxu2 %v11470_v50  ;;  %v11326_v50 = vor.u32 %v13766_v32, %v11325_v26  ;;  %v11638_v26 = vor.u32 %v13844_v6, %v11637_v51  ;;  %v8911_v32 = vld [vmem:[%s14398_s6 + $0x290] sm:$0xf0]  ;;  %17226 = vst [vmem:[#allocation36_spill] sm:$0xff] %v15197_v17  ;;  %v13890_v51 = vld [vmem:[%s14303_s25 + $0x15e4] sm:$0xf0]  ;;  %v15210_v6 = vpop.f32.mrf.mxu1 }
 0x153   : > { %7314 = vmatpush.bf16.msrb.mxu3 %v11534_v61  ;;  %v11390_v61 = vor.u32 %v13782_v8, %v11389_v10  ;;  %v11693_v10 = vld [vmem:[%s14303_s25 + $0x14e0] sm:$0xf]  ;;  %v11830_v8 = vor.u32 %v13892_v19, %v11829_v47  ;;  %17229 = vst [vmem:[#allocation39_spill] sm:$0xff] %v15212_v2  ;;  %v11685_v19 = vld [vmem:[%s14303_s25 + $0x14d0] sm:$0xf] }
 0x154   : > { %7273 = vmatpush.bf16.msrb.mxu0 %v11334_v5  ;;  %v11518_v5 = vor.u32 %v13814_v35, %v11517_v59  ;;  %v15204_v59 = vor.u32 %v13176_v30, %v8917_v20  ;;  %v11821_v35 = vld [vmem:[%s14303_s25 + $0x15e0] sm:$0xf]  ;;  %v11749_v24 = vld [vmem:[%s14303_s25 + $0x1550] sm:$0xf]  ;;  %v13838_v30 = vld [vmem:[%s14303_s25 + $0x1444] sm:$0xf0] }
 0x155   : > { %7287 = vmatpush.bf16.msrb.mxu1 %v11398_v14  ;;  %v11766_v14 = vor.u32 %v13876_v63, %v11765_v62  ;;  %v15206_v63 = vor.u32 %v13143_v56, %v8911_v32  ;;  %v11694_v62 = vor.u32 %v13858_v22, %v11693_v10  ;;  %v11621_v56 = vld [vmem:[%s14303_s25 + $0x1450] sm:$0xf]  ;;  %v11822_v28 = vor.u32 %v13890_v51, %v11821_v35  ;;  %v11613_v20 = vld [vmem:[%s14303_s25 + $0x1440] sm:$0xf]  ;;  %v13870_v10 = vld [vmem:[%s14303_s25 + $0x1544] sm:$0xf0] }
 0x156   : > { %7301 = vmatpush.bf16.msrb.mxu2 %v11462_v27  ;;  %v11629_v27 = vld [vmem:[%s14303_s25 + $0x1460] sm:$0xf]  ;;  %17227 = vst [vmem:[#allocation37_spill] sm:$0xff] %v15204_v59  ;;  %v13886_v35 = vld [vmem:[%s14303_s25 + $0x15c4] sm:$0xf0] }
 0x157   : > { %7315 = vmatpush.bf16.msrb.mxu3 %v11526_v55  ;;  %v13874_v55 = vld [vmem:[%s14303_s25 + $0x1564] sm:$0xf0]  ;;  %17228 = vst [vmem:[#allocation38_spill] sm:$0xff] %v15206_v63  ;;  %v11630_v44 = vor.u32 %v13842_v48, %v11629_v27  ;;  %v11813_v48 = vld [vmem:[%s14303_s25 + $0x15d0] sm:$0xf] }
 0x158   : > { %7274 = vmatpush.bf16.msrb.mxu0 %v11326_v50  ;;  %v11758_v47 = vor.u32 %v13874_v55, %v11757_v43  ;;  %v13840_v50 = vld [vmem:[%s14303_s25 + $0x1454] sm:$0xf0]  ;;  %v11741_v27 = vld [vmem:[%s14303_s25 + $0x1540] sm:$0xf]  ;;  %v7052_v22 = vpop.f32.mrf.mxu0 }
 0x159   : > { %7288 = vmatpush.bf16.msrb.mxu1 %v11390_v61  ;;  %v13888_v43 = vld [vmem:[%s14303_s25 + $0x15d4] sm:$0xf0]  ;;  %v11686_v61 = vor.u32 %v13856_v0, %v11685_v19  ;;  %v11805_v55 = vld [vmem:[%s14303_s25 + $0x15c0] sm:$0xf]  ;;  %v7053_v51 = vadd.f32 %v7052_v22, %v15161_v3 }
 0x15a   : > { %7302 = vmatpush.bf16.msrb.mxu2 %v11454_v58  ;;  %v11750_v58 = vor.u32 %v13872_v36, %v11749_v24  ;;  %v11814_v32 = vor.u32 %v13888_v43, %v11813_v48  ;;  %v13836_v19 = vld [vmem:[%s14303_s25 + $0x1434] sm:$0xf0]  ;;  %v11806_v0 = vor.u32 %v13886_v35, %v11805_v55  ;;  %v11733_v48 = vld [vmem:[%s14303_s25 + $0x1530] sm:$0xf]  ;;  %v11725_v22 = vld [vmem:[%s14303_s25 + $0x1520] sm:$0xf] }
 0x15b   : > { %7316 = vmatpush.bf16.msrb.mxu3 %v11518_v5  ;;  %7275 = vmatmul.bf16.vlgmr.msrb.gmra.mxu0 %v15197_v17  ;;  %v11677_v5 = vld [vmem:[%s14303_s25 + $0x14c0] sm:$0xf]  ;;  %v13852_v36 = vld [vmem:[%s14303_s25 + $0x14b4] sm:$0xf0]  ;;  %v11797_v43 = vld [vmem:[%s14303_s25 + $0x15b0] sm:$0xf] }
 0x15c   : > { %7323 = vmatpush.bf16.msra.mxu0 %v11638_v26  ;;  %7289 = vmatmul.bf16.vlgmr.msrb.gmra.mxu1 %v15206_v63  ;;  %v15229_v26 = vpop.f32.mrf.mxu2  ;;  %v13868_v3 = vld [vmem:[%s14303_s25 + $0x1534] sm:$0xf0]  ;;  %v13866_v55 = vld [vmem:[%s14303_s25 + $0x1524] sm:$0xf0]  ;;  %v13145_v63 = vld [vmem:[%s14398_s6 + $0xa4] sm:$0xf] }
 0x15d   : > { %7337 = vmatpush.bf16.msra.mxu1 %v11702_v53  ;;  %7303 = vmatmul.bf16.vlgmr.msrb.gmra.mxu2 %v15204_v59  ;;  %v11622_v53 = vor.u32 %v13840_v50, %v11621_v56  ;;  %v11742_v56 = vor.u32 %v13870_v10, %v11741_v27  ;;  %v11605_v50 = vld [vmem:[%s14303_s25 + $0x1430] sm:$0xf]  ;;  %v13850_v10 = vld [vmem:[%s14303_s25 + $0x14a4] sm:$0xf0]  ;;  %v13146_v59 = vld [vmem:[%s14398_s6 + $0xac] sm:$0xf] }
 0x15e   : > { %7351 = vmatpush.bf16.msra.mxu2 %v11766_v14  ;;  %7317 = vmatmul.bf16.vlgmr.msrb.gmra.mxu3 %v15212_v2  ;;  %v13854_v14 = vld [vmem:[%s14303_s25 + $0x14c4] sm:$0xf0]  ;;  %v13940_v2 = vld [vmem:[%s14303_s25 + $0x1774] sm:$0xf0]  ;;  %v8935_v17 = vld [vmem:[%s14398_s6 + $0x2a8] sm:$0xf0] }
 0x15f   : > { %7365 = vmatpush.bf16.msra.mxu3 %v11830_v8  ;;  %v15234_v8 = vpop.f32.mrf.mxu3 }
 0x160   : > { %7324 = vmatpush.bf16.msra.mxu0 %v11630_v44  ;;  %v11614_v44 = vor.u32 %v13838_v30, %v11613_v20  ;;  %v11734_v20 = vor.u32 %v13868_v3, %v11733_v48  ;;  %v11597_v30 = vld [vmem:[%s14303_s25 + $0x1420] sm:$0xf]  ;;  %v11717_v3 = vld [vmem:[%s14303_s25 + $0x1510] sm:$0xf]  ;;  %v15297_v37 = vpop.f32.mrf.mxu0 }
 0x161   : > { %7338 = vmatpush.bf16.msra.mxu1 %v11694_v62  ;;  %v7066_v62 = vpop.f32.mrf.mxu1 }
 0x162   : > { %7352 = vmatpush.bf16.msra.mxu2 %v11758_v47  ;;  %v11678_v47 = vor.u32 %v13854_v14, %v11677_v5  ;;  %v7067_v24 = vadd.f32 %v7066_v62, %v7053_v51  ;;  %v13834_v5 = vld [vmem:[%s14303_s25 + $0x1424] sm:$0xf0] }
 0x163   : > { %7366 = vmatpush.bf16.msra.mxu3 %v11822_v28  ;;  %v11669_v28 = vld [vmem:[%s14303_s25 + $0x14b0] sm:$0xf]  ;;  %v13882_v62 = vld [vmem:[%s14303_s25 + $0x15a4] sm:$0xf0] }
 0x164   : > { %7325 = vmatpush.bf16.msra.mxu0 %v11622_v53  ;;  %v13884_v53 = vld [vmem:[%s14303_s25 + $0x15b4] sm:$0xf0]  ;;  %v7080_v27 = vpop.f32.mrf.mxu2 }
 0x165   : > { %7339 = vmatpush.bf16.msra.mxu1 %v11686_v61  ;;  %v11606_v61 = vor.u32 %v13836_v19, %v11605_v50  ;;  %v11798_v14 = vor.u32 %v13884_v53, %v11797_v43  ;;  %v7081_v35 = vadd.f32 %v7080_v27, %v7067_v24  ;;  %v11653_v24 = vld [vmem:[%s14303_s25 + $0x1490] sm:$0xf]  ;;  %v13864_v43 = vld [vmem:[%s14303_s25 + $0x1514] sm:$0xf0]  ;;  %v13862_v27 = vld [vmem:[%s14303_s25 + $0x1504] sm:$0xf0] }
 0x166   : > { %7353 = vmatpush.bf16.msra.mxu2 %v11750_v58  ;;  %v11670_v58 = vor.u32 %v13852_v36, %v11669_v28  ;;  %v11726_v28 = vor.u32 %v13866_v55, %v11725_v22  ;;  %v13848_v36 = vld [vmem:[%s14303_s25 + $0x1494] sm:$0xf0]  ;;  %v11781_v53 = vld [vmem:[%s14303_s25 + $0x1590] sm:$0xf]  ;;  %v11718_v22 = vor.u32 %v13864_v43, %v11717_v3  ;;  %v11773_v55 = vld [vmem:[%s14303_s25 + $0x1580] sm:$0xf] }
 0x167   : > { %7367 = vmatpush.bf16.msra.mxu3 %v11814_v32  ;;  %v11661_v32 = vld [vmem:[%s14303_s25 + $0x14a0] sm:$0xf]  ;;  %v7094_v51 = vpop.f32.mrf.mxu3 }
 0x168   : > { %7326 = vmatpush.bf16.msra.mxu0 %v11614_v44  ;;  %v11789_v44 = vld [vmem:[%s14303_s25 + $0x15a0] sm:$0xf]  ;;  %v15256_v50 = vadd.f32 %v7094_v51, %v7081_v35  ;;  %v11662_v19 = vor.u32 %v13850_v10, %v11661_v32  ;;  %v13846_v32 = vld [vmem:[%s14303_s25 + $0x1484] sm:$0xf0]  ;;  %v11654_v10 = vor.u32 %v13848_v36, %v11653_v24  ;;  %v11893_v51 = vld [vmem:[%s14303_s25 + $0x1670] sm:$0xf] }
 0x169   : > { %7340 = vmatpush.bf16.msra.mxu1 %v11678_v47  ;;  %v11598_v47 = vor.u32 %v13834_v5, %v11597_v30  ;;  %v11790_v48 = vor.u32 %v13882_v62, %v11789_v44  ;;  %v11645_v5 = vld [vmem:[%s14303_s25 + $0x1480] sm:$0xf]  ;;  %v13878_v35 = vld [vmem:[%s14303_s25 + $0x1584] sm:$0xf0]  ;;  %v13908_v62 = vld [vmem:[%s14303_s25 + $0x1674] sm:$0xf0] }
 0x16a   : > { %7354 = vmatpush.bf16.msra.mxu2 %v11742_v56  ;;  %v11589_v56 = vld [vmem:[%s14303_s25 + $0x1410] sm:$0xf]  ;;  %v13956_v24 = vld [vmem:[%s14303_s25 + $0x17f4] sm:$0xf0]  ;;  %v8925_v36 = vld [vmem:[%s14398_s6 + $0xa0] sm:$0xf] }
 0x16b   : > { %7368 = vmatpush.bf16.msra.mxu3 %v11806_v0  ;;  %v13832_v0 = vld [vmem:[%s14303_s25 + $0x1414] sm:$0xf0]  ;;  %v13177_v3 = vld [vmem:[%s14398_s6 + $0x29c] sm:$0xf0] }
 0x16c   : > { %7327 = vmatpush.bf16.msra.mxu0 %v11606_v61  ;;  %v13880_v61 = vld [vmem:[%s14303_s25 + $0x1594] sm:$0xf0]  ;;  %v11590_v30 = vor.u32 %v13832_v0, %v11589_v56  ;;  %v12021_v0 = vld [vmem:[%s14303_s25 + $0x1770] sm:$0xf] }
 0x16d   : > { %7341 = vmatpush.bf16.msra.mxu1 %v11670_v58  ;;  %v11581_v58 = vld [vmem:[%s14303_s25 + $0x1400] sm:$0xf]  ;;  %v11782_v44 = vor.u32 %v13880_v61, %v11781_v53  ;;  %v13924_v56 = vld [vmem:[%s14303_s25 + $0x16f4] sm:$0xf0]  ;;  %v8933_v53 = vld [vmem:[%s14398_s6 + $0xa8] sm:$0xf] }
 0x16e   : > { %7355 = vmatpush.bf16.msra.mxu2 %v11734_v20  ;;  %v13830_v20 = vld [vmem:[%s14303_s25 + $0x1404] sm:$0xf0] }
 0x16f   : > { %7369 = vmatpush.bf16.msra.mxu3 %v11798_v14  ;;  %v11709_v14 = vld [vmem:[%s14303_s25 + $0x1500] sm:$0xf]  ;;  %v13178_v61 = vld [vmem:[%s14398_s6 + $0x2a4] sm:$0xf0] }
 0x170   : > { %7328 = vmatpush.bf16.msra.mxu0 %v11598_v47  ;;  %v11957_v47 = vld [vmem:[%s14303_s25 + $0x16f0] sm:$0xf]  ;;  %v11710_v43 = vor.u32 %v13862_v27, %v11709_v14  ;;  %v15292_v14 = vor.u32 %v13177_v3, %v8925_v36  ;;  %v13922_v27 = vld [vmem:[%s14303_s25 + $0x16e4] sm:$0xf0]  ;;  %v13920_v3 = vld [vmem:[%s14303_s25 + $0x16d4] sm:$0xf0] }
 0x171   : > { %7342 = vmatpush.bf16.msra.mxu1 %v11662_v19  ;;  %v12085_v19 = vld [vmem:[%s14303_s25 + $0x17f0] sm:$0xf]  ;;  %v11958_v34 = vor.u32 %v13924_v56, %v11957_v47  ;;  %v15307_v47 = vor.u32 %v13146_v59, %v8935_v17  ;;  %v13936_v59 = vld [vmem:[%s14303_s25 + $0x1754] sm:$0xf0] }
 0x172   : > { %7356 = vmatpush.bf16.msra.mxu2 %v11726_v28  ;;  %v11582_v28 = vor.u32 %v13830_v20, %v11581_v58  ;;  %v11894_v58 = vor.u32 %v13908_v62, %v11893_v51  ;;  %v8927_v20 = vld [vmem:[%s14398_s6 + $0x2a0] sm:$0xf0]  ;;  %17230 = vst [vmem:[#allocation40_spill] sm:$0xff] %v15292_v14  ;;  %v13954_v51 = vld [vmem:[%s14303_s25 + $0x17e4] sm:$0xf0]  ;;  %v15305_v62 = vpop.f32.mrf.mxu1 }
 0x173   : > { %7370 = vmatpush.bf16.msra.mxu3 %v11790_v48  ;;  %v11646_v48 = vor.u32 %v13846_v32, %v11645_v5  ;;  %v11949_v5 = vld [vmem:[%s14303_s25 + $0x16e0] sm:$0xf]  ;;  %v12086_v32 = vor.u32 %v13956_v24, %v12085_v19  ;;  %17233 = vst [vmem:[#allocation43_spill] sm:$0xff] %v15307_v47  ;;  %v11941_v24 = vld [vmem:[%s14303_s25 + $0x16d0] sm:$0xf] }
 0x174   : > { %7329 = vmatpush.bf16.msra.mxu0 %v11590_v30  ;;  %v11774_v30 = vor.u32 %v13878_v35, %v11773_v55  ;;  %v15299_v55 = vor.u32 %v13178_v61, %v8933_v53  ;;  %v12077_v35 = vld [vmem:[%s14303_s25 + $0x17e0] sm:$0xf]  ;;  %v12005_v17 = vld [vmem:[%s14303_s25 + $0x1750] sm:$0xf]  ;;  %v13902_v61 = vld [vmem:[%s14303_s25 + $0x1644] sm:$0xf0] }
 0x175   : > { %7343 = vmatpush.bf16.msra.mxu1 %v11654_v10  ;;  %v12022_v10 = vor.u32 %v13940_v2, %v12021_v0  ;;  %v15301_v2 = vor.u32 %v13145_v63, %v8927_v20  ;;  %v11950_v0 = vor.u32 %v13922_v27, %v11949_v5  ;;  %v11877_v63 = vld [vmem:[%s14303_s25 + $0x1650] sm:$0xf]  ;;  %v12078_v36 = vor.u32 %v13954_v51, %v12077_v35  ;;  %v11869_v53 = vld [vmem:[%s14303_s25 + $0x1640] sm:$0xf]  ;;  %v13934_v5 = vld [vmem:[%s14303_s25 + $0x1744] sm:$0xf0] }
 0x176   : > { %7357 = vmatpush.bf16.msra.mxu2 %v11718_v22  ;;  %v11885_v22 = vld [vmem:[%s14303_s25 + $0x1660] sm:$0xf]  ;;  %17231 = vst [vmem:[#allocation41_spill] sm:$0xff] %v15299_v55  ;;  %v13950_v35 = vld [vmem:[%s14303_s25 + $0x17c4] sm:$0xf0] }
 0x177   : > { %7371 = vmatpush.bf16.msra.mxu3 %v11782_v44  ;;  %v13938_v44 = vld [vmem:[%s14303_s25 + $0x1764] sm:$0xf0]  ;;  %17232 = vst [vmem:[#allocation42_spill] sm:$0xff] %v15301_v2  ;;  %v11886_v56 = vor.u32 %v13906_v42, %v11885_v22  ;;  %v12069_v42 = vld [vmem:[%s14303_s25 + $0x17d0] sm:$0xf] }
 0x178   : > { %7330 = vmatpush.bf16.msra.mxu0 %v11582_v28  ;;  %v12014_v19 = vor.u32 %v13938_v44, %v12013_v38  ;;  %v13904_v28 = vld [vmem:[%s14303_s25 + $0x1654] sm:$0xf0]  ;;  %v11997_v22 = vld [vmem:[%s14303_s25 + $0x1740] sm:$0xf]  ;;  %v7108_v27 = vpop.f32.mrf.mxu0 }
 0x179   : > { %7344 = vmatpush.bf16.msra.mxu1 %v11646_v48  ;;  %v13952_v38 = vld [vmem:[%s14303_s25 + $0x17d4] sm:$0xf0]  ;;  %v11942_v48 = vor.u32 %v13920_v3, %v11941_v24  ;;  %v12061_v44 = vld [vmem:[%s14303_s25 + $0x17c0] sm:$0xf]  ;;  %v7109_v51 = vadd.f32 %v7108_v27, %v15256_v50 }
 0x17a   : > { %7358 = vmatpush.bf16.msra.mxu2 %v11710_v43  ;;  %v12006_v43 = vor.u32 %v13936_v59, %v12005_v17  ;;  %v12070_v20 = vor.u32 %v13952_v38, %v12069_v42  ;;  %v13900_v24 = vld [vmem:[%s14303_s25 + $0x1634] sm:$0xf0]  ;;  %v12062_v3 = vor.u32 %v13950_v35, %v12061_v44  ;;  %v11989_v42 = vld [vmem:[%s14303_s25 + $0x1730] sm:$0xf]  ;;  %v11981_v27 = vld [vmem:[%s14303_s25 + $0x1720] sm:$0xf] }
 0x17b   : > { %7372 = vmatpush.bf16.msra.mxu3 %v11774_v30  ;;  %7331 = vmatmul.bf16.vlgmr.msra.gmra.mxu0 %v15292_v14  ;;  %v11933_v30 = vld [vmem:[%s14303_s25 + $0x16c0] sm:$0xf]  ;;  %v13916_v59 = vld [vmem:[%s14303_s25 + $0x16b4] sm:$0xf0]  ;;  %v12053_v38 = vld [vmem:[%s14303_s25 + $0x17b0] sm:$0xf] }
 0x17c   : > { %7379 = vmatpush.bf16.msrb.mxu0 %v11894_v58  ;;  %7345 = vmatmul.bf16.vlgmr.msra.gmra.mxu1 %v15301_v2  ;;  %v15324_v58 = vpop.f32.mrf.mxu2  ;;  %v13932_v50 = vld [vmem:[%s14303_s25 + $0x1734] sm:$0xf0]  ;;  %v13930_v44 = vld [vmem:[%s14303_s25 + $0x1724] sm:$0xf0]  ;;  %v13147_v2 = vld [vmem:[%s14398_s6 + $0xb4] sm:$0xf] }
 0x17d   : > { %7393 = vmatpush.bf16.msrb.mxu1 %v11958_v34  ;;  %7359 = vmatmul.bf16.vlgmr.msra.gmra.mxu2 %v15299_v55  ;;  %v11878_v34 = vor.u32 %v13904_v28, %v11877_v63  ;;  %v11998_v63 = vor.u32 %v13934_v5, %v11997_v22  ;;  %v11861_v28 = vld [vmem:[%s14303_s25 + $0x1630] sm:$0xf]  ;;  %v13914_v5 = vld [vmem:[%s14303_s25 + $0x16a4] sm:$0xf0]  ;;  %v13148_v55 = vld [vmem:[%s14398_s6 + $0xbc] sm:$0xf] }
 0x17e   : > { %7407 = vmatpush.bf16.msrb.mxu2 %v12022_v10  ;;  %7373 = vmatmul.bf16.vlgmr.msra.gmra.mxu3 %v15307_v47  ;;  %v13918_v10 = vld [vmem:[%s14303_s25 + $0x16c4] sm:$0xf0]  ;;  %v14004_v47 = vld [vmem:[%s14303_s25 + $0x1974] sm:$0xf0]  ;;  %v8951_v14 = vld [vmem:[%s14398_s6 + $0x2b8] sm:$0xf0] }
 0x17f   : > { %7421 = vmatpush.bf16.msrb.mxu3 %v12086_v32  ;;  %v15329_v32 = vpop.f32.mrf.mxu3 }
 0x180   : > { %7380 = vmatpush.bf16.msrb.mxu0 %v11886_v56  ;;  %v11870_v56 = vor.u32 %v13902_v61, %v11869_v53  ;;  %v11990_v53 = vor.u32 %v13932_v50, %v11989_v42  ;;  %v11853_v61 = vld [vmem:[%s14303_s25 + $0x1620] sm:$0xf]  ;;  %v11973_v50 = vld [vmem:[%s14303_s25 + $0x1710] sm:$0xf]  ;;  %v15392_v45 = vpop.f32.mrf.mxu0 }
 0x181   : > { %7394 = vmatpush.bf16.msrb.mxu1 %v11950_v0  ;;  %v7122_v0 = vpop.f32.mrf.mxu1 }
 0x182   : > { %7408 = vmatpush.bf16.msrb.mxu2 %v12014_v19  ;;  %v11934_v19 = vor.u32 %v13918_v10, %v11933_v30  ;;  %v7123_v17 = vadd.f32 %v7122_v0, %v7109_v51  ;;  %v13898_v30 = vld [vmem:[%s14303_s25 + $0x1624] sm:$0xf0] }
 0x183   : > { %7422 = vmatpush.bf16.msrb.mxu3 %v12078_v36  ;;  %v11925_v36 = vld [vmem:[%s14303_s25 + $0x16b0] sm:$0xf]  ;;  %v13946_v0 = vld [vmem:[%s14303_s25 + $0x17a4] sm:$0xf0] }
 0x184   : > { %7381 = vmatpush.bf16.msrb.mxu0 %v11878_v34  ;;  %v13948_v34 = vld [vmem:[%s14303_s25 + $0x17b4] sm:$0xf0]  ;;  %v7136_v22 = vpop.f32.mrf.mxu2 }
 0x185   : > { %7395 = vmatpush.bf16.msrb.mxu1 %v11942_v48  ;;  %v11862_v48 = vor.u32 %v13900_v24, %v11861_v28  ;;  %v12054_v10 = vor.u32 %v13948_v34, %v12053_v38  ;;  %v7137_v35 = vadd.f32 %v7136_v22, %v7123_v17  ;;  %v11909_v17 = vld [vmem:[%s14303_s25 + $0x1690] sm:$0xf]  ;;  %v13928_v38 = vld [vmem:[%s14303_s25 + $0x1714] sm:$0xf0]  ;;  %v13926_v22 = vld [vmem:[%s14303_s25 + $0x1704] sm:$0xf0] }
 0x186   : > { %7409 = vmatpush.bf16.msrb.mxu2 %v12006_v43  ;;  %v11926_v43 = vor.u32 %v13916_v59, %v11925_v36  ;;  %v11982_v36 = vor.u32 %v13930_v44, %v11981_v27  ;;  %v13912_v59 = vld [vmem:[%s14303_s25 + $0x1694] sm:$0xf0]  ;;  %v12037_v34 = vld [vmem:[%s14303_s25 + $0x1790] sm:$0xf]  ;;  %v11974_v27 = vor.u32 %v13928_v38, %v11973_v50  ;;  %v12029_v44 = vld [vmem:[%s14303_s25 + $0x1780] sm:$0xf] }
 0x187   : > { %7423 = vmatpush.bf16.msrb.mxu3 %v12070_v20  ;;  %v11917_v20 = vld [vmem:[%s14303_s25 + $0x16a0] sm:$0xf]  ;;  %v7150_v51 = vpop.f32.mrf.mxu3  ;;  %v13179_v50 = vld [vmem:[%s14398_s6 + $0x2ac] sm:$0xf0] }
 0x188   : > { %7382 = vmatpush.bf16.msrb.mxu0 %v11870_v56  ;;  %v12045_v56 = vld [vmem:[%s14303_s25 + $0x17a0] sm:$0xf]  ;;  %v15351_v28 = vadd.f32 %v7150_v51, %v7137_v35  ;;  %v11918_v24 = vor.u32 %v13914_v5, %v11917_v20  ;;  %v13910_v20 = vld [vmem:[%s14303_s25 + $0x1684] sm:$0xf0]  ;;  %v11910_v5 = vor.u32 %v13912_v59, %v11909_v17  ;;  %v12149_v51 = vld [vmem:[%s14303_s25 + $0x1870] sm:$0xf] }
 0x189   : > { %7396 = vmatpush.bf16.msrb.mxu1 %v11934_v19  ;;  %v11854_v19 = vor.u32 %v13898_v30, %v11853_v61  ;;  %v12046_v42 = vor.u32 %v13946_v0, %v12045_v56  ;;  %v11901_v30 = vld [vmem:[%s14303_s25 + $0x1680] sm:$0xf]  ;;  %v13942_v35 = vld [vmem:[%s14303_s25 + $0x1784] sm:$0xf0]  ;;  %v13972_v0 = vld [vmem:[%s14303_s25 + $0x1874] sm:$0xf0] }
 0x18a   : > { %7410 = vmatpush.bf16.msrb.mxu2 %v11998_v63  ;;  %v11845_v63 = vld [vmem:[%s14303_s25 + $0x1610] sm:$0xf]  ;;  %v14020_v17 = vld [vmem:[%s14303_s25 + $0x19f4] sm:$0xf0] }
 0x18b   : > { %7424 = vmatpush.bf16.msrb.mxu3 %v12062_v3  ;;  %v13896_v3 = vld [vmem:[%s14303_s25 + $0x1614] sm:$0xf0]  ;;  %v8941_v59 = vld [vmem:[%s14398_s6 + $0xb0] sm:$0xf] }
 0x18c   : > { %7383 = vmatpush.bf16.msrb.mxu0 %v11862_v48  ;;  %v13944_v48 = vld [vmem:[%s14303_s25 + $0x1794] sm:$0xf0]  ;;  %v11846_v61 = vor.u32 %v13896_v3, %v11845_v63  ;;  %v12277_v3 = vld [vmem:[%s14303_s25 + $0x1970] sm:$0xf] }
 0x18d   : > { %7397 = vmatpush.bf16.msrb.mxu1 %v11926_v43  ;;  %v11837_v43 = vld [vmem:[%s14303_s25 + $0x1600] sm:$0xf]  ;;  %v12038_v56 = vor.u32 %v13944_v48, %v12037_v34  ;;  %v13988_v63 = vld [vmem:[%s14303_s25 + $0x18f4] sm:$0xf0] }
 0x18e   : > { %7411 = vmatpush.bf16.msrb.mxu2 %v11990_v53  ;;  %v13894_v53 = vld [vmem:[%s14303_s25 + $0x1604] sm:$0xf0]  ;;  %v8949_v34 = vld [vmem:[%s14398_s6 + $0xb8] sm:$0xf] }
 0x18f   : > { %7425 = vmatpush.bf16.msrb.mxu3 %v12054_v10  ;;  %v11965_v10 = vld [vmem:[%s14303_s25 + $0x1700] sm:$0xf]  ;;  %v13180_v48 = vld [vmem:[%s14398_s6 + $0x2b4] sm:$0xf0] }
 0x190   : > { %7384 = vmatpush.bf16.msrb.mxu0 %v11854_v19  ;;  %v12213_v19 = vld [vmem:[%s14303_s25 + $0x18f0] sm:$0xf]  ;;  %v11966_v38 = vor.u32 %v13926_v22, %v11965_v10  ;;  %v15387_v10 = vor.u32 %v13179_v50, %v8941_v59  ;;  %v13986_v22 = vld [vmem:[%s14303_s25 + $0x18e4] sm:$0xf0]  ;;  %v13984_v50 = vld [vmem:[%s14303_s25 + $0x18d4] sm:$0xf0] }
 0x191   : > { %7398 = vmatpush.bf16.msrb.mxu1 %v11918_v24  ;;  %v12341_v24 = vld [vmem:[%s14303_s25 + $0x19f0] sm:$0xf]  ;;  %v12214_v33 = vor.u32 %v13988_v63, %v12213_v19  ;;  %v15402_v19 = vor.u32 %v13148_v55, %v8951_v14  ;;  %v14000_v55 = vld [vmem:[%s14303_s25 + $0x1954] sm:$0xf0] }
 0x192   : > { %7412 = vmatpush.bf16.msrb.mxu2 %v11982_v36  ;;  %v11838_v36 = vor.u32 %v13894_v53, %v11837_v43  ;;  %v12150_v43 = vor.u32 %v13972_v0, %v12149_v51  ;;  %v8943_v53 = vld [vmem:[%s14398_s6 + $0x2b0] sm:$0xf0]  ;;  %17234 = vst [vmem:[#allocation44_spill] sm:$0xff] %v15387_v10  ;;  %v14018_v51 = vld [vmem:[%s14303_s25 + $0x19e4] sm:$0xf0]  ;;  %v15400_v0 = vpop.f32.mrf.mxu1 }
 0x193   : > { %7426 = vmatpush.bf16.msrb.mxu3 %v12046_v42  ;;  %v11902_v42 = vor.u32 %v13910_v20, %v11901_v30  ;;  %v12205_v30 = vld [vmem:[%s14303_s25 + $0x18e0] sm:$0xf]  ;;  %v12342_v20 = vor.u32 %v14020_v17, %v12341_v24  ;;  %17237 = vst [vmem:[#allocation47_spill] sm:$0xff] %v15402_v19  ;;  %v12197_v17 = vld [vmem:[%s14303_s25 + $0x18d0] sm:$0xf] }
 0x194   : > { %7385 = vmatpush.bf16.msrb.mxu0 %v11846_v61  ;;  %v12030_v61 = vor.u32 %v13942_v35, %v12029_v44  ;;  %v15394_v44 = vor.u32 %v13180_v48, %v8949_v34  ;;  %v12333_v35 = vld [vmem:[%s14303_s25 + $0x19e0] sm:$0xf]  ;;  %v12261_v14 = vld [vmem:[%s14303_s25 + $0x1950] sm:$0xf]  ;;  %v13966_v48 = vld [vmem:[%s14303_s25 + $0x1844] sm:$0xf0] }
 0x195   : > { %7399 = vmatpush.bf16.msrb.mxu1 %v11910_v5  ;;  %v12278_v5 = vor.u32 %v14004_v47, %v12277_v3  ;;  %v15396_v47 = vor.u32 %v13147_v2, %v8943_v53  ;;  %v12206_v3 = vor.u32 %v13986_v22, %v12205_v30  ;;  %v12133_v2 = vld [vmem:[%s14303_s25 + $0x1850] sm:$0xf]  ;;  %v12334_v59 = vor.u32 %v14018_v51, %v12333_v35  ;;  %v12125_v34 = vld [vmem:[%s14303_s25 + $0x1840] sm:$0xf]  ;;  %v13998_v30 = vld [vmem:[%s14303_s25 + $0x1944] sm:$0xf0] }
 0x196   : > { %7413 = vmatpush.bf16.msrb.mxu2 %v11974_v27  ;;  %v12141_v27 = vld [vmem:[%s14303_s25 + $0x1860] sm:$0xf]  ;;  %17235 = vst [vmem:[#allocation45_spill] sm:$0xff] %v15394_v44  ;;  %v14014_v35 = vld [vmem:[%s14303_s25 + $0x19c4] sm:$0xf0] }
 0x197   : > { %7427 = vmatpush.bf16.msrb.mxu3 %v12038_v56  ;;  %v14002_v56 = vld [vmem:[%s14303_s25 + $0x1964] sm:$0xf0]  ;;  %17236 = vst [vmem:[#allocation46_spill] sm:$0xff] %v15396_v47  ;;  %v12142_v63 = vor.u32 %v13970_v49, %v12141_v27  ;;  %v12325_v49 = vld [vmem:[%s14303_s25 + $0x19d0] sm:$0xf] }
 0x198   : > { %7386 = vmatpush.bf16.msrb.mxu0 %v11838_v36  ;;  %v12270_v24 = vor.u32 %v14002_v56, %v12269_v46  ;;  %v13968_v36 = vld [vmem:[%s14303_s25 + $0x1854] sm:$0xf0]  ;;  %v12253_v27 = vld [vmem:[%s14303_s25 + $0x1940] sm:$0xf]  ;;  %v7164_v22 = vpop.f32.mrf.mxu0 }
 0x199   : > { %7400 = vmatpush.bf16.msrb.mxu1 %v11902_v42  ;;  %v14016_v46 = vld [vmem:[%s14303_s25 + $0x19d4] sm:$0xf0]  ;;  %v12198_v42 = vor.u32 %v13984_v50, %v12197_v17  ;;  %v12317_v56 = vld [vmem:[%s14303_s25 + $0x19c0] sm:$0xf]  ;;  %v7165_v51 = vadd.f32 %v7164_v22, %v15351_v28 }
 0x19a   : > { %7414 = vmatpush.bf16.msrb.mxu2 %v11966_v38  ;;  %v12262_v38 = vor.u32 %v14000_v55, %v12261_v14  ;;  %v12326_v53 = vor.u32 %v14016_v46, %v12325_v49  ;;  %v13964_v17 = vld [vmem:[%s14303_s25 + $0x1834] sm:$0xf0]  ;;  %v12318_v50 = vor.u32 %v14014_v35, %v12317_v56  ;;  %v12245_v49 = vld [vmem:[%s14303_s25 + $0x1930] sm:$0xf]  ;;  %v12237_v22 = vld [vmem:[%s14303_s25 + $0x1920] sm:$0xf] }
 0x19b   : > { %7428 = vmatpush.bf16.msrb.mxu3 %v12030_v61  ;;  %7387 = vmatmul.bf16.vlgmr.msrb.gmra.mxu0 %v15387_v10  ;;  %v12189_v61 = vld [vmem:[%s14303_s25 + $0x18c0] sm:$0xf]  ;;  %v13980_v55 = vld [vmem:[%s14303_s25 + $0x18b4] sm:$0xf0]  ;;  %v12309_v46 = vld [vmem:[%s14303_s25 + $0x19b0] sm:$0xf] }
 0x19c   : > { %7435 = vmatpush.bf16.msra.mxu0 %v12150_v43  ;;  %7401 = vmatmul.bf16.vlgmr.msrb.gmra.mxu1 %v15396_v47  ;;  %v15419_v43 = vpop.f32.mrf.mxu2  ;;  %v13996_v28 = vld [vmem:[%s14303_s25 + $0x1934] sm:$0xf0]  ;;  %v13994_v56 = vld [vmem:[%s14303_s25 + $0x1924] sm:$0xf0]  ;;  %v13149_v47 = vld [vmem:[%s14398_s6 + $0xc4] sm:$0xf] }
 0x19d   : > { %7449 = vmatpush.bf16.msra.mxu1 %v12214_v33  ;;  %7415 = vmatmul.bf16.vlgmr.msrb.gmra.mxu2 %v15394_v44  ;;  %v12134_v33 = vor.u32 %v13968_v36, %v12133_v2  ;;  %v12254_v2 = vor.u32 %v13998_v30, %v12253_v27  ;;  %v12117_v36 = vld [vmem:[%s14303_s25 + $0x1830] sm:$0xf]  ;;  %v13978_v30 = vld [vmem:[%s14303_s25 + $0x18a4] sm:$0xf0]  ;;  %v13150_v44 = vld [vmem:[%s14398_s6 + $0xcc] sm:$0xf] }
 0x19e   : > { %7463 = vmatpush.bf16.msra.mxu2 %v12278_v5  ;;  %7429 = vmatmul.bf16.vlgmr.msrb.gmra.mxu3 %v15402_v19  ;;  %v13982_v5 = vld [vmem:[%s14303_s25 + $0x18c4] sm:$0xf0]  ;;  %v14068_v19 = vld [vmem:[%s14303_s25 + $0x1b74] sm:$0xf0]  ;;  %v8967_v10 = vld [vmem:[%s14398_s6 + $0x2c8] sm:$0xf0] }
 0x19f   : > { %7477 = vmatpush.bf16.msra.mxu3 %v12342_v20  ;;  %v15424_v20 = vpop.f32.mrf.mxu3 }
 0x1a0   : > { %7436 = vmatpush.bf16.msra.mxu0 %v12142_v63  ;;  %17238 = vst [vmem:[#allocation48_spill] sm:$0xff] %v15424_v20  ;;  %v12126_v63 = vor.u32 %v13966_v48, %v12125_v34  ;;  %v12246_v34 = vor.u32 %v13996_v28, %v12245_v49  ;;  %v12109_v48 = vld [vmem:[%s14303_s25 + $0x1820] sm:$0xf]  ;;  %v12229_v28 = vld [vmem:[%s14303_s25 + $0x1910] sm:$0xf] }
 0x1a1   : > { %7450 = vmatpush.bf16.msra.mxu1 %v12206_v3  ;;  %v7178_v3 = vpop.f32.mrf.mxu1  ;;  %v12525_v20 = vld [vmem:[%s14303_s25 + $0x1b60] sm:$0xf] }
 0x1a2   : > { %7464 = vmatpush.bf16.msra.mxu2 %v12270_v24  ;;  %v12190_v24 = vor.u32 %v13982_v5, %v12189_v61  ;;  %v7179_v14 = vadd.f32 %v7178_v3, %v7165_v51  ;;  %v13962_v61 = vld [vmem:[%s14303_s25 + $0x1824] sm:$0xf0] }
 0x1a3   : > { %7478 = vmatpush.bf16.msra.mxu3 %v12334_v59  ;;  %v12181_v59 = vld [vmem:[%s14303_s25 + $0x18b0] sm:$0xf]  ;;  %v14010_v3 = vld [vmem:[%s14303_s25 + $0x19a4] sm:$0xf0] }
 0x1a4   : > { %7437 = vmatpush.bf16.msra.mxu0 %v12134_v33  ;;  %v14012_v33 = vld [vmem:[%s14303_s25 + $0x19b4] sm:$0xf0]  ;;  %v7192_v27 = vpop.f32.mrf.mxu2 }
 0x1a5   : > { %7451 = vmatpush.bf16.msra.mxu1 %v12198_v42  ;;  %v12118_v42 = vor.u32 %v13964_v17, %v12117_v36  ;;  %v12310_v5 = vor.u32 %v14012_v33, %v12309_v46  ;;  %v7193_v35 = vadd.f32 %v7192_v27, %v7179_v14  ;;  %v12165_v14 = vld [vmem:[%s14303_s25 + $0x1890] sm:$0xf]  ;;  %v13992_v46 = vld [vmem:[%s14303_s25 + $0x1914] sm:$0xf0]  ;;  %v13990_v27 = vld [vmem:[%s14303_s25 + $0x1904] sm:$0xf0] }
 0x1a6   : > { %7465 = vmatpush.bf16.msra.mxu2 %v12262_v38  ;;  %v12182_v38 = vor.u32 %v13980_v55, %v12181_v59  ;;  %v12238_v59 = vor.u32 %v13994_v56, %v12237_v22  ;;  %v13976_v55 = vld [vmem:[%s14303_s25 + $0x1894] sm:$0xf0]  ;;  %v12293_v33 = vld [vmem:[%s14303_s25 + $0x1990] sm:$0xf]  ;;  %v12230_v22 = vor.u32 %v13992_v46, %v12229_v28  ;;  %v12285_v56 = vld [vmem:[%s14303_s25 + $0x1980] sm:$0xf] }
 0x1a7   : > { %7479 = vmatpush.bf16.msra.mxu3 %v12326_v53  ;;  %v12173_v53 = vld [vmem:[%s14303_s25 + $0x18a0] sm:$0xf]  ;;  %v7206_v51 = vpop.f32.mrf.mxu3 }
 0x1a8   : > { %7438 = vmatpush.bf16.msra.mxu0 %v12126_v63  ;;  %v12301_v63 = vld [vmem:[%s14303_s25 + $0x19a0] sm:$0xf]  ;;  %v15446_v36 = vadd.f32 %v7206_v51, %v7193_v35  ;;  %v12174_v17 = vor.u32 %v13978_v30, %v12173_v53  ;;  %v13974_v53 = vld [vmem:[%s14303_s25 + $0x1884] sm:$0xf0]  ;;  %v12166_v30 = vor.u32 %v13976_v55, %v12165_v14  ;;  %v12405_v51 = vld [vmem:[%s14303_s25 + $0x1a70] sm:$0xf] }
 0x1a9   : > { %7452 = vmatpush.bf16.msra.mxu1 %v12190_v24  ;;  %v12110_v24 = vor.u32 %v13962_v61, %v12109_v48  ;;  %v12302_v49 = vor.u32 %v14010_v3, %v12301_v63  ;;  %v12157_v61 = vld [vmem:[%s14303_s25 + $0x1880] sm:$0xf]  ;;  %v14006_v35 = vld [vmem:[%s14303_s25 + $0x1984] sm:$0xf0]  ;;  %v14036_v3 = vld [vmem:[%s14303_s25 + $0x1a74] sm:$0xf0] }
 0x1aa   : > { %7466 = vmatpush.bf16.msra.mxu2 %v12254_v2  ;;  %v12101_v2 = vld [vmem:[%s14303_s25 + $0x1810] sm:$0xf]  ;;  %17239 = vst [vmem:[#allocation49_spill] sm:$0xff] %v15446_v36  ;;  %v14084_v14 = vld [vmem:[%s14303_s25 + $0x1bf4] sm:$0xf0] }
 0x1ab   : > { %7480 = vmatpush.bf16.msra.mxu3 %v12318_v50  ;;  %v13960_v50 = vld [vmem:[%s14303_s25 + $0x1814] sm:$0xf0]  ;;  %v8957_v55 = vld [vmem:[%s14398_s6 + $0xc0] sm:$0xf]  ;;  %v14034_v36 = vld [vmem:[%s14303_s25 + $0x1a64] sm:$0xf0] }
 0x1ac   : > { %7439 = vmatpush.bf16.msra.mxu0 %v12118_v42  ;;  %v14008_v42 = vld [vmem:[%s14303_s25 + $0x1994] sm:$0xf0]  ;;  %v12102_v48 = vor.u32 %v13960_v50, %v12101_v2  ;;  %v12533_v50 = vld [vmem:[%s14303_s25 + $0x1b70] sm:$0xf]  ;;  %v13181_v28 = vld [vmem:[%s14398_s6 + $0x2bc] sm:$0xf0] }
 0x1ad   : > { %7453 = vmatpush.bf16.msra.mxu1 %v12182_v38  ;;  %v12093_v38 = vld [vmem:[%s14303_s25 + $0x1800] sm:$0xf]  ;;  %v12294_v63 = vor.u32 %v14008_v42, %v12293_v33  ;;  %v14052_v2 = vld [vmem:[%s14303_s25 + $0x1af4] sm:$0xf0]  ;;  %v8965_v33 = vld [vmem:[%s14398_s6 + $0xc8] sm:$0xf] }
 0x1ae   : > { %7467 = vmatpush.bf16.msra.mxu2 %v12246_v34  ;;  %v13958_v34 = vld [vmem:[%s14303_s25 + $0x1804] sm:$0xf0] }
 0x1af   : > { %7481 = vmatpush.bf16.msra.mxu3 %v12310_v5  ;;  %v12221_v5 = vld [vmem:[%s14303_s25 + $0x1900] sm:$0xf]  ;;  %v13182_v42 = vld [vmem:[%s14398_s6 + $0x2c4] sm:$0xf0] }
 0x1b0   : > { %7440 = vmatpush.bf16.msra.mxu0 %v12110_v24  ;;  %v12469_v24 = vld [vmem:[%s14303_s25 + $0x1af0] sm:$0xf]  ;;  %v12222_v46 = vor.u32 %v13990_v27, %v12221_v5  ;;  %v15482_v5 = vor.u32 %v13181_v28, %v8957_v55  ;;  %v14050_v27 = vld [vmem:[%s14303_s25 + $0x1ae4] sm:$0xf0]  ;;  %v14048_v55 = vld [vmem:[%s14303_s25 + $0x1ad4] sm:$0xf0] }
 0x1b1   : > { %7454 = vmatpush.bf16.msra.mxu1 %v12174_v17  ;;  %v12597_v17 = vld [vmem:[%s14303_s25 + $0x1bf0] sm:$0xf]  ;;  %v12470_v41 = vor.u32 %v14052_v2, %v12469_v24 }
 0x1b2   : > { %7468 = vmatpush.bf16.msra.mxu2 %v12238_v59  ;;  %v12094_v59 = vor.u32 %v13958_v34, %v12093_v38  ;;  %v12406_v38 = vor.u32 %v14036_v3, %v12405_v51  ;;  %v8959_v34 = vld [vmem:[%s14398_s6 + $0x2c0] sm:$0xf0]  ;;  %17240 = vst [vmem:[#allocation50_spill] sm:$0xff] %v15482_v5  ;;  %v14082_v51 = vld [vmem:[%s14303_s25 + $0x1be4] sm:$0xf0]  ;;  %v15493_v3 = vor.u32 %v13150_v44, %v8967_v10 }
 0x1b3   : > { %7482 = vmatpush.bf16.msra.mxu3 %v12302_v49  ;;  %v12158_v49 = vor.u32 %v13974_v53, %v12157_v61  ;;  %v12461_v61 = vld [vmem:[%s14303_s25 + $0x1ae0] sm:$0xf]  ;;  %v12598_v53 = vor.u32 %v14084_v14, %v12597_v17  ;;  %v12389_v17 = vld [vmem:[%s14303_s25 + $0x1a50] sm:$0xf]  ;;  %v14064_v44 = vld [vmem:[%s14303_s25 + $0x1b54] sm:$0xf0] }
 0x1b4   : > { %7441 = vmatpush.bf16.msra.mxu0 %v12102_v48  ;;  %v12286_v48 = vor.u32 %v14006_v35, %v12285_v56  ;;  %v15487_v56 = vor.u32 %v13182_v42, %v8965_v33  ;;  %v15489_v35 = vor.u32 %v13149_v47, %v8959_v34  ;;  %17243 = vst [vmem:[#allocation53_spill] sm:$0xff] %v15493_v3  ;;  %v12453_v47 = vld [vmem:[%s14303_s25 + $0x1ad0] sm:$0xf]  ;;  %v14030_v33 = vld [vmem:[%s14303_s25 + $0x1a44] sm:$0xf0] }
 0x1b5   : > { %7455 = vmatpush.bf16.msra.mxu1 %v12166_v30  ;;  %v12534_v30 = vor.u32 %v14068_v19, %v12533_v50  ;;  %v12589_v19 = vld [vmem:[%s14303_s25 + $0x1be0] sm:$0xf]  ;;  %v12462_v2 = vor.u32 %v14050_v27, %v12461_v61  ;;  %v12517_v10 = vld [vmem:[%s14303_s25 + $0x1b50] sm:$0xf]  ;;  %v12454_v28 = vor.u32 %v14048_v55, %v12453_v47  ;;  %v14078_v61 = vld [vmem:[%s14303_s25 + $0x1bc4] sm:$0xf0] }
 0x1b6   : > { %7469 = vmatpush.bf16.msra.mxu2 %v12230_v22  ;;  %v12397_v22 = vld [vmem:[%s14303_s25 + $0x1a60] sm:$0xf]  ;;  %17241 = vst [vmem:[#allocation51_spill] sm:$0xff] %v15487_v56  ;;  %v12590_v14 = vor.u32 %v14082_v51, %v12589_v19  ;;  %v12373_v19 = vld [vmem:[%s14303_s25 + $0x1a30] sm:$0xf] }
 0x1b7   : > { %7483 = vmatpush.bf16.msra.mxu3 %v12294_v63  ;;  %v14066_v63 = vld [vmem:[%s14303_s25 + $0x1b64] sm:$0xf0]  ;;  %17242 = vst [vmem:[#allocation52_spill] sm:$0xff] %v15489_v35  ;;  %v12398_v24 = vor.u32 %v14034_v36, %v12397_v22  ;;  %v12445_v42 = vld [vmem:[%s14303_s25 + $0x1ac0] sm:$0xf] }
 0x1b8   : > { %7442 = vmatpush.bf16.msra.mxu0 %v12094_v59  ;;  %v12526_v50 = vor.u32 %v14066_v63, %v12525_v20  ;;  %v14032_v59 = vld [vmem:[%s14303_s25 + $0x1a54] sm:$0xf0]  ;;  %v12509_v34 = vld [vmem:[%s14303_s25 + $0x1b40] sm:$0xf]  ;;  %v12565_v47 = vld [vmem:[%s14303_s25 + $0x1bb0] sm:$0xf] }
 0x1b9   : > { %7456 = vmatpush.bf16.msra.mxu1 %v12158_v49  ;;  %v14080_v20 = vld [vmem:[%s14303_s25 + $0x1bd4] sm:$0xf0]  ;;  %v12390_v36 = vor.u32 %v14032_v59, %v12389_v17  ;;  %v12518_v49 = vor.u32 %v14064_v44, %v12517_v10  ;;  %v12573_v22 = vld [vmem:[%s14303_s25 + $0x1bc0] sm:$0xf]  ;;  %v12501_v17 = vld [vmem:[%s14303_s25 + $0x1b30] sm:$0xf] }
 0x1ba   : > { %7470 = vmatpush.bf16.msra.mxu2 %v12222_v46  ;;  %v12381_v46 = vld [vmem:[%s14303_s25 + $0x1a40] sm:$0xf]  ;;  %v14028_v51 = vld [vmem:[%s14303_s25 + $0x1a34] sm:$0xf0] }
 0x1bb   : > { %7484 = vmatpush.bf16.msra.mxu3 %v12286_v48  ;;  %7443 = vmatmul.bf16.vlgmr.msra.gmra.mxu0 %v15482_v5  ;;  %v14060_v59 = vld [vmem:[%s14303_s25 + $0x1b34] sm:$0xf0]  ;;  %v12374_v55 = vor.u32 %v14028_v51, %v12373_v19  ;;  %v12485_v19 = vld [vmem:[%s14303_s25 + $0x1b10] sm:$0xf]  ;;  %v12781_v5 = vld [vmem:[%s14303_s25 + $0x1d60] sm:$0xf] }
 0x1bc   : > { %7491 = vmatpush.bf16.msrb.mxu0 %v12406_v38  ;;  %7457 = vmatmul.bf16.vlgmr.msra.gmra.mxu1 %v15489_v35  ;;  %v14046_v38 = vld [vmem:[%s14303_s25 + $0x1ac4] sm:$0xf0]  ;;  %v12502_v44 = vor.u32 %v14060_v59, %v12501_v17  ;;  %v14056_v51 = vld [vmem:[%s14303_s25 + $0x1b14] sm:$0xf0] }
 0x1bd   : > { %7505 = vmatpush.bf16.msrb.mxu1 %v12470_v41  ;;  %7471 = vmatmul.bf16.vlgmr.msra.gmra.mxu2 %v15487_v56  ;;  %v12581_v41 = vld [vmem:[%s14303_s25 + $0x1bd0] sm:$0xf]  ;;  %v12446_v27 = vor.u32 %v14046_v38, %v12445_v42  ;;  %v12557_v42 = vld [vmem:[%s14303_s25 + $0x1ba0] sm:$0xf]  ;;  %v14022_v17 = vld [vmem:[%s14303_s25 + $0x1a04] sm:$0xf0] }
 0x1be   : > { %7519 = vmatpush.bf16.msrb.mxu2 %v12534_v30  ;;  %7485 = vmatmul.bf16.vlgmr.msra.gmra.mxu3 %v15493_v3  ;;  %v12582_v48 = vor.u32 %v14080_v20, %v12581_v41  ;;  %v14062_v30 = vld [vmem:[%s14303_s25 + $0x1b44] sm:$0xf0]  ;;  %v12365_v41 = vld [vmem:[%s14303_s25 + $0x1a20] sm:$0xf]  ;;  %v8983_v3 = vld [vmem:[%s14398_s6 + $0x2d8] sm:$0xf0] }
 0x1bf   : > { %7533 = vmatpush.bf16.msrb.mxu3 %v12598_v53  ;;  %v12382_v53 = vor.u32 %v14030_v33, %v12381_v46  ;;  %v12510_v63 = vor.u32 %v14062_v30, %v12509_v34  ;;  %v14026_v20 = vld [vmem:[%s14303_s25 + $0x1a24] sm:$0xf0]  ;;  %v12493_v46 = vld [vmem:[%s14303_s25 + $0x1b20] sm:$0xf]  ;;  %v12357_v34 = vld [vmem:[%s14303_s25 + $0x1a10] sm:$0xf] }
 0x1c0   : > { %7492 = vmatpush.bf16.msrb.mxu0 %v12398_v24  ;;  %v12437_v24 = vld [vmem:[%s14303_s25 + $0x1ab0] sm:$0xf]  ;;  %v14058_v33 = vld [vmem:[%s14303_s25 + $0x1b24] sm:$0xf0]  ;;  %v12366_v38 = vor.u32 %v14026_v20, %v12365_v41  ;;  %v12486_v41 = vor.u32 %v14056_v51, %v12485_v19  ;;  %v12541_v20 = vld [vmem:[%s14303_s25 + $0x1b80] sm:$0xf] }
 0x1c1   : > { %7506 = vmatpush.bf16.msrb.mxu1 %v12462_v2  ;;  %v12574_v2 = vor.u32 %v14078_v61, %v12573_v22  ;;  %v12494_v22 = vor.u32 %v14058_v33, %v12493_v46  ;;  %v14024_v61 = vld [vmem:[%s14303_s25 + $0x1a14] sm:$0xf0]  ;;  %v12725_v33 = vld [vmem:[%s14303_s25 + $0x1cf0] sm:$0xf]  ;;  %v14098_v56 = vld [vmem:[%s14303_s25 + $0x1c64] sm:$0xf0] }
 0x1c2   : > { %7520 = vmatpush.bf16.msrb.mxu2 %v12526_v50  ;;  %v14044_v50 = vld [vmem:[%s14303_s25 + $0x1ab4] sm:$0xf0]  ;;  %v12358_v59 = vor.u32 %v14024_v61, %v12357_v34  ;;  %v12853_v34 = vld [vmem:[%s14303_s25 + $0x1df0] sm:$0xf] }
 0x1c3   : > { %7534 = vmatpush.bf16.msrb.mxu3 %v12590_v14  ;;  %v14076_v14 = vld [vmem:[%s14303_s25 + $0x1bb4] sm:$0xf0]  ;;  %v12438_v10 = vor.u32 %v14044_v50, %v12437_v24  ;;  %v12549_v24 = vld [vmem:[%s14303_s25 + $0x1b90] sm:$0xf]  ;;  %v12349_v50 = vld [vmem:[%s14303_s25 + $0x1a00] sm:$0xf] }
 0x1c4   : > { %7493 = vmatpush.bf16.msrb.mxu0 %v12390_v36  ;;  %v12429_v36 = vld [vmem:[%s14303_s25 + $0x1aa0] sm:$0xf]  ;;  %v14100_v46 = vld [vmem:[%s14303_s25 + $0x1c74] sm:$0xf0]  ;;  %v8973_v61 = vld [vmem:[%s14398_s6 + $0xd0] sm:$0xf] }
 0x1c5   : > { %7507 = vmatpush.bf16.msrb.mxu1 %v12454_v28  ;;  %v12566_v28 = vor.u32 %v14076_v14, %v12565_v47  ;;  %v12413_v47 = vld [vmem:[%s14303_s25 + $0x1a80] sm:$0xf]  ;;  %v14038_v14 = vld [vmem:[%s14303_s25 + $0x1a84] sm:$0xf0]  ;;  %v8981_v19 = vld [vmem:[%s14398_s6 + $0xd8] sm:$0xf] }
 0x1c6   : > { %7521 = vmatpush.bf16.msrb.mxu2 %v12518_v49  ;;  %v14042_v49 = vld [vmem:[%s14303_s25 + $0x1aa4] sm:$0xf0]  ;;  %v13184_v51 = vld [vmem:[%s14398_s6 + $0x2d4] sm:$0xf0] }
 0x1c7   : > { %7535 = vmatpush.bf16.msrb.mxu3 %v12582_v48  ;;  %v14074_v48 = vld [vmem:[%s14303_s25 + $0x1ba4] sm:$0xf0]  ;;  %v12430_v30 = vor.u32 %v14042_v49, %v12429_v36 }
 0x1c8   : > { %7494 = vmatpush.bf16.msrb.mxu0 %v12382_v53  ;;  %v12421_v53 = vld [vmem:[%s14303_s25 + $0x1a90] sm:$0xf]  ;;  %v14070_v36 = vld [vmem:[%s14303_s25 + $0x1b84] sm:$0xf0] }
 0x1c9   : > { %7508 = vmatpush.bf16.msrb.mxu1 %v12446_v27  ;;  %v14040_v27 = vld [vmem:[%s14303_s25 + $0x1a94] sm:$0xf0] }
 0x1ca   : > { %7522 = vmatpush.bf16.msrb.mxu2 %v12510_v63  ;;  %v12558_v63 = vor.u32 %v14074_v48, %v12557_v42  ;;  %v14116_v42 = vld [vmem:[%s14303_s25 + $0x1cf4] sm:$0xf0]  ;;  %v12789_v48 = vld [vmem:[%s14303_s25 + $0x1d70] sm:$0xf] }
 0x1cb   : > { %7536 = vmatpush.bf16.msrb.mxu3 %v12574_v2  ;;  %v14072_v2 = vld [vmem:[%s14303_s25 + $0x1b94] sm:$0xf0]  ;;  %v12726_v35 = vor.u32 %v14116_v42, %v12725_v33 }
 0x1cc   : > { %7495 = vmatpush.bf16.msrb.mxu0 %v12374_v55  ;;  %v12477_v55 = vld [vmem:[%s14303_s25 + $0x1b00] sm:$0xf]  ;;  %v12550_v49 = vor.u32 %v14072_v2, %v12549_v24  ;;  %v13151_v24 = vld [vmem:[%s14398_s6 + $0xd4] sm:$0xf]  ;;  %v12542_v2 = vor.u32 %v14070_v36, %v12541_v20  ;;  %v15571_v20 = vor.u32 %v13184_v51, %v8981_v19 }
 0x1cd   : > { %7509 = vmatpush.bf16.msrb.mxu1 %v12438_v10  ;;  %v14054_v10 = vld [vmem:[%s14303_s25 + $0x1b04] sm:$0xf0]  ;;  %v12637_v51 = vld [vmem:[%s14303_s25 + $0x1c40] sm:$0xf] }
 0x1ce   : > { %7523 = vmatpush.bf16.msrb.mxu2 %v12502_v44  ;;  %v12422_v44 = vor.u32 %v14040_v27, %v12421_v53  ;;  %v13183_v53 = vld [vmem:[%s14398_s6 + $0x2cc] sm:$0xf0]  ;;  %v12414_v27 = vor.u32 %v14038_v14, %v12413_v47  ;;  %v12717_v47 = vld [vmem:[%s14303_s25 + $0x1ce0] sm:$0xf] }
 0x1cf   : > { %7537 = vmatpush.bf16.msrb.mxu3 %v12566_v28  ;;  %v12661_v28 = vld [vmem:[%s14303_s25 + $0x1c70] sm:$0xf] }
 0x1d0   : > { %7496 = vmatpush.bf16.msrb.mxu0 %v12366_v38  ;;  %v14132_v38 = vld [vmem:[%s14303_s25 + $0x1d74] sm:$0xf0] }
 0x1d1   : > { %7510 = vmatpush.bf16.msrb.mxu1 %v12430_v30  ;;  %v12350_v30 = vor.u32 %v14022_v17, %v12349_v50  ;;  %v12662_v50 = vor.u32 %v14100_v46, %v12661_v28  ;;  %v8975_v17 = vld [vmem:[%s14398_s6 + $0x2d0] sm:$0xf0]  ;;  %v12845_v28 = vld [vmem:[%s14303_s25 + $0x1de0] sm:$0xf]  ;;  %v14146_v46 = vld [vmem:[%s14303_s25 + $0x1de4] sm:$0xf0] }
 0x1d2   : > { %7524 = vmatpush.bf16.msrb.mxu2 %v12494_v22  ;;  %v14148_v22 = vld [vmem:[%s14303_s25 + $0x1df4] sm:$0xf0]  ;;  %v15573_v36 = vor.u32 %v13151_v24, %v8975_v17  ;;  %v14094_v24 = vld [vmem:[%s14303_s25 + $0x1c44] sm:$0xf0] }
 0x1d3   : > { %7538 = vmatpush.bf16.msrb.mxu3 %v12558_v63  ;;  %v12478_v63 = vor.u32 %v14054_v10, %v12477_v55  ;;  %v12854_v14 = vor.u32 %v14148_v22, %v12853_v34  ;;  %v15566_v55 = vor.u32 %v13183_v53, %v8973_v61  ;;  %v14114_v10 = vld [vmem:[%s14303_s25 + $0x1ce4] sm:$0xf0]  ;;  %v12645_v34 = vld [vmem:[%s14303_s25 + $0x1c50] sm:$0xf]  ;;  %v12846_v61 = vor.u32 %v14146_v46, %v12845_v28  ;;  %v14112_v53 = vld [vmem:[%s14303_s25 + $0x1cd4] sm:$0xf0] }
 0x1d4   : > { %7497 = vmatpush.bf16.msrb.mxu0 %v12358_v59  ;;  %v13152_v59 = vld [vmem:[%s14398_s6 + $0xdc] sm:$0xf]  ;;  %v12709_v22 = vld [vmem:[%s14303_s25 + $0x1cd0] sm:$0xf]  ;;  %v14110_v17 = vld [vmem:[%s14303_s25 + $0x1cc4] sm:$0xf0] }
 0x1d5   : > { %7511 = vmatpush.bf16.msrb.mxu1 %v12422_v44  ;;  %v12790_v44 = vor.u32 %v14132_v38, %v12789_v48  ;;  %v15577_v33 = vor.u32 %v13152_v59, %v8983_v3  ;;  %v12718_v48 = vor.u32 %v14114_v10, %v12717_v47  ;;  %v12773_v3 = vld [vmem:[%s14303_s25 + $0x1d50] sm:$0xf]  ;;  %v12765_v59 = vld [vmem:[%s14303_s25 + $0x1d40] sm:$0xf]  ;;  %v14142_v47 = vld [vmem:[%s14303_s25 + $0x1dc4] sm:$0xf0] }
 0x1d6   : > { %7525 = vmatpush.bf16.msrb.mxu2 %v12486_v41  ;;  %v12653_v41 = vld [vmem:[%s14303_s25 + $0x1c60] sm:$0xf]  ;;  %v12629_v28 = vld [vmem:[%s14303_s25 + $0x1c30] sm:$0xf]  ;;  %v14092_v46 = vld [vmem:[%s14303_s25 + $0x1c34] sm:$0xf0] }
 0x1d7   : > { %7539 = vmatpush.bf16.msrb.mxu3 %v12550_v49  ;;  %v14130_v49 = vld [vmem:[%s14303_s25 + $0x1d64] sm:$0xf0]  ;;  %v12654_v42 = vor.u32 %v14098_v56, %v12653_v41  ;;  %v14144_v56 = vld [vmem:[%s14303_s25 + $0x1dd4] sm:$0xf0]  ;;  %v12829_v41 = vld [vmem:[%s14303_s25 + $0x1dc0] sm:$0xf] }
 0x1d8   : > { %7498 = vmatpush.bf16.msrb.mxu0 %v12350_v30  ;;  %v12782_v38 = vor.u32 %v14130_v49, %v12781_v5  ;;  %v14096_v30 = vld [vmem:[%s14303_s25 + $0x1c54] sm:$0xf0]  ;;  %v12837_v5 = vld [vmem:[%s14303_s25 + $0x1dd0] sm:$0xf] }
 0x1d9   : > { %7512 = vmatpush.bf16.msrb.mxu1 %v12414_v27  ;;  %v14128_v27 = vld [vmem:[%s14303_s25 + $0x1d54] sm:$0xf0] }
 0x1da   : > { %7526 = vmatpush.bf16.msrb.mxu2 %v12478_v63  ;;  %v12710_v63 = vor.u32 %v14112_v53, %v12709_v22  ;;  %v12774_v19 = vor.u32 %v14128_v27, %v12773_v3  ;;  %v12821_v22 = vld [vmem:[%s14303_s25 + $0x1db0] sm:$0xf]  ;;  %v12630_v53 = vor.u32 %v14092_v46, %v12629_v28 }
 0x1db   : > { %7540 = vmatpush.bf16.msrb.mxu3 %v12542_v2  ;;  %7499 = vmatmul.bf16.vlgmr.msrb.gmra.mxu0 %v15566_v55  ;;  %v12701_v2 = vld [vmem:[%s14303_s25 + $0x1cc0] sm:$0xf]  ;;  %v12741_v46 = vld [vmem:[%s14303_s25 + $0x1d10] sm:$0xf] }
 0x1dc   : > { %7547 = vmatpush.bf16.msra.mxu0 %v12662_v50  ;;  %7513 = vmatmul.bf16.vlgmr.msrb.gmra.mxu1 %v15573_v36  ;;  %v12838_v50 = vor.u32 %v14144_v56, %v12837_v5  ;;  %v12702_v10 = vor.u32 %v14110_v17, %v12701_v2  ;;  %v12621_v5 = vld [vmem:[%s14303_s25 + $0x1c20] sm:$0xf]  ;;  %v14090_v56 = vld [vmem:[%s14303_s25 + $0x1c24] sm:$0xf0] }
 0x1dd   : > { %7561 = vmatpush.bf16.msra.mxu1 %v12726_v35  ;;  %7527 = vmatmul.bf16.vlgmr.msrb.gmra.mxu2 %v15571_v20  ;;  %v12646_v35 = vor.u32 %v14096_v30, %v12645_v34  ;;  %v12757_v34 = vld [vmem:[%s14303_s25 + $0x1d30] sm:$0xf]  ;;  %v14124_v30 = vld [vmem:[%s14303_s25 + $0x1d34] sm:$0xf0]  ;;  %v12813_v2 = vld [vmem:[%s14303_s25 + $0x1da0] sm:$0xf]  ;;  %v12622_v17 = vor.u32 %v14090_v56, %v12621_v5 }
 0x1de   : > { %7575 = vmatpush.bf16.msra.mxu2 %v12790_v44  ;;  %7541 = vmatmul.bf16.vlgmr.msrb.gmra.mxu3 %v15577_v33  ;;  %v14126_v44 = vld [vmem:[%s14303_s25 + $0x1d44] sm:$0xf0]  ;;  %v12758_v27 = vor.u32 %v14124_v30, %v12757_v34  ;;  %v12605_v34 = vld [vmem:[%s14303_s25 + $0x1c00] sm:$0xf] }
 0x1df   : > { %7589 = vmatpush.bf16.msra.mxu3 %v12854_v14  ;;  %v12638_v14 = vor.u32 %v14094_v24, %v12637_v51  ;;  %v12766_v49 = vor.u32 %v14126_v44, %v12765_v59  ;;  %v12749_v51 = vld [vmem:[%s14303_s25 + $0x1d20] sm:$0xf]  ;;  %v14122_v24 = vld [vmem:[%s14303_s25 + $0x1d24] sm:$0xf0]  ;;  %v12613_v59 = vld [vmem:[%s14303_s25 + $0x1c10] sm:$0xf] }
 0x1e0   : > { %7548 = vmatpush.bf16.msra.mxu0 %v12654_v42  ;;  %v12693_v42 = vld [vmem:[%s14303_s25 + $0x1cb0] sm:$0xf]  ;;  %v14086_v30 = vld [vmem:[%s14303_s25 + $0x1c04] sm:$0xf0]  ;;  %v12797_v5 = vld [vmem:[%s14303_s25 + $0x1d80] sm:$0xf] }
 0x1e1   : > { %7562 = vmatpush.bf16.msra.mxu1 %v12718_v48  ;;  %v12830_v48 = vor.u32 %v14142_v47, %v12829_v41  ;;  %v12750_v41 = vor.u32 %v14122_v24, %v12749_v51  ;;  %v14088_v47 = vld [vmem:[%s14303_s25 + $0x1c14] sm:$0xf0]  ;;  %v14134_v56 = vld [vmem:[%s14303_s25 + $0x1d84] sm:$0xf0]  ;;  %v12981_v24 = vld [vmem:[%s14303_s25 + $0x1ef0] sm:$0xf] }
 0x1e2   : > { %7576 = vmatpush.bf16.msra.mxu2 %v12782_v38  ;;  %v14108_v38 = vld [vmem:[%s14303_s25 + $0x1cb4] sm:$0xf0] }
 0x1e3   : > { %7590 = vmatpush.bf16.msra.mxu3 %v12846_v61  ;;  %v14140_v61 = vld [vmem:[%s14303_s25 + $0x1db4] sm:$0xf0]  ;;  %v12694_v3 = vor.u32 %v14108_v38, %v12693_v42 }
 0x1e4   : > { %7549 = vmatpush.bf16.msra.mxu0 %v12646_v35  ;;  %v12685_v35 = vld [vmem:[%s14303_s25 + $0x1ca0] sm:$0xf]  ;;  %v14120_v42 = vld [vmem:[%s14303_s25 + $0x1d14] sm:$0xf0] }
 0x1e5   : > { %7563 = vmatpush.bf16.msra.mxu1 %v12710_v63  ;;  %v12822_v63 = vor.u32 %v14140_v61, %v12821_v22  ;;  %v14136_v38 = vld [vmem:[%s14303_s25 + $0x1d94] sm:$0xf0]  ;;  %v12614_v22 = vor.u32 %v14088_v47, %v12613_v59  ;;  %v12669_v61 = vld [vmem:[%s14303_s25 + $0x1c80] sm:$0xf]  ;;  %v13109_v59 = vld [vmem:[%s14303_s25 + $0x1ff0] sm:$0xf] }
 0x1e6   : > { %7577 = vmatpush.bf16.msra.mxu2 %v12774_v19  ;;  %v14106_v19 = vld [vmem:[%s14303_s25 + $0x1ca4] sm:$0xf0]  ;;  %v14164_v51 = vld [vmem:[%s14303_s25 + $0x1e74] sm:$0xf0]  ;;  %v8989_v47 = vld [vmem:[%s14398_s6 + $0xe0] sm:$0xf] }
 0x1e7   : > { %7591 = vmatpush.bf16.msra.mxu3 %v12838_v50  ;;  %v14138_v50 = vld [vmem:[%s14303_s25 + $0x1da4] sm:$0xf0]  ;;  %v12686_v44 = vor.u32 %v14106_v19, %v12685_v35  ;;  %v12917_v35 = vld [vmem:[%s14303_s25 + $0x1e70] sm:$0xf] }
 0x1e8   : > { %7550 = vmatpush.bf16.msra.mxu0 %v12638_v14  ;;  %v12677_v14 = vld [vmem:[%s14303_s25 + $0x1c90] sm:$0xf]  ;;  %v12814_v28 = vor.u32 %v14138_v50, %v12813_v2  ;;  %v14180_v2 = vld [vmem:[%s14303_s25 + $0x1ef4] sm:$0xf0] }
 0x1e9   : > { %7564 = vmatpush.bf16.msra.mxu1 %v12702_v10  ;;  %v14104_v10 = vld [vmem:[%s14303_s25 + $0x1c94] sm:$0xf0]  ;;  %v13045_v50 = vld [vmem:[%s14303_s25 + $0x1f70] sm:$0xf] }
 0x1ea   : > { %7578 = vmatpush.bf16.msra.mxu2 %v12766_v49  ;;  %v6789_v49 = vadd.f32 %v14830_v29, %v14814_v13  ;;  %v12733_v13 = vld [vmem:[%s14303_s25 + $0x1d00] sm:$0xf]  ;;  %v14118_v29 = vld [vmem:[%s14303_s25 + $0x1d04] sm:$0xf0] }
 0x1eb   : > { %7592 = vmatpush.bf16.msra.mxu3 %v12830_v48  ;;  %v12805_v48 = vld [vmem:[%s14303_s25 + $0x1d90] sm:$0xf] }
 0x1ec   : > { %7551 = vmatpush.bf16.msra.mxu0 %v12630_v53  ;;  %v14102_v53 = vld [vmem:[%s14303_s25 + $0x1c84] sm:$0xf0]  ;;  %v12806_v19 = vor.u32 %v14136_v38, %v12805_v48  ;;  %v12798_v48 = vor.u32 %v14134_v56, %v12797_v5  ;;  %v12918_v38 = vor.u32 %v14164_v51, %v12917_v35  ;;  %v13037_v5 = vld [vmem:[%s14303_s25 + $0x1f60] sm:$0xf] }
 0x1ed   : > { %7565 = vmatpush.bf16.msra.mxu1 %v12694_v3  ;;  %v12678_v3 = vor.u32 %v14104_v10, %v12677_v14  ;;  %v13185_v14 = vld [vmem:[%s14398_s6 + $0x2dc] sm:$0xf0]  ;;  %v12734_v10 = vor.u32 %v14118_v29, %v12733_v13  ;;  %v14194_v56 = vld [vmem:[%s14303_s25 + $0x1f64] sm:$0xf0] }
 0x1ee   : > { %7579 = vmatpush.bf16.msra.mxu2 %v12758_v27  ;;  %v12742_v27 = vor.u32 %v14120_v42, %v12741_v46  ;;  %v13153_v46 = vld [vmem:[%s14398_s6 + $0xe4] sm:$0xf]  ;;  %v12973_v13 = vld [vmem:[%s14303_s25 + $0x1ee0] sm:$0xf] }
 0x1ef   : > { %7593 = vmatpush.bf16.msra.mxu3 %v12822_v63  ;;  %v6803_v63 = vadd.f32 %v14846_v60, %v6789_v49  ;;  %v12670_v60 = vor.u32 %v14102_v53, %v12669_v61  ;;  %v8997_v49 = vld [vmem:[%s14398_s6 + $0xe8] sm:$0xf]  ;;  %v12909_v61 = vld [vmem:[%s14303_s25 + $0x1e60] sm:$0xf] }
 0x1f0   : > { %7552 = vmatpush.bf16.msra.mxu0 %v12622_v17  ;;  %v14196_v17 = vld [vmem:[%s14303_s25 + $0x1f74] sm:$0xf0]  ;;  %v14162_v53 = vld [vmem:[%s14303_s25 + $0x1e64] sm:$0xf0] }
 0x1f1   : > { %7566 = vmatpush.bf16.msra.mxu1 %v12686_v44  ;;  %v12606_v44 = vor.u32 %v14086_v30, %v12605_v34  ;;  %v6817_v42 = vadd.f32 %v14851_v4, %v6803_v63  ;;  %v8991_v34 = vld [vmem:[%s14398_s6 + $0x2e0] sm:$0xf0]  ;;  %v13154_v30 = vld [vmem:[%s14398_s6 + $0xec] sm:$0xf]  ;;  %v15655_v63 = vor.u32 %v13185_v14, %v8989_v47  ;;  %v12965_v47 = vld [vmem:[%s14303_s25 + $0x1ed0] sm:$0xf] }
 0x1f2   : > { %7580 = vmatpush.bf16.msra.mxu2 %v12750_v41  ;;  %v14212_v41 = vld [vmem:[%s14303_s25 + $0x1ff4] sm:$0xf0]  ;;  %v15662_v51 = vor.u32 %v13153_v46, %v8991_v34  ;;  %v13093_v46 = vld [vmem:[%s14303_s25 + $0x1fd0] sm:$0xf] }
 0x1f3   : > { %7594 = vmatpush.bf16.msra.mxu3 %v12814_v28  ;;  %v13186_v28 = vld [vmem:[%s14398_s6 + $0x2e4] sm:$0xf0]  ;;  %v6831_v29 = vadd.f32 %v14917_v39, %v6817_v42  ;;  %v13110_v4 = vor.u32 %v14212_v41, %v13109_v59  ;;  %v13038_v59 = vor.u32 %v14194_v56, %v13037_v5  ;;  %v14160_v41 = vld [vmem:[%s14303_s25 + $0x1e54] sm:$0xf0] }
 0x1f4   : > { %7553 = vmatpush.bf16.msra.mxu0 %v12614_v22  ;;  %v8999_v22 = vld [vmem:[%s14398_s6 + $0x2e8] sm:$0xf0]  ;;  %v15660_v35 = vor.u32 %v13186_v28, %v8997_v49  ;;  %v13029_v49 = vld [vmem:[%s14303_s25 + $0x1f50] sm:$0xf]  ;;  %v14192_v28 = vld [vmem:[%s14303_s25 + $0x1f54] sm:$0xf0] }
 0x1f5   : > { %7567 = vmatpush.bf16.msra.mxu1 %v12678_v3  ;;  %v12982_v3 = vor.u32 %v14180_v2, %v12981_v24  ;;  %v13101_v24 = vld [vmem:[%s14303_s25 + $0x1fe0] sm:$0xf]  ;;  %v14210_v2 = vld [vmem:[%s14303_s25 + $0x1fe4] sm:$0xf0]  ;;  %v15666_v39 = vor.u32 %v13154_v30, %v8999_v22  ;;  %v6845_v14 = vadd.f32 %v14925_v54, %v6831_v29  ;;  %v14208_v42 = vld [vmem:[%s14303_s25 + $0x1fd4] sm:$0xf0]  ;;  %v13030_v34 = vor.u32 %v14192_v28, %v13029_v49 }
 0x1f6   : > { %7581 = vmatpush.bf16.msra.mxu2 %v12742_v27  ;;  %v13046_v27 = vor.u32 %v14196_v17, %v13045_v50  ;;  %v12910_v50 = vor.u32 %v14162_v53, %v12909_v61  ;;  %v12893_v30 = vld [vmem:[%s14303_s25 + $0x1e40] sm:$0xf]  ;;  %v14158_v22 = vld [vmem:[%s14303_s25 + $0x1e44] sm:$0xf0] }
 0x1f7   : > { %7595 = vmatpush.bf16.msra.mxu3 %v12806_v19  ;;  %v14178_v19 = vld [vmem:[%s14303_s25 + $0x1ee4] sm:$0xf0]  ;;  %v6859_v54 = vadd.f32 %v14944_v21, %v6845_v14  ;;  %v13021_v21 = vld [vmem:[%s14303_s25 + $0x1f40] sm:$0xf]  ;;  %v14204_v14 = vld [vmem:[%s14303_s25 + $0x1fb4] sm:$0xf0] }
 0x1f8   : > { %7554 = vmatpush.bf16.msra.mxu0 %v12606_v44  ;;  %v12974_v17 = vor.u32 %v14178_v19, %v12973_v13  ;;  %v12901_v44 = vld [vmem:[%s14303_s25 + $0x1e50] sm:$0xf]  ;;  %v14174_v61 = vld [vmem:[%s14303_s25 + $0x1ec4] sm:$0xf0]  ;;  %v13085_v13 = vld [vmem:[%s14303_s25 + $0x1fc0] sm:$0xf]  ;;  %v12894_v19 = vor.u32 %v14158_v22, %v12893_v30 }
 0x1f9   : > { %7568 = vmatpush.bf16.msra.mxu1 %v12670_v60  ;;  %v13102_v60 = vor.u32 %v14210_v2, %v13101_v24  ;;  %v14190_v53 = vld [vmem:[%s14303_s25 + $0x1f44] sm:$0xf0]  ;;  %v12885_v24 = vld [vmem:[%s14303_s25 + $0x1e30] sm:$0xf]  ;;  %v14156_v2 = vld [vmem:[%s14303_s25 + $0x1e34] sm:$0xf0] }
 0x1fa   : > { %7582 = vmatpush.bf16.msra.mxu2 %v12734_v10  ;;  %v14176_v10 = vld [vmem:[%s14303_s25 + $0x1ed4] sm:$0xf0]  ;;  %v14206_v29 = vld [vmem:[%s14303_s25 + $0x1fc4] sm:$0xf0]  ;;  %v13022_v56 = vor.u32 %v14190_v53, %v13021_v21  ;;  %v12877_v49 = vld [vmem:[%s14303_s25 + $0x1e20] sm:$0xf] }
 0x1fb   : > { %7596 = vmatpush.bf16.msra.mxu3 %v12798_v48  ;;  %7555 = vmatmul.bf16.vlgmr.msra.gmra.mxu0 %v15655_v63  ;;  %v12902_v48 = vor.u32 %v14160_v41, %v12901_v44  ;;  %v14172_v44 = vld [vmem:[%s14303_s25 + $0x1eb4] sm:$0xf0]  ;;  %v14154_v28 = vld [vmem:[%s14303_s25 + $0x1e24] sm:$0xf0]  ;;  %v13069_v30 = vld [vmem:[%s14303_s25 + $0x1fa0] sm:$0xf] }
 0x1fc   : > { %7603 = vmatpush.bf16.msrb.mxu0 %v12918_v38  ;;  %7569 = vmatmul.bf16.vlgmr.msra.gmra.mxu1 %v15662_v51  ;;  %v12966_v38 = vor.u32 %v14176_v10, %v12965_v47  ;;  %v14188_v41 = vld [vmem:[%s14303_s25 + $0x1f34] sm:$0xf0]  ;;  %v13077_v47 = vld [vmem:[%s14303_s25 + $0x1fb0] sm:$0xf]  ;;  %v14202_v22 = vld [vmem:[%s14303_s25 + $0x1fa4] sm:$0xf0] }
 0x1fd   : > { %7617 = vmatpush.bf16.msrb.mxu1 %v12982_v3  ;;  %7583 = vmatmul.bf16.vlgmr.msra.gmra.mxu2 %v15660_v35  ;;  %v12957_v3 = vld [vmem:[%s14303_s25 + $0x1ec0] sm:$0xf]  ;;  %v14152_v53 = vld [vmem:[%s14303_s25 + $0x1e14] sm:$0xf0] }
 0x1fe   : > { %7631 = vmatpush.bf16.msrb.mxu2 %v13046_v27  ;;  %7597 = vmatmul.bf16.vlgmr.msra.gmra.mxu3 %v15666_v39  ;;  %v13094_v27 = vor.u32 %v14208_v42, %v13093_v46  ;;  %v12958_v5 = vor.u32 %v14174_v61, %v12957_v3  ;;  %v12941_v46 = vld [vmem:[%s14303_s25 + $0x1ea0] sm:$0xf] }
 0x1ff   : > { %7645 = vmatpush.bf16.msrb.mxu3 %v13110_v4  ;;  %v6873_v4 = vadd.f32 %v14949_v31, %v6859_v54  ;;  %v13013_v31 = vld [vmem:[%s14303_s25 + $0x1f30] sm:$0xf]  ;;  %v13078_v54 = vor.u32 %v14204_v14, %v13077_v47 }
 0x200   : > { %7604 = vmatpush.bf16.msrb.mxu0 %v12910_v50  ;;  %v12949_v50 = vld [vmem:[%s14303_s25 + $0x1eb0] sm:$0xf] }
 0x201   : > { %7618 = vmatpush.bf16.msrb.mxu1 %v12974_v17  ;;  %v6887_v17 = vadd.f32 %v15012_v25, %v6873_v4  ;;  %v12950_v10 = vor.u32 %v14172_v44, %v12949_v50  ;;  %v13014_v25 = vor.u32 %v14188_v41, %v13013_v31  ;;  %v13070_v4 = vor.u32 %v14202_v22, %v13069_v30  ;;  %v14166_v44 = vld [vmem:[%s14303_s25 + $0x1e84] sm:$0xf0]  ;;  %v12989_v31 = vld [vmem:[%s14303_s25 + $0x1f00] sm:$0xf]  ;;  %v15737_v30 = vpop.f32.mrf.mxu1 }
 0x202   : > { %7632 = vmatpush.bf16.msrb.mxu2 %v13038_v59  ;;  %v13086_v59 = vor.u32 %v14206_v29, %v13085_v13  ;;  %v12933_v13 = vld [vmem:[%s14303_s25 + $0x1e90] sm:$0xf]  ;;  %v14168_v29 = vld [vmem:[%s14303_s25 + $0x1e94] sm:$0xf0]  ;;  %v14182_v41 = vld [vmem:[%s14303_s25 + $0x1f04] sm:$0xf0] }
 0x203   : > { %7646 = vmatpush.bf16.msrb.mxu3 %v13102_v60  ;;  %v12886_v60 = vor.u32 %v14156_v2, %v12885_v24  ;;  %v6901_v42 = vadd.f32 %v15020_v52, %v6887_v17  ;;  %v12869_v52 = vld [vmem:[%s14303_s25 + $0x1e10] sm:$0xf]  ;;  %v12861_v24 = vld [vmem:[%s14303_s25 + $0x1e00] sm:$0xf]  ;;  %v14150_v2 = vld [vmem:[%s14303_s25 + $0x1e04] sm:$0xf0]  ;;  %v12934_v47 = vor.u32 %v14168_v29, %v12933_v13 }
 0x204   : > { %7605 = vmatpush.bf16.msrb.mxu0 %v12902_v48  ;;  %v14170_v48 = vld [vmem:[%s14303_s25 + $0x1ea4] sm:$0xf0]  ;;  %v12870_v17 = vor.u32 %v14152_v53, %v12869_v52  ;;  %v12862_v22 = vor.u32 %v14150_v2, %v12861_v24  ;;  %v13188_v53 = vld [vmem:[%s14398_s6 + $0x2f4] sm:$0xf0]  ;;  %v13155_v13 = vld [vmem:[%s14398_s6 + $0xf4] sm:$0xf] }
 0x205   : > { %7619 = vmatpush.bf16.msrb.mxu1 %v12966_v38  ;;  %v13005_v38 = vld [vmem:[%s14303_s25 + $0x1f20] sm:$0xf]  ;;  %v6915_v3 = vadd.f32 %v15039_v11, %v6901_v42  ;;  %v12942_v61 = vor.u32 %v14170_v48, %v12941_v46  ;;  %v12997_v11 = vld [vmem:[%s14303_s25 + $0x1f10] sm:$0xf]  ;;  %v13219_v46 = vld [vmem:[%s14303_s25 + $0xf4] sm:$0xf] }
 0x206   : > { %7633 = vmatpush.bf16.msrb.mxu2 %v13030_v34  ;;  %v14186_v34 = vld [vmem:[%s14303_s25 + $0x1f24] sm:$0xf0]  ;;  %v9143_v42 = vld [vmem:[%s14303_s25 + $0xf8] sm:$0xf0]  ;;  %v13235_v48 = vld [vmem:[%s14303_s25 + $0x174] sm:$0xf] }
 0x207   : > { %7647 = vmatpush.bf16.msrb.mxu3 %v13094_v27  ;;  %v12878_v27 = vor.u32 %v14154_v28, %v12877_v49  ;;  %v13006_v21 = vor.u32 %v14186_v34, %v13005_v38  ;;  %v6929_v50 = vadd.f32 %v15044_v18, %v6915_v3  ;;  %v13203_v18 = vld [vmem:[%s14303_s25 + $0x74] sm:$0xf]  ;;  %v9079_v28 = vld [vmem:[%s14303_s25 + $0x78] sm:$0xf0]  ;;  %v9005_v3 = vld [vmem:[%s14398_s6 + $0xf0] sm:$0xf]  ;;  %v9146_v24 = vor.u32 %v13219_v46, %v9143_v42  ;;  %v15768_v46 = vpop.f32.mrf.mxu3 }
 0x208   : > { %7606 = vmatpush.bf16.msrb.mxu0 %v12894_v19  ;;  %v14184_v19 = vld [vmem:[%s14303_s25 + $0x1f14] sm:$0xf0]  ;;  %v9207_v38 = vld [vmem:[%s14303_s25 + $0x178] sm:$0xf0]  ;;  %v13251_v34 = vld [vmem:[%s14303_s25 + $0x1f4] sm:$0xf] }
 0x209   : > { %7620 = vmatpush.bf16.msrb.mxu1 %v12958_v5  ;;  %v13061_v5 = vld [vmem:[%s14303_s25 + $0x1f90] sm:$0xf]  ;;  %v12998_v14 = vor.u32 %v14184_v19, %v12997_v11  ;;  %v9082_v11 = vor.u32 %v13203_v18, %v9079_v28  ;;  %v9007_v19 = vld [vmem:[%s14398_s6 + $0x2f0] sm:$0xf0]  ;;  %v9210_v2 = vor.u32 %v13235_v48, %v9207_v38  ;;  %v13249_v18 = vld [vmem:[%s14303_s25 + $0x1e4] sm:$0xf] }
 0x20a   : > { %7634 = vmatpush.bf16.msrb.mxu2 %v13022_v56  ;;  %v14200_v56 = vld [vmem:[%s14303_s25 + $0x1f94] sm:$0xf0] }
 0x20b   : > { %7648 = vmatpush.bf16.msrb.mxu3 %v13086_v59  ;;  %v12925_v59 = vld [vmem:[%s14303_s25 + $0x1e80] sm:$0xf]  ;;  %v13062_v49 = vor.u32 %v14200_v56, %v13061_v5  ;;  %v13156_v5 = vld [vmem:[%s14398_s6 + $0xfc] sm:$0xf] }
 0x20c   : > { %7607 = vmatpush.bf16.msrb.mxu0 %v12886_v60  ;;  %v13053_v60 = vld [vmem:[%s14303_s25 + $0x1f80] sm:$0xf]  ;;  %v12926_v52 = vor.u32 %v14166_v44, %v12925_v59  ;;  %v9015_v56 = vld [vmem:[%s14398_s6 + $0x2f8] sm:$0xf0]  ;;  %v13217_v59 = vld [vmem:[%s14303_s25 + $0xe4] sm:$0xf] }
 0x20d   : > { %7621 = vmatpush.bf16.msrb.mxu1 %v12950_v10  ;;  %v14198_v10 = vld [vmem:[%s14303_s25 + $0x1f84] sm:$0xf0] }
 0x20e   : > { %7635 = vmatpush.bf16.msrb.mxu2 %v13014_v25  ;;  %v6943_v25 = vadd.f32 %v15107_v57, %v6929_v50  ;;  %v9271_v57 = vld [vmem:[%s14303_s25 + $0x1f8] sm:$0xf0]  ;;  %v13201_v50 = vld [vmem:[%s14303_s25 + $0x64] sm:$0xf] }
 0x20f   : > { %7649 = vmatpush.bf16.msrb.mxu3 %v13078_v54  ;;  %v15732_v54 = vpop.f32.mrf.mxu0 }
 0x210   : > { %7608 = vmatpush.bf16.msrb.mxu0 %v12878_v27  ;;  %v13187_v27 = vld [vmem:[%s14398_s6 + $0x2ec] sm:$0xf0]  ;;  %v6957_v29 = vadd.f32 %v15115_v1, %v6943_v25  ;;  %v9274_v1 = vor.u32 %v13251_v34, %v9271_v57  ;;  %v9263_v25 = vld [vmem:[%s14303_s25 + $0x1e8] sm:$0xf0]  ;;  %v13199_v34 = vld [vmem:[%s14303_s25 + $0x54] sm:$0xf] }
 0x211   : > { %7622 = vmatpush.bf16.msrb.mxu1 %v12942_v61  ;;  %v12990_v61 = vor.u32 %v14182_v41, %v12989_v31  ;;  %v15753_v31 = vor.u32 %v13187_v27, %v9005_v3  ;;  %v9135_v41 = vld [vmem:[%s14303_s25 + $0xe8] sm:$0xf0]  ;;  %v13215_v57 = vld [vmem:[%s14303_s25 + $0xd4] sm:$0xf]  ;;  %v15776_v27 = vpop.f32.mrf.mxu1 }
 0x212   : > { %7636 = vmatpush.bf16.msrb.mxu2 %v13006_v21  ;;  %v9013_v21 = vld [vmem:[%s14398_s6 + $0xf8] sm:$0xf]  ;;  %v6971_v44 = vadd.f32 %v15134_v7, %v6957_v29  ;;  %v15766_v7 = vor.u32 %v13156_v5, %v9015_v56  ;;  %v9138_v48 = vor.u32 %v13217_v59, %v9135_v41  ;;  %v13197_v5 = vld [vmem:[%s14303_s25 + $0x44] sm:$0xf]  ;;  %v9055_v56 = vld [vmem:[%s14303_s25 + $0x48] sm:$0xf0] }
 0x213   : > { %7650 = vmatpush.bf16.msrb.mxu3 %v13070_v4  ;;  %v13054_v4 = vor.u32 %v14198_v10, %v13053_v60  ;;  %v15758_v60 = vor.u32 %v13188_v53, %v9013_v21  ;;  %v15760_v10 = vor.u32 %v13155_v13, %v9007_v19  ;;  %v13231_v21 = vld [vmem:[%s14303_s25 + $0x154] sm:$0xf]  ;;  %v9191_v53 = vld [vmem:[%s14303_s25 + $0x158] sm:$0xf0]  ;;  %v13245_v59 = vld [vmem:[%s14303_s25 + $0x1c4] sm:$0xf] }
 0x214   : > { %7609 = vmatpush.bf16.msrb.mxu0 %v12870_v17  ;;  %v9071_v17 = vld [vmem:[%s14303_s25 + $0x68] sm:$0xf0]  ;;  %v6985_v3 = vadd.f32 %v15139_v12, %v6971_v44  ;;  %v13247_v13 = vld [vmem:[%s14303_s25 + $0x1d4] sm:$0xf]  ;;  %v9255_v12 = vld [vmem:[%s14303_s25 + $0x1d8] sm:$0xf0]  ;;  %v9194_v19 = vor.u32 %v13231_v21, %v9191_v53 }
 0x215   : > { %7623 = vmatpush.bf16.msrb.mxu1 %v12934_v47  ;;  %v13233_v47 = vld [vmem:[%s14303_s25 + $0x164] sm:$0xf]  ;;  %v9074_v28 = vor.u32 %v13201_v50, %v9071_v17  ;;  %v9119_v50 = vld [vmem:[%s14303_s25 + $0xc8] sm:$0xf0]  ;;  %v9239_v21 = vld [vmem:[%s14303_s25 + $0x1b8] sm:$0xf0] }
 0x216   : > { %7637 = vmatpush.bf16.msrb.mxu2 %v12998_v14  ;;  %v9199_v14 = vld [vmem:[%s14303_s25 + $0x168] sm:$0xf0]  ;;  %v6999_v29 = vadd.f32 %v15202_v40, %v6985_v3  ;;  %v13229_v40 = vld [vmem:[%s14303_s25 + $0x144] sm:$0xf]  ;;  %v9175_v3 = vld [vmem:[%s14303_s25 + $0x138] sm:$0xf0] }
 0x217   : > { %7651 = vmatpush.bf16.msrb.mxu3 %v13062_v49  ;;  %v15764_v49 = vpop.f32.mrf.mxu2  ;;  %v15770_v42 = vpop.f32.mrf.mxu0  ;;  %v9202_v38 = vor.u32 %v13233_v47, %v9199_v14  ;;  %v9183_v17 = vld [vmem:[%s14303_s25 + $0x148] sm:$0xf0]  ;;  %v9058_v47 = vor.u32 %v13197_v5, %v9055_v56 }
 0x218   : > { %7610 = vmatpush.bf16.msrb.mxu0 %v12862_v22  ;;  %v9063_v22 = vld [vmem:[%s14303_s25 + $0x58] sm:$0xf0]  ;;  %v9247_v44 = vld [vmem:[%s14303_s25 + $0x1c8] sm:$0xf0]  ;;  %v15799_v14 = vpop.f32.mrf.mxu3 }
 0x219   : > { %7624 = vmatpush.bf16.msrb.mxu1 %v12926_v52  ;;  %v9266_v52 = vor.u32 %v13249_v18, %v9263_v25  ;;  %v9186_v25 = vor.u32 %v13229_v40, %v9183_v17  ;;  %v15812_v53 = vpop.f32.mrf.mxu1  ;;  %v9103_v56 = vld [vmem:[%s14303_s25 + $0xa8] sm:$0xf0] }
 0x21a   : > { %7638 = vmatpush.bf16.msrb.mxu2 %v12990_v61  ;;  %v9127_v61 = vld [vmem:[%s14303_s25 + $0xd8] sm:$0xf0]  ;;  %v9231_v40 = vld [vmem:[%s14303_s25 + $0x1a8] sm:$0xf0] }
 0x21b   : > { %7652 = vmatpush.bf16.msrb.mxu3 %v13054_v4  ;;  %7611 = vmatmul.bf16.vlgmr.msrb.gmra.mxu0 %v15753_v31  ;;  %v9066_v4 = vor.u32 %v13199_v34, %v9063_v22  ;;  %v9111_v22 = vld [vmem:[%s14303_s25 + $0xb8] sm:$0xf0] }
 0x21c   : > { %7659 = vmatpush.bf16.msra.mxu0 %v9082_v11  ;;  %7625 = vmatmul.bf16.vlgmr.msrb.gmra.mxu1 %v15760_v10  ;;  %v9130_v11 = vor.u32 %v13215_v57, %v9127_v61  ;;  %v13227_v57 = vld [vmem:[%s14303_s25 + $0x134] sm:$0xf] }
 0x21d   : > { %7673 = vmatpush.bf16.msra.mxu1 %v9146_v24  ;;  %7639 = vmatmul.bf16.vlgmr.msrb.gmra.mxu2 %v15758_v60  ;;  %v13213_v24 = vld [vmem:[%s14303_s25 + $0xc4] sm:$0xf]  ;;  %v13243_v61 = vld [vmem:[%s14303_s25 + $0x1b4] sm:$0xf] }
 0x21e   : > { %7687 = vmatpush.bf16.msra.mxu2 %v9210_v2  ;;  %7653 = vmatmul.bf16.vlgmr.msrb.gmra.mxu3 %v15766_v7  ;;  %v9258_v2 = vor.u32 %v13247_v13, %v9255_v12  ;;  %v9122_v18 = vor.u32 %v13213_v24, %v9119_v50  ;;  %v9178_v12 = vor.u32 %v13227_v57, %v9175_v3  ;;  %v13225_v24 = vld [vmem:[%s14303_s25 + $0x124] sm:$0xf]  ;;  %v9223_v57 = vld [vmem:[%s14303_s25 + $0x198] sm:$0xf0] }
 0x21f   : > { %7701 = vmatpush.bf16.msra.mxu3 %v9274_v1  ;;  %v7013_v1 = vadd.f32 %v15210_v6, %v6999_v29  ;;  %v15797_v41 = vpop.f32.mrf.mxu2  ;;  %v9250_v6 = vor.u32 %v13245_v59, %v9247_v44  ;;  %v13193_v29 = vld [vmem:[%s14303_s25 + $0x24] sm:$0xf]  ;;  %v9242_v5 = vor.u32 %v13243_v61, %v9239_v21 }
 0x220   : > { %7660 = vmatpush.bf16.msra.mxu0 %v9074_v28  ;;  %v13195_v28 = vld [vmem:[%s14303_s25 + $0x34] sm:$0xf]  ;;  %v13241_v50 = vld [vmem:[%s14303_s25 + $0x1a4] sm:$0xf] }
 0x221   : > { %7674 = vmatpush.bf16.msra.mxu1 %v9138_v48  ;;  %v9047_v48 = vld [vmem:[%s14303_s25 + $0x38] sm:$0xf0]  ;;  %v7027_v34 = vadd.f32 %v15229_v26, %v7013_v1  ;;  %v13191_v1 = vld [vmem:[%s14303_s25 + $0x14] sm:$0xf]  ;;  %v15839_v61 = vpop.f32.mrf.mxu1 }
 0x222   : > { %7688 = vmatpush.bf16.msra.mxu2 %v9202_v38  ;;  %v13211_v38 = vld [vmem:[%s14303_s25 + $0xb4] sm:$0xf]  ;;  %v9050_v26 = vor.u32 %v13195_v28, %v9047_v48  ;;  %v9234_v28 = vor.u32 %v13241_v50, %v9231_v40  ;;  %v9095_v48 = vld [vmem:[%s14303_s25 + $0x98] sm:$0xf0] }
 0x223   : > { %7702 = vmatpush.bf16.msra.mxu3 %v9266_v52  ;;  %v15808_v52 = vpop.f32.mrf.mxu0  ;;  %v9114_v13 = vor.u32 %v13211_v38, %v9111_v22  ;;  %v13223_v38 = vld [vmem:[%s14303_s25 + $0x114] sm:$0xf]  ;;  %v9335_v40 = vld [vmem:[%s14303_s25 + $0x278] sm:$0xf0] }
 0x224   : > { %7661 = vmatpush.bf16.msra.mxu0 %v9066_v4  ;;  %v9039_v4 = vld [vmem:[%s14303_s25 + $0x28] sm:$0xf0]  ;;  %v13239_v22 = vld [vmem:[%s14303_s25 + $0x194] sm:$0xf] }
 0x225   : > { %7675 = vmatpush.bf16.msra.mxu1 %v9130_v11  ;;  %v13209_v11 = vld [vmem:[%s14303_s25 + $0xa4] sm:$0xf]  ;;  %v9042_v59 = vor.u32 %v13193_v29, %v9039_v4  ;;  %v13267_v50 = vld [vmem:[%s14303_s25 + $0x274] sm:$0xf] }
 0x226   : > { %7689 = vmatpush.bf16.msra.mxu2 %v9194_v19  ;;  %v7041_v19 = vadd.f32 %v15234_v8, %v7027_v34  ;;  %v9106_v8 = vor.u32 %v13209_v11, %v9103_v56  ;;  %v15832_v34 = vpop.f32.mrf.mxu3  ;;  %v13205_v4 = vld [vmem:[%s14303_s25 + $0x84] sm:$0xf]  ;;  %v9151_v56 = vld [vmem:[%s14303_s25 + $0x108] sm:$0xf0] }
 0x227   : > { %7703 = vmatpush.bf16.msra.mxu3 %v9258_v2  ;;  %v9167_v2 = vld [vmem:[%s14303_s25 + $0x128] sm:$0xf0]  ;;  %v13221_v11 = vld [vmem:[%s14303_s25 + $0x104] sm:$0xf] }
 0x228   : > { %7662 = vmatpush.bf16.msra.mxu0 %v9058_v47  ;;  %v7055_v17 = vadd.f32 %v15297_v37, %v7041_v19  ;;  %v9170_v44 = vor.u32 %v13225_v24, %v9167_v2  ;;  %v9031_v47 = vld [vmem:[%s14303_s25 + $0x18] sm:$0xf0]  ;;  %v13237_v24 = vld [vmem:[%s14303_s25 + $0x184] sm:$0xf]  ;;  %v9215_v2 = vld [vmem:[%s14303_s25 + $0x188] sm:$0xf0] }
 0x229   : > { %7676 = vmatpush.bf16.msra.mxu1 %v9122_v18  ;;  %v13207_v18 = vld [vmem:[%s14303_s25 + $0x94] sm:$0xf]  ;;  %v9159_v37 = vld [vmem:[%s14303_s25 + $0x118] sm:$0xf0]  ;;  %v9034_v21 = vor.u32 %v13191_v1, %v9031_v47  ;;  %v9154_v47 = vor.u32 %v13221_v11, %v9151_v56  ;;  %v9455_v11 = vld [vmem:[%s14303_s25 + $0x368] sm:$0xf0] }
 0x22a   : > { %7690 = vmatpush.bf16.msra.mxu2 %v9186_v25  ;;  %v15827_v25 = vpop.f32.mrf.mxu2  ;;  %v7069_v3 = vadd.f32 %v15305_v62, %v7055_v17  ;;  %v9162_v29 = vor.u32 %v13223_v38, %v9159_v37  ;;  %v9087_v62 = vld [vmem:[%s14303_s25 + $0x88] sm:$0xf0]  ;;  %v13283_v17 = vld [vmem:[%s14303_s25 + $0x2f4] sm:$0xf]  ;;  %v9463_v1 = vld [vmem:[%s14303_s25 + $0x378] sm:$0xf0]  ;;  %v9218_v37 = vor.u32 %v13237_v24, %v9215_v2  ;;  %v15874_v24 = vpop.f32.mrf.mxu1 }
 0x22b   : > { %7704 = vmatpush.bf16.msra.mxu3 %v9250_v6  ;;  %v15834_v6 = vpop.f32.mrf.mxu0  ;;  %v9519_v56 = vld [vmem:[%s14303_s25 + $0x3e8] sm:$0xf0] }
 0x22c   : > { %7663 = vmatpush.bf16.msra.mxu0 %v9050_v26  ;;  %v13189_v26 = vld [vmem:[%s14303_s25 + $0x4] sm:$0xf]  ;;  %v7083_v19 = vadd.f32 %v15324_v58, %v7069_v3  ;;  %v9090_v58 = vor.u32 %v13205_v4, %v9087_v62 }
 0x22d   : > { %7677 = vmatpush.bf16.msra.mxu1 %v9114_v13  ;;  %v9023_v13 = vld [vmem:[%s14303_s25 + $0x8] sm:$0xf0]  ;;  %v13297_v62 = vld [vmem:[%s14303_s25 + $0x364] sm:$0xf] }
 0x22e   : > { %7691 = vmatpush.bf16.msra.mxu2 %v9178_v12  ;;  %v9098_v12 = vor.u32 %v13207_v18, %v9095_v48  ;;  %v13315_v18 = vld [vmem:[%s14303_s25 + $0x3f4] sm:$0xf]  ;;  %v7097_v48 = vadd.f32 %v15329_v32, %v7083_v19  ;;  %v9391_v32 = vld [vmem:[%s14303_s25 + $0x2e8] sm:$0xf0] }
 0x22f   : > { %7705 = vmatpush.bf16.msra.mxu3 %v9242_v5  ;;  %v9226_v5 = vor.u32 %v13239_v22, %v9223_v57  ;;  %v9338_v22 = vor.u32 %v13267_v50, %v9335_v40  ;;  %v15861_v57 = vpop.f32.mrf.mxu3  ;;  %v9458_v50 = vor.u32 %v13297_v62, %v9455_v11  ;;  %v13263_v40 = vld [vmem:[%s14303_s25 + $0x254] sm:$0xf] }
 0x230   : > { %7664 = vmatpush.bf16.msra.mxu0 %v9042_v59  ;;  %v9026_v59 = vor.u32 %v13189_v26, %v9023_v13  ;;  %v13265_v26 = vld [vmem:[%s14303_s25 + $0x264] sm:$0xf]  ;;  %v9327_v13 = vld [vmem:[%s14303_s25 + $0x268] sm:$0xf0] }
 0x231   : > { %7678 = vmatpush.bf16.msra.mxu1 %v9106_v8  ;;  %v9399_v8 = vld [vmem:[%s14303_s25 + $0x2f8] sm:$0xf0] }
 0x232   : > { %7692 = vmatpush.bf16.msra.mxu2 %v9170_v44  ;;  %v13299_v44 = vld [vmem:[%s14303_s25 + $0x374] sm:$0xf]  ;;  %v15859_v38 = vpop.f32.mrf.mxu2  ;;  %v9402_v3 = vor.u32 %v13283_v17, %v9399_v8  ;;  %v9319_v17 = vld [vmem:[%s14303_s25 + $0x258] sm:$0xf0]  ;;  %v15905_v11 = vpop.f32.mrf.mxu1 }
 0x233   : > { %7706 = vmatpush.bf16.msra.mxu3 %v9234_v28  ;;  %v9527_v28 = vld [vmem:[%s14303_s25 + $0x3f8] sm:$0xf0]  ;;  %v15870_v19 = vpop.f32.mrf.mxu0 }
 0x234   : > { %7665 = vmatpush.bf16.msra.mxu0 %v9034_v21  ;;  %v9466_v21 = vor.u32 %v13299_v44, %v9463_v1  ;;  %v9530_v4 = vor.u32 %v13315_v18, %v9527_v28  ;;  %v9383_v1 = vld [vmem:[%s14303_s25 + $0x2d8] sm:$0xf0]  ;;  %v13311_v18 = vld [vmem:[%s14303_s25 + $0x3d4] sm:$0xf] }
 0x235   : > { %7679 = vmatpush.bf16.msra.mxu1 %v9098_v12  ;;  %v13281_v12 = vld [vmem:[%s14303_s25 + $0x2e4] sm:$0xf]  ;;  %v9511_v28 = vld [vmem:[%s14303_s25 + $0x3d8] sm:$0xf0] }
 0x236   : > { %7693 = vmatpush.bf16.msra.mxu2 %v9162_v29  ;;  %v7111_v29 = vadd.f32 %v15392_v45, %v7097_v48  ;;  %v9330_v45 = vor.u32 %v13265_v26, %v9327_v13  ;;  %v9394_v2 = vor.u32 %v13281_v12, %v9391_v32  ;;  %v9322_v48 = vor.u32 %v13263_v40, %v9319_v17  ;;  %v13293_v26 = vld [vmem:[%s14303_s25 + $0x344] sm:$0xf]  ;;  %v9439_v13 = vld [vmem:[%s14303_s25 + $0x348] sm:$0xf0]  ;;  %v13275_v40 = vld [vmem:[%s14303_s25 + $0x2b4] sm:$0xf] }
 0x237   : > { %7707 = vmatpush.bf16.msra.mxu3 %v9226_v5  ;;  %v13313_v5 = vld [vmem:[%s14303_s25 + $0x3e4] sm:$0xf] }
 0x238   : > { %7666 = vmatpush.bf16.msra.mxu0 %v9026_v59  ;;  %v13279_v59 = vld [vmem:[%s14303_s25 + $0x2d4] sm:$0xf]  ;;  %v7125_v8 = vadd.f32 %v15400_v0, %v7111_v29  ;;  %v9522_v44 = vor.u32 %v13313_v5, %v9519_v56  ;;  %v13309_v29 = vld [vmem:[%s14303_s25 + $0x3c4] sm:$0xf] }
 0x239   : > { %7680 = vmatpush.bf16.msra.mxu1 %v9090_v58  ;;  %v13295_v58 = vld [vmem:[%s14303_s25 + $0x354] sm:$0xf]  ;;  %v17244_v32 = vld [vmem:[#allocation48_spill] sm:$0xff] }
 0x23a   : > { %7694 = vmatpush.bf16.msra.mxu2 %v9154_v47  ;;  %v9447_v47 = vld [vmem:[%s14303_s25 + $0x358] sm:$0xf0]  ;;  %v7139_v0 = vadd.f32 %v15419_v43, %v7125_v8  ;;  %v9375_v43 = vld [vmem:[%s14303_s25 + $0x2c8] sm:$0xf0] }
 0x23b   : > { %7708 = vmatpush.bf16.msra.mxu3 %v9218_v37  ;;  %7667 = vmatmul.bf16.vlgmr.msra.gmra.mxu0 %v14405_v9  ;;  %v9386_v9 = vor.u32 %v13279_v59, %v9383_v1  ;;  %v9450_v37 = vor.u32 %v13295_v58, %v9447_v47  ;;  %v15900_v12 = vpop.f32.mrf.mxu0  ;;  %v9367_v8 = vld [vmem:[%s14303_s25 + $0x2b8] sm:$0xf0]  ;;  %v13307_v58 = vld [vmem:[%s14303_s25 + $0x3b4] sm:$0xf] }
 0x23c   : > { %7715 = vmatpush.bf16.msrb.mxu0 %v9338_v22  ;;  %7681 = vmatmul.bf16.vlgmr.msra.gmra.mxu1 %v14413_v16  ;;  %v13261_v22 = vld [vmem:[%s14303_s25 + $0x244] sm:$0xf]  ;;  %v9514_v16 = vor.u32 %v13311_v18, %v9511_v28  ;;  %v7153_v62 = vadd.f32 %v17244_v32, %v7139_v0  ;;  %v9431_v1 = vld [vmem:[%s14303_s25 + $0x338] sm:$0xf0]  ;;  %v9370_v28 = vor.u32 %v13275_v40, %v9367_v8  ;;  %v9487_v32 = vld [vmem:[%s14303_s25 + $0x3a8] sm:$0xf0]  ;;  %v15937_v40 = vpop.f32.mrf.mxu1 }
 0x23d   : > { %7729 = vmatpush.bf16.msrb.mxu1 %v9402_v3  ;;  %7695 = vmatmul.bf16.vlgmr.msra.gmra.mxu2 %v14411_v15  ;;  %v9311_v3 = vld [vmem:[%s14303_s25 + $0x248] sm:$0xf0]  ;;  %v13277_v15 = vld [vmem:[%s14303_s25 + $0x2c4] sm:$0xf]  ;;  %v9495_v47 = vld [vmem:[%s14303_s25 + $0x3b8] sm:$0xf0] }
 0x23e   : > { %7743 = vmatpush.bf16.msrb.mxu2 %v9466_v21  ;;  %7709 = vmatmul.bf16.vlgmr.msra.gmra.mxu3 %v14421_v23  ;;  %v15893_v21 = vpop.f32.mrf.mxu2  ;;  %v15898_v23 = vpop.f32.mrf.mxu3  ;;  %v9314_v5 = vor.u32 %v13261_v22, %v9311_v3  ;;  %v9378_v56 = vor.u32 %v13277_v15, %v9375_v43  ;;  %v7167_v17 = vadd.f32 %v15732_v54, %v7153_v62  ;;  %v13257_v54 = vld [vmem:[%s14303_s25 + $0x224] sm:$0xf]  ;;  %v9359_v15 = vld [vmem:[%s14303_s25 + $0x2a8] sm:$0xf0]  ;;  %v9415_v8 = vld [vmem:[%s14303_s25 + $0x318] sm:$0xf0] }
 0x23f   : > { %7757 = vmatpush.bf16.msrb.mxu3 %v9530_v4  ;;  %v9503_v4 = vld [vmem:[%s14303_s25 + $0x3c8] sm:$0xf0]  ;;  %v9498_v3 = vor.u32 %v13307_v58, %v9495_v47  ;;  %v9479_v58 = vld [vmem:[%s14303_s25 + $0x398] sm:$0xf0] }
 0x240   : > { %7716 = vmatpush.bf16.msrb.mxu0 %v9330_v45  ;;  %v9442_v45 = vor.u32 %v13293_v26, %v9439_v13  ;;  %v9506_v59 = vor.u32 %v13309_v29, %v9503_v4  ;;  %v9423_v43 = vld [vmem:[%s14303_s25 + $0x328] sm:$0xf0]  ;;  %v13305_v4 = vld [vmem:[%s14303_s25 + $0x3a4] sm:$0xf] }
 0x241   : > { %7730 = vmatpush.bf16.msrb.mxu1 %v9394_v2  ;;  %v13259_v2 = vld [vmem:[%s14303_s25 + $0x234] sm:$0xf]  ;;  %v17245_v26 = vld [vmem:[#allocation49_spill] sm:$0xff] }
 0x242   : > { %7744 = vmatpush.bf16.msrb.mxu2 %v9458_v50  ;;  %v9303_v50 = vld [vmem:[%s14303_s25 + $0x238] sm:$0xf0]  ;;  %v7221_v13 = vadd.f32 %v15770_v42, %v17245_v26  ;;  %v13255_v42 = vld [vmem:[%s14303_s25 + $0x214] sm:$0xf]  ;;  %v9471_v26 = vld [vmem:[%s14303_s25 + $0x388] sm:$0xf0] }
 0x243   : > { %7758 = vmatpush.bf16.msrb.mxu3 %v9522_v44  ;;  %v13291_v44 = vld [vmem:[%s14303_s25 + $0x334] sm:$0xf]  ;;  %v9306_v18 = vor.u32 %v13259_v2, %v9303_v50  ;;  %v9287_v2 = vld [vmem:[%s14303_s25 + $0x218] sm:$0xf0] }
 0x244   : > { %7717 = vmatpush.bf16.msrb.mxu0 %v9322_v48  ;;  %v9434_v0 = vor.u32 %v13291_v44, %v9431_v1  ;;  %v9295_v48 = vld [vmem:[%s14303_s25 + $0x228] sm:$0xf0]  ;;  %v13271_v50 = vld [vmem:[%s14303_s25 + $0x294] sm:$0xf]  ;;  %v7235_v44 = vadd.f32 %v15776_v27, %v7221_v13 }
 0x245   : > { %7731 = vmatpush.bf16.msrb.mxu1 %v9386_v9  ;;  %v13273_v9 = vld [vmem:[%s14303_s25 + $0x2a4] sm:$0xf]  ;;  %v9298_v62 = vor.u32 %v13257_v54, %v9295_v48  ;;  %v13303_v1 = vld [vmem:[%s14303_s25 + $0x394] sm:$0xf] }
 0x246   : > { %7745 = vmatpush.bf16.msrb.mxu2 %v9450_v37  ;;  %v7181_v37 = vadd.f32 %v15737_v30, %v7167_v17  ;;  %v15920_v22 = vpop.f32.mrf.mxu2  ;;  %v15927_v29 = vpop.f32.mrf.mxu3  ;;  %v9351_v17 = vld [vmem:[%s14303_s25 + $0x298] sm:$0xf0]  ;;  %v7249_v54 = vadd.f32 %v15797_v41, %v7235_v44  ;;  %v13331_v13 = vld [vmem:[%s14303_s25 + $0x474] sm:$0xf] }
 0x247   : > { %7759 = vmatpush.bf16.msrb.mxu3 %v9514_v16  ;;  %v13289_v16 = vld [vmem:[%s14303_s25 + $0x324] sm:$0xf]  ;;  %v9354_v48 = vor.u32 %v13271_v50, %v9351_v17  ;;  %v9591_v41 = vld [vmem:[%s14303_s25 + $0x478] sm:$0xf0]  ;;  %v13379_v17 = vld [vmem:[%s14303_s25 + $0x5f4] sm:$0xf]  ;;  %v15972_v44 = vpop.f32.mrf.mxu1 }
 0x248   : > { %7718 = vmatpush.bf16.msrb.mxu0 %v9314_v5  ;;  %v7195_v30 = vadd.f32 %v15764_v49, %v7181_v37  ;;  %v15932_v5 = vpop.f32.mrf.mxu0  ;;  %v9490_v49 = vor.u32 %v13305_v4, %v9487_v32  ;;  %v13285_v37 = vld [vmem:[%s14303_s25 + $0x304] sm:$0xf]  ;;  %v13347_v4 = vld [vmem:[%s14303_s25 + $0x4f4] sm:$0xf] }
 0x249   : > { %7732 = vmatpush.bf16.msrb.mxu1 %v9378_v56  ;;  %v9362_v56 = vor.u32 %v13273_v9, %v9359_v15  ;;  %v13269_v9 = vld [vmem:[%s14303_s25 + $0x284] sm:$0xf]  ;;  %v9482_v15 = vor.u32 %v13303_v1, %v9479_v58  ;;  %v9594_v1 = vor.u32 %v13331_v13, %v9591_v41  ;;  %v13343_v13 = vld [vmem:[%s14303_s25 + $0x4d4] sm:$0xf] }
 0x24a   : > { %7746 = vmatpush.bf16.msrb.mxu2 %v9442_v45  ;;  %v9426_v45 = vor.u32 %v13289_v16, %v9423_v43  ;;  %v7209_v47 = vadd.f32 %v15768_v46, %v7195_v30  ;;  %v9343_v46 = vld [vmem:[%s14303_s25 + $0x288] sm:$0xf0]  ;;  %v13301_v43 = vld [vmem:[%s14303_s25 + $0x384] sm:$0xf] }
 0x24b   : > { %7760 = vmatpush.bf16.msrb.mxu3 %v9506_v59  ;;  %v13287_v59 = vld [vmem:[%s14303_s25 + $0x314] sm:$0xf]  ;;  %v9407_v16 = vld [vmem:[%s14303_s25 + $0x308] sm:$0xf0]  ;;  %v9346_v50 = vor.u32 %v13269_v9, %v9343_v46  ;;  %v13361_v9 = vld [vmem:[%s14303_s25 + $0x564] sm:$0xf] }
 0x24c   : > { %7719 = vmatpush.bf16.msrb.mxu0 %v9306_v18  ;;  %v9290_v18 = vor.u32 %v13255_v42, %v9287_v2  ;;  %v9418_v27 = vor.u32 %v13287_v59, %v9415_v8  ;;  %v7263_v42 = vadd.f32 %v15799_v14, %v7249_v54  ;;  %v9783_v59 = vld [vmem:[%s14303_s25 + $0x5f8] sm:$0xf0]  ;;  %v9474_v14 = vor.u32 %v13301_v43, %v9471_v26  ;;  %v13345_v54 = vld [vmem:[%s14303_s25 + $0x4e4] sm:$0xf]  ;;  %v9711_v46 = vld [vmem:[%s14303_s25 + $0x568] sm:$0xf0] }
 0x24d   : > { %7733 = vmatpush.bf16.msrb.mxu1 %v9370_v28  ;;  %v13253_v28 = vld [vmem:[%s14303_s25 + $0x204] sm:$0xf]  ;;  %v13327_v43 = vld [vmem:[%s14303_s25 + $0x454] sm:$0xf]  ;;  %v9575_v26 = vld [vmem:[%s14303_s25 + $0x458] sm:$0xf0] }
 0x24e   : > { %7747 = vmatpush.bf16.msrb.mxu2 %v9434_v0  ;;  %v9279_v0 = vld [vmem:[%s14303_s25 + $0x208] sm:$0xf0]  ;;  %v15959_v32 = vpop.f32.mrf.mxu2  ;;  %v7277_v58 = vadd.f32 %v15834_v6, %v7263_v42 }
 0x24f   : > { %7761 = vmatpush.bf16.msrb.mxu3 %v9498_v3  ;;  %v7223_v3 = vadd.f32 %v15808_v52, %v7209_v47  ;;  %v9282_v30 = vor.u32 %v13253_v28, %v9279_v0  ;;  %v15965_v52 = vpop.f32.mrf.mxu3  ;;  %v13329_v28 = vld [vmem:[%s14303_s25 + $0x464] sm:$0xf]  ;;  %v9583_v0 = vld [vmem:[%s14303_s25 + $0x468] sm:$0xf0] }
 0x250   : > { %7720 = vmatpush.bf16.msrb.mxu0 %v9298_v62  ;;  %v9655_v62 = vld [vmem:[%s14303_s25 + $0x4f8] sm:$0xf0]  ;;  %v15967_v2 = vpop.f32.mrf.mxu0  ;;  %v9586_v6 = vor.u32 %v13329_v28, %v9583_v0  ;;  %v9567_v28 = vld [vmem:[%s14303_s25 + $0x448] sm:$0xf0]  ;;  %v13341_v0 = vld [vmem:[%s14303_s25 + $0x4c4] sm:$0xf] }
 0x251   : > { %7734 = vmatpush.bf16.msrb.mxu1 %v9362_v56  ;;  %v13363_v56 = vld [vmem:[%s14303_s25 + $0x574] sm:$0xf]  ;;  %v7237_v8 = vadd.f32 %v15812_v53, %v7223_v3  ;;  %v9658_v47 = vor.u32 %v13347_v4, %v9655_v62  ;;  %v9647_v53 = vld [vmem:[%s14303_s25 + $0x4e8] sm:$0xf0] }
 0x252   : > { %7748 = vmatpush.bf16.msrb.mxu2 %v9426_v45  ;;  %v9719_v45 = vld [vmem:[%s14303_s25 + $0x578] sm:$0xf0]  ;;  %v9775_v3 = vld [vmem:[%s14303_s25 + $0x5e8] sm:$0xf0] }
 0x253   : > { %7762 = vmatpush.bf16.msrb.mxu3 %v9490_v49  ;;  %v9410_v49 = vor.u32 %v13285_v37, %v9407_v16  ;;  %v13377_v37 = vld [vmem:[%s14303_s25 + $0x5e4] sm:$0xf]  ;;  %v9714_v16 = vor.u32 %v13361_v9, %v9711_v46 }
 0x254   : > { %7721 = vmatpush.bf16.msrb.mxu0 %v9290_v18  ;;  %v9722_v18 = vor.u32 %v13363_v56, %v9719_v45  ;;  %v9778_v62 = vor.u32 %v13377_v37, %v9775_v3  ;;  %v9639_v56 = vld [vmem:[%s14303_s25 + $0x4d8] sm:$0xf0]  ;;  %v13359_v45 = vld [vmem:[%s14303_s25 + $0x554] sm:$0xf]  ;;  %v13373_v46 = vld [vmem:[%s14303_s25 + $0x5c4] sm:$0xf] }
 0x255   : > { %7735 = vmatpush.bf16.msrb.mxu1 %v9354_v48  ;;  %v7251_v48 = vadd.f32 %v15827_v25, %v7237_v8  ;;  %v7291_v25 = vadd.f32 %v15839_v61, %v7277_v58  ;;  %v9703_v61 = vld [vmem:[%s14303_s25 + $0x558] sm:$0xf0]  ;;  %v9642_v58 = vor.u32 %v13343_v13, %v9639_v56  ;;  %v9759_v37 = vld [vmem:[%s14303_s25 + $0x5c8] sm:$0xf0]  ;;  %v13371_v56 = vld [vmem:[%s14303_s25 + $0x5b4] sm:$0xf] }
 0x256   : > { %7749 = vmatpush.bf16.msrb.mxu2 %v9418_v27  ;;  %v9786_v27 = vor.u32 %v13379_v17, %v9783_v59  ;;  %v15989_v4 = vpop.f32.mrf.mxu2  ;;  %v17248_v17 = vld [vmem:[#allocation6_spill] sm:$0xff]  ;;  %v9767_v59 = vld [vmem:[%s14303_s25 + $0x5d8] sm:$0xf0] }
 0x257   : > { %7763 = vmatpush.bf16.msrb.mxu3 %v9482_v15  ;;  %v9650_v15 = vor.u32 %v13345_v54, %v9647_v53  ;;  %v7265_v41 = vadd.f32 %v15832_v34, %v7251_v48  ;;  %v7305_v42 = vadd.f32 %v15859_v38, %v7291_v25  ;;  %v13375_v34 = vld [vmem:[%s14303_s25 + $0x5d4] sm:$0xf]  ;;  %v16009_v54 = vpop.f32.mrf.mxu1  ;;  %v9631_v48 = vld [vmem:[%s14303_s25 + $0x4c8] sm:$0xf0] }
 0x258   : > { %7722 = vmatpush.bf16.msrb.mxu0 %v9282_v30  ;;  %v17246_v30 = vld [vmem:[#allocation4_spill] sm:$0xff]  ;;  %v16004_v38 = vpop.f32.mrf.mxu0  ;;  %v9695_v53 = vld [vmem:[%s14303_s25 + $0x548] sm:$0xf0] }
 0x259   : > { %7736 = vmatpush.bf16.msrb.mxu1 %v9346_v50  ;;  %v15996_v50 = vpop.f32.mrf.mxu3  ;;  %v7279_v8 = vadd.f32 %v15870_v19, %v7265_v41  ;;  %v9770_v19 = vor.u32 %v13375_v34, %v9767_v59  ;;  %v7319_v9 = vadd.f32 %v15861_v57, %v7305_v42  ;;  %v13339_v57 = vld [vmem:[%s14303_s25 + $0x4b4] sm:$0xf]  ;;  %v9762_v41 = vor.u32 %v13373_v46, %v9759_v37  ;;  %v13321_v59 = vld [vmem:[%s14303_s25 + $0x424] sm:$0xf]  ;;  %v9543_v37 = vld [vmem:[%s14303_s25 + $0x418] sm:$0xf0] }
 0x25a   : > { %7750 = vmatpush.bf16.msrb.mxu2 %v9410_v49  ;;  %v17247_v49 = vld [vmem:[#allocation5_spill] sm:$0xff]  ;;  %v13319_v46 = vld [vmem:[%s14303_s25 + $0x414] sm:$0xf] }
 0x25b   : > { %7764 = vmatpush.bf16.msrb.mxu3 %v9474_v14  ;;  %7723 = vmatmul.bf16.vlgmr.msrb.gmra.mxu0 %v17246_v30  ;;  %v17249_v14 = vld [vmem:[#allocation7_spill] sm:$0xff]  ;;  %v7293_v3 = vadd.f32 %v15874_v24, %v7279_v8  ;;  %v7333_v25 = vadd.f32 %v15900_v12, %v7319_v9  ;;  %v13355_v30 = vld [vmem:[%s14303_s25 + $0x534] sm:$0xf]  ;;  %v9551_v8 = vld [vmem:[%s14303_s25 + $0x428] sm:$0xf0] }
 0x25c   : > { %7771 = vmatpush.bf16.msra.mxu0 %v9594_v1  ;;  %7737 = vmatmul.bf16.vlgmr.msrb.gmra.mxu1 %v17248_v17  ;;  %v9578_v1 = vor.u32 %v13327_v43, %v9575_v26  ;;  %v13323_v43 = vld [vmem:[%s14303_s25 + $0x434] sm:$0xf]  ;;  %v9559_v26 = vld [vmem:[%s14303_s25 + $0x438] sm:$0xf0] }
 0x25d   : > { %7785 = vmatpush.bf16.msra.mxu1 %v9658_v47  ;;  %7751 = vmatmul.bf16.vlgmr.msrb.gmra.mxu2 %v17247_v49  ;;  %v9706_v47 = vor.u32 %v13359_v45, %v9703_v61  ;;  %v7307_v13 = vadd.f32 %v15893_v21, %v7293_v3  ;;  %v9623_v24 = vld [vmem:[%s14303_s25 + $0x4b8] sm:$0xf0]  ;;  %v9562_v61 = vor.u32 %v13323_v43, %v9559_v26  ;;  %v13335_v3 = vld [vmem:[%s14303_s25 + $0x494] sm:$0xf] }
 0x25e   : > { %7799 = vmatpush.bf16.msra.mxu2 %v9722_v18  ;;  %7765 = vmatmul.bf16.vlgmr.msrb.gmra.mxu3 %v17249_v14  ;;  %v13325_v18 = vld [vmem:[%s14303_s25 + $0x444] sm:$0xf]  ;;  %v9751_v45 = vld [vmem:[%s14303_s25 + $0x5b8] sm:$0xf0]  ;;  %v16028_v12 = vpop.f32.mrf.mxu2  ;;  %v7347_v42 = vadd.f32 %v15905_v11, %v7333_v25  ;;  %v9626_v17 = vor.u32 %v13339_v57, %v9623_v24  ;;  %v13351_v25 = vld [vmem:[%s14303_s25 + $0x514] sm:$0xf] }
 0x25f   : > { %7813 = vmatpush.bf16.msra.mxu3 %v9786_v27  ;;  %v13357_v27 = vld [vmem:[%s14303_s25 + $0x544] sm:$0xf]  ;;  %v9754_v11 = vor.u32 %v13371_v56, %v9751_v45  ;;  %v9735_v43 = vld [vmem:[%s14303_s25 + $0x598] sm:$0xf0]  ;;  %v9535_v24 = vld [vmem:[%s14303_s25 + $0x408] sm:$0xf0] }
 0x260   : > { %7772 = vmatpush.bf16.msra.mxu0 %v9586_v6  ;;  %v9570_v6 = vor.u32 %v13325_v18, %v9567_v28  ;;  %v16033_v49 = vpop.f32.mrf.mxu0  ;;  %v13337_v14 = vld [vmem:[%s14303_s25 + $0x4a4] sm:$0xf]  ;;  %v9679_v28 = vld [vmem:[%s14303_s25 + $0x528] sm:$0xf0] }
 0x261   : > { %7786 = vmatpush.bf16.msra.mxu1 %v9650_v15  ;;  %v9634_v15 = vor.u32 %v13341_v0, %v9631_v48  ;;  %v16031_v21 = vpop.f32.mrf.mxu3  ;;  %v13353_v18 = vld [vmem:[%s14303_s25 + $0x524] sm:$0xf]  ;;  %v7361_v0 = vadd.f32 %v15920_v22, %v7347_v42  ;;  %v9743_v48 = vld [vmem:[%s14303_s25 + $0x5a8] sm:$0xf0] }
 0x262   : > { %7800 = vmatpush.bf16.msra.mxu2 %v9714_v16  ;;  %v9698_v16 = vor.u32 %v13357_v27, %v9695_v53  ;;  %v9682_v9 = vor.u32 %v13353_v18, %v9679_v28  ;;  %v13333_v56 = vld [vmem:[%s14303_s25 + $0x484] sm:$0xf]  ;;  %v9599_v45 = vld [vmem:[%s14303_s25 + $0x488] sm:$0xf0]  ;;  %v9911_v28 = vld [vmem:[%s14303_s25 + $0x6f8] sm:$0xf0] }
 0x263   : > { %7814 = vmatpush.bf16.msra.mxu3 %v9778_v62  ;;  %v9687_v62 = vld [vmem:[%s14303_s25 + $0x538] sm:$0xf0] }
 0x264   : > { %7773 = vmatpush.bf16.msra.mxu0 %v9578_v1  ;;  %v9690_v34 = vor.u32 %v13355_v30, %v9687_v62  ;;  %v7321_v1 = vadd.f32 %v15898_v23, %v7307_v13  ;;  %v9554_v23 = vor.u32 %v13321_v59, %v9551_v8  ;;  %v9546_v13 = vor.u32 %v13319_v46, %v9543_v37  ;;  %v9727_v59 = vld [vmem:[%s14303_s25 + $0x588] sm:$0xf0] }
 0x265   : > { %7787 = vmatpush.bf16.msra.mxu1 %v9642_v58  ;;  %v16039_v58 = vpop.f32.mrf.mxu1 }
 0x266   : > { %7801 = vmatpush.bf16.msra.mxu2 %v9706_v47  ;;  %v9615_v47 = vld [vmem:[%s14303_s25 + $0x4a8] sm:$0xf0]  ;;  %v7335_v27 = vadd.f32 %v15932_v5, %v7321_v1  ;;  %v7375_v5 = vadd.f32 %v15927_v29, %v7361_v0  ;;  %v16058_v57 = vpop.f32.mrf.mxu2  ;;  %v9847_v1 = vld [vmem:[%s14303_s25 + $0x678] sm:$0xf0]  ;;  %v13427_v0 = vld [vmem:[%s14303_s25 + $0x774] sm:$0xf] }
 0x267   : > { %7815 = vmatpush.bf16.msra.mxu3 %v9770_v19  ;;  %v13369_v19 = vld [vmem:[%s14303_s25 + $0x5a4] sm:$0xf]  ;;  %v9618_v53 = vor.u32 %v13337_v14, %v9615_v47  ;;  %v13395_v14 = vld [vmem:[%s14303_s25 + $0x674] sm:$0xf] }
 0x268   : > { %7774 = vmatpush.bf16.msra.mxu0 %v9570_v6  ;;  %v9746_v22 = vor.u32 %v13369_v19, %v9743_v48  ;;  %v9607_v6 = vld [vmem:[%s14303_s25 + $0x498] sm:$0xf0]  ;;  %v7349_v26 = vadd.f32 %v15937_v40, %v7335_v27  ;;  %v7389_v30 = vadd.f32 %v15967_v2, %v7375_v5  ;;  %v9663_v2 = vld [vmem:[%s14303_s25 + $0x508] sm:$0xf0]  ;;  %v16072_v8 = vpop.f32.mrf.mxu0  ;;  %v9602_v48 = vor.u32 %v13333_v56, %v9599_v45  ;;  %v13391_v45 = vld [vmem:[%s14303_s25 + $0x654] sm:$0xf] }
 0x269   : > { %7788 = vmatpush.bf16.msra.mxu1 %v9634_v15  ;;  %v9671_v15 = vld [vmem:[%s14303_s25 + $0x518] sm:$0xf0]  ;;  %v16063_v62 = vpop.f32.mrf.mxu3  ;;  %v9610_v29 = vor.u32 %v13335_v3, %v9607_v6  ;;  %v9850_v37 = vor.u32 %v13395_v14, %v9847_v1  ;;  %v13393_v6 = vld [vmem:[%s14303_s25 + $0x664] sm:$0xf]  ;;  %v13423_v14 = vld [vmem:[%s14303_s25 + $0x754] sm:$0xf] }
 0x26a   : > { %7802 = vmatpush.bf16.msra.mxu2 %v9698_v16  ;;  %v13367_v16 = vld [vmem:[%s14303_s25 + $0x594] sm:$0xf]  ;;  %v9674_v40 = vor.u32 %v13351_v25, %v9671_v15  ;;  %v7363_v42 = vadd.f32 %v15959_v32, %v7349_v26  ;;  %v9975_v32 = vld [vmem:[%s14303_s25 + $0x778] sm:$0xf0]  ;;  %v7403_v19 = vadd.f32 %v15972_v44, %v7389_v30  ;;  %v9839_v25 = vld [vmem:[%s14303_s25 + $0x668] sm:$0xf0] }
 0x26b   : > { %7816 = vmatpush.bf16.msra.mxu3 %v9762_v41  ;;  %v13317_v41 = vld [vmem:[%s14303_s25 + $0x404] sm:$0xf]  ;;  %v9959_v1 = vld [vmem:[%s14303_s25 + $0x758] sm:$0xf0] }
 0x26c   : > { %7775 = vmatpush.bf16.msra.mxu0 %v9562_v61  ;;  %v13349_v61 = vld [vmem:[%s14303_s25 + $0x504] sm:$0xf]  ;;  %v9538_v18 = vor.u32 %v13317_v41, %v9535_v24  ;;  %v7417_v3 = vadd.f32 %v15989_v4, %v7403_v19  ;;  %v10031_v41 = vld [vmem:[%s14303_s25 + $0x7e8] sm:$0xf0]  ;;  %v9842_v24 = vor.u32 %v13393_v6, %v9839_v25  ;;  %v17253_v19 = vld [vmem:[#allocation11_spill] sm:$0xff] }
 0x26d   : > { %7789 = vmatpush.bf16.msra.mxu1 %v9626_v17  ;;  %v9738_v17 = vor.u32 %v13367_v16, %v9735_v43  ;;  %v16077_v47 = vpop.f32.mrf.mxu1  ;;  %v9666_v27 = vor.u32 %v13349_v61, %v9663_v2  ;;  %v13409_v15 = vld [vmem:[%s14303_s25 + $0x6e4] sm:$0xf]  ;;  %v9903_v43 = vld [vmem:[%s14303_s25 + $0x6e8] sm:$0xf0]  ;;  %v9831_v61 = vld [vmem:[%s14303_s25 + $0x658] sm:$0xf0] }
 0x26e   : > { %7803 = vmatpush.bf16.msra.mxu2 %v9690_v34  ;;  %v13365_v34 = vld [vmem:[%s14303_s25 + $0x584] sm:$0xf]  ;;  %v16096_v4 = vpop.f32.mrf.mxu2  ;;  %v10015_v6 = vld [vmem:[%s14303_s25 + $0x7c8] sm:$0xf0] }
 0x26f   : > { %7817 = vmatpush.bf16.msra.mxu3 %v9754_v11  ;;  %v13411_v11 = vld [vmem:[%s14303_s25 + $0x6f4] sm:$0xf]  ;;  %v9730_v46 = vor.u32 %v13365_v34, %v9727_v59  ;;  %v13425_v26 = vld [vmem:[%s14303_s25 + $0x764] sm:$0xf]  ;;  %v9895_v59 = vld [vmem:[%s14303_s25 + $0x6d8] sm:$0xf0] }
 0x270   : > { %7776 = vmatpush.bf16.msra.mxu0 %v9554_v23  ;;  %v13443_v23 = vld [vmem:[%s14303_s25 + $0x7f4] sm:$0xf]  ;;  %v9914_v44 = vor.u32 %v13411_v11, %v9911_v28 }
 0x271   : > { %7790 = vmatpush.bf16.msra.mxu1 %v9618_v53  ;;  %v10039_v53 = vld [vmem:[%s14303_s25 + $0x7f8] sm:$0xf0]  ;;  %v16099_v30 = vpop.f32.mrf.mxu3  ;;  %v17252_v28 = vld [vmem:[#allocation10_spill] sm:$0xff] }
 0x272   : > { %7804 = vmatpush.bf16.msra.mxu2 %v9682_v9  ;;  %v7377_v9 = vadd.f32 %v15965_v52, %v7363_v42  ;;  %v10042_v16 = vor.u32 %v13443_v23, %v10039_v53  ;;  %v13441_v52 = vld [vmem:[%s14303_s25 + $0x7e4] sm:$0xf]  ;;  %v13407_v42 = vld [vmem:[%s14303_s25 + $0x6d4] sm:$0xf]  ;;  %v9823_v53 = vld [vmem:[%s14303_s25 + $0x648] sm:$0xf0] }
 0x273   : > { %7818 = vmatpush.bf16.msra.mxu3 %v9746_v22  ;;  %v9978_v22 = vor.u32 %v13427_v0, %v9975_v32  ;;  %v10034_v34 = vor.u32 %v13441_v52, %v10031_v41  ;;  %v10023_v0 = vld [vmem:[%s14303_s25 + $0x7d8] sm:$0xf0]  ;;  %v13389_v23 = vld [vmem:[%s14303_s25 + $0x644] sm:$0xf] }
 0x274   : > { %7777 = vmatpush.bf16.msra.mxu0 %v9546_v13  ;;  %v7391_v5 = vadd.f32 %v16004_v38, %v7377_v9  ;;  %v9967_v13 = vld [vmem:[%s14303_s25 + $0x768] sm:$0xf0]  ;;  %v7431_v38 = vadd.f32 %v15996_v50, %v7417_v3  ;;  %v17250_v50 = vld [vmem:[#allocation8_spill] sm:$0xff]  ;;  %v9815_v52 = vld [vmem:[%s14303_s25 + $0x638] sm:$0xf0] }
 0x275   : > { %7791 = vmatpush.bf16.msra.mxu1 %v9610_v29  ;;  %v16101_v29 = vpop.f32.mrf.mxu0  ;;  %v9970_v56 = vor.u32 %v13425_v26, %v9967_v13  ;;  %v16107_v2 = vpop.f32.mrf.mxu1  ;;  %v13405_v9 = vld [vmem:[%s14303_s25 + $0x6c4] sm:$0xf]  ;;  %v13387_v13 = vld [vmem:[%s14303_s25 + $0x634] sm:$0xf] }
 0x276   : > { %7805 = vmatpush.bf16.msra.mxu2 %v9674_v40  ;;  %v9906_v40 = vor.u32 %v13409_v15, %v9903_v43  ;;  %v7445_v11 = vadd.f32 %v16033_v49, %v7431_v38  ;;  %v9898_v49 = vor.u32 %v13407_v42, %v9895_v59  ;;  %v13421_v3 = vld [vmem:[%s14303_s25 + $0x744] sm:$0xf]  ;;  %v16130_v15 = vpop.f32.mrf.mxu2  ;;  %v9879_v38 = vld [vmem:[%s14303_s25 + $0x6b8] sm:$0xf0] }
 0x277   : > { %7819 = vmatpush.bf16.msra.mxu3 %v9738_v17  ;;  %v7405_v17 = vadd.f32 %v16009_v54, %v7391_v5  ;;  %v13439_v54 = vld [vmem:[%s14303_s25 + $0x7d4] sm:$0xf]  ;;  %v9826_v5 = vor.u32 %v13389_v23, %v9823_v53  ;;  %v13385_v59 = vld [vmem:[%s14303_s25 + $0x624] sm:$0xf]  ;;  %v9799_v53 = vld [vmem:[%s14303_s25 + $0x618] sm:$0xf0] }
 0x278   : > { %7778 = vmatpush.bf16.msra.mxu0 %v9538_v18  ;;  %v17251_v18 = vld [vmem:[#allocation9_spill] sm:$0xff]  ;;  %v13383_v23 = vld [vmem:[%s14303_s25 + $0x614] sm:$0xf] }
 0x279   : > { %7792 = vmatpush.bf16.msra.mxu1 %v9602_v48  ;;  %v7419_v32 = vadd.f32 %v16028_v12, %v7405_v17  ;;  %v9834_v48 = vor.u32 %v13391_v45, %v9831_v61  ;;  %v9951_v12 = vld [vmem:[%s14303_s25 + $0x748] sm:$0xf0]  ;;  %v16133_v43 = vpop.f32.mrf.mxu3  ;;  %v13435_v45 = vld [vmem:[%s14303_s25 + $0x7b4] sm:$0xf]  ;;  %v10007_v61 = vld [vmem:[%s14303_s25 + $0x7b8] sm:$0xf0]  ;;  %v9818_v17 = vor.u32 %v13387_v13, %v9815_v52 }
 0x27a   : > { %7806 = vmatpush.bf16.msra.mxu2 %v9666_v27  ;;  %v9962_v27 = vor.u32 %v13423_v14, %v9959_v1  ;;  %v9954_v26 = vor.u32 %v13421_v3, %v9951_v12  ;;  %v9807_v14 = vld [vmem:[%s14303_s25 + $0x628] sm:$0xf0]  ;;  %v13401_v1 = vld [vmem:[%s14303_s25 + $0x6a4] sm:$0xf]  ;;  %v13415_v3 = vld [vmem:[%s14303_s25 + $0x714] sm:$0xf] }
 0x27b   : > { %7820 = vmatpush.bf16.msra.mxu3 %v9730_v46  ;;  %7779 = vmatmul.bf16.vlgmr.msra.gmra.mxu0 %v17250_v50  ;;  %v10026_v46 = vor.u32 %v13439_v54, %v10023_v0  ;;  %v7433_v25 = vadd.f32 %v16031_v21, %v7419_v32  ;;  %v13403_v21 = vld [vmem:[%s14303_s25 + $0x6b4] sm:$0xf]  ;;  %v13417_v54 = vld [vmem:[%s14303_s25 + $0x724] sm:$0xf]  ;;  %v9935_v0 = vld [vmem:[%s14303_s25 + $0x728] sm:$0xf0] }
 0x27c   : > { %7827 = vmatpush.bf16.msrb.mxu0 %v9850_v37  ;;  %7793 = vmatmul.bf16.vlgmr.msra.gmra.mxu1 %v17252_v28  ;;  %v9887_v37 = vld [vmem:[%s14303_s25 + $0x6c8] sm:$0xf0]  ;;  %v9882_v50 = vor.u32 %v13403_v21, %v9879_v38  ;;  %v13433_v32 = vld [vmem:[%s14303_s25 + $0x7a4] sm:$0xf] }
 0x27d   : > { %7841 = vmatpush.bf16.msrb.mxu1 %v9914_v44  ;;  %7807 = vmatmul.bf16.vlgmr.msra.gmra.mxu2 %v17251_v18  ;;  %v7459_v44 = vadd.f32 %v16039_v58, %v7445_v11  ;;  %v9890_v58 = vor.u32 %v13405_v9, %v9887_v37  ;;  %v7447_v41 = vadd.f32 %v16072_v8, %v7433_v25  ;;  %v16146_v42 = vpop.f32.mrf.mxu1  ;;  %v9871_v28 = vld [vmem:[%s14303_s25 + $0x6a8] sm:$0xf0]  ;;  %v13399_v9 = vld [vmem:[%s14303_s25 + $0x694] sm:$0xf]  ;;  %v9863_v37 = vld [vmem:[%s14303_s25 + $0x698] sm:$0xf0] }
 0x27e   : > { %7855 = vmatpush.bf16.msrb.mxu2 %v9978_v22  ;;  %7821 = vmatmul.bf16.vlgmr.msra.gmra.mxu3 %v17253_v19  ;;  %v13437_v22 = vld [vmem:[%s14303_s25 + $0x7c4] sm:$0xf]  ;;  %v10010_v18 = vor.u32 %v13435_v45, %v10007_v61  ;;  %v9999_v19 = vld [vmem:[%s14303_s25 + $0x7a8] sm:$0xf0]  ;;  %v9991_v25 = vld [vmem:[%s14303_s25 + $0x798] sm:$0xf0]  ;;  %v9866_v52 = vor.u32 %v13399_v9, %v9863_v37 }
 0x27f   : > { %7869 = vmatpush.bf16.msrb.mxu3 %v10042_v16  ;;  %v7473_v16 = vadd.f32 %v16058_v57, %v7459_v44  ;;  %v13419_v57 = vld [vmem:[%s14303_s25 + $0x734] sm:$0xf]  ;;  %v7461_v11 = vadd.f32 %v16077_v47, %v7447_v41  ;;  %v9874_v47 = vor.u32 %v13401_v1, %v9871_v28  ;;  %v9791_v13 = vld [vmem:[%s14303_s25 + $0x608] sm:$0xf0] }
 0x280   : > { %7828 = vmatpush.bf16.msrb.mxu0 %v9842_v24  ;;  %v10018_v24 = vor.u32 %v13437_v22, %v10015_v6  ;;  %v13431_v6 = vld [vmem:[%s14303_s25 + $0x794] sm:$0xf]  ;;  %v9855_v41 = vld [vmem:[%s14303_s25 + $0x688] sm:$0xf0] }
 0x281   : > { %7842 = vmatpush.bf16.msrb.mxu1 %v9906_v40  ;;  %v9943_v40 = vld [vmem:[%s14303_s25 + $0x738] sm:$0xf0]  ;;  %v7487_v8 = vadd.f32 %v16063_v62, %v7473_v16  ;;  %v16169_v44 = vpop.f32.mrf.mxu3  ;;  %v9994_v38 = vor.u32 %v13431_v6, %v9991_v25  ;;  %v9983_v45 = vld [vmem:[%s14303_s25 + $0x788] sm:$0xf0]  ;;  %v13459_v61 = vld [vmem:[%s14303_s25 + $0x874] sm:$0xf] }
 0x282   : > { %7856 = vmatpush.bf16.msrb.mxu2 %v9970_v56  ;;  %v16142_v56 = vpop.f32.mrf.mxu0  ;;  %v13507_v28 = vld [vmem:[%s14303_s25 + $0x9f4] sm:$0xf]  ;;  %v10159_v9 = vld [vmem:[%s14303_s25 + $0x8e8] sm:$0xf0] }
 0x283   : > { %7870 = vmatpush.bf16.msrb.mxu3 %v10034_v34  ;;  %v9946_v34 = vor.u32 %v13419_v57, %v9943_v40  ;;  %v7501_v62 = vadd.f32 %v16101_v29, %v7487_v8  ;;  %v16163_v29 = vpop.f32.mrf.mxu2  ;;  %v9919_v57 = vld [vmem:[%s14303_s25 + $0x708] sm:$0xf0]  ;;  %v13429_v40 = vld [vmem:[%s14303_s25 + $0x784] sm:$0xf]  ;;  %v13475_v8 = vld [vmem:[%s14303_s25 + $0x8f4] sm:$0xf] }
 0x284   : > { %7829 = vmatpush.bf16.msrb.mxu0 %v9834_v48  ;;  %v7475_v48 = vadd.f32 %v16096_v4, %v7461_v11  ;;  %v9927_v4 = vld [vmem:[%s14303_s25 + $0x718] sm:$0xf0]  ;;  %v10223_v37 = vld [vmem:[%s14303_s25 + $0x968] sm:$0xf0] }
 0x285   : > { %7843 = vmatpush.bf16.msrb.mxu1 %v9898_v49  ;;  %v9810_v49 = vor.u32 %v13385_v59, %v9807_v14  ;;  %v7515_v12 = vadd.f32 %v16107_v2, %v7501_v62  ;;  %v7570_v16 = vpop.f32.mrf.mxu1  ;;  %v9930_v21 = vor.u32 %v13415_v3, %v9927_v4  ;;  %v13491_v59 = vld [vmem:[%s14303_s25 + $0x974] sm:$0xf]  ;;  %v10231_v14 = vld [vmem:[%s14303_s25 + $0x978] sm:$0xf0] }
 0x286   : > { %7857 = vmatpush.bf16.msrb.mxu2 %v9962_v27  ;;  %v9938_v27 = vor.u32 %v13417_v54, %v9935_v0  ;;  %v9986_v0 = vor.u32 %v13429_v40, %v9983_v45  ;;  %v13503_v40 = vld [vmem:[%s14303_s25 + $0x9d4] sm:$0xf]  ;;  %v10279_v45 = vld [vmem:[%s14303_s25 + $0x9d8] sm:$0xf0] }
 0x287   : > { %7871 = vmatpush.bf16.msrb.mxu3 %v10026_v46  ;;  %v10002_v46 = vor.u32 %v13433_v32, %v9999_v19  ;;  %v7529_v2 = vadd.f32 %v16130_v15, %v7515_v12  ;;  %v10287_v12 = vld [vmem:[%s14303_s25 + $0x9e8] sm:$0xf0] }
 0x288   : > { %7830 = vmatpush.bf16.msrb.mxu0 %v9826_v5  ;;  %v7489_v5 = vadd.f32 %v16099_v30, %v7475_v48  ;;  %v13397_v30 = vld [vmem:[%s14303_s25 + $0x684] sm:$0xf] }
 0x289   : > { %7844 = vmatpush.bf16.msrb.mxu1 %v9890_v58  ;;  %v9802_v58 = vor.u32 %v13383_v23, %v9799_v53  ;;  %v7543_v1 = vadd.f32 %v16133_v43, %v7529_v2  ;;  %v9858_v11 = vor.u32 %v13397_v30, %v9855_v41  ;;  %v7598_v43 = vpop.f32.mrf.mxu3  ;;  %v13473_v23 = vld [vmem:[%s14303_s25 + $0x8e4] sm:$0xf]  ;;  %v13487_v30 = vld [vmem:[%s14303_s25 + $0x954] sm:$0xf]  ;;  %v10215_v41 = vld [vmem:[%s14303_s25 + $0x958] sm:$0xf0] }
 0x28a   : > { %7858 = vmatpush.bf16.msrb.mxu2 %v9954_v26  ;;  %v7556_v22 = vpop.f32.mrf.mxu0  ;;  %v13381_v26 = vld [vmem:[%s14303_s25 + $0x604] sm:$0xf]  ;;  %v7503_v15 = vadd.f32 %v16142_v56, %v7489_v5  ;;  %v10295_v56 = vld [vmem:[%s14303_s25 + $0x9f8] sm:$0xf0]  ;;  %v10162_v5 = vor.u32 %v13473_v23, %v10159_v9  ;;  %v13451_v23 = vld [vmem:[%s14303_s25 + $0x834] sm:$0xf] }
 0x28b   : > { %7872 = vmatpush.bf16.msrb.mxu3 %v10018_v24  ;;  %v13413_v24 = vld [vmem:[%s14303_s25 + $0x704] sm:$0xf]  ;;  %v7584_v54 = vpop.f32.mrf.mxu2  ;;  %v7557_v19 = vadd.f32 %v7556_v22, %v7543_v1  ;;  %v10298_v53 = vor.u32 %v13507_v28, %v10295_v56  ;;  %v10207_v28 = vld [vmem:[%s14303_s25 + $0x948] sm:$0xf0]  ;;  %v13467_v9 = vld [vmem:[%s14303_s25 + $0x8b4] sm:$0xf] }
 0x28c   : > { %7831 = vmatpush.bf16.msrb.mxu0 %v9818_v17  ;;  %v10103_v17 = vld [vmem:[%s14303_s25 + $0x878] sm:$0xf0]  ;;  %v7517_v32 = vadd.f32 %v16146_v42, %v7503_v15  ;;  %v13505_v42 = vld [vmem:[%s14303_s25 + $0x9e4] sm:$0xf] }
 0x28d   : > { %7845 = vmatpush.bf16.msrb.mxu1 %v9882_v50  ;;  %v9794_v50 = vor.u32 %v13381_v26, %v9791_v13  ;;  %v10106_v62 = vor.u32 %v13459_v61, %v10103_v17  ;;  %v7572_v22 = vpop.f32.mrf.mxu1  ;;  %v7571_v25 = vadd.f32 %v7570_v16, %v7557_v19  ;;  %v10087_v26 = vld [vmem:[%s14303_s25 + $0x858] sm:$0xf0]  ;;  %v13471_v13 = vld [vmem:[%s14303_s25 + $0x8d4] sm:$0xf]  ;;  %v17254_v2 = vld [vmem:[#allocation12_spill] sm:$0xff] }
 0x28e   : > { %7859 = vmatpush.bf16.msrb.mxu2 %v9946_v34  ;;  %v10167_v34 = vld [vmem:[%s14303_s25 + $0x8f8] sm:$0xf0]  ;;  %v7531_v3 = vadd.f32 %v16163_v29, %v7517_v32  ;;  %v13453_v17 = vld [vmem:[%s14303_s25 + $0x844] sm:$0xf]  ;;  %v10271_v32 = vld [vmem:[%s14303_s25 + $0x9c8] sm:$0xf0] }
 0x28f   : > { %7873 = vmatpush.bf16.msrb.mxu3 %v10010_v18  ;;  %v9922_v18 = vor.u32 %v13413_v24, %v9919_v57  ;;  %v10170_v48 = vor.u32 %v13475_v8, %v10167_v34  ;;  %v7585_v24 = vadd.f32 %v7584_v54, %v7571_v25  ;;  %v17256_v57 = vld [vmem:[#allocation14_spill] sm:$0xff]  ;;  %v17257_v15 = vld [vmem:[#allocation15_spill] sm:$0xff]  ;;  %v10079_v34 = vld [vmem:[%s14303_s25 + $0x848] sm:$0xf0] }
 0x290   : > { %7832 = vmatpush.bf16.msrb.mxu0 %v9810_v49  ;;  %v10234_v49 = vor.u32 %v13491_v59, %v10231_v14  ;;  %v7545_v16 = vadd.f32 %v16169_v44, %v7531_v3  ;;  %v13469_v59 = vld [vmem:[%s14303_s25 + $0x8c4] sm:$0xf]  ;;  %v10143_v14 = vld [vmem:[%s14303_s25 + $0x8c8] sm:$0xf0]  ;;  %v10082_v19 = vor.u32 %v13453_v17, %v10079_v34  ;;  %v13483_v3 = vld [vmem:[%s14303_s25 + $0x934] sm:$0xf] }
 0x291   : > { %7846 = vmatpush.bf16.msrb.mxu1 %v9874_v47  ;;  %v13457_v47 = vld [vmem:[%s14303_s25 + $0x864] sm:$0xf]  ;;  %v7599_v56 = vadd.f32 %v7598_v43, %v7585_v24  ;;  %v7600_v54 = vpop.f32.mrf.mxu3  ;;  %v13447_v34 = vld [vmem:[%s14303_s25 + $0x814] sm:$0xf] }
 0x292   : > { %7860 = vmatpush.bf16.msrb.mxu2 %v9938_v27  ;;  %v10095_v27 = vld [vmem:[%s14303_s25 + $0x868] sm:$0xf0]  ;;  %v7558_v4 = vpop.f32.mrf.mxu0  ;;  %v13449_v25 = vld [vmem:[%s14303_s25 + $0x824] sm:$0xf] }
 0x293   : > { %7874 = vmatpush.bf16.msrb.mxu3 %v10002_v46  ;;  %v13489_v46 = vld [vmem:[%s14303_s25 + $0x964] sm:$0xf]  ;;  %v10098_v6 = vor.u32 %v13457_v47, %v10095_v27  ;;  %v7559_v8 = vadd.f32 %v7558_v4, %v7545_v16  ;;  %v7586_v1 = vpop.f32.mrf.mxu2  ;;  %v10199_v4 = vld [vmem:[%s14303_s25 + $0x938] sm:$0xf0] }
 0x294   : > { %7833 = vmatpush.bf16.msrb.mxu0 %v9802_v58  ;;  %v10226_v29 = vor.u32 %v13489_v46, %v10223_v37  ;;  %v13455_v58 = vld [vmem:[%s14303_s25 + $0x854] sm:$0xf]  ;;  %v10135_v37 = vld [vmem:[%s14303_s25 + $0x8b8] sm:$0xf0] }
 0x295   : > { %7847 = vmatpush.bf16.msrb.mxu1 %v9866_v52  ;;  %v10290_v52 = vor.u32 %v13505_v42, %v10287_v12  ;;  %v10090_v61 = vor.u32 %v13455_v58, %v10087_v26  ;;  %v7573_v47 = vadd.f32 %v7572_v22, %v7559_v8  ;;  %v13499_v12 = vld [vmem:[%s14303_s25 + $0x9b4] sm:$0xf]  ;;  %v10263_v22 = vld [vmem:[%s14303_s25 + $0x9b8] sm:$0xf0]  ;;  %v10202_v58 = vor.u32 %v13483_v3, %v10199_v4  ;;  %v10063_v26 = vld [vmem:[%s14303_s25 + $0x828] sm:$0xf0] }
 0x296   : > { %7861 = vmatpush.bf16.msrb.mxu2 %v9930_v21  ;;  %v10151_v21 = vld [vmem:[%s14303_s25 + $0x8d8] sm:$0xf0]  ;;  %v10175_v3 = vld [vmem:[%s14303_s25 + $0x908] sm:$0xf0]  ;;  %v13493_v4 = vld [vmem:[%s14303_s25 + $0x984] sm:$0xf] }
 0x297   : > { %7875 = vmatpush.bf16.msrb.mxu3 %v9994_v38  ;;  %v17255_v38 = vld [vmem:[#allocation13_spill] sm:$0xff]  ;;  %v10154_v44 = vor.u32 %v13471_v13, %v10151_v21  ;;  %v7587_v42 = vadd.f32 %v7586_v1, %v7573_v47  ;;  %v13465_v13 = vld [vmem:[%s14303_s25 + $0x8a4] sm:$0xf] }
 0x298   : > { %7834 = vmatpush.bf16.msrb.mxu0 %v9794_v50  ;;  %v10218_v50 = vor.u32 %v13487_v30, %v10215_v41  ;;  %v13481_v30 = vld [vmem:[%s14303_s25 + $0x924] sm:$0xf]  ;;  %v10191_v41 = vld [vmem:[%s14303_s25 + $0x928] sm:$0xf0] }
 0x299   : > { %7848 = vmatpush.bf16.msrb.mxu1 %v9858_v11  ;;  %v10282_v11 = vor.u32 %v13503_v40, %v10279_v45  ;;  %v7601_v16 = vadd.f32 %v7600_v54, %v7587_v42  ;;  %v13497_v40 = vld [vmem:[%s14303_s25 + $0x9a4] sm:$0xf]  ;;  %v10255_v45 = vld [vmem:[%s14303_s25 + $0x9a8] sm:$0xf0] }
 0x29a   : > { %7862 = vmatpush.bf16.msrb.mxu2 %v9922_v18  ;;  %v13485_v18 = vld [vmem:[%s14303_s25 + $0x944] sm:$0xf]  ;;  %v10258_v1 = vor.u32 %v13497_v40, %v10255_v45  ;;  %v10239_v42 = vld [vmem:[%s14303_s25 + $0x988] sm:$0xf0] }
 0x29b   : > { %7876 = vmatpush.bf16.msrb.mxu3 %v9986_v0  ;;  %7835 = vmatmul.bf16.vlgmr.msrb.gmra.mxu0 %v17254_v2  ;;  %v7612_v0 = vpop.f32.mrf.mxu0  ;;  %v10210_v43 = vor.u32 %v13485_v18, %v10207_v28  ;;  %v10127_v2 = vld [vmem:[%s14303_s25 + $0x8a8] sm:$0xf0]  ;;  %v10119_v18 = vld [vmem:[%s14303_s25 + $0x898] sm:$0xf0]  ;;  %v13479_v28 = vld [vmem:[%s14303_s25 + $0x914] sm:$0xf] }
 0x29c   : > { %7883 = vmatpush.bf16.msra.mxu0 %v10106_v62  ;;  %7849 = vmatmul.bf16.vlgmr.msrb.gmra.mxu1 %v17256_v57  ;;  %v13501_v62 = vld [vmem:[%s14303_s25 + $0x9c4] sm:$0xf]  ;;  %v7613_v27 = vadd.f32 %v7612_v0, %v7599_v56  ;;  %v10130_v17 = vor.u32 %v13465_v13, %v10127_v2  ;;  %v10183_v56 = vld [vmem:[%s14303_s25 + $0x918] sm:$0xf0]  ;;  %v13495_v0 = vld [vmem:[%s14303_s25 + $0x994] sm:$0xf] }
 0x29d   : > { %7897 = vmatpush.bf16.msra.mxu1 %v10170_v48  ;;  %7863 = vmatmul.bf16.vlgmr.msrb.gmra.mxu2 %v17255_v38  ;;  %v10146_v48 = vor.u32 %v13469_v59, %v10143_v14  ;;  %v10274_v46 = vor.u32 %v13501_v62, %v10271_v32  ;;  %v10055_v59 = vld [vmem:[%s14303_s25 + $0x818] sm:$0xf0]  ;;  %v13463_v14 = vld [vmem:[%s14303_s25 + $0x894] sm:$0xf]  ;;  %v13521_v45 = vld [vmem:[%s14303_s25 + $0xa64] sm:$0xf] }
 0x29e   : > { %7911 = vmatpush.bf16.msra.mxu2 %v10234_v49  ;;  %7877 = vmatmul.bf16.vlgmr.msrb.gmra.mxu3 %v17257_v15  ;;  %v7626_v49 = vpop.f32.mrf.mxu1  ;;  %v295_v15 = vld [vmem:[#allocation2] sm:$0xff]  ;;  %v10247_v62 = vld [vmem:[%s14303_s25 + $0x998] sm:$0xf0]  ;;  %v10058_v32 = vor.u32 %v13447_v34, %v10055_v59  ;;  %v10543_v59 = vld [vmem:[%s14303_s25 + $0xbe8] sm:$0xf0] }
 0x29f   : > { %7925 = vmatpush.bf16.msra.mxu3 %v10298_v53  ;;  %v10071_v53 = vld [vmem:[%s14303_s25 + $0x838] sm:$0xf0]  ;;  %v13569_v34 = vld [vmem:[%s14303_s25 + $0xbe4] sm:$0xf] }
 0x2a0   : > { %7884 = vmatpush.bf16.msra.mxu0 %v10098_v6  ;;  %v10074_v6 = vor.u32 %v13451_v23, %v10071_v53  ;;  %v7640_v21 = vpop.f32.mrf.mxu2  ;;  %v10111_v23 = vld [vmem:[%s14303_s25 + $0x888] sm:$0xf0]  ;;  %v13477_v53 = vld [vmem:[%s14303_s25 + $0x904] sm:$0xf]  ;;  %v10487_v13 = vld [vmem:[%s14303_s25 + $0xb78] sm:$0xf0] }
 0x2a1   : > { %7898 = vmatpush.bf16.msra.mxu1 %v10162_v5  ;;  %v7627_v5 = vadd.f32 %v7626_v49, %v7613_v27  ;;  %v7654_v57 = vpop.f32.mrf.mxu3  ;;  %v13461_v49 = vld [vmem:[%s14303_s25 + $0x884] sm:$0xf]  ;;  %v10122_v27 = vor.u32 %v13463_v14, %v10119_v18  ;;  %v13519_v18 = vld [vmem:[%s14303_s25 + $0xa54] sm:$0xf] }
 0x2a2   : > { %7912 = vmatpush.bf16.msra.mxu2 %v10226_v29  ;;  %v10138_v29 = vor.u32 %v13467_v9, %v10135_v37  ;;  %v10250_v9 = vor.u32 %v13495_v0, %v10247_v62  ;;  %v297_v37 = vld [vmem:[#allocation2 + $0x10] sm:$0xff]  ;;  %v10546_v0 = vor.u32 %v13569_v34, %v10543_v59  ;;  %v10407_v62 = vld [vmem:[%s14303_s25 + $0xad8] sm:$0xf0]  ;;  %v10383_v34 = vld [vmem:[%s14303_s25 + $0xaa8] sm:$0xf0] }
 0x2a3   : > { %7926 = vmatpush.bf16.msra.mxu3 %v10290_v52  ;;  %v10266_v52 = vor.u32 %v13499_v12, %v10263_v22  ;;  %v7641_v24 = vadd.f32 %v7640_v21, %v7627_v5  ;;  %v7614_v38 = vpop.f32.mrf.mxu0  ;;  %v13539_v5 = vld [vmem:[%s14303_s25 + $0xaf4] sm:$0xf]  ;;  %v10178_v21 = vor.u32 %v13477_v53, %v10175_v3  ;;  %v13533_v3 = vld [vmem:[%s14303_s25 + $0xac4] sm:$0xf] }
 0x2a4   : > { %7885 = vmatpush.bf16.msra.mxu0 %v10090_v61  ;;  %v10066_v61 = vor.u32 %v13449_v25, %v10063_v26  ;;  %v7615_v8 = vadd.f32 %v7614_v38, %v7601_v16  ;;  %v10359_v25 = vld [vmem:[%s14303_s25 + $0xa78] sm:$0xf0]  ;;  %v13555_v26 = vld [vmem:[%s14303_s25 + $0xb74] sm:$0xf]  ;;  %v10242_v16 = vor.u32 %v13493_v4, %v10239_v42  ;;  %v10399_v42 = vld [vmem:[%s14303_s25 + $0xac8] sm:$0xf0] }
 0x2a5   : > { %7899 = vmatpush.bf16.msra.mxu1 %v10154_v44  ;;  %v7655_v44 = vadd.f32 %v7654_v57, %v7641_v24  ;;  %v10490_v40 = vor.u32 %v13555_v26, %v10487_v13  ;;  %v10402_v26 = vor.u32 %v13533_v3, %v10399_v42  ;;  %v13545_v59 = vld [vmem:[%s14303_s25 + $0xb24] sm:$0xf]  ;;  %v10303_v3 = vld [vmem:[%s14303_s25 + $0xa08] sm:$0xf0] }
 0x2a6   : > { %7913 = vmatpush.bf16.msra.mxu2 %v10218_v50  ;;  %v10194_v50 = vor.u32 %v13481_v30, %v10191_v41  ;;  %v13571_v30 = vld [vmem:[%s14303_s25 + $0xbf4] sm:$0xf]  ;;  %v10551_v41 = vld [vmem:[%s14303_s25 + $0xbf8] sm:$0xf0] }
 0x2a7   : > { %7927 = vmatpush.bf16.msra.mxu3 %v10282_v11  ;;  %v7628_v11 = vpop.f32.mrf.mxu1  ;;  %v8555_v54 = vadd.f32 %v7655_v44, %v295_v15  ;;  %v10351_v15 = vld [vmem:[%s14303_s25 + $0xa68] sm:$0xf0]  ;;  %v13553_v44 = vld [vmem:[%s14303_s25 + $0xb64] sm:$0xf] }
 0x2a8   : > { %7886 = vmatpush.bf16.msra.mxu0 %v10082_v19  ;;  %v13445_v19 = vld [vmem:[%s14303_s25 + $0x804] sm:$0xf]  ;;  %v7629_v47 = vadd.f32 %v7628_v11, %v7615_v8  ;;  %v10415_v8 = vld [vmem:[%s14303_s25 + $0xae8] sm:$0xf0]  ;;  %v10354_v14 = vor.u32 %v13521_v45, %v10351_v15 }
 0x2a9   : > { %7900 = vmatpush.bf16.msra.mxu1 %v10146_v48  ;;  %v10047_v48 = vld [vmem:[%s14303_s25 + $0x808] sm:$0xf0]  ;;  %8559 = vst [vmem:[#allocation2] sm:$0xff] %v8555_v54  ;;  %v7656_v22 = vpop.f32.mrf.mxu3  ;;  %v17258_v54 = vld [vmem:[#allocation16_spill] sm:$0xff] }
 0x2aa   : > { %7914 = vmatpush.bf16.msra.mxu2 %v10210_v43  ;;  %v10186_v43 = vor.u32 %v13479_v28, %v10183_v56  ;;  %v10343_v28 = vld [vmem:[%s14303_s25 + $0xa58] sm:$0xf0]  ;;  %v13535_v56 = vld [vmem:[%s14303_s25 + $0xad4] sm:$0xf] }
 0x2ab   : > { %7928 = vmatpush.bf16.msra.mxu3 %v10274_v46  ;;  %v7642_v46 = vpop.f32.mrf.mxu2  ;;  %v10410_v53 = vor.u32 %v13535_v56, %v10407_v62 }
 0x2ac   : > { %7887 = vmatpush.bf16.msra.mxu0 %v10074_v6  ;;  %v7643_v12 = vadd.f32 %v7642_v46, %v7629_v47  ;;  %v13523_v6 = vld [vmem:[%s14303_s25 + $0xa74] sm:$0xf]  ;;  %v13517_v46 = vld [vmem:[%s14303_s25 + $0xa44] sm:$0xf] }
 0x2ad   : > { %7901 = vmatpush.bf16.msra.mxu1 %v10138_v29  ;;  %v10050_v29 = vor.u32 %v13445_v19, %v10047_v48  ;;  %v10362_v24 = vor.u32 %v13523_v6, %v10359_v25  ;;  %v10471_v19 = vld [vmem:[%s14303_s25 + $0xb58] sm:$0xf0]  ;;  %v17259_v48 = vld [vmem:[#allocation17_spill] sm:$0xff]  ;;  %v13567_v47 = vld [vmem:[%s14303_s25 + $0xbd4] sm:$0xf] }
 0x2ae   : > { %7915 = vmatpush.bf16.msra.mxu2 %v10202_v58  ;;  %v10423_v58 = vld [vmem:[%s14303_s25 + $0xaf8] sm:$0xf0]  ;;  %v7657_v2 = vadd.f32 %v7656_v22, %v7643_v12  ;;  %v13549_v12 = vld [vmem:[%s14303_s25 + $0xb44] sm:$0xf]  ;;  %v10463_v22 = vld [vmem:[%s14303_s25 + $0xb48] sm:$0xf0] }
 0x2af   : > { %7929 = vmatpush.bf16.msra.mxu3 %v10266_v52  ;;  %v10114_v52 = vor.u32 %v13461_v49, %v10111_v23  ;;  %v10426_v57 = vor.u32 %v13539_v5, %v10423_v58  ;;  %v17260_v49 = vld [vmem:[#allocation18_spill] sm:$0xff]  ;;  %v10346_v23 = vor.u32 %v13519_v18, %v10343_v28  ;;  %v13565_v6 = vld [vmem:[%s14303_s25 + $0xbc4] sm:$0xf]  ;;  %v10527_v25 = vld [vmem:[%s14303_s25 + $0xbc8] sm:$0xf0]  ;;  %v10466_v13 = vor.u32 %v13549_v12, %v10463_v22 }
 0x2b0   : > { %7888 = vmatpush.bf16.msra.mxu0 %v10066_v61  ;;  %v8557_v38 = vadd.f32 %v7657_v2, %v297_v37  ;;  %v13537_v61 = vld [vmem:[%s14303_s25 + $0xae4] sm:$0xf]  ;;  %v10335_v37 = vld [vmem:[%s14303_s25 + $0xa48] sm:$0xf0]  ;;  %v13515_v2 = vld [vmem:[%s14303_s25 + $0xa34] sm:$0xf] }
 0x2b1   : > { %7902 = vmatpush.bf16.msra.mxu1 %v10130_v17  ;;  %v10554_v17 = vor.u32 %v13571_v30, %v10551_v41  ;;  %v10338_v5 = vor.u32 %v13517_v46, %v10335_v37  ;;  %v10530_v41 = vor.u32 %v13565_v6, %v10527_v25  ;;  %v10511_v18 = vld [vmem:[%s14303_s25 + $0xba8] sm:$0xf0]  ;;  %v13509_v37 = vld [vmem:[%s14303_s25 + $0xa04] sm:$0xf] }
 0x2b2   : > { %7916 = vmatpush.bf16.msra.mxu2 %v10194_v50  ;;  %v10479_v50 = vld [vmem:[%s14303_s25 + $0xb68] sm:$0xf0]  ;;  %8562 = vst [vmem:[#allocation2 + $0x10] sm:$0xff] %v8557_v38  ;;  %v10455_v38 = vld [vmem:[%s14303_s25 + $0xb38] sm:$0xf0] }
 0x2b3   : > { %7930 = vmatpush.bf16.msra.mxu3 %v10258_v1  ;;  %v10418_v1 = vor.u32 %v13537_v61, %v10415_v8  ;;  %v10482_v11 = vor.u32 %v13553_v44, %v10479_v50  ;;  %v10319_v8 = vld [vmem:[%s14303_s25 + $0xa28] sm:$0xf0]  ;;  %v13529_v44 = vld [vmem:[%s14303_s25 + $0xaa4] sm:$0xf] }
 0x2b4   : > { %7889 = vmatpush.bf16.msra.mxu0 %v10058_v32  ;;  %v13551_v32 = vld [vmem:[%s14303_s25 + $0xb54] sm:$0xf]  ;;  %v13525_v12 = vld [vmem:[%s14303_s25 + $0xa84] sm:$0xf]  ;;  %v10367_v22 = vld [vmem:[%s14303_s25 + $0xa88] sm:$0xf0] }
 0x2b5   : > { %7903 = vmatpush.bf16.msra.mxu1 %v10122_v27  ;;  %v10535_v27 = vld [vmem:[%s14303_s25 + $0xbd8] sm:$0xf0]  ;;  %v13541_v6 = vld [vmem:[%s14303_s25 + $0xb04] sm:$0xf] }
 0x2b6   : > { %7917 = vmatpush.bf16.msra.mxu2 %v10186_v43  ;;  %v17261_v43 = vld [vmem:[#allocation19_spill] sm:$0xff]  ;;  %v10538_v4 = vor.u32 %v13567_v47, %v10535_v27 }
 0x2b7   : > { %7931 = vmatpush.bf16.msra.mxu3 %v10250_v9  ;;  %v10474_v9 = vor.u32 %v13551_v32, %v10471_v19  ;;  %v13511_v32 = vld [vmem:[%s14303_s25 + $0xa14] sm:$0xf]  ;;  %v10311_v19 = vld [vmem:[%s14303_s25 + $0xa18] sm:$0xf0] }
 0x2b8   : > { %7890 = vmatpush.bf16.msra.mxu0 %v10050_v29  ;;  %v7668_v29 = vpop.f32.mrf.mxu0  ;;  %v10375_v27 = vld [vmem:[%s14303_s25 + $0xa98] sm:$0xf0]  ;;  %v10314_v46 = vor.u32 %v13511_v32, %v10311_v19  ;;  %v13599_v19 = vld [vmem:[%s14303_s25 + $0xcd4] sm:$0xf] }
 0x2b9   : > { %7904 = vmatpush.bf16.msra.mxu1 %v10114_v52  ;;  %v7682_v58 = vpop.f32.mrf.mxu1  ;;  %v10327_v52 = vld [vmem:[%s14303_s25 + $0xa38] sm:$0xf0] }
 0x2ba   : > { %7918 = vmatpush.bf16.msra.mxu2 %v10178_v21  ;;  %v13531_v21 = vld [vmem:[%s14303_s25 + $0xab4] sm:$0xf]  ;;  %v7683_v30 = vadd.f32 %v7682_v58, %v7668_v29  ;;  %v10330_v45 = vor.u32 %v13515_v2, %v10327_v52  ;;  %v13557_v29 = vld [vmem:[%s14303_s25 + $0xb84] sm:$0xf]  ;;  %v10495_v58 = vld [vmem:[%s14303_s25 + $0xb88] sm:$0xf0]  ;;  %v10306_v52 = vor.u32 %v13509_v37, %v10303_v3 }
 0x2bb   : > { %7932 = vmatpush.bf16.msra.mxu3 %v10242_v16  ;;  %7891 = vmatmul.bf16.vlgmr.msra.gmra.mxu0 %v17258_v54  ;;  %v10391_v16 = vld [vmem:[%s14303_s25 + $0xab8] sm:$0xf0]  ;;  %v13603_v2 = vld [vmem:[%s14303_s25 + $0xcf4] sm:$0xf] }
 0x2bc   : > { %7939 = vmatpush.bf16.msrb.mxu0 %v10362_v24  ;;  %7905 = vmatmul.bf16.vlgmr.msra.gmra.mxu1 %v17260_v49  ;;  %v13547_v24 = vld [vmem:[%s14303_s25 + $0xb34] sm:$0xf]  ;;  %v10394_v15 = vor.u32 %v13531_v21, %v10391_v16  ;;  %v10679_v21 = vld [vmem:[%s14303_s25 + $0xcf8] sm:$0xf0]  ;;  %v10370_v16 = vor.u32 %v13525_v12, %v10367_v22 }
 0x2bd   : > { %7953 = vmatpush.bf16.msrb.mxu1 %v10426_v57  ;;  %7919 = vmatmul.bf16.vlgmr.msra.gmra.mxu2 %v17259_v48  ;;  %v13563_v57 = vld [vmem:[%s14303_s25 + $0xbb4] sm:$0xf]  ;;  %v10458_v61 = vor.u32 %v13547_v24, %v10455_v38  ;;  %v10599_v32 = vld [vmem:[%s14303_s25 + $0xc58] sm:$0xf0] }
 0x2be   : > { %7967 = vmatpush.bf16.msrb.mxu2 %v10490_v40  ;;  %7933 = vmatmul.bf16.vlgmr.msra.gmra.mxu3 %v17261_v43  ;;  %v10519_v40 = vld [vmem:[%s14303_s25 + $0xbb8] sm:$0xf0]  ;;  %v13527_v48 = vld [vmem:[%s14303_s25 + $0xa94] sm:$0xf] }
 0x2bf   : > { %7981 = vmatpush.bf16.msrb.mxu3 %v10554_v17  ;;  %v13513_v17 = vld [vmem:[%s14303_s25 + $0xa24] sm:$0xf]  ;;  %v10522_v50 = vor.u32 %v13563_v57, %v10519_v40  ;;  %v13543_v43 = vld [vmem:[%s14303_s25 + $0xb14] sm:$0xf]  ;;  %v10807_v57 = vld [vmem:[%s14303_s25 + $0xdf8] sm:$0xf0]  ;;  %v10498_v40 = vor.u32 %v13557_v29, %v10495_v58 }
 0x2c0   : > { %7940 = vmatpush.bf16.msrb.mxu0 %v10354_v14  ;;  %v10447_v14 = vld [vmem:[%s14303_s25 + $0xb28] sm:$0xf0]  ;;  %v10322_v56 = vor.u32 %v13513_v17, %v10319_v8  ;;  %v13635_v38 = vld [vmem:[%s14303_s25 + $0xdf4] sm:$0xf]  ;;  %v16334_v17 = vpop.f32.mrf.mxu0  ;;  %v13585_v8 = vld [vmem:[%s14303_s25 + $0xc64] sm:$0xf] }
 0x2c1   : > { %7954 = vmatpush.bf16.msrb.mxu1 %v10418_v1  ;;  %v7696_v1 = vpop.f32.mrf.mxu2  ;;  %v7710_v54 = vpop.f32.mrf.mxu3  ;;  %v10450_v62 = vor.u32 %v13545_v59, %v10447_v14  ;;  %v10671_v59 = vld [vmem:[%s14303_s25 + $0xce8] sm:$0xf0]  ;;  %v13617_v14 = vld [vmem:[%s14303_s25 + $0xd64] sm:$0xf]  ;;  %v10791_v37 = vld [vmem:[%s14303_s25 + $0xdd8] sm:$0xf0] }
 0x2c2   : > { %7968 = vmatpush.bf16.msrb.mxu2 %v10482_v11  ;;  %v13561_v11 = vld [vmem:[%s14303_s25 + $0xba4] sm:$0xf]  ;;  %v7697_v28 = vadd.f32 %v7696_v1, %v7683_v30  ;;  %v13619_v30 = vld [vmem:[%s14303_s25 + $0xd74] sm:$0xf]  ;;  %v10735_v1 = vld [vmem:[%s14303_s25 + $0xd68] sm:$0xf0] }
 0x2c3   : > { %7982 = vmatpush.bf16.msrb.mxu3 %v10546_v0  ;;  %v10386_v0 = vor.u32 %v13529_v44, %v10383_v34  ;;  %v10514_v47 = vor.u32 %v13561_v11, %v10511_v18  ;;  %v10607_v44 = vld [vmem:[%s14303_s25 + $0xc68] sm:$0xf0]  ;;  %v10810_v34 = vor.u32 %v13635_v38, %v10807_v57  ;;  %v13633_v11 = vld [vmem:[%s14303_s25 + $0xde4] sm:$0xf]  ;;  %v17265_v3 = vld [vmem:[#allocation23_spill] sm:$0xff] }
 0x2c4   : > { %7941 = vmatpush.bf16.msrb.mxu0 %v10346_v23  ;;  %v16311_v49 = vadd.f32 %v7710_v54, %v7697_v28  ;;  %v10439_v23 = vld [vmem:[%s14303_s25 + $0xb18] sm:$0xf0]  ;;  %v10799_v18 = vld [vmem:[%s14303_s25 + $0xde8] sm:$0xf0]  ;;  %v16344_v28 = vpop.f32.mrf.mxu1 }
 0x2c5   : > { %7955 = vmatpush.bf16.msrb.mxu1 %v10410_v53  ;;  %v13559_v53 = vld [vmem:[%s14303_s25 + $0xb94] sm:$0xf]  ;;  %v10442_v42 = vor.u32 %v13543_v43, %v10439_v23  ;;  %v10727_v23 = vld [vmem:[%s14303_s25 + $0xd58] sm:$0xf0] }
 0x2c6   : > { %7969 = vmatpush.bf16.msrb.mxu2 %v10474_v9  ;;  %v10503_v9 = vld [vmem:[%s14303_s25 + $0xb98] sm:$0xf0]  ;;  %v13615_v43 = vld [vmem:[%s14303_s25 + $0xd54] sm:$0xf] }
 0x2c7   : > { %7983 = vmatpush.bf16.msrb.mxu3 %v10538_v4  ;;  %v10378_v4 = vor.u32 %v13527_v48, %v10375_v27  ;;  %v10506_v25 = vor.u32 %v13559_v53, %v10503_v9  ;;  %v17262_v48 = vld [vmem:[#allocation20_spill] sm:$0xff]  ;;  %v10663_v27 = vld [vmem:[%s14303_s25 + $0xcd8] sm:$0xf0]  ;;  %v17263_v53 = vld [vmem:[#allocation21_spill] sm:$0xff]  ;;  %v10730_v22 = vor.u32 %v13615_v43, %v10727_v23 }
 0x2c8   : > { %7942 = vmatpush.bf16.msrb.mxu0 %v10338_v5  ;;  %v10431_v5 = vld [vmem:[%s14303_s25 + $0xb08] sm:$0xf0]  ;;  %v17264_v9 = vld [vmem:[#allocation22_spill] sm:$0xff]  ;;  %v10666_v12 = vor.u32 %v13599_v19, %v10663_v27  ;;  %v13609_v19 = vld [vmem:[%s14303_s25 + $0xd24] sm:$0xf] }
 0x2c9   : > { %7956 = vmatpush.bf16.msrb.mxu1 %v10402_v26  ;;  %v13587_v26 = vld [vmem:[%s14303_s25 + $0xc74] sm:$0xf]  ;;  %v10434_v24 = vor.u32 %v13541_v6, %v10431_v5  ;;  %v13581_v6 = vld [vmem:[%s14303_s25 + $0xc44] sm:$0xf]  ;;  %v16363_v58 = vpop.f32.mrf.mxu3  ;;  %v10767_v43 = vld [vmem:[%s14303_s25 + $0xda8] sm:$0xf0] }
 0x2ca   : > { %7970 = vmatpush.bf16.msrb.mxu2 %v10466_v13  ;;  %v10615_v13 = vld [vmem:[%s14303_s25 + $0xc78] sm:$0xf0]  ;;  %v13597_v5 = vld [vmem:[%s14303_s25 + $0xcc4] sm:$0xf] }
 0x2cb   : > { %7984 = vmatpush.bf16.msrb.mxu3 %v10530_v41  ;;  %v10743_v41 = vld [vmem:[%s14303_s25 + $0xd78] sm:$0xf0]  ;;  %v13625_v27 = vld [vmem:[%s14303_s25 + $0xda4] sm:$0xf] }
 0x2cc   : > { %7943 = vmatpush.bf16.msrb.mxu0 %v10330_v45  ;;  %v10618_v45 = vor.u32 %v13587_v26, %v10615_v13  ;;  %v10655_v26 = vld [vmem:[%s14303_s25 + $0xcc8] sm:$0xf0]  ;;  %v13613_v13 = vld [vmem:[%s14303_s25 + $0xd44] sm:$0xf] }
 0x2cd   : > { %7957 = vmatpush.bf16.msrb.mxu1 %v10394_v15  ;;  %v10682_v15 = vor.u32 %v13603_v2, %v10679_v21  ;;  %v10719_v2 = vld [vmem:[%s14303_s25 + $0xd48] sm:$0xf0]  ;;  %v13629_v21 = vld [vmem:[%s14303_s25 + $0xdc4] sm:$0xf] }
 0x2ce   : > { %7971 = vmatpush.bf16.msrb.mxu2 %v10458_v61  ;;  %v10746_v61 = vor.u32 %v13619_v30, %v10743_v41  ;;  %v10783_v30 = vld [vmem:[%s14303_s25 + $0xdc8] sm:$0xf0]  ;;  %v10722_v38 = vor.u32 %v13613_v13, %v10719_v2  ;;  %v13573_v2 = vld [vmem:[%s14303_s25 + $0xc04] sm:$0xf] }
 0x2cf   : > { %7985 = vmatpush.bf16.msrb.mxu3 %v10522_v50  ;;  %v13601_v50 = vld [vmem:[%s14303_s25 + $0xce4] sm:$0xf] }
 0x2d0   : > { %7944 = vmatpush.bf16.msrb.mxu0 %v10322_v56  ;;  %v10610_v56 = vor.u32 %v13585_v8, %v10607_v44  ;;  %v10674_v54 = vor.u32 %v13601_v50, %v10671_v59  ;;  %v10647_v44 = vld [vmem:[%s14303_s25 + $0xcb8] sm:$0xf0]  ;;  %v13611_v50 = vld [vmem:[%s14303_s25 + $0xd34] sm:$0xf] }
 0x2d1   : > { %7958 = vmatpush.bf16.msrb.mxu1 %v10386_v0  ;;  %v10738_v0 = vor.u32 %v13617_v14, %v10735_v1  ;;  %v10775_v59 = vld [vmem:[%s14303_s25 + $0xdb8] sm:$0xf0] }
 0x2d2   : > { %7972 = vmatpush.bf16.msrb.mxu2 %v10450_v62  ;;  %v13583_v62 = vld [vmem:[%s14303_s25 + $0xc54] sm:$0xf] }
 0x2d3   : > { %7986 = vmatpush.bf16.msrb.mxu3 %v10514_v47  ;;  %v10802_v47 = vor.u32 %v13633_v11, %v10799_v18  ;;  %v13577_v18 = vld [vmem:[%s14303_s25 + $0xc24] sm:$0xf] }
 0x2d4   : > { %7945 = vmatpush.bf16.msrb.mxu0 %v10314_v46  ;;  %v13631_v46 = vld [vmem:[%s14303_s25 + $0xdd4] sm:$0xf] }
 0x2d5   : > { %7959 = vmatpush.bf16.msrb.mxu1 %v10378_v4  ;;  %v10602_v4 = vor.u32 %v13583_v62, %v10599_v32  ;;  %v10794_v29 = vor.u32 %v13631_v46, %v10791_v37  ;;  %v10639_v32 = vld [vmem:[%s14303_s25 + $0xca8] sm:$0xf0] }
 0x2d6   : > { %7973 = vmatpush.bf16.msrb.mxu2 %v10442_v42  ;;  %v16358_v42 = vpop.f32.mrf.mxu2 }
 0x2d7   : > { %7987 = vmatpush.bf16.msrb.mxu3 %v10506_v25  ;;  %v10591_v25 = vld [vmem:[%s14303_s25 + $0xc48] sm:$0xf0] }
 0x2d8   : > { %7946 = vmatpush.bf16.msrb.mxu0 %v10306_v52  ;;  %v7724_v52 = vpop.f32.mrf.mxu0 }
 0x2d9   : > { %7960 = vmatpush.bf16.msrb.mxu1 %v10370_v16  ;;  %v7725_v41 = vadd.f32 %v7724_v52, %v16311_v49  ;;  %v10594_v16 = vor.u32 %v13581_v6, %v10591_v25  ;;  %v7738_v57 = vpop.f32.mrf.mxu1  ;;  %v10711_v49 = vld [vmem:[%s14303_s25 + $0xd38] sm:$0xf0]  ;;  %v13607_v25 = vld [vmem:[%s14303_s25 + $0xd14] sm:$0xf]  ;;  %v10559_v52 = vld [vmem:[%s14303_s25 + $0xc08] sm:$0xf0] }
 0x2da   : > { %7974 = vmatpush.bf16.msrb.mxu2 %v10434_v24  ;;  %v10658_v24 = vor.u32 %v13597_v5, %v10655_v26  ;;  %v10714_v11 = vor.u32 %v13611_v50, %v10711_v49  ;;  %v10631_v6 = vld [vmem:[%s14303_s25 + $0xc98] sm:$0xf0]  ;;  %v13683_v49 = vld [vmem:[%s14303_s25 + $0xf74] sm:$0xf] }
 0x2db   : > { %7988 = vmatpush.bf16.msrb.mxu3 %v10498_v40  ;;  %7947 = vmatmul.bf16.vlgmr.msrb.gmra.mxu0 %v17262_v48  ;;  %v13579_v40 = vld [vmem:[%s14303_s25 + $0xc34] sm:$0xf]  ;;  %v7739_v8 = vadd.f32 %v7738_v57, %v7725_v41  ;;  %v10703_v48 = vld [vmem:[%s14303_s25 + $0xd28] sm:$0xf0]  ;;  %v10695_v5 = vld [vmem:[%s14303_s25 + $0xd18] sm:$0xf0] }
 0x2dc   : > { %7995 = vmatpush.bf16.msra.mxu0 %v10618_v45  ;;  %7961 = vmatmul.bf16.vlgmr.msrb.gmra.mxu1 %v17264_v9  ;;  %v10583_v45 = vld [vmem:[%s14303_s25 + $0xc38] sm:$0xf0]  ;;  %v10706_v37 = vor.u32 %v13609_v19, %v10703_v48  ;;  %v13589_v41 = vld [vmem:[%s14303_s25 + $0xc84] sm:$0xf]  ;;  %v10687_v57 = vld [vmem:[%s14303_s25 + $0xd08] sm:$0xf0] }
 0x2dd   : > { %8009 = vmatpush.bf16.msra.mxu1 %v10682_v15  ;;  %7975 = vmatmul.bf16.vlgmr.msrb.gmra.mxu2 %v17263_v53  ;;  %v13595_v15 = vld [vmem:[%s14303_s25 + $0xcb4] sm:$0xf]  ;;  %v10586_v14 = vor.u32 %v13579_v40, %v10583_v45  ;;  %v10759_v26 = vld [vmem:[%s14303_s25 + $0xd98] sm:$0xf0]  ;;  %v13621_v40 = vld [vmem:[%s14303_s25 + $0xd84] sm:$0xf] }
 0x2de   : > { %8023 = vmatpush.bf16.msra.mxu2 %v10746_v61  ;;  %7989 = vmatmul.bf16.vlgmr.msrb.gmra.mxu3 %v17265_v3  ;;  %v10786_v61 = vor.u32 %v13629_v21, %v10783_v30  ;;  %v10650_v1 = vor.u32 %v13595_v15, %v10647_v44  ;;  %v13575_v3 = vld [vmem:[%s14303_s25 + $0xc14] sm:$0xf]  ;;  %v10698_v30 = vor.u32 %v13607_v25, %v10695_v5  ;;  %v10751_v45 = vld [vmem:[%s14303_s25 + $0xd88] sm:$0xf0]  ;;  %v10935_v50 = vld [vmem:[%s14303_s25 + $0xef8] sm:$0xf0] }
 0x2df   : > { %8037 = vmatpush.bf16.msra.mxu3 %v10810_v34  ;;  %v13627_v34 = vld [vmem:[%s14303_s25 + $0xdb4] sm:$0xf]  ;;  %v10562_v44 = vor.u32 %v13573_v2, %v10559_v52  ;;  %v13665_v19 = vld [vmem:[%s14303_s25 + $0xee4] sm:$0xf]  ;;  %v10983_v2 = vld [vmem:[%s14303_s25 + $0xf58] sm:$0xf0] }
 0x2e0   : > { %7996 = vmatpush.bf16.msra.mxu0 %v10610_v56  ;;  %v10575_v56 = vld [vmem:[%s14303_s25 + $0xc28] sm:$0xf0]  ;;  %v7752_v62 = vpop.f32.mrf.mxu2  ;;  %v13651_v15 = vld [vmem:[%s14303_s25 + $0xe74] sm:$0xf]  ;;  %v17266_v5 = vld [vmem:[#allocation24_spill] sm:$0xff] }
 0x2e1   : > { %8010 = vmatpush.bf16.msra.mxu1 %v10674_v54  ;;  %v13593_v54 = vld [vmem:[%s14303_s25 + $0xca4] sm:$0xf]  ;;  %v7766_v23 = vpop.f32.mrf.mxu3  ;;  %v10578_v53 = vor.u32 %v13577_v18, %v10575_v56  ;;  %v10754_v18 = vor.u32 %v13621_v40, %v10751_v45  ;;  %v13663_v25 = vld [vmem:[%s14303_s25 + $0xed4] sm:$0xf]  ;;  %v17267_v52 = vld [vmem:[#allocation25_spill] sm:$0xff] }
 0x2e2   : > { %8024 = vmatpush.bf16.msra.mxu2 %v10738_v0  ;;  %v10778_v0 = vor.u32 %v13627_v34, %v10775_v59  ;;  %v10642_v46 = vor.u32 %v13593_v54, %v10639_v32  ;;  %v10999_v34 = vld [vmem:[%s14303_s25 + $0xf78] sm:$0xf0]  ;;  %v10863_v32 = vld [vmem:[%s14303_s25 + $0xe68] sm:$0xf0]  ;;  %v13645_v40 = vld [vmem:[%s14303_s25 + $0xe44] sm:$0xf] }
 0x2e3   : > { %8038 = vmatpush.bf16.msra.mxu3 %v10802_v47  ;;  %v7753_v47 = vadd.f32 %v7752_v62, %v7739_v8  ;;  %v13667_v8 = vld [vmem:[%s14303_s25 + $0xef4] sm:$0xf]  ;;  %v13649_v62 = vld [vmem:[%s14303_s25 + $0xe64] sm:$0xf]  ;;  %v10847_v45 = vld [vmem:[%s14303_s25 + $0xe48] sm:$0xf0] }
 0x2e4   : > { %7997 = vmatpush.bf16.msra.mxu0 %v10602_v4  ;;  %v10567_v4 = vld [vmem:[%s14303_s25 + $0xc18] sm:$0xf0]  ;;  %v10938_v54 = vor.u32 %v13667_v8, %v10935_v50  ;;  %v13677_v50 = vld [vmem:[%s14303_s25 + $0xf44] sm:$0xf] }
 0x2e5   : > { %8011 = vmatpush.bf16.msra.mxu1 %v10666_v12  ;;  %v16387_v9 = vadd.f32 %v7766_v23, %v7753_v47  ;;  %v13591_v12 = vld [vmem:[%s14303_s25 + $0xc94] sm:$0xf]  ;;  %v10570_v13 = vor.u32 %v13575_v3, %v10567_v4  ;;  %v10927_v47 = vld [vmem:[%s14303_s25 + $0xee8] sm:$0xf0]  ;;  %v16419_v23 = vpop.f32.mrf.mxu0  ;;  %v10866_v3 = vor.u32 %v13649_v62, %v10863_v32  ;;  %v10839_v32 = vld [vmem:[%s14303_s25 + $0xe38] sm:$0xf0] }
 0x2e6   : > { %8025 = vmatpush.bf16.msra.mxu2 %v10730_v22  ;;  %v10770_v22 = vor.u32 %v13625_v27, %v10767_v43  ;;  %v10634_v21 = vor.u32 %v13591_v12, %v10631_v6  ;;  %v13681_v27 = vld [vmem:[%s14303_s25 + $0xf64] sm:$0xf]  ;;  %v10991_v43 = vld [vmem:[%s14303_s25 + $0xf68] sm:$0xf0]  ;;  %v10930_v4 = vor.u32 %v13665_v19, %v10927_v47  ;;  %v10855_v6 = vld [vmem:[%s14303_s25 + $0xe58] sm:$0xf0] }
 0x2e7   : > { %8039 = vmatpush.bf16.msra.mxu3 %v10794_v29  ;;  %v13623_v29 = vld [vmem:[%s14303_s25 + $0xd94] sm:$0xf]  ;;  %v10994_v12 = vor.u32 %v13681_v27, %v10991_v43  ;;  %v10903_v27 = vld [vmem:[%s14303_s25 + $0xeb8] sm:$0xf0] }
 0x2e8   : > { %7998 = vmatpush.bf16.msra.mxu0 %v10594_v16  ;;  %v10623_v16 = vld [vmem:[%s14303_s25 + $0xc88] sm:$0xf0]  ;;  %v13643_v62 = vld [vmem:[%s14303_s25 + $0xe34] sm:$0xf] }
 0x2e9   : > { %8012 = vmatpush.bf16.msra.mxu1 %v10658_v24  ;;  %v13605_v24 = vld [vmem:[%s14303_s25 + $0xd04] sm:$0xf]  ;;  %v10626_v59 = vor.u32 %v13589_v41, %v10623_v16  ;;  %v11047_v41 = vld [vmem:[%s14303_s25 + $0xfd8] sm:$0xf0]  ;;  %v13659_v19 = vld [vmem:[%s14303_s25 + $0xeb4] sm:$0xf] }
 0x2ea   : > { %8026 = vmatpush.bf16.msra.mxu2 %v10722_v38  ;;  %v10762_v38 = vor.u32 %v13623_v29, %v10759_v26  ;;  %v10919_v26 = vld [vmem:[%s14303_s25 + $0xed8] sm:$0xf0]  ;;  %v13675_v43 = vld [vmem:[%s14303_s25 + $0xf34] sm:$0xf] }
 0x2eb   : > { %8040 = vmatpush.bf16.msra.mxu3 %v10786_v61  ;;  %v10871_v61 = vld [vmem:[%s14303_s25 + $0xe78] sm:$0xf0] }
 0x2ec   : > { %7999 = vmatpush.bf16.msra.mxu0 %v10586_v14  ;;  %v10690_v14 = vor.u32 %v13605_v24, %v10687_v57  ;;  %v10874_v56 = vor.u32 %v13651_v15, %v10871_v61  ;;  %v17269_v16 = vld [vmem:[#allocation27_spill] sm:$0xff]  ;;  %v13661_v15 = vld [vmem:[%s14303_s25 + $0xec4] sm:$0xf]  ;;  %v16440_v61 = vpop.f32.mrf.mxu2 }
 0x2ed   : > { %8013 = vmatpush.bf16.msra.mxu1 %v10650_v1  ;;  %v13699_v1 = vld [vmem:[%s14303_s25 + $0xff4] sm:$0xf] }
 0x2ee   : > { %8027 = vmatpush.bf16.msra.mxu2 %v10714_v11  ;;  %v11063_v11 = vld [vmem:[%s14303_s25 + $0xff8] sm:$0xf0] }
 0x2ef   : > { %8041 = vmatpush.bf16.msra.mxu3 %v10778_v0  ;;  %v11002_v0 = vor.u32 %v13683_v49, %v10999_v34  ;;  %v11066_v48 = vor.u32 %v13699_v1, %v11063_v11  ;;  %v10975_v49 = vld [vmem:[%s14303_s25 + $0xf48] sm:$0xf0]  ;;  %v16445_v34 = vpop.f32.mrf.mxu3 }
 0x2f0   : > { %8000 = vmatpush.bf16.msra.mxu0 %v10578_v53  ;;  %v13697_v53 = vld [vmem:[%s14303_s25 + $0xfe4] sm:$0xf]  ;;  %v11039_v1 = vld [vmem:[%s14303_s25 + $0xfc8] sm:$0xf0] }
 0x2f1   : > { %8014 = vmatpush.bf16.msra.mxu1 %v10642_v46  ;;  %v11055_v46 = vld [vmem:[%s14303_s25 + $0xfe8] sm:$0xf0] }
 0x2f2   : > { %8028 = vmatpush.bf16.msra.mxu2 %v10706_v37  ;;  %v16423_v37 = vpop.f32.mrf.mxu1  ;;  %v11058_v29 = vor.u32 %v13697_v53, %v11055_v46  ;;  %v13691_v53 = vld [vmem:[%s14303_s25 + $0xfb4] sm:$0xf]  ;;  %v11031_v46 = vld [vmem:[%s14303_s25 + $0xfb8] sm:$0xf0] }
 0x2f3   : > { %8042 = vmatpush.bf16.msra.mxu3 %v10770_v22  ;;  %v13647_v22 = vld [vmem:[%s14303_s25 + $0xe54] sm:$0xf] }
 0x2f4   : > { %8001 = vmatpush.bf16.msra.mxu0 %v10570_v13  ;;  %v13679_v13 = vld [vmem:[%s14303_s25 + $0xf54] sm:$0xf]  ;;  %v10858_v24 = vor.u32 %v13647_v22, %v10855_v6  ;;  %v13641_v22 = vld [vmem:[%s14303_s25 + $0xe24] sm:$0xf]  ;;  %v10831_v6 = vld [vmem:[%s14303_s25 + $0xe28] sm:$0xf0] }
 0x2f5   : > { %8015 = vmatpush.bf16.msra.mxu1 %v10634_v21  ;;  %v17268_v21 = vld [vmem:[#allocation26_spill] sm:$0xff]  ;;  %v10986_v57 = vor.u32 %v13679_v13, %v10983_v2  ;;  %v13673_v13 = vld [vmem:[%s14303_s25 + $0xf24] sm:$0xf]  ;;  %v10959_v2 = vld [vmem:[%s14303_s25 + $0xf28] sm:$0xf0] }
 0x2f6   : > { %8029 = vmatpush.bf16.msra.mxu2 %v10698_v30  ;;  %v13695_v30 = vld [vmem:[%s14303_s25 + $0xfd4] sm:$0xf] }
 0x2f7   : > { %8043 = vmatpush.bf16.msra.mxu3 %v10762_v38  ;;  %v10922_v38 = vor.u32 %v13663_v25, %v10919_v26  ;;  %v11050_v8 = vor.u32 %v13695_v30, %v11047_v41  ;;  %v13657_v25 = vld [vmem:[%s14303_s25 + $0xea4] sm:$0xf]  ;;  %v10895_v26 = vld [vmem:[%s14303_s25 + $0xea8] sm:$0xf0] }
 0x2f8   : > { %8002 = vmatpush.bf16.msra.mxu0 %v10562_v44  ;;  %v10911_v44 = vld [vmem:[%s14303_s25 + $0xec8] sm:$0xf0]  ;;  %v13689_v30 = vld [vmem:[%s14303_s25 + $0xfa4] sm:$0xf] }
 0x2f9   : > { %8016 = vmatpush.bf16.msra.mxu1 %v10626_v59  ;;  %v7780_v59 = vpop.f32.mrf.mxu0  ;;  %v11023_v41 = vld [vmem:[%s14303_s25 + $0xfa8] sm:$0xf0] }
 0x2fa   : > { %8030 = vmatpush.bf16.msra.mxu2 %v10690_v14  ;;  %v13693_v14 = vld [vmem:[%s14303_s25 + $0xfc4] sm:$0xf]  ;;  %v7781_v11 = vadd.f32 %v7780_v59, %v16387_v9  ;;  %v10967_v9 = vld [vmem:[%s14303_s25 + $0xf38] sm:$0xf0]  ;;  %v13687_v59 = vld [vmem:[%s14303_s25 + $0xf94] sm:$0xf] }
 0x2fb   : > { %8044 = vmatpush.bf16.msra.mxu3 %v10754_v18  ;;  %8003 = vmatmul.bf16.vlgmr.msra.gmra.mxu0 %v17266_v5  ;;  %v10850_v18 = vor.u32 %v13645_v40, %v10847_v45  ;;  %v11034_v5 = vor.u32 %v13691_v53, %v11031_v46  ;;  %v13639_v40 = vld [vmem:[%s14303_s25 + $0xe14] sm:$0xf]  ;;  %v10823_v45 = vld [vmem:[%s14303_s25 + $0xe18] sm:$0xf0] }
 0x2fc   : > { %8051 = vmatpush.bf16.msrb.mxu0 %v10874_v56  ;;  %8017 = vmatmul.bf16.vlgmr.msra.gmra.mxu1 %v17268_v21  ;;  %v7794_v56 = vpop.f32.mrf.mxu1  ;;  %v13731_v53 = vld [vmem:[%s14303_s25 + $0x10f4] sm:$0xf] }
 0x2fd   : > { %8065 = vmatpush.bf16.msrb.mxu1 %v10938_v54  ;;  %8031 = vmatmul.bf16.vlgmr.msra.gmra.mxu2 %v17267_v52  ;;  %v10914_v54 = vor.u32 %v13661_v15, %v10911_v44  ;;  %v7795_v47 = vadd.f32 %v7794_v56, %v7781_v11  ;;  %v13655_v15 = vld [vmem:[%s14303_s25 + $0xe94] sm:$0xf]  ;;  %v10887_v44 = vld [vmem:[%s14303_s25 + $0xe98] sm:$0xf0]  ;;  %v13637_v11 = vld [vmem:[%s14303_s25 + $0xe04] sm:$0xf] }
 0x2fe   : > { %8079 = vmatpush.bf16.msrb.mxu2 %v11002_v0  ;;  %8045 = vmatmul.bf16.vlgmr.msra.gmra.mxu3 %v17269_v16  ;;  %v10978_v0 = vor.u32 %v13677_v50, %v10975_v49  ;;  %v10834_v16 = vor.u32 %v13641_v22, %v10831_v6  ;;  %v13671_v50 = vld [vmem:[%s14303_s25 + $0xf14] sm:$0xf]  ;;  %v10951_v49 = vld [vmem:[%s14303_s25 + $0xf18] sm:$0xf0]  ;;  %v10890_v56 = vor.u32 %v13655_v15, %v10887_v44  ;;  %v11311_v15 = vld [vmem:[%s14303_s25 + $0x11e8] sm:$0xf0] }
 0x2ff   : > { %8093 = vmatpush.bf16.msrb.mxu3 %v11066_v48  ;;  %v11042_v48 = vor.u32 %v13693_v14, %v11039_v1  ;;  %v11015_v14 = vld [vmem:[%s14303_s25 + $0xf98] sm:$0xf0]  ;;  %v10826_v1 = vor.u32 %v13639_v40, %v10823_v45  ;;  %v13761_v45 = vld [vmem:[%s14303_s25 + $0x11e4] sm:$0xf] }
 0x300   : > { %8052 = vmatpush.bf16.msrb.mxu0 %v10866_v3  ;;  %v10842_v3 = vor.u32 %v13643_v62, %v10839_v32  ;;  %v10879_v62 = vld [vmem:[%s14303_s25 + $0xe88] sm:$0xf0]  ;;  %v13669_v32 = vld [vmem:[%s14303_s25 + $0xf04] sm:$0xf] }
 0x301   : > { %8066 = vmatpush.bf16.msrb.mxu1 %v10930_v4  ;;  %v10906_v4 = vor.u32 %v13659_v19, %v10903_v27  ;;  %v7822_v21 = vpop.f32.mrf.mxu3  ;;  %v11018_v19 = vor.u32 %v13687_v59, %v11015_v14  ;;  %v11007_v27 = vld [vmem:[%s14303_s25 + $0xf88] sm:$0xf0]  ;;  %v16498_v40 = vpop.f32.mrf.mxu0  ;;  %v13711_v14 = vld [vmem:[%s14303_s25 + $0x1054] sm:$0xf] }
 0x302   : > { %8080 = vmatpush.bf16.msrb.mxu2 %v10994_v12  ;;  %v10970_v12 = vor.u32 %v13675_v43, %v10967_v9  ;;  %v13715_v43 = vld [vmem:[%s14303_s25 + $0x1074] sm:$0xf]  ;;  %v11127_v9 = vld [vmem:[%s14303_s25 + $0x1078] sm:$0xf0] }
 0x303   : > { %8094 = vmatpush.bf16.msrb.mxu3 %v11058_v29  ;;  %v7808_v29 = vpop.f32.mrf.mxu2 }
 0x304   : > { %8053 = vmatpush.bf16.msrb.mxu0 %v10858_v24  ;;  %v7809_v52 = vadd.f32 %v7808_v29, %v7795_v47  ;;  %v13685_v47 = vld [vmem:[%s14303_s25 + $0xf84] sm:$0xf]  ;;  %v16504_v44 = vpop.f32.mrf.mxu1 }
 0x305   : > { %8067 = vmatpush.bf16.msrb.mxu1 %v10922_v38  ;;  %v10898_v38 = vor.u32 %v13657_v25, %v10895_v26  ;;  %v13763_v25 = vld [vmem:[%s14303_s25 + $0x11f4] sm:$0xf]  ;;  %v11010_v29 = vor.u32 %v13685_v47, %v11007_v27  ;;  %v11130_v26 = vor.u32 %v13715_v43, %v11127_v9  ;;  %v17273_v47 = vld [vmem:[#allocation31_spill] sm:$0xff] }
 0x306   : > { %8081 = vmatpush.bf16.msrb.mxu2 %v10986_v57  ;;  %v16466_v24 = vadd.f32 %v7822_v21, %v7809_v52  ;;  %v10962_v57 = vor.u32 %v13673_v13, %v10959_v2  ;;  %v13713_v52 = vld [vmem:[%s14303_s25 + $0x1064] sm:$0xf]  ;;  %v11119_v21 = vld [vmem:[%s14303_s25 + $0x1068] sm:$0xf0] }
 0x307   : > { %8095 = vmatpush.bf16.msrb.mxu3 %v11050_v8  ;;  %v11026_v8 = vor.u32 %v13689_v30, %v11023_v41  ;;  %v13729_v30 = vld [vmem:[%s14303_s25 + $0x10e4] sm:$0xf] }
 0x308   : > { %8054 = vmatpush.bf16.msrb.mxu0 %v10850_v18  ;;  %v10815_v18 = vld [vmem:[%s14303_s25 + $0xe08] sm:$0xf0] }
 0x309   : > { %8068 = vmatpush.bf16.msrb.mxu1 %v10914_v54  ;;  %v10954_v54 = vor.u32 %v13671_v50, %v10951_v49  ;;  %v10818_v46 = vor.u32 %v13637_v11, %v10815_v18  ;;  %v11122_v50 = vor.u32 %v13713_v52, %v11119_v21  ;;  %v13727_v11 = vld [vmem:[%s14303_s25 + $0x10d4] sm:$0xf]  ;;  %v17270_v18 = vld [vmem:[#allocation28_spill] sm:$0xff] }
 0x30a   : > { %8082 = vmatpush.bf16.msrb.mxu2 %v10978_v0  ;;  %v13653_v0 = vld [vmem:[%s14303_s25 + $0xe84] sm:$0xf] }
 0x30b   : > { %8096 = vmatpush.bf16.msrb.mxu3 %v11042_v48  ;;  %v10943_v48 = vld [vmem:[%s14303_s25 + $0xf08] sm:$0xf0]  ;;  %v10882_v22 = vor.u32 %v13653_v0, %v10879_v62  ;;  %v17272_v62 = vld [vmem:[#allocation30_spill] sm:$0xff] }
 0x30c   : > { %8055 = vmatpush.bf16.msrb.mxu0 %v10842_v3  ;;  %v11191_v3 = vld [vmem:[%s14303_s25 + $0x10f8] sm:$0xf0]  ;;  %v10946_v6 = vor.u32 %v13669_v32, %v10943_v48  ;;  %v17271_v0 = vld [vmem:[#allocation29_spill] sm:$0xff]  ;;  %v13759_v32 = vld [vmem:[%s14303_s25 + $0x11d4] sm:$0xf] }
 0x30d   : > { %8069 = vmatpush.bf16.msrb.mxu1 %v10906_v4  ;;  %v13747_v4 = vld [vmem:[%s14303_s25 + $0x1174] sm:$0xf]  ;;  %v11194_v13 = vor.u32 %v13731_v53, %v11191_v3  ;;  %v13709_v53 = vld [vmem:[%s14303_s25 + $0x1044] sm:$0xf] }
 0x30e   : > { %8083 = vmatpush.bf16.msrb.mxu2 %v10970_v12  ;;  %v11255_v12 = vld [vmem:[%s14303_s25 + $0x1178] sm:$0xf0]  ;;  %v13725_v3 = vld [vmem:[%s14303_s25 + $0x10c4] sm:$0xf] }
 0x30f   : > { %8097 = vmatpush.bf16.msrb.mxu3 %v11034_v5  ;;  %v11319_v5 = vld [vmem:[%s14303_s25 + $0x11f8] sm:$0xf0]  ;;  %v11258_v2 = vor.u32 %v13747_v4, %v11255_v12  ;;  %v16522_v4 = vpop.f32.mrf.mxu2 }
 0x310   : > { %8056 = vmatpush.bf16.msrb.mxu0 %v10834_v16  ;;  %v11322_v41 = vor.u32 %v13763_v25, %v11319_v5  ;;  %v11183_v16 = vld [vmem:[%s14303_s25 + $0x10e8] sm:$0xf0]  ;;  %v16527_v25 = vpop.f32.mrf.mxu3 }
 0x311   : > { %8070 = vmatpush.bf16.msrb.mxu1 %v10898_v38  ;;  %v13745_v38 = vld [vmem:[%s14303_s25 + $0x1164] sm:$0xf]  ;;  %v11186_v49 = vor.u32 %v13729_v30, %v11183_v16  ;;  %v13707_v16 = vld [vmem:[%s14303_s25 + $0x1034] sm:$0xf] }
 0x312   : > { %8084 = vmatpush.bf16.msrb.mxu2 %v10962_v57  ;;  %v11247_v57 = vld [vmem:[%s14303_s25 + $0x1168] sm:$0xf0] }
 0x313   : > { %8098 = vmatpush.bf16.msrb.mxu3 %v11026_v8  ;;  %v7685_v8 = vadd.f32 %v16344_v28, %v16334_v17  ;;  %v11250_v59 = vor.u32 %v13745_v38, %v11247_v57  ;;  %v11314_v17 = vor.u32 %v13761_v45, %v11311_v15  ;;  %v11175_v28 = vld [vmem:[%s14303_s25 + $0x10d8] sm:$0xf0]  ;;  %v13723_v57 = vld [vmem:[%s14303_s25 + $0x10b4] sm:$0xf] }
 0x314   : > { %8057 = vmatpush.bf16.msrb.mxu0 %v10826_v1  ;;  %v11111_v1 = vld [vmem:[%s14303_s25 + $0x1058] sm:$0xf0]  ;;  %v11178_v43 = vor.u32 %v13727_v11, %v11175_v28  ;;  %v13705_v11 = vld [vmem:[%s14303_s25 + $0x1024] sm:$0xf] }
 0x315   : > { %8071 = vmatpush.bf16.msrb.mxu1 %v10890_v56  ;;  %v13743_v56 = vld [vmem:[%s14303_s25 + $0x1154] sm:$0xf]  ;;  %v7699_v48 = vadd.f32 %v16358_v42, %v7685_v8  ;;  %v11114_v27 = vor.u32 %v13711_v14, %v11111_v1  ;;  %v13741_v42 = vld [vmem:[%s14303_s25 + $0x1144] sm:$0xf]  ;;  %v11095_v38 = vld [vmem:[%s14303_s25 + $0x1038] sm:$0xf0] }
 0x316   : > { %8085 = vmatpush.bf16.msrb.mxu2 %v10954_v54  ;;  %v11239_v54 = vld [vmem:[%s14303_s25 + $0x1158] sm:$0xf0]  ;;  %v13739_v8 = vld [vmem:[%s14303_s25 + $0x1134] sm:$0xf]  ;;  %v11098_v14 = vor.u32 %v13707_v16, %v11095_v38  ;;  %v13717_v16 = vld [vmem:[%s14303_s25 + $0x1084] sm:$0xf] }
 0x317   : > { %8099 = vmatpush.bf16.msrb.mxu3 %v11018_v19  ;;  %v11303_v19 = vld [vmem:[%s14303_s25 + $0x11d8] sm:$0xf0]  ;;  %v11242_v9 = vor.u32 %v13743_v56, %v11239_v54  ;;  %v11135_v38 = vld [vmem:[%s14303_s25 + $0x1088] sm:$0xf0] }
 0x318   : > { %8058 = vmatpush.bf16.msrb.mxu0 %v10818_v46  ;;  %v11103_v46 = vld [vmem:[%s14303_s25 + $0x1048] sm:$0xf0]  ;;  %v11306_v12 = vor.u32 %v13759_v32, %v11303_v19  ;;  %v7836_v5 = vpop.f32.mrf.mxu0  ;;  %v11159_v15 = vld [vmem:[%s14303_s25 + $0x10b8] sm:$0xf0] }
 0x319   : > { %8072 = vmatpush.bf16.msrb.mxu1 %v10882_v22  ;;  %v11167_v22 = vld [vmem:[%s14303_s25 + $0x10c8] sm:$0xf0]  ;;  %v11106_v52 = vor.u32 %v13709_v53, %v11103_v46  ;;  %v7850_v21 = vpop.f32.mrf.mxu1 }
 0x31a   : > { %8086 = vmatpush.bf16.msrb.mxu2 %v10946_v6  ;;  %v11231_v6 = vld [vmem:[%s14303_s25 + $0x1148] sm:$0xf0]  ;;  %v11170_v30 = vor.u32 %v13725_v3, %v11167_v22  ;;  %v13703_v3 = vld [vmem:[%s14303_s25 + $0x1014] sm:$0xf] }
 0x31b   : > { %8100 = vmatpush.bf16.msrb.mxu3 %v11010_v29  ;;  %8059 = vmatmul.bf16.vlgmr.msrb.gmra.mxu0 %v17270_v18  ;;  %v13757_v29 = vld [vmem:[%s14303_s25 + $0x11c4] sm:$0xf]  ;;  %v11087_v18 = vld [vmem:[%s14303_s25 + $0x1028] sm:$0xf0]  ;;  %v13719_v22 = vld [vmem:[%s14303_s25 + $0x1094] sm:$0xf] }
 0x31c   : > { %8107 = vmatpush.bf16.msra.mxu0 %v11130_v26  ;;  %8073 = vmatmul.bf16.vlgmr.msrb.gmra.mxu1 %v17272_v62  ;;  %v11295_v26 = vld [vmem:[%s14303_s25 + $0x11c8] sm:$0xf0]  ;;  %v13737_v62 = vld [vmem:[%s14303_s25 + $0x1124] sm:$0xf] }
 0x31d   : > { %8121 = vmatpush.bf16.msra.mxu1 %v11194_v13  ;;  %8087 = vmatmul.bf16.vlgmr.msrb.gmra.mxu2 %v17271_v0  ;;  %v7713_v13 = vadd.f32 %v16363_v58, %v7699_v48  ;;  %v11298_v45 = vor.u32 %v13757_v29, %v11295_v26  ;;  %v11151_v0 = vld [vmem:[%s14303_s25 + $0x10a8] sm:$0xf0]  ;;  %v13751_v29 = vld [vmem:[%s14303_s25 + $0x1194] sm:$0xf]  ;;  %v11271_v26 = vld [vmem:[%s14303_s25 + $0x1198] sm:$0xf0] }
 0x31e   : > { %8135 = vmatpush.bf16.msra.mxu2 %v11258_v2  ;;  %8101 = vmatmul.bf16.vlgmr.msrb.gmra.mxu3 %v17273_v47  ;;  %v7837_v2 = vadd.f32 %v7836_v5, %v16466_v24  ;;  %v11215_v32 = vld [vmem:[%s14303_s25 + $0x1128] sm:$0xf0]  ;;  %v13753_v47 = vld [vmem:[%s14303_s25 + $0x11a4] sm:$0xf]  ;;  %v11207_v5 = vld [vmem:[%s14303_s25 + $0x1118] sm:$0xf0] }
 0x31f   : > { %8149 = vmatpush.bf16.msra.mxu3 %v11322_v41  ;;  %v11234_v41 = vor.u32 %v13741_v42, %v11231_v6  ;;  %v7727_v58 = vadd.f32 %v16419_v23, %v7713_v13  ;;  %v11162_v23 = vor.u32 %v13723_v57, %v11159_v15  ;;  %v11218_v46 = vor.u32 %v13737_v62, %v11215_v32  ;;  %v13735_v6 = vld [vmem:[%s14303_s25 + $0x1114] sm:$0xf]  ;;  %v13733_v57 = vld [vmem:[%s14303_s25 + $0x1104] sm:$0xf]  ;;  %v11263_v15 = vld [vmem:[%s14303_s25 + $0x1188] sm:$0xf0] }
 0x320   : > { %8108 = vmatpush.bf16.msra.mxu0 %v11122_v50  ;;  %v7851_v24 = vadd.f32 %v7850_v21, %v7837_v2  ;;  %v11223_v50 = vld [vmem:[%s14303_s25 + $0x1138] sm:$0xf0]  ;;  %v7864_v54 = vpop.f32.mrf.mxu2  ;;  %v11071_v21 = vld [vmem:[%s14303_s25 + $0x1008] sm:$0xf0]  ;;  %v13777_v32 = vld [vmem:[%s14303_s25 + $0x1264] sm:$0xf] }
 0x321   : > { %8122 = vmatpush.bf16.msra.mxu1 %v11186_v49  ;;  %v13755_v49 = vld [vmem:[%s14303_s25 + $0x11b4] sm:$0xf]  ;;  %v11226_v1 = vor.u32 %v13739_v8, %v11223_v50  ;;  %v7741_v28 = vadd.f32 %v16423_v37, %v7727_v58  ;;  %v7878_v48 = vpop.f32.mrf.mxu3  ;;  %v11090_v37 = vor.u32 %v13705_v11, %v11087_v18  ;;  %v11274_v58 = vor.u32 %v13751_v29, %v11271_v26  ;;  %v11383_v50 = vld [vmem:[%s14303_s25 + $0x1278] sm:$0xf0]  ;;  %v17274_v26 = vld [vmem:[#allocation32_spill] sm:$0xff] }
 0x322   : > { %8136 = vmatpush.bf16.msra.mxu2 %v11250_v59  ;;  %v11287_v59 = vld [vmem:[%s14303_s25 + $0x11b8] sm:$0xf0]  ;;  %v7865_v19 = vadd.f32 %v7864_v54, %v7851_v24  ;;  %v13749_v24 = vld [vmem:[%s14303_s25 + $0x1184] sm:$0xf]  ;;  %v13779_v8 = vld [vmem:[%s14303_s25 + $0x1274] sm:$0xf] }
 0x323   : > { %8150 = vmatpush.bf16.msra.mxu3 %v11314_v17  ;;  %v13721_v17 = vld [vmem:[%s14303_s25 + $0x10a4] sm:$0xf]  ;;  %v11290_v56 = vor.u32 %v13755_v49, %v11287_v59  ;;  %v13795_v49 = vld [vmem:[%s14303_s25 + $0x12f4] sm:$0xf]  ;;  %v11386_v54 = vor.u32 %v13779_v8, %v11383_v50 }
 0x324   : > { %8109 = vmatpush.bf16.msra.mxu0 %v11114_v27  ;;  %v11279_v27 = vld [vmem:[%s14303_s25 + $0x11a8] sm:$0xf0]  ;;  %v11154_v53 = vor.u32 %v13721_v17, %v11151_v0  ;;  %v13827_v18 = vld [vmem:[%s14303_s25 + $0x13f4] sm:$0xf]  ;;  %v11575_v17 = vld [vmem:[%s14303_s25 + $0x13f8] sm:$0xf0] }
 0x325   : > { %8123 = vmatpush.bf16.msra.mxu1 %v11178_v43  ;;  %v7755_v43 = vadd.f32 %v16440_v61, %v7741_v28  ;;  %v11282_v42 = vor.u32 %v13753_v47, %v11279_v27  ;;  %v11143_v61 = vld [vmem:[%s14303_s25 + $0x1098] sm:$0xf0]  ;;  %v11578_v27 = vor.u32 %v13827_v18, %v11575_v17  ;;  %v13789_v8 = vld [vmem:[%s14303_s25 + $0x12c4] sm:$0xf]  ;;  %v11551_v18 = vld [vmem:[%s14303_s25 + $0x13c8] sm:$0xf0] }
 0x326   : > { %8137 = vmatpush.bf16.msra.mxu2 %v11242_v9  ;;  %v16552_v9 = vadd.f32 %v7878_v48, %v7865_v19  ;;  %v11375_v19 = vld [vmem:[%s14303_s25 + $0x1268] sm:$0xf0]  ;;  %v13793_v48 = vld [vmem:[%s14303_s25 + $0x12e4] sm:$0xf] }
 0x327   : > { %8151 = vmatpush.bf16.msra.mxu3 %v11306_v12  ;;  %v11079_v12 = vld [vmem:[%s14303_s25 + $0x1018] sm:$0xf0]  ;;  %v7769_v13 = vadd.f32 %v16445_v34, %v7755_v43  ;;  %v11439_v43 = vld [vmem:[%s14303_s25 + $0x12e8] sm:$0xf0] }
 0x328   : > { %8110 = vmatpush.bf16.msra.mxu0 %v11106_v52  ;;  %v11082_v2 = vor.u32 %v13703_v3, %v11079_v12  ;;  %v13701_v52 = vld [vmem:[%s14303_s25 + $0x1004] sm:$0xf]  ;;  %v11567_v3 = vld [vmem:[%s14303_s25 + $0x13e8] sm:$0xf0]  ;;  %v7852_v12 = vpop.f32.mrf.mxu1  ;;  %v7866_v50 = vpop.f32.mrf.mxu2 }
 0x329   : > { %8124 = vmatpush.bf16.msra.mxu1 %v11170_v30  ;;  %v11146_v30 = vor.u32 %v13719_v22, %v11143_v61  ;;  %v7783_v34 = vadd.f32 %v16498_v40, %v7769_v13  ;;  %v11074_v59 = vor.u32 %v13701_v52, %v11071_v21  ;;  %v11138_v40 = vor.u32 %v13717_v16, %v11135_v38  ;;  %v13775_v61 = vld [vmem:[%s14303_s25 + $0x1254] sm:$0xf]  ;;  %v11495_v21 = vld [vmem:[%s14303_s25 + $0x1358] sm:$0xf0] }
 0x32a   : > { %8138 = vmatpush.bf16.msra.mxu2 %v11234_v41  ;;  %v11210_v41 = vor.u32 %v13735_v6, %v11207_v5  ;;  %v11442_v22 = vor.u32 %v13793_v48, %v11439_v43  ;;  %v11367_v6 = vld [vmem:[%s14303_s25 + $0x1258] sm:$0xf0]  ;;  %v13791_v5 = vld [vmem:[%s14303_s25 + $0x12d4] sm:$0xf] }
 0x32b   : > { %8152 = vmatpush.bf16.msra.mxu3 %v11298_v45  ;;  %v11199_v45 = vld [vmem:[%s14303_s25 + $0x1108] sm:$0xf0]  ;;  %v7797_v28 = vadd.f32 %v16504_v44, %v7783_v34  ;;  %v7838_v44 = vpop.f32.mrf.mxu0  ;;  %v13807_v52 = vld [vmem:[%s14303_s25 + $0x1354] sm:$0xf]  ;;  %v11559_v38 = vld [vmem:[%s14303_s25 + $0x13d8] sm:$0xf0]  ;;  %v11370_v34 = vor.u32 %v13775_v61, %v11367_v6 }
 0x32c   : > { %8111 = vmatpush.bf16.msra.mxu0 %v11098_v14  ;;  %v11447_v14 = vld [vmem:[%s14303_s25 + $0x12f8] sm:$0xf0]  ;;  %v11202_v11 = vor.u32 %v13733_v57, %v11199_v45  ;;  %v13823_v16 = vld [vmem:[%s14303_s25 + $0x13d4] sm:$0xf]  ;;  %v11498_v45 = vor.u32 %v13807_v52, %v11495_v21  ;;  %v13785_v61 = vld [vmem:[%s14303_s25 + $0x12a4] sm:$0xf] }
 0x32d   : > { %8125 = vmatpush.bf16.msra.mxu1 %v11162_v23  ;;  %v13811_v23 = vld [vmem:[%s14303_s25 + $0x1374] sm:$0xf]  ;;  %v11450_v0 = vor.u32 %v13795_v49, %v11447_v14  ;;  %v7811_v47 = vadd.f32 %v16522_v4, %v7797_v28  ;;  %v11378_v4 = vor.u32 %v13777_v32, %v11375_v19  ;;  %v11562_v49 = vor.u32 %v13823_v16, %v11559_v38  ;;  %v13805_v14 = vld [vmem:[%s14303_s25 + $0x1344] sm:$0xf]  ;;  %v11351_v19 = vld [vmem:[%s14303_s25 + $0x1238] sm:$0xf0] }
 0x32e   : > { %8139 = vmatpush.bf16.msra.mxu2 %v11226_v1  ;;  %v11511_v1 = vld [vmem:[%s14303_s25 + $0x1378] sm:$0xf0]  ;;  %v13771_v32 = vld [vmem:[%s14303_s25 + $0x1234] sm:$0xf]  ;;  %v11535_v16 = vld [vmem:[%s14303_s25 + $0x13a8] sm:$0xf0] }
 0x32f   : > { %8153 = vmatpush.bf16.msra.mxu3 %v11290_v56  ;;  %v11266_v56 = vor.u32 %v13749_v24, %v11263_v15  ;;  %v11514_v62 = vor.u32 %v13811_v23, %v11511_v1  ;;  %v7825_v29 = vadd.f32 %v16527_v25, %v7811_v47  ;;  %v17277_v25 = vld [vmem:[#allocation35_spill] sm:$0xff]  ;;  %v13773_v24 = vld [vmem:[%s14303_s25 + $0x1244] sm:$0xf]  ;;  %v11359_v15 = vld [vmem:[%s14303_s25 + $0x1248] sm:$0xf0]  ;;  %v7880_v1 = vpop.f32.mrf.mxu3 }
 0x330   : > { %8112 = vmatpush.bf16.msra.mxu0 %v11090_v37  ;;  %v13809_v37 = vld [vmem:[%s14303_s25 + $0x1364] sm:$0xf]  ;;  %v11487_v23 = vld [vmem:[%s14303_s25 + $0x1348] sm:$0xf0]  ;;  %v13787_v48 = vld [vmem:[%s14303_s25 + $0x12b4] sm:$0xf] }
 0x331   : > { %8126 = vmatpush.bf16.msra.mxu1 %v11154_v53  ;;  %v11503_v53 = vld [vmem:[%s14303_s25 + $0x1368] sm:$0xf0]  ;;  %v7839_v57 = vadd.f32 %v7838_v44, %v7825_v29  ;;  %v13819_v44 = vld [vmem:[%s14303_s25 + $0x13b4] sm:$0xf] }
 0x332   : > { %8140 = vmatpush.bf16.msra.mxu2 %v11218_v46  ;;  %v13825_v46 = vld [vmem:[%s14303_s25 + $0x13e4] sm:$0xf] }
 0x333   : > { %8154 = vmatpush.bf16.msra.mxu3 %v11282_v42  ;;  %v11506_v42 = vor.u32 %v13809_v37, %v11503_v53  ;;  %v11570_v13 = vor.u32 %v13825_v46, %v11567_v3  ;;  %v7853_v17 = vadd.f32 %v7852_v12, %v7839_v57  ;;  %v13803_v37 = vld [vmem:[%s14303_s25 + $0x1334] sm:$0xf]  ;;  %v11479_v53 = vld [vmem:[%s14303_s25 + $0x1338] sm:$0xf0]  ;;  %v11354_v3 = vor.u32 %v13771_v32, %v11351_v19 }
 0x334   : > { %8113 = vmatpush.bf16.msra.mxu0 %v11082_v2  ;;  %v11431_v2 = vld [vmem:[%s14303_s25 + $0x12d8] sm:$0xf0] }
 0x335   : > { %8127 = vmatpush.bf16.msra.mxu1 %v11146_v30  ;;  %v17275_v30 = vld [vmem:[#allocation33_spill] sm:$0xff]  ;;  %v7867_v47 = vadd.f32 %v7866_v50, %v7853_v17  ;;  %v11543_v46 = vld [vmem:[%s14303_s25 + $0x13b8] sm:$0xf0] }
 0x336   : > { %8141 = vmatpush.bf16.msra.mxu2 %v11210_v41  ;;  %v17276_v41 = vld [vmem:[#allocation34_spill] sm:$0xff]  ;;  %v11327_v17 = vld [vmem:[%s14303_s25 + $0x1208] sm:$0xf0] }
 0x337   : > { %8155 = vmatpush.bf16.msra.mxu3 %v11274_v58  ;;  %v11434_v58 = vor.u32 %v13791_v5, %v11431_v2  ;;  %v7881_v6 = vadd.f32 %v7880_v1, %v7867_v47  ;;  %v11546_v5 = vor.u32 %v13819_v44, %v11543_v46  ;;  %v11471_v2 = vld [vmem:[%s14303_s25 + $0x1328] sm:$0xf0]  ;;  %v13815_v1 = vld [vmem:[%s14303_s25 + $0x1394] sm:$0xf]  ;;  %v13813_v47 = vld [vmem:[%s14303_s25 + $0x1384] sm:$0xf] }
 0x338   : > { %8114 = vmatpush.bf16.msra.mxu0 %v11074_v59  ;;  %v11423_v59 = vld [vmem:[%s14303_s25 + $0x12c8] sm:$0xf0]  ;;  %v13859_v44 = vld [vmem:[%s14303_s25 + $0x14f4] sm:$0xf] }
 0x339   : > { %8128 = vmatpush.bf16.msra.mxu1 %v11138_v40  ;;  %v7892_v40 = vpop.f32.mrf.mxu0 }
 0x33a   : > { %8142 = vmatpush.bf16.msra.mxu2 %v11202_v11  ;;  %v13821_v11 = vld [vmem:[%s14303_s25 + $0x13c4] sm:$0xf]  ;;  %v7893_v28 = vadd.f32 %v7892_v40, %v16552_v9  ;;  %v11415_v9 = vld [vmem:[%s14303_s25 + $0x12b8] sm:$0xf0] }
 0x33b   : > { %8156 = vmatpush.bf16.msra.mxu3 %v11266_v56  ;;  %8115 = vmatmul.bf16.vlgmr.msra.gmra.mxu0 %v17274_v26  ;;  %v11362_v56 = vor.u32 %v13773_v24, %v11359_v15  ;;  %v11418_v12 = vor.u32 %v13787_v48, %v11415_v9  ;;  %v11407_v26 = vld [vmem:[%s14303_s25 + $0x12a8] sm:$0xf0]  ;;  %v13767_v24 = vld [vmem:[%s14303_s25 + $0x1214] sm:$0xf]  ;;  %v11335_v15 = vld [vmem:[%s14303_s25 + $0x1218] sm:$0xf0] }
 0x33c   : > { %8163 = vmatpush.bf16.msrb.mxu0 %v11386_v54  ;;  %8129 = vmatmul.bf16.vlgmr.msra.gmra.mxu1 %v17276_v41  ;;  %v7906_v54 = vpop.f32.mrf.mxu1  ;;  %v13817_v41 = vld [vmem:[%s14303_s25 + $0x13a4] sm:$0xf]  ;;  %v11527_v40 = vld [vmem:[%s14303_s25 + $0x1398] sm:$0xf0]  ;;  %v11455_v48 = vld [vmem:[%s14303_s25 + $0x1308] sm:$0xf0] }
 0x33d   : > { %8177 = vmatpush.bf16.msrb.mxu1 %v11450_v0  ;;  %8143 = vmatmul.bf16.vlgmr.msra.gmra.mxu2 %v17275_v30  ;;  %v11426_v0 = vor.u32 %v13789_v8, %v11423_v59  ;;  %v7907_v43 = vadd.f32 %v7906_v54, %v7893_v28  ;;  %v13783_v8 = vld [vmem:[%s14303_s25 + $0x1294] sm:$0xf]  ;;  %v11538_v50 = vor.u32 %v13817_v41, %v11535_v16  ;;  %v11399_v59 = vld [vmem:[%s14303_s25 + $0x1298] sm:$0xf0]  ;;  %v13781_v54 = vld [vmem:[%s14303_s25 + $0x1284] sm:$0xf] }
 0x33e   : > { %8191 = vmatpush.bf16.msrb.mxu2 %v11514_v62  ;;  %8157 = vmatmul.bf16.vlgmr.msra.gmra.mxu3 %v17277_v25  ;;  %v11490_v62 = vor.u32 %v13805_v14, %v11487_v23  ;;  %v13799_v14 = vld [vmem:[%s14303_s25 + $0x1314] sm:$0xf]  ;;  %v11463_v23 = vld [vmem:[%s14303_s25 + $0x1318] sm:$0xf0]  ;;  %v11402_v28 = vor.u32 %v13783_v8, %v11399_v59  ;;  %v11530_v32 = vor.u32 %v13815_v1, %v11527_v40  ;;  %v11695_v16 = vld [vmem:[%s14303_s25 + $0x14e8] sm:$0xf0] }
 0x33f   : > { %8205 = vmatpush.bf16.msrb.mxu3 %v11578_v27  ;;  %v11554_v27 = vor.u32 %v13821_v11, %v11551_v18  ;;  %v11338_v11 = vor.u32 %v13767_v24, %v11335_v15  ;;  %v13765_v18 = vld [vmem:[%s14303_s25 + $0x1204] sm:$0xf]  ;;  %v13839_v8 = vld [vmem:[%s14303_s25 + $0x1454] sm:$0xf]  ;;  %v11751_v40 = vld [vmem:[%s14303_s25 + $0x1558] sm:$0xf0] }
 0x340   : > { %8164 = vmatpush.bf16.msrb.mxu0 %v11378_v4  ;;  %v11482_v4 = vor.u32 %v13803_v37, %v11479_v53  ;;  %v7920_v29 = vpop.f32.mrf.mxu2  ;;  %v13843_v37 = vld [vmem:[%s14303_s25 + $0x1474] sm:$0xf]  ;;  %v11639_v53 = vld [vmem:[%s14303_s25 + $0x1478] sm:$0xf0]  ;;  %v11330_v46 = vor.u32 %v13765_v18, %v11327_v17  ;;  %v17278_v59 = vld [vmem:[#allocation36_spill] sm:$0xff] }
 0x341   : > { %8178 = vmatpush.bf16.msrb.mxu1 %v11442_v22  ;;  %v13769_v22 = vld [vmem:[%s14303_s25 + $0x1224] sm:$0xf]  ;;  %v7921_v52 = vadd.f32 %v7920_v29, %v7907_v43  ;;  %v7894_v21 = vpop.f32.mrf.mxu0  ;;  %v7934_v30 = vpop.f32.mrf.mxu3  ;;  %v13871_v1 = vld [vmem:[%s14303_s25 + $0x1554] sm:$0xf] }
 0x342   : > { %8192 = vmatpush.bf16.msrb.mxu2 %v11506_v42  ;;  %v11343_v42 = vld [vmem:[%s14303_s25 + $0x1228] sm:$0xf0]  ;;  %v7895_v38 = vadd.f32 %v7894_v21, %v7881_v6  ;;  %v13891_v6 = vld [vmem:[%s14303_s25 + $0x15f4] sm:$0xf] }
 0x343   : > { %8206 = vmatpush.bf16.msrb.mxu3 %v11570_v13  ;;  %v13801_v13 = vld [vmem:[%s14303_s25 + $0x1324] sm:$0xf]  ;;  %v11346_v57 = vor.u32 %v13769_v22, %v11343_v42  ;;  %v11631_v21 = vld [vmem:[%s14303_s25 + $0x1468] sm:$0xf0]  ;;  %v17280_v18 = vld [vmem:[#allocation38_spill] sm:$0xff] }
 0x344   : > { %8165 = vmatpush.bf16.msrb.mxu0 %v11370_v34  ;;  %v7908_v25 = vpop.f32.mrf.mxu1  ;;  %v16628_v34 = vadd.f32 %v7934_v30, %v7921_v52  ;;  %v13841_v52 = vld [vmem:[%s14303_s25 + $0x1464] sm:$0xf]  ;;  %v13887_v17 = vld [vmem:[%s14303_s25 + $0x15d4] sm:$0xf] }
 0x345   : > { %8179 = vmatpush.bf16.msrb.mxu1 %v11434_v58  ;;  %v11410_v58 = vor.u32 %v13785_v61, %v11407_v26  ;;  %v11642_v26 = vor.u32 %v13843_v37, %v11639_v53  ;;  %v13857_v30 = vld [vmem:[%s14303_s25 + $0x14e4] sm:$0xf] }
 0x346   : > { %8193 = vmatpush.bf16.msrb.mxu2 %v11498_v45  ;;  %v11474_v45 = vor.u32 %v13801_v13, %v11471_v2  ;;  %v11698_v24 = vor.u32 %v13857_v30, %v11695_v16  ;;  %v13885_v53 = vld [vmem:[%s14303_s25 + $0x15c4] sm:$0xf] }
 0x347   : > { %8207 = vmatpush.bf16.msrb.mxu3 %v11562_v49  ;;  %v7909_v49 = vadd.f32 %v7908_v25, %v7895_v38  ;;  %v13873_v38 = vld [vmem:[%s14303_s25 + $0x1564] sm:$0xf] }
 0x348   : > { %8166 = vmatpush.bf16.msrb.mxu0 %v11362_v56  ;;  %v11466_v56 = vor.u32 %v13799_v14, %v11463_v23  ;;  %v7922_v19 = vpop.f32.mrf.mxu2  ;;  %v13889_v25 = vld [vmem:[%s14303_s25 + $0x15e4] sm:$0xf]  ;;  %v11687_v23 = vld [vmem:[%s14303_s25 + $0x14d8] sm:$0xf0] }
 0x349   : > { %8180 = vmatpush.bf16.msrb.mxu1 %v11426_v0  ;;  %v11391_v0 = vld [vmem:[%s14303_s25 + $0x1288] sm:$0xf0]  ;;  %v7923_v43 = vadd.f32 %v7922_v19, %v7909_v49  ;;  %v7936_v9 = vpop.f32.mrf.mxu3  ;;  %v13855_v49 = vld [vmem:[%s14303_s25 + $0x14d4] sm:$0xf] }
 0x34a   : > { %8194 = vmatpush.bf16.msrb.mxu2 %v11490_v62  ;;  %v13797_v62 = vld [vmem:[%s14303_s25 + $0x1304] sm:$0xf]  ;;  %v11394_v42 = vor.u32 %v13781_v54, %v11391_v0  ;;  %v11690_v0 = vor.u32 %v13855_v49, %v11687_v23  ;;  %v11615_v19 = vld [vmem:[%s14303_s25 + $0x1448] sm:$0xf0] }
 0x34b   : > { %8208 = vmatpush.bf16.msrb.mxu3 %v11554_v27  ;;  %v11519_v27 = vld [vmem:[%s14303_s25 + $0x1388] sm:$0xf0]  ;;  %v16652_v22 = vadd.f32 %v7936_v9, %v7923_v43  ;;  %v11458_v61 = vor.u32 %v13797_v62, %v11455_v48  ;;  %v11754_v62 = vor.u32 %v13871_v1, %v11751_v40  ;;  %v13853_v48 = vld [vmem:[%s14303_s25 + $0x14c4] sm:$0xf] }
 0x34c   : > { %8167 = vmatpush.bf16.msrb.mxu0 %v11354_v3  ;;  %v11703_v3 = vld [vmem:[%s14303_s25 + $0x14f8] sm:$0xf0]  ;;  %v11522_v29 = vor.u32 %v13813_v47, %v11519_v27  ;;  %v11679_v27 = vld [vmem:[%s14303_s25 + $0x14c8] sm:$0xf0]  ;;  %v13869_v43 = vld [vmem:[%s14303_s25 + $0x1544] sm:$0xf] }
 0x34d   : > { %8181 = vmatpush.bf16.msrb.mxu1 %v11418_v12  ;;  %v13875_v12 = vld [vmem:[%s14303_s25 + $0x1574] sm:$0xf]  ;;  %v11706_v13 = vor.u32 %v13859_v44, %v11703_v3  ;;  %v11743_v9 = vld [vmem:[%s14303_s25 + $0x1548] sm:$0xf0] }
 0x34e   : > { %8195 = vmatpush.bf16.msrb.mxu2 %v11482_v4  ;;  %v11767_v4 = vld [vmem:[%s14303_s25 + $0x1578] sm:$0xf0]  ;;  %v11807_v44 = vld [vmem:[%s14303_s25 + $0x15c8] sm:$0xf0] }
 0x34f   : > { %8209 = vmatpush.bf16.msrb.mxu3 %v11546_v5  ;;  %v11831_v5 = vld [vmem:[%s14303_s25 + $0x15f8] sm:$0xf0]  ;;  %v11770_v2 = vor.u32 %v13875_v12, %v11767_v4  ;;  %v11682_v4 = vor.u32 %v13853_v48, %v11679_v27  ;;  %v11791_v23 = vld [vmem:[%s14303_s25 + $0x15a8] sm:$0xf0] }
 0x350   : > { %8168 = vmatpush.bf16.msrb.mxu0 %v11346_v57  ;;  %v11834_v41 = vor.u32 %v13891_v6, %v11831_v5  ;;  %v11759_v57 = vld [vmem:[%s14303_s25 + $0x1568] sm:$0xf0]  ;;  %v11607_v6 = vld [vmem:[%s14303_s25 + $0x1438] sm:$0xf0]  ;;  %v13851_v5 = vld [vmem:[%s14303_s25 + $0x14b4] sm:$0xf] }
 0x351   : > { %8182 = vmatpush.bf16.msrb.mxu1 %v11410_v58  ;;  %v11823_v58 = vld [vmem:[%s14303_s25 + $0x15e8] sm:$0xf0]  ;;  %v11762_v15 = vor.u32 %v13873_v38, %v11759_v57  ;;  %v13833_v38 = vld [vmem:[%s14303_s25 + $0x1424] sm:$0xf]  ;;  %v11719_v48 = vld [vmem:[%s14303_s25 + $0x1518] sm:$0xf0] }
 0x352   : > { %8196 = vmatpush.bf16.msrb.mxu2 %v11474_v45  ;;  %v11634_v45 = vor.u32 %v13841_v52, %v11631_v21  ;;  %v11826_v14 = vor.u32 %v13889_v25, %v11823_v58  ;;  %v13883_v52 = vld [vmem:[%s14303_s25 + $0x15b4] sm:$0xf]  ;;  %v11799_v21 = vld [vmem:[%s14303_s25 + $0x15b8] sm:$0xf0]  ;;  %v11599_v57 = vld [vmem:[%s14303_s25 + $0x1428] sm:$0xf0] }
 0x353   : > { %8210 = vmatpush.bf16.msrb.mxu3 %v11538_v50  ;;  %v11623_v50 = vld [vmem:[%s14303_s25 + $0x1458] sm:$0xf0]  ;;  %v13849_v25 = vld [vmem:[%s14303_s25 + $0x14a4] sm:$0xf]  ;;  %v11802_v58 = vor.u32 %v13883_v52, %v11799_v21  ;;  %v11602_v40 = vor.u32 %v13833_v38, %v11599_v57 }
 0x354   : > { %8169 = vmatpush.bf16.msrb.mxu0 %v11338_v11  ;;  %v17279_v11 = vld [vmem:[#allocation37_spill] sm:$0xff]  ;;  %v11626_v54 = vor.u32 %v13839_v8, %v11623_v50  ;;  %v11783_v27 = vld [vmem:[%s14303_s25 + $0x1598] sm:$0xf0] }
 0x355   : > { %8183 = vmatpush.bf16.msrb.mxu1 %v11402_v28  ;;  %v11815_v28 = vld [vmem:[%s14303_s25 + $0x15d8] sm:$0xf0]  ;;  %v11727_v8 = vld [vmem:[%s14303_s25 + $0x1528] sm:$0xf0] }
 0x356   : > { %8197 = vmatpush.bf16.msrb.mxu2 %v11466_v56  ;;  %v17281_v56 = vld [vmem:[#allocation39_spill] sm:$0xff]  ;;  %v11818_v47 = vor.u32 %v13887_v17, %v11815_v28 }
 0x357   : > { %8211 = vmatpush.bf16.msrb.mxu3 %v11530_v32  ;;  %v13837_v32 = vld [vmem:[%s14303_s25 + $0x1444] sm:$0xf]  ;;  %v11959_v21 = vld [vmem:[%s14303_s25 + $0x16f8] sm:$0xf0] }
 0x358   : > { %8170 = vmatpush.bf16.msrb.mxu0 %v11330_v46  ;;  %v7948_v37 = vpop.f32.mrf.mxu0  ;;  %v11618_v3 = vor.u32 %v13837_v32, %v11615_v19  ;;  %v11655_v32 = vld [vmem:[%s14303_s25 + $0x1498] sm:$0xf0]  ;;  %v13863_v19 = vld [vmem:[%s14303_s25 + $0x1514] sm:$0xf] }
 0x359   : > { %8184 = vmatpush.bf16.msrb.mxu1 %v11394_v42  ;;  %v7949_v46 = vadd.f32 %v7948_v37, %v16628_v34  ;;  %v7962_v12 = vpop.f32.mrf.mxu1  ;;  %v11746_v42 = vor.u32 %v13869_v43, %v11743_v9  ;;  %v11735_v34 = vld [vmem:[%s14303_s25 + $0x1538] sm:$0xf0]  ;;  %v13829_v9 = vld [vmem:[%s14303_s25 + $0x1404] sm:$0xf]  ;;  %v11583_v37 = vld [vmem:[%s14303_s25 + $0x1408] sm:$0xf0] }
 0x35a   : > { %8198 = vmatpush.bf16.msrb.mxu2 %v11458_v61  ;;  %v13835_v61 = vld [vmem:[%s14303_s25 + $0x1434] sm:$0xf]  ;;  %v11586_v52 = vor.u32 %v13829_v9, %v11583_v37 }
 0x35b   : > { %8212 = vmatpush.bf16.msrb.mxu3 %v11522_v29  ;;  %8171 = vmatmul.bf16.vlgmr.msrb.gmra.mxu0 %v17278_v59  ;;  %v11810_v29 = vor.u32 %v13885_v53, %v11807_v44  ;;  %v11610_v30 = vor.u32 %v13835_v61, %v11607_v6  ;;  %v11722_v44 = vor.u32 %v13863_v19, %v11719_v48  ;;  %v11711_v61 = vld [vmem:[%s14303_s25 + $0x1508] sm:$0xf0]  ;;  %v13877_v6 = vld [vmem:[%s14303_s25 + $0x1584] sm:$0xf]  ;;  %v11943_v48 = vld [vmem:[%s14303_s25 + $0x16d8] sm:$0xf0] }
 0x35c   : > { %8219 = vmatpush.bf16.msra.mxu0 %v11642_v26  ;;  %8185 = vmatmul.bf16.vlgmr.msrb.gmra.mxu1 %v17280_v18  ;;  %v7963_v26 = vadd.f32 %v7962_v12, %v7949_v46  ;;  %v13845_v46 = vld [vmem:[%s14303_s25 + $0x1484] sm:$0xf]  ;;  %v17284_v9 = vld [vmem:[#allocation42_spill] sm:$0xff] }
 0x35d   : > { %8233 = vmatpush.bf16.msra.mxu1 %v11706_v13  ;;  %8199 = vmatmul.bf16.vlgmr.msrb.gmra.mxu2 %v17279_v11  ;;  %v11671_v13 = vld [vmem:[%s14303_s25 + $0x14b8] sm:$0xf0]  ;;  %v13861_v12 = vld [vmem:[%s14303_s25 + $0x1504] sm:$0xf]  ;;  %v13951_v37 = vld [vmem:[%s14303_s25 + $0x17d4] sm:$0xf] }
 0x35e   : > { %8247 = vmatpush.bf16.msra.mxu2 %v11770_v2  ;;  %8213 = vmatmul.bf16.vlgmr.msrb.gmra.mxu3 %v17281_v56  ;;  %v13867_v2 = vld [vmem:[%s14303_s25 + $0x1534] sm:$0xf]  ;;  %v11714_v57 = vor.u32 %v13861_v12, %v11711_v61  ;;  %v13917_v61 = vld [vmem:[%s14303_s25 + $0x16c4] sm:$0xf] }
 0x35f   : > { %8261 = vmatpush.bf16.msra.mxu3 %v11834_v41  ;;  %v11674_v41 = vor.u32 %v13851_v5, %v11671_v13  ;;  %v11738_v16 = vor.u32 %v13867_v2, %v11735_v34  ;;  %v13831_v56 = vld [vmem:[%s14303_s25 + $0x1414] sm:$0xf]  ;;  %v11775_v5 = vld [vmem:[%s14303_s25 + $0x1588] sm:$0xf0]  ;;  %v11895_v2 = vld [vmem:[%s14303_s25 + $0x1678] sm:$0xf0] }
 0x360   : > { %8220 = vmatpush.bf16.msra.mxu0 %v11634_v45  ;;  %v7976_v45 = vpop.f32.mrf.mxu2  ;;  %v7950_v49 = vpop.f32.mrf.mxu0  ;;  %v13907_v13 = vld [vmem:[%s14303_s25 + $0x1674] sm:$0xf] }
 0x361   : > { %8234 = vmatpush.bf16.msra.mxu1 %v11698_v24  ;;  %v11663_v24 = vld [vmem:[%s14303_s25 + $0x14a8] sm:$0xf0]  ;;  %v7977_v50 = vadd.f32 %v7976_v45, %v7963_v26  ;;  %v7990_v59 = vpop.f32.mrf.mxu3  ;;  %v7951_v1 = vadd.f32 %v7950_v49, %v16652_v22  ;;  %v7964_v11 = vpop.f32.mrf.mxu1  ;;  %v13923_v34 = vld [vmem:[%s14303_s25 + $0x16f4] sm:$0xf]  ;;  %v11778_v45 = vor.u32 %v13877_v6, %v11775_v5 }
 0x362   : > { %8248 = vmatpush.bf16.msra.mxu2 %v11762_v15  ;;  %v13865_v15 = vld [vmem:[%s14303_s25 + $0x1524] sm:$0xf]  ;;  %v11666_v17 = vor.u32 %v13849_v25, %v11663_v24  ;;  %v13955_v25 = vld [vmem:[%s14303_s25 + $0x17f4] sm:$0xf]  ;;  %v11898_v24 = vor.u32 %v13907_v13, %v11895_v2  ;;  %v11887_v49 = vld [vmem:[%s14303_s25 + $0x1668] sm:$0xf0] }
 0x363   : > { %8262 = vmatpush.bf16.msra.mxu3 %v11826_v14  ;;  %v13881_v14 = vld [vmem:[%s14303_s25 + $0x15a4] sm:$0xf]  ;;  %v16702_v18 = vadd.f32 %v7990_v59, %v7977_v50  ;;  %v11730_v28 = vor.u32 %v13865_v15, %v11727_v8  ;;  %v7965_v22 = vadd.f32 %v7964_v11, %v7951_v1  ;;  %v11962_v15 = vor.u32 %v13923_v34, %v11959_v21  ;;  %v11935_v5 = vld [vmem:[%s14303_s25 + $0x16c8] sm:$0xf0] }
 0x364   : > { %8221 = vmatpush.bf16.msra.mxu0 %v11626_v54  ;;  %v11591_v54 = vld [vmem:[%s14303_s25 + $0x1418] sm:$0xf0]  ;;  %v13905_v50 = vld [vmem:[%s14303_s25 + $0x1664] sm:$0xf]  ;;  %v12063_v34 = vld [vmem:[%s14303_s25 + $0x17c8] sm:$0xf0] }
 0x365   : > { %8235 = vmatpush.bf16.msra.mxu1 %v11690_v0  ;;  %v13847_v0 = vld [vmem:[%s14303_s25 + $0x1494] sm:$0xf]  ;;  %v11594_v43 = vor.u32 %v13831_v56, %v11591_v54  ;;  %v13921_v59 = vld [vmem:[%s14303_s25 + $0x16e4] sm:$0xf] }
 0x366   : > { %8249 = vmatpush.bf16.msra.mxu2 %v11754_v62  ;;  %v11794_v62 = vor.u32 %v13881_v14, %v11791_v23  ;;  %v11658_v53 = vor.u32 %v13847_v0, %v11655_v32  ;;  %v11951_v23 = vld [vmem:[%s14303_s25 + $0x16e8] sm:$0xf0]  ;;  %v13937_v1 = vld [vmem:[%s14303_s25 + $0x1764] sm:$0xf]  ;;  %v13903_v0 = vld [vmem:[%s14303_s25 + $0x1654] sm:$0xf] }
 0x367   : > { %8263 = vmatpush.bf16.msra.mxu3 %v11818_v47  ;;  %v13879_v47 = vld [vmem:[%s14303_s25 + $0x1594] sm:$0xf]  ;;  %v13953_v11 = vld [vmem:[%s14303_s25 + $0x17e4] sm:$0xf]  ;;  %v11954_v56 = vor.u32 %v13921_v59, %v11951_v23 }
 0x368   : > { %8222 = vmatpush.bf16.msra.mxu0 %v11618_v3  ;;  %v11647_v3 = vld [vmem:[%s14303_s25 + $0x1488] sm:$0xf0]  ;;  %v17282_v32 = vld [vmem:[#allocation40_spill] sm:$0xff] }
 0x369   : > { %8236 = vmatpush.bf16.msra.mxu1 %v11682_v4  ;;  %v11786_v4 = vor.u32 %v13879_v47, %v11783_v27  ;;  %v7992_v26 = vpop.f32.mrf.mxu3  ;;  %v11650_v38 = vor.u32 %v13845_v46, %v11647_v3  ;;  %v13935_v47 = vld [vmem:[%s14303_s25 + $0x1754] sm:$0xf]  ;;  %v12007_v27 = vld [vmem:[%s14303_s25 + $0x1758] sm:$0xf0]  ;;  %v13949_v2 = vld [vmem:[%s14303_s25 + $0x17c4] sm:$0xf] }
 0x36a   : > { %8250 = vmatpush.bf16.msra.mxu2 %v11746_v42  ;;  %v7978_v42 = vpop.f32.mrf.mxu2  ;;  %v12010_v12 = vor.u32 %v13935_v47, %v12007_v27 }
 0x36b   : > { %8264 = vmatpush.bf16.msra.mxu3 %v11810_v29  ;;  %v7979_v29 = vadd.f32 %v7978_v42, %v7965_v22  ;;  %v13919_v22 = vld [vmem:[%s14303_s25 + $0x16d4] sm:$0xf]  ;;  %v11871_v42 = vld [vmem:[%s14303_s25 + $0x1648] sm:$0xf0] }
 0x36c   : > { %8223 = vmatpush.bf16.msra.mxu0 %v11610_v30  ;;  %v13939_v30 = vld [vmem:[%s14303_s25 + $0x1774] sm:$0xf]  ;;  %v11946_v3 = vor.u32 %v13919_v22, %v11943_v48  ;;  %v12047_v48 = vld [vmem:[%s14303_s25 + $0x17a8] sm:$0xf0] }
 0x36d   : > { %8237 = vmatpush.bf16.msra.mxu1 %v11674_v41  ;;  %v12023_v41 = vld [vmem:[%s14303_s25 + $0x1778] sm:$0xf0] }
 0x36e   : > { %8251 = vmatpush.bf16.msra.mxu2 %v11738_v16  ;;  %v16726_v16 = vadd.f32 %v7992_v26, %v7979_v29  ;;  %v12026_v8 = vor.u32 %v13939_v30, %v12023_v41  ;;  %v13933_v29 = vld [vmem:[%s14303_s25 + $0x1744] sm:$0xf]  ;;  %v11999_v26 = vld [vmem:[%s14303_s25 + $0x1748] sm:$0xf0]  ;;  %v11938_v41 = vor.u32 %v13917_v61, %v11935_v5  ;;  %v11975_v61 = vld [vmem:[%s14303_s25 + $0x1718] sm:$0xf0] }
 0x36f   : > { %8265 = vmatpush.bf16.msra.mxu3 %v11802_v58  ;;  %v12087_v58 = vld [vmem:[%s14303_s25 + $0x17f8] sm:$0xf0] }
 0x370   : > { %8224 = vmatpush.bf16.msra.mxu0 %v11602_v40  ;;  %v12090_v14 = vor.u32 %v13955_v25, %v12087_v58  ;;  %v12015_v40 = vld [vmem:[%s14303_s25 + $0x1768] sm:$0xf0]  ;;  %v11863_v25 = vld [vmem:[%s14303_s25 + $0x1638] sm:$0xf0]  ;;  %v13915_v58 = vld [vmem:[%s14303_s25 + $0x16b4] sm:$0xf] }
 0x371   : > { %8238 = vmatpush.bf16.msra.mxu1 %v11666_v17  ;;  %v12079_v17 = vld [vmem:[%s14303_s25 + $0x17e8] sm:$0xf0]  ;;  %v12018_v54 = vor.u32 %v13937_v1, %v12015_v40  ;;  %v13897_v1 = vld [vmem:[%s14303_s25 + $0x1624] sm:$0xf]  ;;  %v12039_v5 = vld [vmem:[%s14303_s25 + $0x1798] sm:$0xf0] }
 0x372   : > { %8252 = vmatpush.bf16.msra.mxu2 %v11730_v28  ;;  %v11890_v28 = vor.u32 %v13905_v50, %v11887_v49  ;;  %v12082_v19 = vor.u32 %v13953_v11, %v12079_v17  ;;  %v13947_v50 = vld [vmem:[%s14303_s25 + $0x17b4] sm:$0xf]  ;;  %v12055_v49 = vld [vmem:[%s14303_s25 + $0x17b8] sm:$0xf0]  ;;  %v11855_v40 = vld [vmem:[%s14303_s25 + $0x1628] sm:$0xf0] }
 0x373   : > { %8266 = vmatpush.bf16.msra.mxu3 %v11794_v62  ;;  %v11879_v62 = vld [vmem:[%s14303_s25 + $0x1658] sm:$0xf0]  ;;  %v13913_v11 = vld [vmem:[%s14303_s25 + $0x16a4] sm:$0xf]  ;;  %v12058_v17 = vor.u32 %v13947_v50, %v12055_v49  ;;  %v11858_v27 = vor.u32 %v13897_v1, %v11855_v40 }
 0x374   : > { %8225 = vmatpush.bf16.msra.mxu0 %v11594_v43  ;;  %v17283_v43 = vld [vmem:[#allocation41_spill] sm:$0xff]  ;;  %v11882_v46 = vor.u32 %v13903_v0, %v11879_v62  ;;  %v12215_v49 = vld [vmem:[%s14303_s25 + $0x18f8] sm:$0xf0] }
 0x375   : > { %8239 = vmatpush.bf16.msra.mxu1 %v11658_v53  ;;  %v12071_v53 = vld [vmem:[%s14303_s25 + $0x17d8] sm:$0xf0]  ;;  %v11983_v0 = vld [vmem:[%s14303_s25 + $0x1728] sm:$0xf0] }
 0x376   : > { %8253 = vmatpush.bf16.msra.mxu2 %v11722_v44  ;;  %v17285_v44 = vld [vmem:[#allocation43_spill] sm:$0xff]  ;;  %v12074_v6 = vor.u32 %v13951_v37, %v12071_v53 }
 0x377   : > { %8267 = vmatpush.bf16.msra.mxu3 %v11786_v4  ;;  %v13901_v4 = vld [vmem:[%s14303_s25 + $0x1644] sm:$0xf] }
 0x378   : > { %8226 = vmatpush.bf16.msra.mxu0 %v11586_v52  ;;  %v8004_v13 = vpop.f32.mrf.mxu0  ;;  %v11874_v21 = vor.u32 %v13901_v4, %v11871_v42  ;;  %v11911_v4 = vld [vmem:[%s14303_s25 + $0x1698] sm:$0xf0]  ;;  %v13927_v42 = vld [vmem:[%s14303_s25 + $0x1714] sm:$0xf] }
 0x379   : > { %8240 = vmatpush.bf16.msra.mxu1 %v11650_v38  ;;  %v8005_v52 = vadd.f32 %v8004_v13, %v16702_v18  ;;  %v8018_v30 = vpop.f32.mrf.mxu1  ;;  %v12002_v38 = vor.u32 %v13933_v29, %v11999_v26  ;;  %v11991_v18 = vld [vmem:[%s14303_s25 + $0x1738] sm:$0xf0]  ;;  %v13893_v26 = vld [vmem:[%s14303_s25 + $0x1604] sm:$0xf]  ;;  %v11839_v13 = vld [vmem:[%s14303_s25 + $0x1608] sm:$0xf0] }
 0x37a   : > { %8254 = vmatpush.bf16.msra.mxu2 %v11714_v57  ;;  %v13899_v57 = vld [vmem:[%s14303_s25 + $0x1634] sm:$0xf]  ;;  %v11842_v50 = vor.u32 %v13893_v26, %v11839_v13 }
 0x37b   : > { %8268 = vmatpush.bf16.msra.mxu3 %v11778_v45  ;;  %8227 = vmatmul.bf16.vlgmr.msra.gmra.mxu0 %v17282_v32  ;;  %v12066_v45 = vor.u32 %v13949_v2, %v12063_v34  ;;  %v11866_v59 = vor.u32 %v13899_v57, %v11863_v25  ;;  %v11978_v34 = vor.u32 %v13927_v42, %v11975_v61  ;;  %v11967_v57 = vld [vmem:[%s14303_s25 + $0x1708] sm:$0xf0]  ;;  %v13941_v25 = vld [vmem:[%s14303_s25 + $0x1784] sm:$0xf]  ;;  %v12199_v61 = vld [vmem:[%s14303_s25 + $0x18d8] sm:$0xf0] }
 0x37c   : > { %8275 = vmatpush.bf16.msrb.mxu0 %v11898_v24  ;;  %8241 = vmatmul.bf16.vlgmr.msra.gmra.mxu1 %v17284_v9  ;;  %v8019_v24 = vadd.f32 %v8018_v30, %v8005_v52  ;;  %v13909_v52 = vld [vmem:[%s14303_s25 + $0x1684] sm:$0xf]  ;;  %v17288_v26 = vld [vmem:[#allocation46_spill] sm:$0xff] }
 0x37d   : > { %8289 = vmatpush.bf16.msrb.mxu1 %v11962_v15  ;;  %8255 = vmatmul.bf16.vlgmr.msra.gmra.mxu2 %v17283_v43  ;;  %v11927_v15 = vld [vmem:[%s14303_s25 + $0x16b8] sm:$0xf0]  ;;  %v13925_v30 = vld [vmem:[%s14303_s25 + $0x1704] sm:$0xf]  ;;  %v14015_v13 = vld [vmem:[%s14303_s25 + $0x19d4] sm:$0xf] }
 0x37e   : > { %8303 = vmatpush.bf16.msrb.mxu2 %v12026_v8  ;;  %8269 = vmatmul.bf16.vlgmr.msra.gmra.mxu3 %v17285_v44  ;;  %v13931_v8 = vld [vmem:[%s14303_s25 + $0x1734] sm:$0xf]  ;;  %v11970_v40 = vor.u32 %v13925_v30, %v11967_v57  ;;  %v13981_v57 = vld [vmem:[%s14303_s25 + $0x18c4] sm:$0xf] }
 0x37f   : > { %8317 = vmatpush.bf16.msrb.mxu3 %v12090_v14  ;;  %v11930_v14 = vor.u32 %v13915_v58, %v11927_v15  ;;  %v11994_v23 = vor.u32 %v13931_v8, %v11991_v18  ;;  %v13895_v44 = vld [vmem:[%s14303_s25 + $0x1614] sm:$0xf]  ;;  %v12031_v58 = vld [vmem:[%s14303_s25 + $0x1788] sm:$0xf0]  ;;  %v12151_v8 = vld [vmem:[%s14303_s25 + $0x1878] sm:$0xf0] }
 0x380   : > { %8276 = vmatpush.bf16.msrb.mxu0 %v11890_v28  ;;  %v8032_v28 = vpop.f32.mrf.mxu2  ;;  %v8006_v22 = vpop.f32.mrf.mxu0  ;;  %v13971_v15 = vld [vmem:[%s14303_s25 + $0x1874] sm:$0xf] }
 0x381   : > { %8290 = vmatpush.bf16.msrb.mxu1 %v11954_v56  ;;  %v11919_v56 = vld [vmem:[%s14303_s25 + $0x16a8] sm:$0xf0]  ;;  %v8033_v62 = vadd.f32 %v8032_v28, %v8019_v24  ;;  %v8046_v32 = vpop.f32.mrf.mxu3  ;;  %v8007_v47 = vadd.f32 %v8006_v22, %v16726_v16  ;;  %v8020_v43 = vpop.f32.mrf.mxu1  ;;  %v13987_v18 = vld [vmem:[%s14303_s25 + $0x18f4] sm:$0xf]  ;;  %v12034_v28 = vor.u32 %v13941_v25, %v12031_v58 }
 0x382   : > { %8304 = vmatpush.bf16.msrb.mxu2 %v12018_v54  ;;  %v13929_v54 = vld [vmem:[%s14303_s25 + $0x1724] sm:$0xf]  ;;  %v11922_v37 = vor.u32 %v13913_v11, %v11919_v56  ;;  %v14019_v11 = vld [vmem:[%s14303_s25 + $0x19f4] sm:$0xf]  ;;  %v12154_v56 = vor.u32 %v13971_v15, %v12151_v8  ;;  %v12143_v22 = vld [vmem:[%s14303_s25 + $0x1868] sm:$0xf0] }
 0x383   : > { %8318 = vmatpush.bf16.msrb.mxu3 %v12082_v19  ;;  %v13945_v19 = vld [vmem:[%s14303_s25 + $0x17a4] sm:$0xf]  ;;  %v16776_v9 = vadd.f32 %v8046_v32, %v8033_v62  ;;  %v11986_v53 = vor.u32 %v13929_v54, %v11983_v0  ;;  %v8021_v16 = vadd.f32 %v8020_v43, %v8007_v47  ;;  %v12218_v54 = vor.u32 %v13987_v18, %v12215_v49  ;;  %v12191_v58 = vld [vmem:[%s14303_s25 + $0x18c8] sm:$0xf0] }
 0x384   : > { %8277 = vmatpush.bf16.msrb.mxu0 %v11882_v46  ;;  %v11847_v46 = vld [vmem:[%s14303_s25 + $0x1618] sm:$0xf0]  ;;  %v13969_v62 = vld [vmem:[%s14303_s25 + $0x1864] sm:$0xf]  ;;  %v12319_v18 = vld [vmem:[%s14303_s25 + $0x19c8] sm:$0xf0] }
 0x385   : > { %8291 = vmatpush.bf16.msrb.mxu1 %v11946_v3  ;;  %v13911_v3 = vld [vmem:[%s14303_s25 + $0x1694] sm:$0xf]  ;;  %v11850_v29 = vor.u32 %v13895_v44, %v11847_v46  ;;  %v13985_v32 = vld [vmem:[%s14303_s25 + $0x18e4] sm:$0xf] }
 0x386   : > { %8305 = vmatpush.bf16.msrb.mxu2 %v12010_v12  ;;  %v12050_v12 = vor.u32 %v13945_v19, %v12047_v48  ;;  %v11914_v2 = vor.u32 %v13911_v3, %v11911_v4  ;;  %v12207_v48 = vld [vmem:[%s14303_s25 + $0x18e8] sm:$0xf0]  ;;  %v14001_v47 = vld [vmem:[%s14303_s25 + $0x1964] sm:$0xf]  ;;  %v13967_v3 = vld [vmem:[%s14303_s25 + $0x1854] sm:$0xf] }
 0x387   : > { %8319 = vmatpush.bf16.msrb.mxu3 %v12074_v6  ;;  %v13943_v6 = vld [vmem:[%s14303_s25 + $0x1794] sm:$0xf]  ;;  %v14017_v43 = vld [vmem:[%s14303_s25 + $0x19e4] sm:$0xf]  ;;  %v12210_v44 = vor.u32 %v13985_v32, %v12207_v48 }
 0x388   : > { %8278 = vmatpush.bf16.msrb.mxu0 %v11874_v21  ;;  %v11903_v21 = vld [vmem:[%s14303_s25 + $0x1688] sm:$0xf0]  ;;  %v17286_v4 = vld [vmem:[#allocation44_spill] sm:$0xff] }
 0x389   : > { %8292 = vmatpush.bf16.msrb.mxu1 %v11938_v41  ;;  %v12042_v41 = vor.u32 %v13943_v6, %v12039_v5  ;;  %v8048_v24 = vpop.f32.mrf.mxu3  ;;  %v11906_v1 = vor.u32 %v13909_v52, %v11903_v21  ;;  %v13999_v6 = vld [vmem:[%s14303_s25 + $0x1954] sm:$0xf]  ;;  %v12263_v5 = vld [vmem:[%s14303_s25 + $0x1958] sm:$0xf0]  ;;  %v14013_v8 = vld [vmem:[%s14303_s25 + $0x19c4] sm:$0xf] }
 0x38a   : > { %8306 = vmatpush.bf16.msrb.mxu2 %v12002_v38  ;;  %v8034_v38 = vpop.f32.mrf.mxu2  ;;  %v12266_v30 = vor.u32 %v13999_v6, %v12263_v5 }
 0x38b   : > { %8320 = vmatpush.bf16.msrb.mxu3 %v12066_v45  ;;  %v8035_v45 = vadd.f32 %v8034_v38, %v8021_v16  ;;  %v13983_v16 = vld [vmem:[%s14303_s25 + $0x18d4] sm:$0xf]  ;;  %v12127_v38 = vld [vmem:[%s14303_s25 + $0x1848] sm:$0xf0] }
 0x38c   : > { %8279 = vmatpush.bf16.msrb.mxu0 %v11866_v59  ;;  %v14003_v59 = vld [vmem:[%s14303_s25 + $0x1974] sm:$0xf]  ;;  %v12202_v21 = vor.u32 %v13983_v16, %v12199_v61  ;;  %v12303_v61 = vld [vmem:[%s14303_s25 + $0x19a8] sm:$0xf0] }
 0x38d   : > { %8293 = vmatpush.bf16.msrb.mxu1 %v11930_v14  ;;  %v12279_v14 = vld [vmem:[%s14303_s25 + $0x1978] sm:$0xf0] }
 0x38e   : > { %8307 = vmatpush.bf16.msrb.mxu2 %v11994_v23  ;;  %v16800_v23 = vadd.f32 %v8048_v24, %v8035_v45  ;;  %v12282_v0 = vor.u32 %v14003_v59, %v12279_v14  ;;  %v13997_v45 = vld [vmem:[%s14303_s25 + $0x1944] sm:$0xf]  ;;  %v12255_v24 = vld [vmem:[%s14303_s25 + $0x1948] sm:$0xf0]  ;;  %v12194_v14 = vor.u32 %v13981_v57, %v12191_v58  ;;  %v12231_v57 = vld [vmem:[%s14303_s25 + $0x1918] sm:$0xf0] }
 0x38f   : > { %8321 = vmatpush.bf16.msrb.mxu3 %v12058_v17  ;;  %v12343_v17 = vld [vmem:[%s14303_s25 + $0x19f8] sm:$0xf0] }
 0x390   : > { %8280 = vmatpush.bf16.msrb.mxu0 %v11858_v27  ;;  %v12346_v19 = vor.u32 %v14019_v11, %v12343_v17  ;;  %v12271_v27 = vld [vmem:[%s14303_s25 + $0x1968] sm:$0xf0]  ;;  %v12119_v11 = vld [vmem:[%s14303_s25 + $0x1838] sm:$0xf0]  ;;  %v13979_v17 = vld [vmem:[%s14303_s25 + $0x18b4] sm:$0xf] }
 0x391   : > { %8294 = vmatpush.bf16.msrb.mxu1 %v11922_v37  ;;  %v12335_v37 = vld [vmem:[%s14303_s25 + $0x19e8] sm:$0xf0]  ;;  %v12274_v46 = vor.u32 %v14001_v47, %v12271_v27  ;;  %v13961_v47 = vld [vmem:[%s14303_s25 + $0x1824] sm:$0xf]  ;;  %v12295_v58 = vld [vmem:[%s14303_s25 + $0x1998] sm:$0xf0] }
 0x392   : > { %8308 = vmatpush.bf16.msrb.mxu2 %v11986_v53  ;;  %v12146_v53 = vor.u32 %v13969_v62, %v12143_v22  ;;  %v12338_v42 = vor.u32 %v14017_v43, %v12335_v37  ;;  %v14011_v62 = vld [vmem:[%s14303_s25 + $0x19b4] sm:$0xf]  ;;  %v12311_v22 = vld [vmem:[%s14303_s25 + $0x19b8] sm:$0xf0]  ;;  %v12111_v27 = vld [vmem:[%s14303_s25 + $0x1828] sm:$0xf0] }
 0x393   : > { %8322 = vmatpush.bf16.msrb.mxu3 %v12050_v12  ;;  %v12135_v12 = vld [vmem:[%s14303_s25 + $0x1858] sm:$0xf0]  ;;  %v13977_v43 = vld [vmem:[%s14303_s25 + $0x18a4] sm:$0xf]  ;;  %v12314_v37 = vor.u32 %v14011_v62, %v12311_v22  ;;  %v12114_v5 = vor.u32 %v13961_v47, %v12111_v27 }
 0x394   : > { %8281 = vmatpush.bf16.msrb.mxu0 %v11850_v29  ;;  %v17287_v29 = vld [vmem:[#allocation45_spill] sm:$0xff]  ;;  %v12138_v52 = vor.u32 %v13967_v3, %v12135_v12  ;;  %v12471_v22 = vld [vmem:[%s14303_s25 + $0x1af8] sm:$0xf0] }
 0x395   : > { %8295 = vmatpush.bf16.msrb.mxu1 %v11914_v2  ;;  %v12327_v2 = vld [vmem:[%s14303_s25 + $0x19d8] sm:$0xf0]  ;;  %v12239_v3 = vld [vmem:[%s14303_s25 + $0x1928] sm:$0xf0] }
 0x396   : > { %8309 = vmatpush.bf16.msrb.mxu2 %v11978_v34  ;;  %v17289_v34 = vld [vmem:[#allocation47_spill] sm:$0xff]  ;;  %v12330_v25 = vor.u32 %v14015_v13, %v12327_v2 }
 0x397   : > { %8323 = vmatpush.bf16.msrb.mxu3 %v12042_v41  ;;  %v13965_v41 = vld [vmem:[%s14303_s25 + $0x1844] sm:$0xf] }
 0x398   : > { %8282 = vmatpush.bf16.msrb.mxu0 %v11842_v50  ;;  %v8060_v15 = vpop.f32.mrf.mxu0  ;;  %v12130_v49 = vor.u32 %v13965_v41, %v12127_v38  ;;  %v12167_v41 = vld [vmem:[%s14303_s25 + $0x1898] sm:$0xf0]  ;;  %v13991_v38 = vld [vmem:[%s14303_s25 + $0x1914] sm:$0xf] }
 0x399   : > { %8296 = vmatpush.bf16.msrb.mxu1 %v11906_v1  ;;  %v8061_v50 = vadd.f32 %v8060_v15, %v16776_v9  ;;  %v8074_v59 = vpop.f32.mrf.mxu1  ;;  %v12258_v1 = vor.u32 %v13997_v45, %v12255_v24  ;;  %v12247_v9 = vld [vmem:[%s14303_s25 + $0x1938] sm:$0xf0]  ;;  %v13957_v24 = vld [vmem:[%s14303_s25 + $0x1804] sm:$0xf]  ;;  %v12095_v15 = vld [vmem:[%s14303_s25 + $0x1808] sm:$0xf0] }
 0x39a   : > { %8310 = vmatpush.bf16.msrb.mxu2 %v11970_v40  ;;  %v13963_v40 = vld [vmem:[%s14303_s25 + $0x1834] sm:$0xf]  ;;  %v12098_v62 = vor.u32 %v13957_v24, %v12095_v15  ;;  %v17292_v24 = vld [vmem:[#allocation52_spill] sm:$0xff] }
 0x39b   : > { %8324 = vmatpush.bf16.msrb.mxu3 %v12034_v28  ;;  %8283 = vmatmul.bf16.vlgmr.msrb.gmra.mxu0 %v17286_v4  ;;  %v12322_v28 = vor.u32 %v14013_v8, %v12319_v18  ;;  %v12122_v32 = vor.u32 %v13963_v40, %v12119_v11  ;;  %v12234_v18 = vor.u32 %v13991_v38, %v12231_v57  ;;  %v12223_v40 = vld [vmem:[%s14303_s25 + $0x1908] sm:$0xf0]  ;;  %v14005_v11 = vld [vmem:[%s14303_s25 + $0x1984] sm:$0xf]  ;;  %v12455_v57 = vld [vmem:[%s14303_s25 + $0x1ad8] sm:$0xf0] }
 0x39c   : > { %8331 = vmatpush.bf16.msra.mxu0 %v12154_v56  ;;  %8297 = vmatmul.bf16.vlgmr.msrb.gmra.mxu1 %v17288_v26  ;;  %v8075_v56 = vadd.f32 %v8074_v59, %v8061_v50  ;;  %v13973_v50 = vld [vmem:[%s14303_s25 + $0x1884] sm:$0xf]  ;;  %v14079_v15 = vld [vmem:[%s14303_s25 + $0x1bd4] sm:$0xf] }
 0x39d   : > { %8345 = vmatpush.bf16.msra.mxu1 %v12218_v54  ;;  %8311 = vmatmul.bf16.vlgmr.msrb.gmra.mxu2 %v17287_v29  ;;  %v12183_v54 = vld [vmem:[%s14303_s25 + $0x18b8] sm:$0xf0]  ;;  %v13989_v59 = vld [vmem:[%s14303_s25 + $0x1904] sm:$0xf] }
 0x39e   : > { %8359 = vmatpush.bf16.msra.mxu2 %v12282_v0  ;;  %8325 = vmatmul.bf16.vlgmr.msrb.gmra.mxu3 %v17289_v34  ;;  %v13995_v0 = vld [vmem:[%s14303_s25 + $0x1934] sm:$0xf]  ;;  %v12226_v27 = vor.u32 %v13989_v59, %v12223_v40  ;;  %v14045_v40 = vld [vmem:[%s14303_s25 + $0x1ac4] sm:$0xf] }
 0x39f   : > { %8373 = vmatpush.bf16.msra.mxu3 %v12346_v19  ;;  %v12186_v19 = vor.u32 %v13979_v17, %v12183_v54  ;;  %v12250_v48 = vor.u32 %v13995_v0, %v12247_v9  ;;  %v13959_v34 = vld [vmem:[%s14303_s25 + $0x1814] sm:$0xf]  ;;  %v12287_v17 = vld [vmem:[%s14303_s25 + $0x1988] sm:$0xf0]  ;;  %v12407_v0 = vld [vmem:[%s14303_s25 + $0x1a78] sm:$0xf0] }
 0x3a0   : > { %8332 = vmatpush.bf16.msra.mxu0 %v12146_v53  ;;  %v8088_v53 = vpop.f32.mrf.mxu2  ;;  %v8062_v16 = vpop.f32.mrf.mxu0  ;;  %v14035_v54 = vld [vmem:[%s14303_s25 + $0x1a74] sm:$0xf] }
 0x3a1   : > { %8346 = vmatpush.bf16.msra.mxu1 %v12210_v44  ;;  %v12175_v44 = vld [vmem:[%s14303_s25 + $0x18a8] sm:$0xf0]  ;;  %v8089_v12 = vadd.f32 %v8088_v53, %v8075_v56  ;;  %v8102_v4 = vpop.f32.mrf.mxu3  ;;  %v8063_v6 = vadd.f32 %v8062_v16, %v16800_v23  ;;  %v8076_v29 = vpop.f32.mrf.mxu1  ;;  %v14051_v9 = vld [vmem:[%s14303_s25 + $0x1af4] sm:$0xf]  ;;  %v12290_v53 = vor.u32 %v14005_v11, %v12287_v17 }
 0x3a2   : > { %8360 = vmatpush.bf16.msra.mxu2 %v12274_v46  ;;  %v13993_v46 = vld [vmem:[%s14303_s25 + $0x1924] sm:$0xf]  ;;  %v12178_v13 = vor.u32 %v13977_v43, %v12175_v44  ;;  %v14083_v43 = vld [vmem:[%s14303_s25 + $0x1bf4] sm:$0xf]  ;;  %v12410_v44 = vor.u32 %v14035_v54, %v12407_v0  ;;  %v12399_v16 = vld [vmem:[%s14303_s25 + $0x1a68] sm:$0xf0] }
 0x3a3   : > { %8374 = vmatpush.bf16.msra.mxu3 %v12338_v42  ;;  %v14009_v42 = vld [vmem:[%s14303_s25 + $0x19a4] sm:$0xf]  ;;  %v16850_v26 = vadd.f32 %v8102_v4, %v8089_v12  ;;  %v12242_v2 = vor.u32 %v13993_v46, %v12239_v3  ;;  %v8077_v23 = vadd.f32 %v8076_v29, %v8063_v6  ;;  %v12474_v46 = vor.u32 %v14051_v9, %v12471_v22  ;;  %v12447_v17 = vld [vmem:[%s14303_s25 + $0x1ac8] sm:$0xf0] }
 0x3a4   : > { %8333 = vmatpush.bf16.msra.mxu0 %v12138_v52  ;;  %v12103_v52 = vld [vmem:[%s14303_s25 + $0x1818] sm:$0xf0]  ;;  %v14033_v12 = vld [vmem:[%s14303_s25 + $0x1a64] sm:$0xf]  ;;  %v12575_v0 = vld [vmem:[%s14303_s25 + $0x1bc8] sm:$0xf0] }
 0x3a5   : > { %8347 = vmatpush.bf16.msra.mxu1 %v12202_v21  ;;  %v13975_v21 = vld [vmem:[%s14303_s25 + $0x1894] sm:$0xf]  ;;  %v12106_v45 = vor.u32 %v13959_v34, %v12103_v52  ;;  %v14049_v4 = vld [vmem:[%s14303_s25 + $0x1ae4] sm:$0xf] }
 0x3a6   : > { %8361 = vmatpush.bf16.msra.mxu2 %v12266_v30  ;;  %v12306_v30 = vor.u32 %v14009_v42, %v12303_v61  ;;  %v12170_v8 = vor.u32 %v13975_v21, %v12167_v41  ;;  %v12463_v61 = vld [vmem:[%s14303_s25 + $0x1ae8] sm:$0xf0]  ;;  %v14065_v6 = vld [vmem:[%s14303_s25 + $0x1b64] sm:$0xf]  ;;  %v14031_v21 = vld [vmem:[%s14303_s25 + $0x1a54] sm:$0xf] }
 0x3a7   : > { %8375 = vmatpush.bf16.msra.mxu3 %v12330_v25  ;;  %v14007_v25 = vld [vmem:[%s14303_s25 + $0x1994] sm:$0xf]  ;;  %v14081_v29 = vld [vmem:[%s14303_s25 + $0x1be4] sm:$0xf]  ;;  %v12466_v34 = vor.u32 %v14049_v4, %v12463_v61 }
 0x3a8   : > { %8334 = vmatpush.bf16.msra.mxu0 %v12130_v49  ;;  %v12159_v49 = vld [vmem:[%s14303_s25 + $0x1888] sm:$0xf0]  ;;  %v17290_v41 = vld [vmem:[#allocation50_spill] sm:$0xff]  ;;  %v14077_v54 = vld [vmem:[%s14303_s25 + $0x1bc4] sm:$0xf] }
 0x3a9   : > { %8348 = vmatpush.bf16.msra.mxu1 %v12194_v14  ;;  %v12298_v14 = vor.u32 %v14007_v25, %v12295_v58  ;;  %v8104_v56 = vpop.f32.mrf.mxu3  ;;  %v12162_v47 = vor.u32 %v13973_v50, %v12159_v49  ;;  %v14063_v25 = vld [vmem:[%s14303_s25 + $0x1b54] sm:$0xf]  ;;  %v12519_v58 = vld [vmem:[%s14303_s25 + $0x1b58] sm:$0xf0]  ;;  %v14025_v4 = vld [vmem:[%s14303_s25 + $0x1a24] sm:$0xf] }
 0x3aa   : > { %8362 = vmatpush.bf16.msra.mxu2 %v12258_v1  ;;  %v8090_v1 = vpop.f32.mrf.mxu2  ;;  %v12522_v59 = vor.u32 %v14063_v25, %v12519_v58  ;;  %v14041_v61 = vld [vmem:[%s14303_s25 + $0x1aa4] sm:$0xf]  ;;  %v12423_v25 = vld [vmem:[%s14303_s25 + $0x1a98] sm:$0xf0]  ;;  %v14055_v58 = vld [vmem:[%s14303_s25 + $0x1b14] sm:$0xf] }
 0x3ab   : > { %8376 = vmatpush.bf16.msra.mxu3 %v12322_v28  ;;  %v8091_v28 = vadd.f32 %v8090_v1, %v8077_v23  ;;  %v14047_v23 = vld [vmem:[%s14303_s25 + $0x1ad4] sm:$0xf]  ;;  %v12383_v1 = vld [vmem:[%s14303_s25 + $0x1a48] sm:$0xf0] }
 0x3ac   : > { %8335 = vmatpush.bf16.msra.mxu0 %v12122_v32  ;;  %v14067_v32 = vld [vmem:[%s14303_s25 + $0x1b74] sm:$0xf]  ;;  %v12458_v49 = vor.u32 %v14047_v23, %v12455_v57 }
 0x3ad   : > { %8349 = vmatpush.bf16.msra.mxu1 %v12186_v19  ;;  %v12535_v19 = vld [vmem:[%s14303_s25 + $0x1b78] sm:$0xf0]  ;;  %v14023_v23 = vld [vmem:[%s14303_s25 + $0x1a14] sm:$0xf] }
 0x3ae   : > { %8363 = vmatpush.bf16.msra.mxu2 %v12250_v48  ;;  %v16874_v48 = vadd.f32 %v8104_v56, %v8091_v28  ;;  %v12538_v3 = vor.u32 %v14067_v32, %v12535_v19  ;;  %v14061_v28 = vld [vmem:[%s14303_s25 + $0x1b44] sm:$0xf]  ;;  %v12511_v56 = vld [vmem:[%s14303_s25 + $0x1b48] sm:$0xf0]  ;;  %v14027_v32 = vld [vmem:[%s14303_s25 + $0x1a34] sm:$0xf] }
 0x3af   : > { %8377 = vmatpush.bf16.msra.mxu3 %v12314_v37  ;;  %v12599_v37 = vld [vmem:[%s14303_s25 + $0x1bf8] sm:$0xf0]  ;;  %v12514_v22 = vor.u32 %v14061_v28, %v12511_v56  ;;  %v14069_v28 = vld [vmem:[%s14303_s25 + $0x1b84] sm:$0xf]  ;;  %v12543_v56 = vld [vmem:[%s14303_s25 + $0x1b88] sm:$0xf0] }
 0x3b0   : > { %8336 = vmatpush.bf16.msra.mxu0 %v12114_v5  ;;  %v12602_v42 = vor.u32 %v14083_v43, %v12599_v37  ;;  %v12527_v5 = vld [vmem:[%s14303_s25 + $0x1b68] sm:$0xf0]  ;;  %v12375_v19 = vld [vmem:[%s14303_s25 + $0x1a38] sm:$0xf0]  ;;  %v14059_v37 = vld [vmem:[%s14303_s25 + $0x1b34] sm:$0xf] }
 0x3b1   : > { %8350 = vmatpush.bf16.msra.mxu1 %v12178_v13  ;;  %v12591_v13 = vld [vmem:[%s14303_s25 + $0x1be8] sm:$0xf0]  ;;  %v12530_v52 = vor.u32 %v14065_v6, %v12527_v5  ;;  %v12439_v43 = vld [vmem:[%s14303_s25 + $0x1ab8] sm:$0xf0] }
 0x3b2   : > { %8364 = vmatpush.bf16.msra.mxu2 %v12242_v2  ;;  %v12402_v2 = vor.u32 %v14033_v12, %v12399_v16  ;;  %v12594_v38 = vor.u32 %v14081_v29, %v12591_v13  ;;  %v12431_v5 = vld [vmem:[%s14303_s25 + $0x1aa8] sm:$0xf0]  ;;  %v14057_v29 = vld [vmem:[%s14303_s25 + $0x1b24] sm:$0xf] }
 0x3b3   : > { %8378 = vmatpush.bf16.msra.mxu3 %v12306_v30  ;;  %v12391_v30 = vld [vmem:[%s14303_s25 + $0x1a58] sm:$0xf0]  ;;  %v12495_v13 = vld [vmem:[%s14303_s25 + $0x1b28] sm:$0xf0] }
 0x3b4   : > { %8337 = vmatpush.bf16.msra.mxu0 %v12106_v45  ;;  %v17291_v45 = vld [vmem:[#allocation51_spill] sm:$0xff]  ;;  %v12394_v50 = vor.u32 %v14031_v21, %v12391_v30  ;;  %v12434_v21 = vor.u32 %v14041_v61, %v12431_v5  ;;  %v12498_v30 = vor.u32 %v14057_v29, %v12495_v13  ;;  %v12719_v61 = vld [vmem:[%s14303_s25 + $0x1ce8] sm:$0xf0]  ;;  %v14145_v29 = vld [vmem:[%s14303_s25 + $0x1de4] sm:$0xf] }
 0x3b5   : > { %8351 = vmatpush.bf16.msra.mxu1 %v12170_v8  ;;  %v12583_v8 = vld [vmem:[%s14303_s25 + $0x1bd8] sm:$0xf0]  ;;  %v12783_v5 = vld [vmem:[%s14303_s25 + $0x1d68] sm:$0xf0] }
 0x3b6   : > { %8365 = vmatpush.bf16.msra.mxu2 %v12234_v18  ;;  %v17293_v18 = vld [vmem:[#allocation53_spill] sm:$0xff]  ;;  %v12586_v11 = vor.u32 %v14079_v15, %v12583_v8  ;;  %v12551_v15 = vld [vmem:[%s14303_s25 + $0x1b98] sm:$0xf0] }
 0x3b7   : > { %8379 = vmatpush.bf16.msra.mxu3 %v12298_v14  ;;  %v14029_v14 = vld [vmem:[%s14303_s25 + $0x1a44] sm:$0xf]  ;;  %v12847_v13 = vld [vmem:[%s14303_s25 + $0x1de8] sm:$0xf0] }
 0x3b8   : > { %8338 = vmatpush.bf16.msra.mxu0 %v12098_v62  ;;  %v12386_v9 = vor.u32 %v14029_v14, %v12383_v1  ;;  %v12450_v62 = vor.u32 %v14045_v40, %v12447_v17  ;;  %v14037_v14 = vld [vmem:[%s14303_s25 + $0x1a84] sm:$0xf]  ;;  %v12415_v1 = vld [vmem:[%s14303_s25 + $0x1a88] sm:$0xf0] }
 0x3b9   : > { %8352 = vmatpush.bf16.msra.mxu1 %v12162_v47  ;;  %v14043_v47 = vld [vmem:[%s14303_s25 + $0x1ab4] sm:$0xf]  ;;  %v14053_v40 = vld [vmem:[%s14303_s25 + $0x1b04] sm:$0xf]  ;;  %v12479_v17 = vld [vmem:[%s14303_s25 + $0x1b08] sm:$0xf0] }
 0x3ba   : > { %8366 = vmatpush.bf16.msra.mxu2 %v12226_v27  ;;  %v12578_v27 = vor.u32 %v14077_v54, %v12575_v0  ;;  %v12442_v12 = vor.u32 %v14043_v47, %v12439_v43  ;;  %v14099_v54 = vld [vmem:[%s14303_s25 + $0x1c74] sm:$0xf]  ;;  %v12663_v0 = vld [vmem:[%s14303_s25 + $0x1c78] sm:$0xf0]  ;;  %v12418_v47 = vor.u32 %v14037_v14, %v12415_v1  ;;  %v12831_v14 = vld [vmem:[%s14303_s25 + $0x1dc8] sm:$0xf0] }
 0x3bb   : > { %8380 = vmatpush.bf16.msra.mxu3 %v12290_v53  ;;  %8339 = vmatmul.bf16.vlgmr.msra.gmra.mxu0 %v17290_v41  ;;  %v12503_v53 = vld [vmem:[%s14303_s25 + $0x1b38] sm:$0xf0]  ;;  %v14147_v43 = vld [vmem:[%s14303_s25 + $0x1df4] sm:$0xf] }
 0x3bc   : > { %8387 = vmatpush.bf16.msrb.mxu0 %v12410_v44  ;;  %8353 = vmatmul.bf16.vlgmr.msra.gmra.mxu1 %v17292_v24  ;;  %v14075_v44 = vld [vmem:[%s14303_s25 + $0x1bb4] sm:$0xf]  ;;  %v12506_v16 = vor.u32 %v14059_v37, %v12503_v53  ;;  %v12359_v41 = vld [vmem:[%s14303_s25 + $0x1a18] sm:$0xf0]  ;;  %v12546_v53 = vor.u32 %v14069_v28, %v12543_v56 }
 0x3bd   : > { %8401 = vmatpush.bf16.msrb.mxu1 %v12474_v46  ;;  %8367 = vmatmul.bf16.vlgmr.msra.gmra.mxu2 %v17291_v45  ;;  %v12567_v46 = vld [vmem:[%s14303_s25 + $0x1bb8] sm:$0xf0]  ;;  %v14071_v24 = vld [vmem:[%s14303_s25 + $0x1b94] sm:$0xf]  ;;  %v12362_v8 = vor.u32 %v14023_v23, %v12359_v41  ;;  %v12850_v41 = vor.u32 %v14145_v29, %v12847_v13 }
 0x3be   : > { %8415 = vmatpush.bf16.msrb.mxu2 %v12538_v3  ;;  %8381 = vmatmul.bf16.vlgmr.msra.gmra.mxu3 %v17293_v18  ;;  %v12378_v3 = vor.u32 %v14027_v32, %v12375_v19  ;;  %v12570_v6 = vor.u32 %v14075_v44, %v12567_v46  ;;  %v12487_v45 = vld [vmem:[%s14303_s25 + $0x1b18] sm:$0xf0]  ;;  %v14021_v18 = vld [vmem:[%s14303_s25 + $0x1a04] sm:$0xf]  ;;  %v14131_v32 = vld [vmem:[%s14303_s25 + $0x1d74] sm:$0xf]  ;;  %v12666_v44 = vor.u32 %v14099_v54, %v12663_v0 }
 0x3bf   : > { %8429 = vmatpush.bf16.msrb.mxu3 %v12602_v42  ;;  %v12367_v42 = vld [vmem:[%s14303_s25 + $0x1a28] sm:$0xf0]  ;;  %v12791_v19 = vld [vmem:[%s14303_s25 + $0x1d78] sm:$0xf0]  ;;  %v14111_v23 = vld [vmem:[%s14303_s25 + $0x1cd4] sm:$0xf] }
 0x3c0   : > { %8388 = vmatpush.bf16.msrb.mxu0 %v12402_v2  ;;  %v14073_v2 = vld [vmem:[%s14303_s25 + $0x1ba4] sm:$0xf]  ;;  %v12855_v37 = vld [vmem:[%s14303_s25 + $0x1df8] sm:$0xf0]  ;;  %v14107_v56 = vld [vmem:[%s14303_s25 + $0x1cb4] sm:$0xf] }
 0x3c1   : > { %8402 = vmatpush.bf16.msrb.mxu1 %v12466_v34  ;;  %v12559_v34 = vld [vmem:[%s14303_s25 + $0x1ba8] sm:$0xf0]  ;;  %v12631_v28 = vld [vmem:[%s14303_s25 + $0x1c38] sm:$0xf0]  ;;  %v14103_v13 = vld [vmem:[%s14303_s25 + $0x1c94] sm:$0xf] }
 0x3c2   : > { %8416 = vmatpush.bf16.msrb.mxu2 %v12530_v52  ;;  %v12370_v52 = vor.u32 %v14025_v4, %v12367_v42  ;;  %v12562_v57 = vor.u32 %v14073_v2, %v12559_v34  ;;  %v14113_v4 = vld [vmem:[%s14303_s25 + $0x1ce4] sm:$0xf]  ;;  %v12858_v42 = vor.u32 %v14147_v43, %v12855_v37  ;;  %v12695_v0 = vld [vmem:[%s14303_s25 + $0x1cb8] sm:$0xf0]  ;;  %v12623_v37 = vld [vmem:[%s14303_s25 + $0x1c28] sm:$0xf0] }
 0x3c3   : > { %8430 = vmatpush.bf16.msrb.mxu3 %v12594_v38  ;;  %v14039_v38 = vld [vmem:[%s14303_s25 + $0x1a94] sm:$0xf]  ;;  %v12722_v34 = vor.u32 %v14113_v4, %v12719_v61  ;;  %v14089_v43 = vld [vmem:[%s14303_s25 + $0x1c24] sm:$0xf]  ;;  %v12815_v4 = vld [vmem:[%s14303_s25 + $0x1da8] sm:$0xf0] }
 0x3c4   : > { %8389 = vmatpush.bf16.msrb.mxu0 %v12394_v50  ;;  %v12351_v50 = vld [vmem:[%s14303_s25 + $0x1a08] sm:$0xf0]  ;;  %v12615_v29 = vld [vmem:[%s14303_s25 + $0x1c18] sm:$0xf0] }
 0x3c5   : > { %8403 = vmatpush.bf16.msrb.mxu1 %v12458_v49  ;;  %v12426_v49 = vor.u32 %v14039_v38, %v12423_v25  ;;  %v12711_v38 = vld [vmem:[%s14303_s25 + $0x1cd8] sm:$0xf0] }
 0x3c6   : > { %8417 = vmatpush.bf16.msrb.mxu2 %v12522_v59  ;;  %v12490_v59 = vor.u32 %v14055_v58, %v12487_v45  ;;  %v12775_v25 = vld [vmem:[%s14303_s25 + $0x1d58] sm:$0xf0]  ;;  %v14143_v58 = vld [vmem:[%s14303_s25 + $0x1dd4] sm:$0xf] }
 0x3c7   : > { %8431 = vmatpush.bf16.msrb.mxu3 %v12586_v11  ;;  %v12554_v11 = vor.u32 %v14071_v24, %v12551_v15  ;;  %v12839_v45 = vld [vmem:[%s14303_s25 + $0x1dd8] sm:$0xf0]  ;;  %v12714_v24 = vor.u32 %v14111_v23, %v12711_v38  ;;  %v14085_v38 = vld [vmem:[%s14303_s25 + $0x1c04] sm:$0xf] }
 0x3c8   : > { %8390 = vmatpush.bf16.msrb.mxu0 %v12386_v9  ;;  %v14115_v9 = vld [vmem:[%s14303_s25 + $0x1cf4] sm:$0xf]  ;;  %v12807_v23 = vld [vmem:[%s14303_s25 + $0x1d98] sm:$0xf0] }
 0x3c9   : > { %8404 = vmatpush.bf16.msrb.mxu1 %v12450_v62  ;;  %v12354_v62 = vor.u32 %v14021_v18, %v12351_v50  ;;  %v14109_v18 = vld [vmem:[%s14303_s25 + $0x1cc4] sm:$0xf]  ;;  %v12703_v50 = vld [vmem:[%s14303_s25 + $0x1cc8] sm:$0xf0] }
 0x3ca   : > { %8418 = vmatpush.bf16.msrb.mxu2 %v12514_v22  ;;  %v12727_v22 = vld [vmem:[%s14303_s25 + $0x1cf8] sm:$0xf0] }
 0x3cb   : > { %8432 = vmatpush.bf16.msrb.mxu3 %v12578_v27  ;;  %v12482_v27 = vor.u32 %v14053_v40, %v12479_v17  ;;  %v12730_v46 = vor.u32 %v14115_v9, %v12727_v22  ;;  %v12706_v40 = vor.u32 %v14109_v18, %v12703_v50  ;;  %v14091_v17 = vld [vmem:[%s14303_s25 + $0x1c34] sm:$0xf]  ;;  %v12799_v18 = vld [vmem:[%s14303_s25 + $0x1d88] sm:$0xf0]  ;;  %v12919_v50 = vld [vmem:[%s14303_s25 + $0x1e78] sm:$0xf0] }
 0x3cc   : > { %8391 = vmatpush.bf16.msrb.mxu0 %v12378_v3  ;;  %v12794_v3 = vor.u32 %v14131_v32, %v12791_v19  ;;  %v14123_v9 = vld [vmem:[%s14303_s25 + $0x1d34] sm:$0xf]  ;;  %v12823_v32 = vld [vmem:[%s14303_s25 + $0x1db8] sm:$0xf0]  ;;  %v12634_v19 = vor.u32 %v14091_v17, %v12631_v28 }
 0x3cd   : > { %8405 = vmatpush.bf16.msrb.mxu1 %v12442_v12  ;;  %v14097_v12 = vld [vmem:[%s14303_s25 + $0x1c64] sm:$0xf]  ;;  %v14139_v22 = vld [vmem:[%s14303_s25 + $0x1db4] sm:$0xf]  ;;  %v13111_v28 = vld [vmem:[%s14303_s25 + $0x1ff8] sm:$0xf0] }
 0x3ce   : > { %8419 = vmatpush.bf16.msrb.mxu2 %v12506_v16  ;;  %v12655_v16 = vld [vmem:[%s14303_s25 + $0x1c68] sm:$0xf0]  ;;  %v14211_v17 = vld [vmem:[%s14303_s25 + $0x1ff4] sm:$0xf] }
 0x3cf   : > { %8433 = vmatpush.bf16.msrb.mxu3 %v12570_v6  ;;  %v14129_v6 = vld [vmem:[%s14303_s25 + $0x1d64] sm:$0xf]  ;;  %v12658_v2 = vor.u32 %v14097_v12, %v12655_v16  ;;  %v12751_v12 = vld [vmem:[%s14303_s25 + $0x1d28] sm:$0xf0] }
 0x3d0   : > { %8392 = vmatpush.bf16.msrb.mxu0 %v12370_v52  ;;  %v12786_v52 = vor.u32 %v14129_v6, %v12783_v5  ;;  %v14137_v16 = vld [vmem:[%s14303_s25 + $0x1da4] sm:$0xf]  ;;  %v14087_v5 = vld [vmem:[%s14303_s25 + $0x1c14] sm:$0xf] }
 0x3d1   : > { %8406 = vmatpush.bf16.msrb.mxu1 %v12434_v21  ;;  %v14095_v21 = vld [vmem:[%s14303_s25 + $0x1c54] sm:$0xf] }
 0x3d2   : > { %8420 = vmatpush.bf16.msrb.mxu2 %v12498_v30  ;;  %v12647_v30 = vld [vmem:[%s14303_s25 + $0x1c58] sm:$0xf0] }
 0x3d3   : > { %8434 = vmatpush.bf16.msrb.mxu3 %v12562_v57  ;;  %v14127_v57 = vld [vmem:[%s14303_s25 + $0x1d54] sm:$0xf] }
 0x3d4   : > { %8393 = vmatpush.bf16.msrb.mxu0 %v12362_v8  ;;  %v12778_v15 = vor.u32 %v14127_v57, %v12775_v25  ;;  %v14093_v8 = vld [vmem:[%s14303_s25 + $0x1c44] sm:$0xf]  ;;  %v12607_v57 = vld [vmem:[%s14303_s25 + $0x1c08] sm:$0xf0] }
 0x3d5   : > { %8407 = vmatpush.bf16.msrb.mxu1 %v12426_v49  ;;  %v14125_v49 = vld [vmem:[%s14303_s25 + $0x1d44] sm:$0xf] }
 0x3d6   : > { %8421 = vmatpush.bf16.msrb.mxu2 %v12490_v59  ;;  %v14141_v59 = vld [vmem:[%s14303_s25 + $0x1dc4] sm:$0xf] }
 0x3d7   : > { %8435 = vmatpush.bf16.msrb.mxu3 %v12554_v11  ;;  %v12834_v54 = vor.u32 %v14141_v59, %v12831_v14  ;;  %v12983_v59 = vld [vmem:[%s14303_s25 + $0x1ef8] sm:$0xf0]  ;;  %v14195_v14 = vld [vmem:[%s14303_s25 + $0x1f74] sm:$0xf] }
 0x3d8   : > { %8394 = vmatpush.bf16.msrb.mxu0 %v12354_v62  ;;  %v12759_v62 = vld [vmem:[%s14303_s25 + $0x1d38] sm:$0xf0] }
 0x3d9   : > { %8408 = vmatpush.bf16.msrb.mxu1 %v12418_v47  ;;  %v12698_v47 = vor.u32 %v14107_v56, %v12695_v0 }
 0x3da   : > { %8422 = vmatpush.bf16.msrb.mxu2 %v12482_v27  ;;  %v12762_v27 = vor.u32 %v14123_v9, %v12759_v62  ;;  %v14161_v62 = vld [vmem:[%s14303_s25 + $0x1e64] sm:$0xf] }
 0x3db   : > { %8436 = vmatpush.bf16.msrb.mxu3 %v12546_v53  ;;  %8395 = vmatmul.bf16.vlgmr.msrb.gmra.mxu0 %v15566_v55  ;;  %v12650_v55 = vor.u32 %v14095_v21, %v12647_v30  ;;  %v14105_v53 = vld [vmem:[%s14303_s25 + $0x1ca4] sm:$0xf]  ;;  %v12743_v21 = vld [vmem:[%s14303_s25 + $0x1d18] sm:$0xf0]  ;;  %v14135_v30 = vld [vmem:[%s14303_s25 + $0x1d94] sm:$0xf] }
 0x3dc   : > { %8443 = vmatpush.bf16.msra.mxu0 %v12666_v44  ;;  %8409 = vmatmul.bf16.vlgmr.msrb.gmra.mxu1 %v15573_v36  ;;  %v12842_v36 = vor.u32 %v14143_v58, %v12839_v45  ;;  %v12826_v44 = vor.u32 %v14139_v22, %v12823_v32  ;;  %v14101_v45 = vld [vmem:[%s14303_s25 + $0x1c84] sm:$0xf]  ;;  %v12911_v22 = vld [vmem:[%s14303_s25 + $0x1e68] sm:$0xf0] }
 0x3dd   : > { %8457 = vmatpush.bf16.msra.mxu1 %v12730_v46  ;;  %8423 = vmatmul.bf16.vlgmr.msrb.gmra.mxu2 %v15571_v20  ;;  %v12639_v20 = vld [vmem:[%s14303_s25 + $0x1c48] sm:$0xf0]  ;;  %v14177_v32 = vld [vmem:[%s14303_s25 + $0x1ee4] sm:$0xf] }
 0x3de   : > { %8471 = vmatpush.bf16.msra.mxu2 %v12794_v3  ;;  %8437 = vmatmul.bf16.vlgmr.msrb.gmra.mxu3 %v15577_v33  ;;  %v12767_v33 = vld [vmem:[%s14303_s25 + $0x1d48] sm:$0xf0]  ;;  %v12642_v1 = vor.u32 %v14093_v8, %v12639_v20  ;;  %v14121_v3 = vld [vmem:[%s14303_s25 + $0x1d24] sm:$0xf] }
 0x3df   : > { %8485 = vmatpush.bf16.msra.mxu3 %v12858_v42  ;;  %v12770_v11 = vor.u32 %v14125_v49, %v12767_v33  ;;  %v12687_v46 = vld [vmem:[%s14303_s25 + $0x1ca8] sm:$0xf0]  ;;  %v12626_v42 = vor.u32 %v14089_v43, %v12623_v37  ;;  %v12754_v6 = vor.u32 %v14121_v3, %v12751_v12  ;;  %v14133_v20 = vld [vmem:[%s14303_s25 + $0x1d84] sm:$0xf]  ;;  %v14179_v49 = vld [vmem:[%s14303_s25 + $0x1ef4] sm:$0xf]  ;;  %v12610_v33 = vor.u32 %v14085_v38, %v12607_v57 }
 0x3e0   : > { %8444 = vmatpush.bf16.msra.mxu0 %v12658_v2  ;;  %v12690_v61 = vor.u32 %v14105_v53, %v12687_v46  ;;  %v12818_v2 = vor.u32 %v14137_v16, %v12815_v4  ;;  %v12735_v8 = vld [vmem:[%s14303_s25 + $0x1d08] sm:$0xf0]  ;;  %v12802_v56 = vor.u32 %v14133_v20, %v12799_v18  ;;  %v12986_v0 = vor.u32 %v14179_v49, %v12983_v59  ;;  %v14209_v37 = vld [vmem:[%s14303_s25 + $0x1fe4] sm:$0xf]  ;;  %v14159_v12 = vld [vmem:[%s14303_s25 + $0x1e54] sm:$0xf] }
 0x3e1   : > { %8458 = vmatpush.bf16.msra.mxu1 %v12722_v34  ;;  %v12679_v34 = vld [vmem:[%s14303_s25 + $0x1c98] sm:$0xf0]  ;;  %v13039_v43 = vld [vmem:[%s14303_s25 + $0x1f68] sm:$0xf0]  ;;  %v14175_v4 = vld [vmem:[%s14303_s25 + $0x1ed4] sm:$0xf] }
 0x3e2   : > { %8472 = vmatpush.bf16.msra.mxu2 %v12786_v52  ;;  %v14119_v52 = vld [vmem:[%s14303_s25 + $0x1d14] sm:$0xf]  ;;  %v12682_v25 = vor.u32 %v14103_v13, %v12679_v34  ;;  %v13103_v53 = vld [vmem:[%s14303_s25 + $0x1fe8] sm:$0xf0]  ;;  %v12903_v16 = vld [vmem:[%s14303_s25 + $0x1e58] sm:$0xf0] }
 0x3e3   : > { %8486 = vmatpush.bf16.msra.mxu3 %v12850_v41  ;;  %v12618_v41 = vor.u32 %v14087_v5, %v12615_v29  ;;  %v12746_v58 = vor.u32 %v14119_v52, %v12743_v21  ;;  %v13031_v5 = vld [vmem:[%s14303_s25 + $0x1f58] sm:$0xf0]  ;;  %v14207_v29 = vld [vmem:[%s14303_s25 + $0x1fd4] sm:$0xf]  ;;  %v14157_v52 = vld [vmem:[%s14303_s25 + $0x1e44] sm:$0xf] }
 0x3e4   : > { %8445 = vmatpush.bf16.msra.mxu0 %v12650_v55  ;;  %v12671_v55 = vld [vmem:[%s14303_s25 + $0x1c88] sm:$0xf0]  ;;  %v13095_v13 = vld [vmem:[%s14303_s25 + $0x1fd8] sm:$0xf0]  ;;  %v14173_v21 = vld [vmem:[%s14303_s25 + $0x1ec4] sm:$0xf] }
 0x3e5   : > { %8459 = vmatpush.bf16.msra.mxu1 %v12714_v24  ;;  %v14117_v24 = vld [vmem:[%s14303_s25 + $0x1d04] sm:$0xf]  ;;  %v13087_v38 = vld [vmem:[%s14303_s25 + $0x1fc8] sm:$0xf0]  ;;  %v14187_v20 = vld [vmem:[%s14303_s25 + $0x1f34] sm:$0xf] }
 0x3e6   : > { %8473 = vmatpush.bf16.msra.mxu2 %v12778_v15  ;;  %v12810_v15 = vor.u32 %v14135_v30, %v12807_v23  ;;  %v12959_v30 = vld [vmem:[%s14303_s25 + $0x1ec8] sm:$0xf0]  ;;  %v14189_v23 = vld [vmem:[%s14303_s25 + $0x1f44] sm:$0xf]  ;;  %v13015_v18 = vld [vmem:[%s14303_s25 + $0x1f38] sm:$0xf0] }
 0x3e7   : > { %8487 = vmatpush.bf16.msra.mxu3 %v12842_v36  ;;  %v14163_v36 = vld [vmem:[%s14303_s25 + $0x1e74] sm:$0xf]  ;;  %v13018_v59 = vor.u32 %v14187_v20, %v13015_v18 }
 0x3e8   : > { %8446 = vmatpush.bf16.msra.mxu0 %v12642_v1  ;;  %v13047_v1 = vld [vmem:[%s14303_s25 + $0x1f78] sm:$0xf0] }
 0x3e9   : > { %8460 = vmatpush.bf16.msra.mxu1 %v12706_v40  ;;  %v12674_v40 = vor.u32 %v14101_v45, %v12671_v55  ;;  %v13050_v9 = vor.u32 %v14195_v14, %v13047_v1  ;;  %v14155_v45 = vld [vmem:[%s14303_s25 + $0x1e34] sm:$0xf]  ;;  %v12887_v55 = vld [vmem:[%s14303_s25 + $0x1e38] sm:$0xf0]  ;;  %v14153_v14 = vld [vmem:[%s14303_s25 + $0x1e24] sm:$0xf] }
 0x3ea   : > { %8474 = vmatpush.bf16.msra.mxu2 %v12770_v11  ;;  %v12738_v11 = vor.u32 %v14117_v24, %v12735_v8  ;;  %v14171_v24 = vld [vmem:[%s14303_s25 + $0x1eb4] sm:$0xf]  ;;  %v12951_v8 = vld [vmem:[%s14303_s25 + $0x1eb8] sm:$0xf0]  ;;  %v12890_v49 = vor.u32 %v14155_v45, %v12887_v55  ;;  %v12879_v1 = vld [vmem:[%s14303_s25 + $0x1e28] sm:$0xf0] }
 0x3eb   : > { %8488 = vmatpush.bf16.msra.mxu3 %v12834_v54  ;;  %v12922_v54 = vor.u32 %v14163_v36, %v12919_v50  ;;  %v14203_v36 = vld [vmem:[%s14303_s25 + $0x1fb4] sm:$0xf]  ;;  %v13079_v50 = vld [vmem:[%s14303_s25 + $0x1fb8] sm:$0xf0] }
 0x3ec   : > { %8447 = vmatpush.bf16.msra.mxu0 %v12634_v19  ;;  %v13114_v19 = vor.u32 %v14211_v17, %v13111_v28  ;;  %v12943_v17 = vld [vmem:[%s14303_s25 + $0x1ea8] sm:$0xf0]  ;;  %v14185_v28 = vld [vmem:[%s14303_s25 + $0x1f24] sm:$0xf] }
 0x3ed   : > { %8461 = vmatpush.bf16.msra.mxu1 %v12698_v47  ;;  %v12975_v47 = vld [vmem:[%s14303_s25 + $0x1ee8] sm:$0xf0] }
 0x3ee   : > { %8475 = vmatpush.bf16.msra.mxu2 %v12762_v27  ;;  %v14193_v27 = vld [vmem:[%s14303_s25 + $0x1f64] sm:$0xf]  ;;  %v12978_v46 = vor.u32 %v14177_v32, %v12975_v47  ;;  %v14151_v32 = vld [vmem:[%s14303_s25 + $0x1e14] sm:$0xf] }
 0x3ef   : > { %8489 = vmatpush.bf16.msra.mxu3 %v12826_v44  ;;  %v12914_v44 = vor.u32 %v14161_v62, %v12911_v22  ;;  %v13042_v3 = vor.u32 %v14193_v27, %v13039_v43  ;;  %v14167_v47 = vld [vmem:[%s14303_s25 + $0x1e94] sm:$0xf]  ;;  %v12935_v43 = vld [vmem:[%s14303_s25 + $0x1e98] sm:$0xf0] }
 0x3f0   : > { %8448 = vmatpush.bf16.msra.mxu0 %v12626_v42  ;;  %v13106_v42 = vor.u32 %v14209_v37, %v13103_v53  ;;  %v14183_v37 = vld [vmem:[%s14303_s25 + $0x1f14] sm:$0xf]  ;;  %v12999_v53 = vld [vmem:[%s14303_s25 + $0x1f18] sm:$0xf0] }
 0x3f1   : > { %8462 = vmatpush.bf16.msra.mxu1 %v12690_v61  ;;  %v12967_v61 = vld [vmem:[%s14303_s25 + $0x1ed8] sm:$0xf0] }
 0x3f2   : > { %8476 = vmatpush.bf16.msra.mxu2 %v12754_v6  ;;  %v14191_v6 = vld [vmem:[%s14303_s25 + $0x1f54] sm:$0xf] }
 0x3f3   : > { %8490 = vmatpush.bf16.msra.mxu3 %v12818_v2  ;;  %v12970_v2 = vor.u32 %v14175_v4, %v12967_v61  ;;  %v13034_v34 = vor.u32 %v14191_v6, %v13031_v5  ;;  %v14149_v4 = vld [vmem:[%s14303_s25 + $0x1e04] sm:$0xf]  ;;  %v12927_v5 = vld [vmem:[%s14303_s25 + $0x1e88] sm:$0xf0] }
 0x3f4   : > { %8449 = vmatpush.bf16.msra.mxu0 %v12618_v41  ;;  %v14205_v41 = vld [vmem:[%s14303_s25 + $0x1fc4] sm:$0xf] }
 0x3f5   : > { %8463 = vmatpush.bf16.msra.mxu1 %v12682_v25  ;;  %v12962_v25 = vor.u32 %v14173_v21, %v12959_v30  ;;  %v14165_v61 = vld [vmem:[%s14303_s25 + $0x1e84] sm:$0xf]  ;;  %v8130_v30 = vpop.f32.mrf.mxu1 }
 0x3f6   : > { %8477 = vmatpush.bf16.msra.mxu2 %v12746_v58 }
 0x3f7   : > { %8491 = vmatpush.bf16.msra.mxu3 %v12810_v15  ;;  %v13090_v15 = vor.u32 %v14205_v41, %v13087_v38 }
 0x3f8   : > { %8450 = vmatpush.bf16.msra.mxu0 %v12610_v33  ;;  %v12954_v33 = vor.u32 %v14171_v24, %v12951_v8 }
 0x3f9   : > { %8464 = vmatpush.bf16.msra.mxu1 %v12674_v40  ;;  %v14169_v40 = vld [vmem:[%s14303_s25 + $0x1ea4] sm:$0xf] }
 0x3fa   : > { %8478 = vmatpush.bf16.msra.mxu2 %v12738_v11  ;;  %v13082_v11 = vor.u32 %v14203_v36, %v13079_v50  ;;  %v12946_v62 = vor.u32 %v14169_v40, %v12943_v17 }
 0x3fb   : > { %8492 = vmatpush.bf16.msra.mxu3 %v12802_v56  ;;  %8451 = vmatmul.bf16.vlgmr.msra.gmra.mxu0 %v15655_v63  ;;  %v12906_v63 = vor.u32 %v14159_v12, %v12903_v16  ;;  %v13007_v56 = vld [vmem:[%s14303_s25 + $0x1f28] sm:$0xf0]  ;;  %v12938_v12 = vor.u32 %v14167_v47, %v12935_v43  ;;  %v13002_v16 = vor.u32 %v14183_v37, %v12999_v53 }
 0x3fc   : > { %8499 = vmatpush.bf16.msrb.mxu0 %v12922_v54  ;;  %8465 = vmatmul.bf16.vlgmr.msra.gmra.mxu1 %v15662_v51  ;;  %v13098_v51 = vor.u32 %v14207_v29, %v13095_v13  ;;  %v14201_v54 = vld [vmem:[%s14303_s25 + $0x1fa4] sm:$0xf]  ;;  %v13010_v22 = vor.u32 %v14185_v28, %v13007_v56  ;;  %v12991_v13 = vld [vmem:[%s14303_s25 + $0x1f08] sm:$0xf0] }
 0x3fd   : > { %8513 = vmatpush.bf16.msrb.mxu1 %v12986_v0  ;;  %8479 = vmatmul.bf16.vlgmr.msra.gmra.mxu2 %v15660_v35  ;;  %v12895_v35 = vld [vmem:[%s14303_s25 + $0x1e48] sm:$0xf0]  ;;  %v14181_v29 = vld [vmem:[%s14303_s25 + $0x1f04] sm:$0xf]  ;;  %v8132_v38 = vpop.f32.mrf.mxu1 }
 0x3fe   : > { %8527 = vmatpush.bf16.msrb.mxu2 %v13050_v9  ;;  %8493 = vmatmul.bf16.vlgmr.msra.gmra.mxu3 %v15666_v39  ;;  %v13023_v39 = vld [vmem:[%s14303_s25 + $0x1f48] sm:$0xf0]  ;;  %v12898_v57 = vor.u32 %v14157_v52, %v12895_v35  ;;  %v12882_v9 = vor.u32 %v14153_v14, %v12879_v1  ;;  %v12930_v52 = vor.u32 %v14165_v61, %v12927_v5 }
 0x3ff   : > { %8541 = vmatpush.bf16.msrb.mxu3 %v13114_v19  ;;  %v13026_v58 = vor.u32 %v14189_v23, %v13023_v39  ;;  %v13071_v0 = vld [vmem:[%s14303_s25 + $0x1fa8] sm:$0xf0]  ;;  %v12871_v19 = vld [vmem:[%s14303_s25 + $0x1e18] sm:$0xf0]  ;;  %v12994_v35 = vor.u32 %v14181_v29, %v12991_v13  ;;  %v8144_v23 = vpop.f32.mrf.mxu2  ;;  %v8158_v39 = vpop.f32.mrf.mxu3 }
 0x400   : > { %8500 = vmatpush.bf16.msrb.mxu0 %v12914_v44  ;;  %v13074_v27 = vor.u32 %v14201_v54, %v13071_v0  ;;  %v14199_v44 = vld [vmem:[%s14303_s25 + $0x1f94] sm:$0xf] }
 0x401   : > { %8514 = vmatpush.bf16.msrb.mxu1 %v12978_v46  ;;  %v13063_v46 = vld [vmem:[%s14303_s25 + $0x1f98] sm:$0xf0] }
 0x402   : > { %8528 = vmatpush.bf16.msrb.mxu2 %v13042_v3  ;;  %v12874_v3 = vor.u32 %v14151_v32, %v12871_v19  ;;  %v13066_v6 = vor.u32 %v14199_v44, %v13063_v46 }
 0x403   : > { %8542 = vmatpush.bf16.msrb.mxu3 %v13106_v42  ;;  %v12863_v42 = vld [vmem:[%s14303_s25 + $0x1e08] sm:$0xf0] }
 0x404   : > { %8501 = vmatpush.bf16.msrb.mxu0 %v12906_v63  ;;  %v14197_v63 = vld [vmem:[%s14303_s25 + $0x1f84] sm:$0xf] }
 0x405   : > { %8515 = vmatpush.bf16.msrb.mxu1 %v12970_v2  ;;  %v13055_v2 = vld [vmem:[%s14303_s25 + $0x1f88] sm:$0xf0]  ;;  %v8186_v45 = vpop.f32.mrf.mxu1 }
 0x406   : > { %8529 = vmatpush.bf16.msrb.mxu2 %v13034_v34  ;;  %v12866_v34 = vor.u32 %v14149_v4, %v12863_v42  ;;  %v13058_v21 = vor.u32 %v14197_v63, %v13055_v2 }
 0x407   : > { %8543 = vmatpush.bf16.msrb.mxu3 %v13098_v51  ;;  %v8116_v51 = vpop.f32.mrf.mxu0 }
 0x408   : > { %8502 = vmatpush.bf16.msrb.mxu0 %v12898_v57  ;;  %v8146_v57 = vpop.f32.mrf.mxu2  ;;  %v8117_v36 = vadd.f32 %v8116_v51, %v16850_v26 }
 0x409   : > { %8516 = vmatpush.bf16.msrb.mxu1 %v12962_v25  ;;  %v8160_v25 = vpop.f32.mrf.mxu3 }
 0x40a   : > { %8530 = vmatpush.bf16.msrb.mxu2 %v13026_v58 }
 0x40b   : > { %8544 = vmatpush.bf16.msrb.mxu3 %v13090_v15 }
 0x40c   : > { %8503 = vmatpush.bf16.msrb.mxu0 %v12890_v49  ;;  %v8131_v49 = vadd.f32 %v8130_v30, %v8117_v36 }
 0x40d   : > { %8517 = vmatpush.bf16.msrb.mxu1 %v12954_v33  ;;  %v8188_v8 = vpop.f32.mrf.mxu1 }
 0x40e   : > { %8531 = vmatpush.bf16.msrb.mxu2 %v13018_v59  ;;  %v8145_v59 = vadd.f32 %v8144_v23, %v8131_v49 }
 0x40f   : > { %8545 = vmatpush.bf16.msrb.mxu3 %v13082_v11  ;;  %v8118_v41 = vpop.f32.mrf.mxu0 }
 0x410   : > { %8504 = vmatpush.bf16.msrb.mxu0 %v12882_v9  ;;  %v8200_v55 = vpop.f32.mrf.mxu2  ;;  %v8119_v14 = vadd.f32 %v8118_v41, %v16874_v48  ;;  %v8159_v40 = vadd.f32 %v8158_v39, %v8145_v59 }
 0x411   : > { %8518 = vmatpush.bf16.msrb.mxu1 %v12946_v62  ;;  %v8214_v24 = vpop.f32.mrf.mxu3 }
 0x412   : > { %8532 = vmatpush.bf16.msrb.mxu2 %v13010_v22  ;;  %v8133_v28 = vadd.f32 %v8132_v38, %v8119_v14 }
 0x413   : > { %8546 = vmatpush.bf16.msrb.mxu3 %v13074_v27 }
 0x414   : > { %8505 = vmatpush.bf16.msrb.mxu0 %v12874_v3  ;;  %v8147_v0 = vadd.f32 %v8146_v57, %v8133_v28 }
 0x415   : > { %8519 = vmatpush.bf16.msrb.mxu1 %v12938_v12  ;;  %v8242_v18 = vpop.f32.mrf.mxu1 }
 0x416   : > { %8533 = vmatpush.bf16.msrb.mxu2 %v13002_v16  ;;  %v8161_v22 = vadd.f32 %v8160_v25, %v8147_v0 }
 0x417   : > { %8547 = vmatpush.bf16.msrb.mxu3 %v13066_v6  ;;  %v8172_v58 = vpop.f32.mrf.mxu0 }
 0x418   : > { %8506 = vmatpush.bf16.msrb.mxu0 %v12866_v34  ;;  %v8173_v56 = vadd.f32 %v8172_v58, %v8159_v40 }
 0x419   : > { %8520 = vmatpush.bf16.msrb.mxu1 %v12930_v52  ;;  %v8216_v20 = vpop.f32.mrf.mxu3 }
 0x41a   : > { %8534 = vmatpush.bf16.msrb.mxu2 %v12994_v35  ;;  %v8187_v9 = vadd.f32 %v8186_v45, %v8173_v56 }
 0x41b   : > { %8548 = vmatpush.bf16.msrb.mxu3 %v13058_v21  ;;  %8507 = vmatmul.bf16.vlgmr.msrb.gmra.mxu0 %v15753_v31  ;;  %v8202_v31 = vpop.f32.mrf.mxu2 }
 0x41c   : > { %8521 = vmatmul.bf16.vlgmr.msrb.gmra.mxu1 %v15760_v10  ;;  %v8201_v32 = vadd.f32 %v8200_v55, %v8187_v9 }
 0x41d   : > { %8535 = vmatmul.bf16.vlgmr.msrb.gmra.mxu2 %v15758_v60  ;;  %v8244_v33 = vpop.f32.mrf.mxu1 }
 0x41e   : > { %8549 = vmatmul.bf16.vlgmr.msrb.gmra.mxu3 %v15766_v7  ;;  %v8215_v27 = vadd.f32 %v8214_v24, %v8201_v32 }
 0x41f   : > { %v8174_v15 = vpop.f32.mrf.mxu0 }
 0x420   : > { %v8175_v19 = vadd.f32 %v8174_v15, %v8161_v22 }
 0x421   : > { %v8270_v7 = vpop.f32.mrf.mxu3 }
 0x422   : > { %v8189_v37 = vadd.f32 %v8188_v8, %v8175_v19 }
 0x423   : > { %v8256_v60 = vpop.f32.mrf.mxu2 }
 0x424   : > { %v8203_v48 = vadd.f32 %v8202_v31, %v8189_v37 }
 0x425   : > { %v8298_v54 = vpop.f32.mrf.mxu1 }
 0x426   : > { %v8217_v16 = vadd.f32 %v8216_v20, %v8203_v48 }
 0x427   : > { %v8228_v10 = vpop.f32.mrf.mxu0 }
 0x428   : > { %v8229_v53 = vadd.f32 %v8228_v10, %v8215_v27 }
 0x429   : > { %v8272_v11 = vpop.f32.mrf.mxu3 }
 0x42a   : > { %v8243_v46 = vadd.f32 %v8242_v18, %v8229_v53 }
 0x42b   : > { %v8258_v1 = vpop.f32.mrf.mxu2 }
 0x42c   : > { %v8257_v4 = vadd.f32 %v8256_v60, %v8243_v46 }
 0x42d   : > { %v8300_v43 = vpop.f32.mrf.mxu1 }
 0x42e   : > { %v8271_v6 = vadd.f32 %v8270_v7, %v8257_v4 }
 0x42f   : > { %v8230_v50 = vpop.f32.mrf.mxu0 }
 0x430   : > { %v8231_v61 = vadd.f32 %v8230_v50, %v8217_v16 }
 0x431   : > { %v8326_v26 = vpop.f32.mrf.mxu3 }
 0x432   : > { %v8245_v29 = vadd.f32 %v8244_v33, %v8231_v61 }
 0x433   : > { %v8312_v62 = vpop.f32.mrf.mxu2 }
 0x434   : > { %v8259_v2 = vadd.f32 %v8258_v1, %v8245_v29  ;;  %v296_v29 = vld [vmem:[#allocation2 + $0x8] sm:$0xff] }
 0x436   : > { %v8273_v21 = vadd.f32 %v8272_v11, %v8259_v2 }
 0x437   : > { %v8284_v17 = vpop.f32.mrf.mxu0 }
 0x438   : > { %v8285_v13 = vadd.f32 %v8284_v17, %v8271_v6 }
 0x439   : > { %v8328_v3 = vpop.f32.mrf.mxu3  ;;  %v8354_v42 = vpop.f32.mrf.mxu1 }
 0x43a   : > { %v8299_v52 = vadd.f32 %v8298_v54, %v8285_v13 }
 0x43b   : > { %v8314_v44 = vpop.f32.mrf.mxu2 }
 0x43c   : > { %v8313_v51 = vadd.f32 %v8312_v62, %v8299_v52 }
 0x43e   : > { %v8327_v39 = vadd.f32 %v8326_v26, %v8313_v51  ;;  %v298_v51 = vld [vmem:[#allocation2 + $0x18] sm:$0xff] }
 0x43f   : > { %v8286_v47 = vpop.f32.mrf.mxu0 }
 0x440   : > { %v8287_v30 = vadd.f32 %v8286_v47, %v8273_v21 }
 0x441   : > { %v8382_v63 = vpop.f32.mrf.mxu3  ;;  %v8356_v35 = vpop.f32.mrf.mxu1 }
 0x442   : > { %v8301_v57 = vadd.f32 %v8300_v43, %v8287_v30 }
 0x443   : > { %v8368_v5 = vpop.f32.mrf.mxu2 }
 0x444   : > { %v8315_v45 = vadd.f32 %v8314_v44, %v8301_v57 }
 0x446   : > { %v8329_v15 = vadd.f32 %v8328_v3, %v8315_v45 }
 0x447   : > { %v8340_v12 = vpop.f32.mrf.mxu0 }
 0x448   : > { %v8341_v25 = vadd.f32 %v8340_v12, %v8327_v39 }
 0x449   : > { %v8384_v41 = vpop.f32.mrf.mxu3 }
 0x44a   : > { %v8355_v55 = vadd.f32 %v8354_v42, %v8341_v25 }
 0x44b   : > { %v8370_v23 = vpop.f32.mrf.mxu2 }
 0x44c   : > { %v8369_v8 = vadd.f32 %v8368_v5, %v8355_v55 }
 0x44e   : > { %v8383_v18 = vadd.f32 %v8382_v63, %v8369_v8 }
 0x44f   : > { %v8342_v34 = vpop.f32.mrf.mxu0 }
 0x450   : > { %v8343_v20 = vadd.f32 %v8342_v34, %v8329_v15 }
 0x452   : > { %v8357_v36 = vadd.f32 %v8356_v35, %v8343_v20 }
 0x454   : > { %v8371_v50 = vadd.f32 %v8370_v23, %v8357_v36 }
 0x456   : > { %v8385_v1 = vadd.f32 %v8384_v41, %v8371_v50 }
 0x458   : > { %v8396_v38 = vpop.f32.mrf.mxu0 }
 0x459   : > { %v8410_v58 = vpop.f32.mrf.mxu1  ;;  %v8397_v7 = vadd.f32 %v8396_v38, %v8383_v18 }
 0x45b   : > { %v8411_v33 = vadd.f32 %v8410_v58, %v8397_v7 }
 0x460   : > { %v8424_v24 = vpop.f32.mrf.mxu2  ;;  %v8398_v10 = vpop.f32.mrf.mxu0 }
 0x461   : > { %v8438_v31 = vpop.f32.mrf.mxu3  ;;  %v8412_v60 = vpop.f32.mrf.mxu1  ;;  %v8425_v40 = vadd.f32 %v8424_v24, %v8411_v33  ;;  %v8399_v17 = vadd.f32 %v8398_v10, %v8385_v1 }
 0x463   : > { %v8439_v28 = vadd.f32 %v8438_v31, %v8425_v40  ;;  %v8413_v54 = vadd.f32 %v8412_v60, %v8399_v17 }
 0x468   : > { %v8426_v49 = vpop.f32.mrf.mxu2 }
 0x469   : > { %v8440_v59 = vpop.f32.mrf.mxu3  ;;  %v8427_v62 = vadd.f32 %v8426_v49, %v8413_v54 }
 0x46b   : > { %v8441_v19 = vadd.f32 %v8440_v59, %v8427_v62 }
 0x478   : > { %v8452_v14 = vpop.f32.mrf.mxu0 }
 0x479   : > { %v8466_v11 = vpop.f32.mrf.mxu1  ;;  %v8453_v0 = vadd.f32 %v8452_v14, %v8439_v28 }
 0x47b   : > { %v8467_v32 = vadd.f32 %v8466_v11, %v8453_v0 }
 0x480   : > { %v8480_v56 = vpop.f32.mrf.mxu2  ;;  %v8454_v22 = vpop.f32.mrf.mxu0 }
 0x481   : > { %v8494_v9 = vpop.f32.mrf.mxu3  ;;  %v8468_v26 = vpop.f32.mrf.mxu1  ;;  %v8481_v47 = vadd.f32 %v8480_v56, %v8467_v32  ;;  %v8455_v27 = vadd.f32 %v8454_v22, %v8441_v19 }
 0x483   : > { %v8495_v37 = vadd.f32 %v8494_v9, %v8481_v47  ;;  %v8469_v44 = vadd.f32 %v8468_v26, %v8455_v27 }
 0x488   : > { %v8482_v43 = vpop.f32.mrf.mxu2 }
 0x489   : > { %v8496_v53 = vpop.f32.mrf.mxu3  ;;  %v8483_v12 = vadd.f32 %v8482_v43, %v8469_v44 }
 0x48b   : > { %v8497_v42 = vadd.f32 %v8496_v53, %v8483_v12 }
 0x498   : > { %v8508_v48 = vpop.f32.mrf.mxu0 }
 0x499   : > { %v8509_v46 = vadd.f32 %v8508_v48, %v8495_v37  ;;  %v8522_v3 = vpop.f32.mrf.mxu1 }
 0x49b   : > { %v8523_v16 = vadd.f32 %v8522_v3, %v8509_v46 }
 0x4a0   : > { %v8536_v4 = vpop.f32.mrf.mxu2  ;;  %v8510_v5 = vpop.f32.mrf.mxu0 }
 0x4a1   : > { %v8537_v61 = vadd.f32 %v8536_v4, %v8523_v16  ;;  %v8550_v6 = vpop.f32.mrf.mxu3  ;;  %v8511_v63 = vadd.f32 %v8510_v5, %v8497_v42  ;;  %v8524_v34 = vpop.f32.mrf.mxu1 }
 0x4a3   : > { %v8551_v13 = vadd.f32 %v8550_v6, %v8537_v61  ;;  %v8525_v52 = vadd.f32 %v8524_v34, %v8511_v63 }
 0x4a5   : > { %v8556_v2 = vadd.f32 %v8551_v13, %v296_v29 }
 0x4a7   : > { %8561 = vst.msk [vmem:[#allocation2 + $0x8] sm:$0xff] %vm8560_vm1, %v8556_v2 }
 0x4a8   : > { %v8538_v35 = vpop.f32.mrf.mxu2 }
 0x4a9   : > { %v8539_v21 = vadd.f32 %v8538_v35, %v8525_v52  ;;  %v8552_v30 = vpop.f32.mrf.mxu3 }
 0x4ab   : > { %v8553_v23 = vadd.f32 %v8552_v30, %v8539_v21  ;;  %8567 = sbr.rel (%p13115_p5) target bundleno = 1395 (0x573), region = 48 }
 0x4ad   : > { %v8558_v39 = vadd.f32 %v8553_v23, %v298_v51 }
 0x4af   : > { %8563 = vst.msk [vmem:[#allocation2 + $0x18] sm:$0xff] %vm8560_vm1, %v8558_v39 }
 0x4b0   : > { %v8568_v41 = vld [vmem:[#allocation2] sm:$0xff]  ;;  %v8569_v38 = vld [vmem:[#allocation2 + $0x8] sm:$0xff]  ;;  %v8570_v45 = vld [vmem:[#allocation2 + $0x10] sm:$0xff] }
 0x4b1   : > { %v8572_v57 = vld [vmem:[%s17142_s2] sm:$0x3] }
 0x4b2   : > { %v8574_v25 = vperm.slane %v8572_v57, 0  ;;  %v8575_v58 = vperm.slane %v8572_v57, 1  ;;  %v17089_v40 = vld [vmem:[%s17143_s3] sm:$0x3] }
 0x4b3   : > { %v8660_v62 = vperm.slane %v17089_v40, 0  ;;  %v8661_v32 = vperm.slane %v17089_v40, 1 }
 0x4b4   : > { %v8578_v24 = vadd.f32 %v8574_v25, %v8568_v41  ;;  %v8579_v15 = vadd.f32 %v8575_v58, %v8569_v38  ;;  %v8580_v8 = vadd.f32 %v8574_v25, %v8570_v45 }
 0x4b6   : > { %v8571_v55 = vld [vmem:[#allocation2 + $0x18] sm:$0xff]  ;;  %v13116_v20 = vmul.f32 -1.442695, %v8578_v24  ;;  %v13117_v10 = vmul.f32 -1.442695, %v8579_v15 }
 0x4b7   : > { %v8581_v31 = vadd.f32 %v8575_v58, %v8571_v55  ;;  %v13118_v18 = vmul.f32 -1.442695, %v8580_v8 }
 0x4b8   : > { %14223 = vpow2.f32 %v13116_v20 }
 0x4b9   : > { %v13119_v60 = vmul.f32 -1.442695, %v8581_v31  ;;  %14225 = vpow2.f32 %v13117_v10 }
 0x4ba   : > { %14227 = vpow2.f32 %v13118_v18 }
 0x4bb   : > { %14229 = vpow2.f32 %v13119_v60 }
 0x4be   : > { %v14224_v36 = vpop.eup %14223 }
 0x4bf   : > { %v14226_v7 = vpop.eup %14225  ;;  %v8594_v50 = vadd.f32 1.0, %v14224_v36  ;;  %v14222_v36 = vld [vmem:[#allocation3] ss:$0 sm:$0xff] }
 0x4c0   : > { %v14228_v49 = vpop.eup %14227  ;;  %v8595_v33 = vadd.f32 1.0, %v14226_v7 }
 0x4c1   : > { %v14230_v59 = vpop.eup %14229  ;;  %14231 = vrcp.f32 %v8594_v50  ;;  %v8596_v14 = vadd.f32 1.0, %v14228_v49  ;;  %v8607_v11 = vand.u32 2147483647, %v8594_v50  ;;  %v8609_v17 = vand.u32 2147483648, %v8594_v50 }
 0x4c2   : > { %14233 = vrcp.f32 %v8595_v33  ;;  %v8597_v1 = vadd.f32 1.0, %v14230_v59  ;;  %v8622_v56 = vand.u32 2147483647, %v8595_v33  ;;  %v8624_v54 = vand.u32 2147483648, %v8595_v33 }
 0x4c3   : > { %14235 = vrcp.f32 %v8596_v14  ;;  %vm8603_vm2 = vweird.f32 %v8594_v50  ;;  %vm8618_vm3 = vweird.f32 %v8595_v33  ;;  %vm17093_vm5 = vcmp.eq.f32.partialorder %v8607_v11, 8.507059e+37 }
 0x4c4   : > { %14237 = vrcp.f32 %v8597_v1  ;;  %v8610_v47 = vor.u32 1.1754944e-38, %v8609_v17  ;;  %vm17097_vm7 = vcmp.eq.f32.partialorder %v8622_v56, 8.507059e+37  ;;  %v8625_v53 = vor.u32 1.1754944e-38, %v8624_v54 }
 0x4c5   : > { %vm8633_vm8 = vweird.f32 %v8596_v14  ;;  %v8637_v3 = vand.u32 2147483647, %v8596_v14  ;;  %v8639_v4 = vand.u32 2147483648, %v8596_v14  ;;  %vm8648_vm10 = vweird.f32 %v8597_v1 }
 0x4c6   : > { %v8654_v29 = vand.u32 2147483648, %v8597_v1  ;;  %v8652_v2 = vand.u32 2147483647, %v8597_v1 }
 0x4c7   : > { %v14232_v28 = vpop.eup %14231  ;;  %vm17113_vm14 = vcmp.eq.f32.partialorder %v8637_v3, 8.507059e+37  ;;  %v8640_v30 = vor.u32 1.1754944e-38, %v8639_v4 }
 0x4c8   : > { %v14234_v0 = vpop.eup %14233  ;;  %v8599_v9 = vmul.f32 %v14232_v28, %v8594_v50  ;;  %vm8604_vm4 = vweird.f32 %v14232_v28  ;;  %v8655_v57 = vor.u32 1.1754944e-38, %v8654_v29 }
 0x4c9   : > { %v8614_v22 = vmul.f32 %v14234_v0, %v8595_v33  ;;  %v14236_v27 = vpop.eup %14235  ;;  %vm8619_vm6 = vweird.f32 %v14234_v0  ;;  %vm17102_vm9 = vmor %vm8603_vm2, %vm8604_vm4  ;;  %vm8653_vm2 = vcmp.eq.f32.partialorder %v8652_v2, 8.507059e+37  ;;  %vm8720_vm4 = vcmask 7168  }
 0x4ca   : > { %v8600_v26 = vsub.f32 1.0, %v8599_v9  ;;  %v14238_v48 = vpop.eup %14237  ;;  %v8629_v46 = vmul.f32 %v14236_v27, %v8596_v14  ;;  %vm17107_vm11 = vmor %vm8618_vm3, %vm8619_vm6  ;;  %vm8634_vm12 = vweird.f32 %v14236_v27 }
 0x4cb   : > { %v8615_v43 = vsub.f32 1.0, %v8614_v22  ;;  %v8644_v42 = vmul.f32 %v14238_v48, %v8597_v1  ;;  %vm8649_vm13 = vweird.f32 %v14238_v48  ;;  %vm8635_vm15 = vmor %vm8633_vm8, %vm8634_vm12 }
 0x4cc   : > { %v8601_v44 = vmul.f32 %v14232_v28, %v8600_v26  ;;  %v8630_v5 = vsub.f32 1.0, %v8629_v46  ;;  %vm8650_vm0 = vmor %vm8648_vm10, %vm8649_vm13 }
 0x4cd   : > { %v8616_v16 = vmul.f32 %v14234_v0, %v8615_v43  ;;  %v8645_v63 = vsub.f32 1.0, %v8644_v42 }
 0x4ce   : > { %v8602_v61 = vadd.f32 %v14232_v28, %v8601_v44  ;;  %v8631_v52 = vmul.f32 %v14236_v27, %v8630_v5 }
 0x4cf   : > { %v8617_v13 = vadd.f32 %v14234_v0, %v8616_v16  ;;  %v8646_v23 = vmul.f32 %v14238_v48, %v8645_v63 }
 0x4d0   : > { %v8606_v34 = vsel %vm17102_vm9, %v14232_v28, %v8602_v61  ;;  %v8632_v38 = vadd.f32 %v14236_v27, %v8631_v52 }
 0x4d1   : > { %v8611_v21 = vsel %vm17093_vm5, %v8610_v47, %v8606_v34  ;;  %v8621_v51 = vsel %vm17107_vm11, %v14234_v0, %v8617_v13  ;;  %v8647_v58 = vadd.f32 %v14238_v48, %v8646_v23 }
 0x4d2   : > { %v8626_v39 = vsel %vm17097_vm7, %v8625_v53, %v8621_v51  ;;  %v8664_v41 = vmul.f32 %v8660_v62, %v8611_v21  ;;  %v8636_v45 = vsel %vm8635_vm15, %v14236_v27, %v8632_v38 }
 0x4d3   : > { %v8665_v25 = vmul.f32 %v8661_v32, %v8626_v39  ;;  %v8641_v24 = vsel %vm17113_vm14, %v8640_v30, %v8636_v45  ;;  %v8651_v15 = vsel %vm8650_vm0, %v14238_v48, %v8647_v58 }
 0x4d4   : > { %v8656_v31 = vsel %vm8653_vm2, %v8655_v57, %v8651_v15  ;;  %v8666_v10 = vmul.f32 %v8660_v62, %v8641_v24 }
 0x4d5   : > { %v8668_v55 = vsel %vm8560_vm1, %v8665_v25, 0.0  ;;  %v8667_v20 = vmul.f32 %v8661_v32, %v8656_v31 }
 0x4d6   : > { %v8669_v8 = vadd.f32 %v8668_v55, %v8664_v41 }
 0x4d7   : > { %v8672_v18 = vsel %vm8560_vm1, %v8667_v20, 0.0 }
 0x4d8   : > { %8670 = vadd.xlane.f32.xlu0 %v8669_v8  ;;  %v8673_v60 = vadd.f32 %v8672_v18, %v8666_v10 }
 0x4e0   : > { %8674 = vadd.xlane.f32.xlu0 %v8673_v60 }
 0x54b   : > { %v8671_v7 = vpop.xlane.xlu0 %8670 }
 0x54c   : > { %v8680_v50 = vadd.f32 %v14222_v36, %v8671_v7 }
 0x54e   : > { %v13120_v49 = vmul.f32 -1.442695, %v8680_v50 }
 0x550   : > { %14239 = vpow2.f32 %v13120_v49 }
 0x553   : > { %v8675_v33 = vpop.xlane.xlu0 %8674 }
 0x554   : > { %v8681_v59 = vadd.f32 %v14222_v36, %v8675_v33 }
 0x556   : > { %v14240_v14 = vpop.eup %14239  ;;  %v13121_v1 = vmul.f32 -1.442695, %v8681_v59 }
 0x557   : > { %v8688_v40 = vadd.f32 1.0, %v14240_v14 }
 0x558   : > { %14241 = vpow2.f32 %v13121_v1 }
 0x559   : > { %14243 = vrcp.f32 %v8688_v40  ;;  %v8701_v0 = vand.u32 2147483648, %v8688_v40  ;;  %v8699_v62 = vand.u32 2147483647, %v8688_v40  ;;  %vm8695_vm3 = vweird.f32 %v8688_v40 }
 0x55b   : > { %v8702_v26 = vor.u32 1.1754944e-38, %v8701_v0  ;;  %vm8700_vm6 = vcmp.eq.f32.partialorder %v8699_v62, 8.507059e+37 }
 0x55e   : > { %v14242_v11 = vpop.eup %14241 }
 0x55f   : > { %v14244_v17 = vpop.eup %14243  ;;  %v8689_v28 = vadd.f32 1.0, %v14242_v11 }
 0x560   : > { %v8691_v56 = vmul.f32 %v14244_v17, %v8688_v40  ;;  %vm8696_vm1 = vweird.f32 %v14244_v17 }
 0x561   : > { %14245 = vrcp.f32 %v8689_v28  ;;  %vm8697_vm5 = vmor %vm8695_vm3, %vm8696_vm1  ;;  %v8716_v37 = vand.u32 2147483648, %v8689_v28  ;;  %v8714_v48 = vand.u32 2147483647, %v8689_v28  ;;  %vm8710_vm8 = vweird.f32 %v8689_v28 }
 0x562   : > { %v8692_v54 = vsub.f32 1.0, %v8691_v56 }
 0x563   : > { %v8717_v46 = vor.u32 1.1754944e-38, %v8716_v37  ;;  %vm8715_vm10 = vcmp.eq.f32.partialorder %v8714_v48, 8.507059e+37 }
 0x564   : > { %v8693_v9 = vmul.f32 %v14244_v17, %v8692_v54 }
 0x566   : > { %v8694_v22 = vadd.f32 %v14244_v17, %v8693_v9 }
 0x567   : > { %v14246_v32 = vpop.eup %14245 }
 0x568   : > { %v8698_v19 = vsel %vm8697_vm5, %v14244_v17, %v8694_v22  ;;  %v8706_v47 = vmul.f32 %v14246_v32, %v8689_v28  ;;  %vm8711_vm7 = vweird.f32 %v14246_v32 }
 0x569   : > { %v8703_v27 = vsel %vm8700_vm6, %v8702_v26, %v8698_v19  ;;  %vm8712_vm9 = vmor %vm8710_vm8, %vm8711_vm7 }
 0x56a   : > { %8721 = vst.msk [vmem:[%s17145_s5] sm:$0xff] %vm8720_vm4, %v8703_v27  ;;  %v8707_v43 = vsub.f32 1.0, %v8706_v47 }
 0x56c   : > { %v8708_v53 = vmul.f32 %v14246_v32, %v8707_v43 }
 0x56e   : > { %v8709_v44 = vadd.f32 %v14246_v32, %v8708_v53 }
 0x570   : > { %v8713_v3 = vsel %vm8712_vm9, %v14246_v32, %v8709_v44 }
 0x571   : > { %v8718_v12 = vsel %vm8715_vm10, %v8717_v46, %v8713_v3 }
 0x572   : > { %8722 = vst.msk [vmem:[%s17145_s5 + $0x8] sm:$0xff] %vm8720_vm4, %v8718_v12 }
 0x573 PF: > { %s17_s20 = sadd.s32 1, %s14253_s20  }
 0x574   : > { %p14_p6 = scmp.ge.s32.totalorder %s17_s20, 4  }
 0x576   :  { %16 = sbr.rel (!%p14_p6) target bundleno = 3 (0x3), region = 75 }

</bundles_post_ra>
